<compile_context>
chip_gen: v7x
topology: tpu7x:2x2x1
jax: 0.10.0
libtpu: 0.0.40
codegen_flags: <defaults>
</compile_context>

<pallas_src>
import numpy as np
import jax
import jax.numpy as jnp
from jax.experimental import pallas as pl
from jax.experimental.pallas import tpu as pltpu


# ---------------------------------------------------------------------------
# Constant selection / shift matrices (built once on host, 0/1 entries)
# ---------------------------------------------------------------------------
def _shift_mats(H, W):
    """(9, H*W, H*W): S[t, q, p]=1 iff output flat pos p reads input flat pos q
    for 3x3 tap t=(dy*3+dx) with padding=1 (out-of-range columns are all-zero,
    i.e. the zero padding is folded into the matrix)."""
    HW = H * W
    m = np.zeros((9, HW, HW), np.float32)
    for dy in range(3):
        for dx in range(3):
            t = dy * 3 + dx
            oy, ox = dy - 1, dx - 1
            for h in range(H):
                hs = h + oy
                if not (0 <= hs < H):
                    continue
                for w in range(W):
                    ws = w + ox
                    if 0 <= ws < W:
                        m[t, hs * W + ws, h * W + w] = 1.0
    return m


def _pool_mats(H, W):
    """(4, H*W, Ho*Wo): the four 2x2-window element selectors; maxpool is the
    elementwise max of the four selected maps."""
    Ho, Wo = H // 2, W // 2
    m = np.zeros((4, H * W, Ho * Wo), np.float32)
    for i in range(2):
        for j in range(2):
            t = i * 2 + j
            for ho in range(Ho):
                for wo in range(Wo):
                    m[t, (2 * ho + i) * W + (2 * wo + j), ho * Wo + wo] = 1.0
    return m


def _upsample_mat(Ho, Wo):
    """(Ho*Wo, 4*Ho*Wo): nearest-neighbour x2 duplication matrix."""
    H, W = 2 * Ho, 2 * Wo
    m = np.zeros((Ho * Wo, H * W), np.float32)
    for h in range(H):
        for w in range(W):
            m[(h // 2) * Wo + (w // 2), h * W + w] = 1.0
    return m


def build_constants(H, W):
    assert H % 4 == 0 and W % 4 == 0, "spatial dims must be divisible by 4"
    H2, W2 = H // 2, W // 2
    H4, W4 = H // 4, W // 4
    return dict(
        s_hi=jnp.asarray(_shift_mats(H, W)),       # 16x16 stages
        s_mid=jnp.asarray(_shift_mats(H2, W2)),    # 8x8 stages
        s_lo=jnp.asarray(_shift_mats(H4, W4)),     # 4x4 stage
        pool_hi=jnp.asarray(_pool_mats(H, W)),
        pool_mid=jnp.asarray(_pool_mats(H2, W2)),
        up_lo=jnp.asarray(_upsample_mat(H4, W4)),
        up_mid=jnp.asarray(_upsample_mat(H2, W2)),
    )


# ---------------------------------------------------------------------------
# Fused Pallas kernel: whole AutoEncoder forward for one image per grid step
# ---------------------------------------------------------------------------
def _autoencoder_kernel(x_ref,
                        s_hi_ref, s_mid_ref, s_lo_ref,
                        pool_hi_ref, pool_mid_ref,
                        up_lo_ref, up_mid_ref,
                        w1_ref, b1_ref, w2_ref, b2_ref,
                        wl_ref, bl_ref, w3_ref, b3_ref,
                        wo_ref, bo_ref,
                        o_ref):
    def conv3x3_relu(x, s_ref, w_ref, b_ref):
        # x: (Cin, HW), s_ref: (9, HW, HW), w_ref: (9, Cout, Cin), b_ref: (Cout, 1)
        cout = w_ref.shape[1]
        hw = x.shape[1]
        acc = jnp.zeros((cout, hw), jnp.float32)
        for t in range(9):                       # static unroll over taps
            shifted = jnp.dot(x, s_ref[t], preferred_element_type=jnp.float32)
            acc = acc + jnp.dot(w_ref[t], shifted,
                                preferred_element_type=jnp.float32)
        return jnp.maximum(acc + b_ref[...], 0.0)

    def maxpool2x2(x, p_ref):
        t0 = jnp.dot(x, p_ref[0], preferred_element_type=jnp.float32)
        t1 = jnp.dot(x, p_ref[1], preferred_element_type=jnp.float32)
        t2 = jnp.dot(x, p_ref[2], preferred_element_type=jnp.float32)
        t3 = jnp.dot(x, p_ref[3], preferred_element_type=jnp.float32)
        return jnp.maximum(jnp.maximum(t0, t1), jnp.maximum(t2, t3))

    def upsample2x(x, u_ref):
        return jnp.dot(x, u_ref[...], preferred_element_type=jnp.float32)

    x = x_ref[0]                                        # (3,  H*W)
    x = conv3x3_relu(x, s_hi_ref, w1_ref, b1_ref)       # (8,  H*W)
    x = maxpool2x2(x, pool_hi_ref)                      # (8,  H*W/4)
    x = conv3x3_relu(x, s_mid_ref, w2_ref, b2_ref)      # (12, H*W/4)
    x = maxpool2x2(x, pool_mid_ref)                     # (12, H*W/16)
    x = conv3x3_relu(x, s_lo_ref, wl_ref, bl_ref)       # (16, H*W/16)
    x = upsample2x(x, up_lo_ref)                        # (16, H*W/4)
    x = conv3x3_relu(x, s_mid_ref, w3_ref, b3_ref)      # (12, H*W/4)
    x = upsample2x(x, up_mid_ref)                       # (12, H*W)
    x = conv3x3_relu(x, s_hi_ref, wo_ref, bo_ref)       # (3,  H*W)
    o_ref[0] = x


# ---------------------------------------------------------------------------
# Parameters (PyTorch Conv2d layout, then packed to (tap, Cout, Cin))
# ---------------------------------------------------------------------------
_LAYER_DIMS = [(3, 8), (8, 12), (12, 16), (16, 12), (12, 3)]


def init_params(key):
    params = []
    for cin, cout in _LAYER_DIMS:
        key, kw, kb = jax.random.split(key, 3)
        fan_in = 9 * cin
        w = jax.random.normal(kw, (cout, cin, 3, 3), jnp.float32) / np.sqrt(fan_in)
        b = 0.01 * jax.random.normal(kb, (cout,), jnp.float32)
        params.append((w, b))
    return params


def _pack_conv(w, b):
    cout, cin = w.shape[0], w.shape[1]
    # (Cout, Cin, ky, kx) -> (tap = ky*3+kx, Cout, Cin)
    w9 = jnp.transpose(w, (2, 3, 0, 1)).reshape(9, cout, cin)
    return w9.astype(jnp.float32), b.reshape(cout, 1).astype(jnp.float32)


# ---------------------------------------------------------------------------
# Forward pass (matches AutoEncoder.forward semantics)
# ---------------------------------------------------------------------------
def autoencoder_forward(img_nchw, params, consts):
    N, C, H, W = img_nchw.shape
    HW = H * W
    x = img_nchw.reshape(N, C, HW).astype(jnp.float32)   # pure reshape, no transpose

    packed = [_pack_conv(w, b) for (w, b) in params]
    (w1, b1), (w2, b2), (wl, bl), (w3, b3), (wo, bo) = packed

    const_args = (consts["s_hi"], consts["s_mid"], consts["s_lo"],
                  consts["pool_hi"], consts["pool_mid"],
                  consts["up_lo"], consts["up_mid"])
    weight_args = (w1, b1, w2, b2, wl, bl, w3, b3, wo, bo)

    def _const_spec(a):
        zeros = (0,) * a.ndim
        return pl.BlockSpec(a.shape, lambda n, _z=zeros: _z)  # resident block

    in_specs = ([pl.BlockSpec((1, C, HW), lambda n: (n, 0, 0))]
                + [_const_spec(a) for a in const_args]
                + [_const_spec(a) for a in weight_args])

    c_out = _LAYER_DIMS[-1][1]
    out = pl.pallas_call(
        _autoencoder_kernel,
        out_shape=jax.ShapeDtypeStruct((N, c_out, HW), jnp.float32),
        grid=(N,),
        in_specs=in_specs,
        out_specs=pl.BlockSpec((1, c_out, HW), lambda n: (n, 0, 0)),
        compiler_params=pltpu.CompilerParams(
            dimension_semantics=("parallel",)),
    )(x, *const_args, *weight_args)

    return out.reshape(N, c_out, H, W)


if __name__ == "__main__":
    key = jax.random.PRNGKey(0)
    key_x, key_p = jax.random.split(key)

    # Small deterministic input consistent with the module: (N=2, C=3, H=W=16)
    N, C, H, W = 2, 3, 16, 16
    img = jax.random.normal(key_x, (N, C, H, W), jnp.float32)
    params = init_params(key_p)
    consts = build_constants(H, W)

    fwd = jax.jit(autoencoder_forward)
    out = fwd(img, params, consts)
    jax.block_until_ready(out)

    assert out.shape == (N, 3, H, W)
    assert out.dtype == jnp.float32
    assert bool(jnp.all(jnp.isfinite(out)))
    print("KERNEL_OK")
</pallas_src>

<mosaic_0001>
module attributes {stable_mosaic.version = 11 : i64} {
  func.func @_autoencoder_kernel(%arg0: i32, %arg1: memref<1x3x256xf32, #tpu.memory_space<vmem>>, %arg2: memref<9x256x256xf32, #tpu.memory_space<vmem>>, %arg3: memref<9x64x64xf32, #tpu.memory_space<vmem>>, %arg4: memref<9x16x16xf32, #tpu.memory_space<vmem>>, %arg5: memref<4x256x64xf32, #tpu.memory_space<vmem>>, %arg6: memref<4x64x16xf32, #tpu.memory_space<vmem>>, %arg7: memref<16x64xf32, #tpu.memory_space<vmem>>, %arg8: memref<64x256xf32, #tpu.memory_space<vmem>>, %arg9: memref<9x8x3xf32, #tpu.memory_space<vmem>>, %arg10: memref<8x1xf32, #tpu.memory_space<vmem>>, %arg11: memref<9x12x8xf32, #tpu.memory_space<vmem>>, %arg12: memref<12x1xf32, #tpu.memory_space<vmem>>, %arg13: memref<9x16x12xf32, #tpu.memory_space<vmem>>, %arg14: memref<16x1xf32, #tpu.memory_space<vmem>>, %arg15: memref<9x12x16xf32, #tpu.memory_space<vmem>>, %arg16: memref<12x1xf32, #tpu.memory_space<vmem>>, %arg17: memref<9x3x12xf32, #tpu.memory_space<vmem>>, %arg18: memref<3x1xf32, #tpu.memory_space<vmem>>, %arg19: memref<1x3x256xf32, #tpu.memory_space<vmem>>) attributes {dimension_semantics = [#tpu.dimension_semantics<parallel>], iteration_bounds = array<i64: 2>, scalar_prefetch = 0 : i64, scratch_operands = 0 : i64, tpu.core_type = #tpu.core_type<tc>, window_params = [{transform_indices = @transform_0, window_bounds = array<i64: 1, 3, 256>}, {pipeline_mode = #tpu.pipeline_mode<synchronous>, transform_indices = @transform_1, window_bounds = array<i64: 9, 256, 256>}, {pipeline_mode = #tpu.pipeline_mode<synchronous>, transform_indices = @transform_2, window_bounds = array<i64: 9, 64, 64>}, {pipeline_mode = #tpu.pipeline_mode<synchronous>, transform_indices = @transform_3, window_bounds = array<i64: 9, 16, 16>}, {pipeline_mode = #tpu.pipeline_mode<synchronous>, transform_indices = @transform_4, window_bounds = array<i64: 4, 256, 64>}, {pipeline_mode = #tpu.pipeline_mode<synchronous>, transform_indices = @transform_5, window_bounds = array<i64: 4, 64, 16>}, {pipeline_mode = #tpu.pipeline_mode<synchronous>, transform_indices = @transform_6, window_bounds = array<i64: 16, 64>}, {pipeline_mode = #tpu.pipeline_mode<synchronous>, transform_indices = @transform_7, window_bounds = array<i64: 64, 256>}, {pipeline_mode = #tpu.pipeline_mode<synchronous>, transform_indices = @transform_8, window_bounds = array<i64: 9, 8, 3>}, {pipeline_mode = #tpu.pipeline_mode<synchronous>, transform_indices = @transform_9, window_bounds = array<i64: 8, 1>}, {pipeline_mode = #tpu.pipeline_mode<synchronous>, transform_indices = @transform_10, window_bounds = array<i64: 9, 12, 8>}, {pipeline_mode = #tpu.pipeline_mode<synchronous>, transform_indices = @transform_11, window_bounds = array<i64: 12, 1>}, {pipeline_mode = #tpu.pipeline_mode<synchronous>, transform_indices = @transform_12, window_bounds = array<i64: 9, 16, 12>}, {pipeline_mode = #tpu.pipeline_mode<synchronous>, transform_indices = @transform_13, window_bounds = array<i64: 16, 1>}, {pipeline_mode = #tpu.pipeline_mode<synchronous>, transform_indices = @transform_14, window_bounds = array<i64: 9, 12, 16>}, {pipeline_mode = #tpu.pipeline_mode<synchronous>, transform_indices = @transform_15, window_bounds = array<i64: 12, 1>}, {pipeline_mode = #tpu.pipeline_mode<synchronous>, transform_indices = @transform_16, window_bounds = array<i64: 9, 3, 12>}, {pipeline_mode = #tpu.pipeline_mode<synchronous>, transform_indices = @transform_17, window_bounds = array<i64: 3, 1>}, {transform_indices = @transform_18, window_bounds = array<i64: 1, 3, 256>}]} {
    %c0 = arith.constant 0 : index
    %c0_0 = arith.constant 0 : index
    %c0_1 = arith.constant 0 : index
    %0 = vector.load %arg1[%c0, %c0_0, %c0_1] : memref<1x3x256xf32, #tpu.memory_space<vmem>>, vector<1x3x256xf32>
    %1 = vector.shape_cast %0 : vector<1x3x256xf32> to vector<3x256xf32>
    %cst = arith.constant 0.000000e+00 : f32
    %2 = vector.broadcast %cst : f32 to vector<8x256xf32>
    %c0_2 = arith.constant 0 : index
    %c0_3 = arith.constant 0 : index
    %c0_4 = arith.constant 0 : index
    %3 = vector.load %arg2[%c0_2, %c0_3, %c0_4] : memref<9x256x256xf32, #tpu.memory_space<vmem>>, vector<1x256x256xf32>
    %4 = vector.shape_cast %3 : vector<1x256x256xf32> to vector<256x256xf32>
    %cst_5 = arith.constant dense<0.000000e+00> : vector<3x256xf32>
    %5 = tpu.matmul %1, %4, %cst_5 {dimension_numbers = #tpu.dot_dimension_numbers<[1], [0], [0], [1], [0, 0, 1, 1], [], []>} : vector<3x256xf32>, vector<256x256xf32>, vector<3x256xf32> -> vector<3x256xf32>
    %c0_6 = arith.constant 0 : index
    %c0_7 = arith.constant 0 : index
    %c0_8 = arith.constant 0 : index
    %6 = vector.load %arg9[%c0_6, %c0_7, %c0_8] : memref<9x8x3xf32, #tpu.memory_space<vmem>>, vector<1x8x3xf32>
    %7 = vector.shape_cast %6 : vector<1x8x3xf32> to vector<8x3xf32>
    %cst_9 = arith.constant dense<0.000000e+00> : vector<8x256xf32>
    %8 = tpu.matmul %7, %5, %cst_9 {dimension_numbers = #tpu.dot_dimension_numbers<[1], [0], [0], [1], [0, 0, 1, 1], [], []>} : vector<8x3xf32>, vector<3x256xf32>, vector<8x256xf32> -> vector<8x256xf32>
    %9 = arith.addf %2, %8 : vector<8x256xf32>
    %c1 = arith.constant 1 : index
    %c0_10 = arith.constant 0 : index
    %c0_11 = arith.constant 0 : index
    %10 = vector.load %arg2[%c1, %c0_10, %c0_11] : memref<9x256x256xf32, #tpu.memory_space<vmem>>, vector<1x256x256xf32>
    %11 = vector.shape_cast %10 : vector<1x256x256xf32> to vector<256x256xf32>
    %cst_12 = arith.constant dense<0.000000e+00> : vector<3x256xf32>
    %12 = tpu.matmul %1, %11, %cst_12 {dimension_numbers = #tpu.dot_dimension_numbers<[1], [0], [0], [1], [0, 0, 1, 1], [], []>} : vector<3x256xf32>, vector<256x256xf32>, vector<3x256xf32> -> vector<3x256xf32>
    %c1_13 = arith.constant 1 : index
    %c0_14 = arith.constant 0 : index
    %c0_15 = arith.constant 0 : index
    %13 = vector.load %arg9[%c1_13, %c0_14, %c0_15] : memref<9x8x3xf32, #tpu.memory_space<vmem>>, vector<1x8x3xf32>
    %14 = vector.shape_cast %13 : vector<1x8x3xf32> to vector<8x3xf32>
    %cst_16 = arith.constant dense<0.000000e+00> : vector<8x256xf32>
    %15 = tpu.matmul %14, %12, %cst_16 {dimension_numbers = #tpu.dot_dimension_numbers<[1], [0], [0], [1], [0, 0, 1, 1], [], []>} : vector<8x3xf32>, vector<3x256xf32>, vector<8x256xf32> -> vector<8x256xf32>
    %16 = arith.addf %9, %15 : vector<8x256xf32>
    %c2 = arith.constant 2 : index
    %c0_17 = arith.constant 0 : index
    %c0_18 = arith.constant 0 : index
    %17 = vector.load %arg2[%c2, %c0_17, %c0_18] : memref<9x256x256xf32, #tpu.memory_space<vmem>>, vector<1x256x256xf32>
    %18 = vector.shape_cast %17 : vector<1x256x256xf32> to vector<256x256xf32>
    %cst_19 = arith.constant dense<0.000000e+00> : vector<3x256xf32>
    %19 = tpu.matmul %1, %18, %cst_19 {dimension_numbers = #tpu.dot_dimension_numbers<[1], [0], [0], [1], [0, 0, 1, 1], [], []>} : vector<3x256xf32>, vector<256x256xf32>, vector<3x256xf32> -> vector<3x256xf32>
    %c2_20 = arith.constant 2 : index
    %c0_21 = arith.constant 0 : index
    %c0_22 = arith.constant 0 : index
    %20 = vector.load %arg9[%c2_20, %c0_21, %c0_22] : memref<9x8x3xf32, #tpu.memory_space<vmem>>, vector<1x8x3xf32>
    %21 = vector.shape_cast %20 : vector<1x8x3xf32> to vector<8x3xf32>
    %cst_23 = arith.constant dense<0.000000e+00> : vector<8x256xf32>
    %22 = tpu.matmul %21, %19, %cst_23 {dimension_numbers = #tpu.dot_dimension_numbers<[1], [0], [0], [1], [0, 0, 1, 1], [], []>} : vector<8x3xf32>, vector<3x256xf32>, vector<8x256xf32> -> vector<8x256xf32>
    %23 = arith.addf %16, %22 : vector<8x256xf32>
    %c3 = arith.constant 3 : index
    %c0_24 = arith.constant 0 : index
    %c0_25 = arith.constant 0 : index
    %24 = vector.load %arg2[%c3, %c0_24, %c0_25] : memref<9x256x256xf32, #tpu.memory_space<vmem>>, vector<1x256x256xf32>
    %25 = vector.shape_cast %24 : vector<1x256x256xf32> to vector<256x256xf32>
    %cst_26 = arith.constant dense<0.000000e+00> : vector<3x256xf32>
    %26 = tpu.matmul %1, %25, %cst_26 {dimension_numbers = #tpu.dot_dimension_numbers<[1], [0], [0], [1], [0, 0, 1, 1], [], []>} : vector<3x256xf32>, vector<256x256xf32>, vector<3x256xf32> -> vector<3x256xf32>
    %c3_27 = arith.constant 3 : index
    %c0_28 = arith.constant 0 : index
    %c0_29 = arith.constant 0 : index
    %27 = vector.load %arg9[%c3_27, %c0_28, %c0_29] : memref<9x8x3xf32, #tpu.memory_space<vmem>>, vector<1x8x3xf32>
    %28 = vector.shape_cast %27 : vector<1x8x3xf32> to vector<8x3xf32>
    %cst_30 = arith.constant dense<0.000000e+00> : vector<8x256xf32>
    %29 = tpu.matmul %28, %26, %cst_30 {dimension_numbers = #tpu.dot_dimension_numbers<[1], [0], [0], [1], [0, 0, 1, 1], [], []>} : vector<8x3xf32>, vector<3x256xf32>, vector<8x256xf32> -> vector<8x256xf32>
    %30 = arith.addf %23, %29 : vector<8x256xf32>
    %c4 = arith.constant 4 : index
    %c0_31 = arith.constant 0 : index
    %c0_32 = arith.constant 0 : index
    %31 = vector.load %arg2[%c4, %c0_31, %c0_32] : memref<9x256x256xf32, #tpu.memory_space<vmem>>, vector<1x256x256xf32>
    %32 = vector.shape_cast %31 : vector<1x256x256xf32> to vector<256x256xf32>
    %cst_33 = arith.constant dense<0.000000e+00> : vector<3x256xf32>
    %33 = tpu.matmul %1, %32, %cst_33 {dimension_numbers = #tpu.dot_dimension_numbers<[1], [0], [0], [1], [0, 0, 1, 1], [], []>} : vector<3x256xf32>, vector<256x256xf32>, vector<3x256xf32> -> vector<3x256xf32>
    %c4_34 = arith.constant 4 : index
    %c0_35 = arith.constant 0 : index
    %c0_36 = arith.constant 0 : index
    %34 = vector.load %arg9[%c4_34, %c0_35, %c0_36] : memref<9x8x3xf32, #tpu.memory_space<vmem>>, vector<1x8x3xf32>
    %35 = vector.shape_cast %34 : vector<1x8x3xf32> to vector<8x3xf32>
    %cst_37 = arith.constant dense<0.000000e+00> : vector<8x256xf32>
    %36 = tpu.matmul %35, %33, %cst_37 {dimension_numbers = #tpu.dot_dimension_numbers<[1], [0], [0], [1], [0, 0, 1, 1], [], []>} : vector<8x3xf32>, vector<3x256xf32>, vector<8x256xf32> -> vector<8x256xf32>
    %37 = arith.addf %30, %36 : vector<8x256xf32>
    %c5 = arith.constant 5 : index
    %c0_38 = arith.constant 0 : index
    %c0_39 = arith.constant 0 : index
    %38 = vector.load %arg2[%c5, %c0_38, %c0_39] : memref<9x256x256xf32, #tpu.memory_space<vmem>>, vector<1x256x256xf32>
    %39 = vector.shape_cast %38 : vector<1x256x256xf32> to vector<256x256xf32>
    %cst_40 = arith.constant dense<0.000000e+00> : vector<3x256xf32>
    %40 = tpu.matmul %1, %39, %cst_40 {dimension_numbers = #tpu.dot_dimension_numbers<[1], [0], [0], [1], [0, 0, 1, 1], [], []>} : vector<3x256xf32>, vector<256x256xf32>, vector<3x256xf32> -> vector<3x256xf32>
    %c5_41 = arith.constant 5 : index
    %c0_42 = arith.constant 0 : index
    %c0_43 = arith.constant 0 : index
    %41 = vector.load %arg9[%c5_41, %c0_42, %c0_43] : memref<9x8x3xf32, #tpu.memory_space<vmem>>, vector<1x8x3xf32>
    %42 = vector.shape_cast %41 : vector<1x8x3xf32> to vector<8x3xf32>
    %cst_44 = arith.constant dense<0.000000e+00> : vector<8x256xf32>
    %43 = tpu.matmul %42, %40, %cst_44 {dimension_numbers = #tpu.dot_dimension_numbers<[1], [0], [0], [1], [0, 0, 1, 1], [], []>} : vector<8x3xf32>, vector<3x256xf32>, vector<8x256xf32> -> vector<8x256xf32>
    %44 = arith.addf %37, %43 : vector<8x256xf32>
    %c6 = arith.constant 6 : index
    %c0_45 = arith.constant 0 : index
    %c0_46 = arith.constant 0 : index
    %45 = vector.load %arg2[%c6, %c0_45, %c0_46] : memref<9x256x256xf32, #tpu.memory_space<vmem>>, vector<1x256x256xf32>
    %46 = vector.shape_cast %45 : vector<1x256x256xf32> to vector<256x256xf32>
    %cst_47 = arith.constant dense<0.000000e+00> : vector<3x256xf32>
    %47 = tpu.matmul %1, %46, %cst_47 {dimension_numbers = #tpu.dot_dimension_numbers<[1], [0], [0], [1], [0, 0, 1, 1], [], []>} : vector<3x256xf32>, vector<256x256xf32>, vector<3x256xf32> -> vector<3x256xf32>
    %c6_48 = arith.constant 6 : index
    %c0_49 = arith.constant 0 : index
    %c0_50 = arith.constant 0 : index
    %48 = vector.load %arg9[%c6_48, %c0_49, %c0_50] : memref<9x8x3xf32, #tpu.memory_space<vmem>>, vector<1x8x3xf32>
    %49 = vector.shape_cast %48 : vector<1x8x3xf32> to vector<8x3xf32>
    %cst_51 = arith.constant dense<0.000000e+00> : vector<8x256xf32>
    %50 = tpu.matmul %49, %47, %cst_51 {dimension_numbers = #tpu.dot_dimension_numbers<[1], [0], [0], [1], [0, 0, 1, 1], [], []>} : vector<8x3xf32>, vector<3x256xf32>, vector<8x256xf32> -> vector<8x256xf32>
    %51 = arith.addf %44, %50 : vector<8x256xf32>
    %c7 = arith.constant 7 : index
    %c0_52 = arith.constant 0 : index
    %c0_53 = arith.constant 0 : index
    %52 = vector.load %arg2[%c7, %c0_52, %c0_53] : memref<9x256x256xf32, #tpu.memory_space<vmem>>, vector<1x256x256xf32>
    %53 = vector.shape_cast %52 : vector<1x256x256xf32> to vector<256x256xf32>
    %cst_54 = arith.constant dense<0.000000e+00> : vector<3x256xf32>
    %54 = tpu.matmul %1, %53, %cst_54 {dimension_numbers = #tpu.dot_dimension_numbers<[1], [0], [0], [1], [0, 0, 1, 1], [], []>} : vector<3x256xf32>, vector<256x256xf32>, vector<3x256xf32> -> vector<3x256xf32>
    %c7_55 = arith.constant 7 : index
    %c0_56 = arith.constant 0 : index
    %c0_57 = arith.constant 0 : index
    %55 = vector.load %arg9[%c7_55, %c0_56, %c0_57] : memref<9x8x3xf32, #tpu.memory_space<vmem>>, vector<1x8x3xf32>
    %56 = vector.shape_cast %55 : vector<1x8x3xf32> to vector<8x3xf32>
    %cst_58 = arith.constant dense<0.000000e+00> : vector<8x256xf32>
    %57 = tpu.matmul %56, %54, %cst_58 {dimension_numbers = #tpu.dot_dimension_numbers<[1], [0], [0], [1], [0, 0, 1, 1], [], []>} : vector<8x3xf32>, vector<3x256xf32>, vector<8x256xf32> -> vector<8x256xf32>
    %58 = arith.addf %51, %57 : vector<8x256xf32>
    %c8 = arith.constant 8 : index
    %c0_59 = arith.constant 0 : index
    %c0_60 = arith.constant 0 : index
    %59 = vector.load %arg2[%c8, %c0_59, %c0_60] : memref<9x256x256xf32, #tpu.memory_space<vmem>>, vector<1x256x256xf32>
    %60 = vector.shape_cast %59 : vector<1x256x256xf32> to vector<256x256xf32>
    %cst_61 = arith.constant dense<0.000000e+00> : vector<3x256xf32>
    %61 = tpu.matmul %1, %60, %cst_61 {dimension_numbers = #tpu.dot_dimension_numbers<[1], [0], [0], [1], [0, 0, 1, 1], [], []>} : vector<3x256xf32>, vector<256x256xf32>, vector<3x256xf32> -> vector<3x256xf32>
    %c8_62 = arith.constant 8 : index
    %c0_63 = arith.constant 0 : index
    %c0_64 = arith.constant 0 : index
    %62 = vector.load %arg9[%c8_62, %c0_63, %c0_64] : memref<9x8x3xf32, #tpu.memory_space<vmem>>, vector<1x8x3xf32>
    %63 = vector.shape_cast %62 : vector<1x8x3xf32> to vector<8x3xf32>
    %cst_65 = arith.constant dense<0.000000e+00> : vector<8x256xf32>
    %64 = tpu.matmul %63, %61, %cst_65 {dimension_numbers = #tpu.dot_dimension_numbers<[1], [0], [0], [1], [0, 0, 1, 1], [], []>} : vector<8x3xf32>, vector<3x256xf32>, vector<8x256xf32> -> vector<8x256xf32>
    %65 = arith.addf %58, %64 : vector<8x256xf32>
    %c0_66 = arith.constant 0 : index
    %c0_67 = arith.constant 0 : index
    %66 = vector.load %arg10[%c0_66, %c0_67] : memref<8x1xf32, #tpu.memory_space<vmem>>, vector<8x1xf32>
    %67 = vector.broadcast %66 : vector<8x1xf32> to vector<8x256xf32>
    %68 = arith.addf %65, %67 : vector<8x256xf32>
    %cst_68 = arith.constant 0.000000e+00 : f32
    %69 = vector.broadcast %cst_68 : f32 to vector<8x256xf32>
    %70 = arith.maximumf %68, %69 : vector<8x256xf32>
    %c0_69 = arith.constant 0 : index
    %c0_70 = arith.constant 0 : index
    %c0_71 = arith.constant 0 : index
    %71 = vector.load %arg5[%c0_69, %c0_70, %c0_71] : memref<4x256x64xf32, #tpu.memory_space<vmem>>, vector<1x256x64xf32>
    %72 = vector.shape_cast %71 : vector<1x256x64xf32> to vector<256x64xf32>
    %cst_72 = arith.constant dense<0.000000e+00> : vector<8x64xf32>
    %73 = tpu.matmul %70, %72, %cst_72 {dimension_numbers = #tpu.dot_dimension_numbers<[1], [0], [0], [1], [0, 0, 1, 1], [], []>} : vector<8x256xf32>, vector<256x64xf32>, vector<8x64xf32> -> vector<8x64xf32>
    %c1_73 = arith.constant 1 : index
    %c0_74 = arith.constant 0 : index
    %c0_75 = arith.constant 0 : index
    %74 = vector.load %arg5[%c1_73, %c0_74, %c0_75] : memref<4x256x64xf32, #tpu.memory_space<vmem>>, vector<1x256x64xf32>
    %75 = vector.shape_cast %74 : vector<1x256x64xf32> to vector<256x64xf32>
    %cst_76 = arith.constant dense<0.000000e+00> : vector<8x64xf32>
    %76 = tpu.matmul %70, %75, %cst_76 {dimension_numbers = #tpu.dot_dimension_numbers<[1], [0], [0], [1], [0, 0, 1, 1], [], []>} : vector<8x256xf32>, vector<256x64xf32>, vector<8x64xf32> -> vector<8x64xf32>
    %c2_77 = arith.constant 2 : index
    %c0_78 = arith.constant 0 : index
    %c0_79 = arith.constant 0 : index
    %77 = vector.load %arg5[%c2_77, %c0_78, %c0_79] : memref<4x256x64xf32, #tpu.memory_space<vmem>>, vector<1x256x64xf32>
    %78 = vector.shape_cast %77 : vector<1x256x64xf32> to vector<256x64xf32>
    %cst_80 = arith.constant dense<0.000000e+00> : vector<8x64xf32>
    %79 = tpu.matmul %70, %78, %cst_80 {dimension_numbers = #tpu.dot_dimension_numbers<[1], [0], [0], [1], [0, 0, 1, 1], [], []>} : vector<8x256xf32>, vector<256x64xf32>, vector<8x64xf32> -> vector<8x64xf32>
    %c3_81 = arith.constant 3 : index
    %c0_82 = arith.constant 0 : index
    %c0_83 = arith.constant 0 : index
    %80 = vector.load %arg5[%c3_81, %c0_82, %c0_83] : memref<4x256x64xf32, #tpu.memory_space<vmem>>, vector<1x256x64xf32>
    %81 = vector.shape_cast %80 : vector<1x256x64xf32> to vector<256x64xf32>
    %cst_84 = arith.constant dense<0.000000e+00> : vector<8x64xf32>
    %82 = tpu.matmul %70, %81, %cst_84 {dimension_numbers = #tpu.dot_dimension_numbers<[1], [0], [0], [1], [0, 0, 1, 1], [], []>} : vector<8x256xf32>, vector<256x64xf32>, vector<8x64xf32> -> vector<8x64xf32>
    %83 = arith.maximumf %73, %76 : vector<8x64xf32>
    %84 = arith.maximumf %79, %82 : vector<8x64xf32>
    %85 = arith.maximumf %83, %84 : vector<8x64xf32>
    %cst_85 = arith.constant 0.000000e+00 : f32
    %86 = vector.broadcast %cst_85 : f32 to vector<12x64xf32>
    %c0_86 = arith.constant 0 : index
    %c0_87 = arith.constant 0 : index
    %c0_88 = arith.constant 0 : index
    %87 = vector.load %arg3[%c0_86, %c0_87, %c0_88] : memref<9x64x64xf32, #tpu.memory_space<vmem>>, vector<1x64x64xf32>
    %88 = vector.shape_cast %87 : vector<1x64x64xf32> to vector<64x64xf32>
    %cst_89 = arith.constant dense<0.000000e+00> : vector<8x64xf32>
    %89 = tpu.matmul %85, %88, %cst_89 {dimension_numbers = #tpu.dot_dimension_numbers<[1], [0], [0], [1], [0, 0, 1, 1], [], []>} : vector<8x64xf32>, vector<64x64xf32>, vector<8x64xf32> -> vector<8x64xf32>
    %c0_90 = arith.constant 0 : index
    %c0_91 = arith.constant 0 : index
    %c0_92 = arith.constant 0 : index
    %90 = vector.load %arg11[%c0_90, %c0_91, %c0_92] : memref<9x12x8xf32, #tpu.memory_space<vmem>>, vector<1x12x8xf32>
    %91 = vector.shape_cast %90 : vector<1x12x8xf32> to vector<12x8xf32>
    %cst_93 = arith.constant dense<0.000000e+00> : vector<12x64xf32>
    %92 = tpu.matmul %91, %89, %cst_93 {dimension_numbers = #tpu.dot_dimension_numbers<[1], [0], [0], [1], [0, 0, 1, 1], [], []>} : vector<12x8xf32>, vector<8x64xf32>, vector<12x64xf32> -> vector<12x64xf32>
    %93 = arith.addf %86, %92 : vector<12x64xf32>
    %c1_94 = arith.constant 1 : index
    %c0_95 = arith.constant 0 : index
    %c0_96 = arith.constant 0 : index
    %94 = vector.load %arg3[%c1_94, %c0_95, %c0_96] : memref<9x64x64xf32, #tpu.memory_space<vmem>>, vector<1x64x64xf32>
    %95 = vector.shape_cast %94 : vector<1x64x64xf32> to vector<64x64xf32>
    %cst_97 = arith.constant dense<0.000000e+00> : vector<8x64xf32>
    %96 = tpu.matmul %85, %95, %cst_97 {dimension_numbers = #tpu.dot_dimension_numbers<[1], [0], [0], [1], [0, 0, 1, 1], [], []>} : vector<8x64xf32>, vector<64x64xf32>, vector<8x64xf32> -> vector<8x64xf32>
    %c1_98 = arith.constant 1 : index
    %c0_99 = arith.constant 0 : index
    %c0_100 = arith.constant 0 : index
    %97 = vector.load %arg11[%c1_98, %c0_99, %c0_100] : memref<9x12x8xf32, #tpu.memory_space<vmem>>, vector<1x12x8xf32>
    %98 = vector.shape_cast %97 : vector<1x12x8xf32> to vector<12x8xf32>
    %cst_101 = arith.constant dense<0.000000e+00> : vector<12x64xf32>
    %99 = tpu.matmul %98, %96, %cst_101 {dimension_numbers = #tpu.dot_dimension_numbers<[1], [0], [0], [1], [0, 0, 1, 1], [], []>} : vector<12x8xf32>, vector<8x64xf32>, vector<12x64xf32> -> vector<12x64xf32>
    %100 = arith.addf %93, %99 : vector<12x64xf32>
    %c2_102 = arith.constant 2 : index
    %c0_103 = arith.constant 0 : index
    %c0_104 = arith.constant 0 : index
    %101 = vector.load %arg3[%c2_102, %c0_103, %c0_104] : memref<9x64x64xf32, #tpu.memory_space<vmem>>, vector<1x64x64xf32>
    %102 = vector.shape_cast %101 : vector<1x64x64xf32> to vector<64x64xf32>
    %cst_105 = arith.constant dense<0.000000e+00> : vector<8x64xf32>
    %103 = tpu.matmul %85, %102, %cst_105 {dimension_numbers = #tpu.dot_dimension_numbers<[1], [0], [0], [1], [0, 0, 1, 1], [], []>} : vector<8x64xf32>, vector<64x64xf32>, vector<8x64xf32> -> vector<8x64xf32>
    %c2_106 = arith.constant 2 : index
    %c0_107 = arith.constant 0 : index
    %c0_108 = arith.constant 0 : index
    %104 = vector.load %arg11[%c2_106, %c0_107, %c0_108] : memref<9x12x8xf32, #tpu.memory_space<vmem>>, vector<1x12x8xf32>
    %105 = vector.shape_cast %104 : vector<1x12x8xf32> to vector<12x8xf32>
    %cst_109 = arith.constant dense<0.000000e+00> : vector<12x64xf32>
    %106 = tpu.matmul %105, %103, %cst_109 {dimension_numbers = #tpu.dot_dimension_numbers<[1], [0], [0], [1], [0, 0, 1, 1], [], []>} : vector<12x8xf32>, vector<8x64xf32>, vector<12x64xf32> -> vector<12x64xf32>
    %107 = arith.addf %100, %106 : vector<12x64xf32>
    %c3_110 = arith.constant 3 : index
    %c0_111 = arith.constant 0 : index
    %c0_112 = arith.constant 0 : index
    %108 = vector.load %arg3[%c3_110, %c0_111, %c0_112] : memref<9x64x64xf32, #tpu.memory_space<vmem>>, vector<1x64x64xf32>
    %109 = vector.shape_cast %108 : vector<1x64x64xf32> to vector<64x64xf32>
    %cst_113 = arith.constant dense<0.000000e+00> : vector<8x64xf32>
    %110 = tpu.matmul %85, %109, %cst_113 {dimension_numbers = #tpu.dot_dimension_numbers<[1], [0], [0], [1], [0, 0, 1, 1], [], []>} : vector<8x64xf32>, vector<64x64xf32>, vector<8x64xf32> -> vector<8x64xf32>
    %c3_114 = arith.constant 3 : index
    %c0_115 = arith.constant 0 : index
    %c0_116 = arith.constant 0 : index
    %111 = vector.load %arg11[%c3_114, %c0_115, %c0_116] : memref<9x12x8xf32, #tpu.memory_space<vmem>>, vector<1x12x8xf32>
    %112 = vector.shape_cast %111 : vector<1x12x8xf32> to vector<12x8xf32>
    %cst_117 = arith.constant dense<0.000000e+00> : vector<12x64xf32>
    %113 = tpu.matmul %112, %110, %cst_117 {dimension_numbers = #tpu.dot_dimension_numbers<[1], [0], [0], [1], [0, 0, 1, 1], [], []>} : vector<12x8xf32>, vector<8x64xf32>, vector<12x64xf32> -> vector<12x64xf32>
    %114 = arith.addf %107, %113 : vector<12x64xf32>
    %c4_118 = arith.constant 4 : index
    %c0_119 = arith.constant 0 : index
    %c0_120 = arith.constant 0 : index
    %115 = vector.load %arg3[%c4_118, %c0_119, %c0_120] : memref<9x64x64xf32, #tpu.memory_space<vmem>>, vector<1x64x64xf32>
    %116 = vector.shape_cast %115 : vector<1x64x64xf32> to vector<64x64xf32>
    %cst_121 = arith.constant dense<0.000000e+00> : vector<8x64xf32>
    %117 = tpu.matmul %85, %116, %cst_121 {dimension_numbers = #tpu.dot_dimension_numbers<[1], [0], [0], [1], [0, 0, 1, 1], [], []>} : vector<8x64xf32>, vector<64x64xf32>, vector<8x64xf32> -> vector<8x64xf32>
    %c4_122 = arith.constant 4 : index
    %c0_123 = arith.constant 0 : index
    %c0_124 = arith.constant 0 : index
    %118 = vector.load %arg11[%c4_122, %c0_123, %c0_124] : memref<9x12x8xf32, #tpu.memory_space<vmem>>, vector<1x12x8xf32>
    %119 = vector.shape_cast %118 : vector<1x12x8xf32> to vector<12x8xf32>
    %cst_125 = arith.constant dense<0.000000e+00> : vector<12x64xf32>
    %120 = tpu.matmul %119, %117, %cst_125 {dimension_numbers = #tpu.dot_dimension_numbers<[1], [0], [0], [1], [0, 0, 1, 1], [], []>} : vector<12x8xf32>, vector<8x64xf32>, vector<12x64xf32> -> vector<12x64xf32>
    %121 = arith.addf %114, %120 : vector<12x64xf32>
    %c5_126 = arith.constant 5 : index
    %c0_127 = arith.constant 0 : index
    %c0_128 = arith.constant 0 : index
    %122 = vector.load %arg3[%c5_126, %c0_127, %c0_128] : memref<9x64x64xf32, #tpu.memory_space<vmem>>, vector<1x64x64xf32>
    %123 = vector.shape_cast %122 : vector<1x64x64xf32> to vector<64x64xf32>
    %cst_129 = arith.constant dense<0.000000e+00> : vector<8x64xf32>
    %124 = tpu.matmul %85, %123, %cst_129 {dimension_numbers = #tpu.dot_dimension_numbers<[1], [0], [0], [1], [0, 0, 1, 1], [], []>} : vector<8x64xf32>, vector<64x64xf32>, vector<8x64xf32> -> vector<8x64xf32>
    %c5_130 = arith.constant 5 : index
    %c0_131 = arith.constant 0 : index
    %c0_132 = arith.constant 0 : index
    %125 = vector.load %arg11[%c5_130, %c0_131, %c0_132] : memref<9x12x8xf32, #tpu.memory_space<vmem>>, vector<1x12x8xf32>
    %126 = vector.shape_cast %125 : vector<1x12x8xf32> to vector<12x8xf32>
    %cst_133 = arith.constant dense<0.000000e+00> : vector<12x64xf32>
    %127 = tpu.matmul %126, %124, %cst_133 {dimension_numbers = #tpu.dot_dimension_numbers<[1], [0], [0], [1], [0, 0, 1, 1], [], []>} : vector<12x8xf32>, vector<8x64xf32>, vector<12x64xf32> -> vector<12x64xf32>
    %128 = arith.addf %121, %127 : vector<12x64xf32>
    %c6_134 = arith.constant 6 : index
    %c0_135 = arith.constant 0 : index
    %c0_136 = arith.constant 0 : index
    %129 = vector.load %arg3[%c6_134, %c0_135, %c0_136] : memref<9x64x64xf32, #tpu.memory_space<vmem>>, vector<1x64x64xf32>
    %130 = vector.shape_cast %129 : vector<1x64x64xf32> to vector<64x64xf32>
    %cst_137 = arith.constant dense<0.000000e+00> : vector<8x64xf32>
    %131 = tpu.matmul %85, %130, %cst_137 {dimension_numbers = #tpu.dot_dimension_numbers<[1], [0], [0], [1], [0, 0, 1, 1], [], []>} : vector<8x64xf32>, vector<64x64xf32>, vector<8x64xf32> -> vector<8x64xf32>
    %c6_138 = arith.constant 6 : index
    %c0_139 = arith.constant 0 : index
    %c0_140 = arith.constant 0 : index
    %132 = vector.load %arg11[%c6_138, %c0_139, %c0_140] : memref<9x12x8xf32, #tpu.memory_space<vmem>>, vector<1x12x8xf32>
    %133 = vector.shape_cast %132 : vector<1x12x8xf32> to vector<12x8xf32>
    %cst_141 = arith.constant dense<0.000000e+00> : vector<12x64xf32>
    %134 = tpu.matmul %133, %131, %cst_141 {dimension_numbers = #tpu.dot_dimension_numbers<[1], [0], [0], [1], [0, 0, 1, 1], [], []>} : vector<12x8xf32>, vector<8x64xf32>, vector<12x64xf32> -> vector<12x64xf32>
    %135 = arith.addf %128, %134 : vector<12x64xf32>
    %c7_142 = arith.constant 7 : index
    %c0_143 = arith.constant 0 : index
    %c0_144 = arith.constant 0 : index
    %136 = vector.load %arg3[%c7_142, %c0_143, %c0_144] : memref<9x64x64xf32, #tpu.memory_space<vmem>>, vector<1x64x64xf32>
    %137 = vector.shape_cast %136 : vector<1x64x64xf32> to vector<64x64xf32>
    %cst_145 = arith.constant dense<0.000000e+00> : vector<8x64xf32>
    %138 = tpu.matmul %85, %137, %cst_145 {dimension_numbers = #tpu.dot_dimension_numbers<[1], [0], [0], [1], [0, 0, 1, 1], [], []>} : vector<8x64xf32>, vector<64x64xf32>, vector<8x64xf32> -> vector<8x64xf32>
    %c7_146 = arith.constant 7 : index
    %c0_147 = arith.constant 0 : index
    %c0_148 = arith.constant 0 : index
    %139 = vector.load %arg11[%c7_146, %c0_147, %c0_148] : memref<9x12x8xf32, #tpu.memory_space<vmem>>, vector<1x12x8xf32>
    %140 = vector.shape_cast %139 : vector<1x12x8xf32> to vector<12x8xf32>
    %cst_149 = arith.constant dense<0.000000e+00> : vector<12x64xf32>
    %141 = tpu.matmul %140, %138, %cst_149 {dimension_numbers = #tpu.dot_dimension_numbers<[1], [0], [0], [1], [0, 0, 1, 1], [], []>} : vector<12x8xf32>, vector<8x64xf32>, vector<12x64xf32> -> vector<12x64xf32>
    %142 = arith.addf %135, %141 : vector<12x64xf32>
    %c8_150 = arith.constant 8 : index
    %c0_151 = arith.constant 0 : index
    %c0_152 = arith.constant 0 : index
    %143 = vector.load %arg3[%c8_150, %c0_151, %c0_152] : memref<9x64x64xf32, #tpu.memory_space<vmem>>, vector<1x64x64xf32>
    %144 = vector.shape_cast %143 : vector<1x64x64xf32> to vector<64x64xf32>
    %cst_153 = arith.constant dense<0.000000e+00> : vector<8x64xf32>
    %145 = tpu.matmul %85, %144, %cst_153 {dimension_numbers = #tpu.dot_dimension_numbers<[1], [0], [0], [1], [0, 0, 1, 1], [], []>} : vector<8x64xf32>, vector<64x64xf32>, vector<8x64xf32> -> vector<8x64xf32>
    %c8_154 = arith.constant 8 : index
    %c0_155 = arith.constant 0 : index
    %c0_156 = arith.constant 0 : index
    %146 = vector.load %arg11[%c8_154, %c0_155, %c0_156] : memref<9x12x8xf32, #tpu.memory_space<vmem>>, vector<1x12x8xf32>
    %147 = vector.shape_cast %146 : vector<1x12x8xf32> to vector<12x8xf32>
    %cst_157 = arith.constant dense<0.000000e+00> : vector<12x64xf32>
    %148 = tpu.matmul %147, %145, %cst_157 {dimension_numbers = #tpu.dot_dimension_numbers<[1], [0], [0], [1], [0, 0, 1, 1], [], []>} : vector<12x8xf32>, vector<8x64xf32>, vector<12x64xf32> -> vector<12x64xf32>
    %149 = arith.addf %142, %148 : vector<12x64xf32>
    %c0_158 = arith.constant 0 : index
    %c0_159 = arith.constant 0 : index
    %150 = vector.load %arg12[%c0_158, %c0_159] : memref<12x1xf32, #tpu.memory_space<vmem>>, vector<12x1xf32>
    %151 = vector.broadcast %150 : vector<12x1xf32> to vector<12x64xf32>
    %152 = arith.addf %149, %151 : vector<12x64xf32>
    %cst_160 = arith.constant 0.000000e+00 : f32
    %153 = vector.broadcast %cst_160 : f32 to vector<12x64xf32>
    %154 = arith.maximumf %152, %153 : vector<12x64xf32>
    %c0_161 = arith.constant 0 : index
    %c0_162 = arith.constant 0 : index
    %c0_163 = arith.constant 0 : index
    %155 = vector.load %arg6[%c0_161, %c0_162, %c0_163] : memref<4x64x16xf32, #tpu.memory_space<vmem>>, vector<1x64x16xf32>
    %156 = vector.shape_cast %155 : vector<1x64x16xf32> to vector<64x16xf32>
    %cst_164 = arith.constant dense<0.000000e+00> : vector<12x16xf32>
    %157 = tpu.matmul %154, %156, %cst_164 {dimension_numbers = #tpu.dot_dimension_numbers<[1], [0], [0], [1], [0, 0, 1, 1], [], []>} : vector<12x64xf32>, vector<64x16xf32>, vector<12x16xf32> -> vector<12x16xf32>
    %c1_165 = arith.constant 1 : index
    %c0_166 = arith.constant 0 : index
    %c0_167 = arith.constant 0 : index
    %158 = vector.load %arg6[%c1_165, %c0_166, %c0_167] : memref<4x64x16xf32, #tpu.memory_space<vmem>>, vector<1x64x16xf32>
    %159 = vector.shape_cast %158 : vector<1x64x16xf32> to vector<64x16xf32>
    %cst_168 = arith.constant dense<0.000000e+00> : vector<12x16xf32>
    %160 = tpu.matmul %154, %159, %cst_168 {dimension_numbers = #tpu.dot_dimension_numbers<[1], [0], [0], [1], [0, 0, 1, 1], [], []>} : vector<12x64xf32>, vector<64x16xf32>, vector<12x16xf32> -> vector<12x16xf32>
    %c2_169 = arith.constant 2 : index
    %c0_170 = arith.constant 0 : index
    %c0_171 = arith.constant 0 : index
    %161 = vector.load %arg6[%c2_169, %c0_170, %c0_171] : memref<4x64x16xf32, #tpu.memory_space<vmem>>, vector<1x64x16xf32>
    %162 = vector.shape_cast %161 : vector<1x64x16xf32> to vector<64x16xf32>
    %cst_172 = arith.constant dense<0.000000e+00> : vector<12x16xf32>
    %163 = tpu.matmul %154, %162, %cst_172 {dimension_numbers = #tpu.dot_dimension_numbers<[1], [0], [0], [1], [0, 0, 1, 1], [], []>} : vector<12x64xf32>, vector<64x16xf32>, vector<12x16xf32> -> vector<12x16xf32>
    %c3_173 = arith.constant 3 : index
    %c0_174 = arith.constant 0 : index
    %c0_175 = arith.constant 0 : index
    %164 = vector.load %arg6[%c3_173, %c0_174, %c0_175] : memref<4x64x16xf32, #tpu.memory_space<vmem>>, vector<1x64x16xf32>
    %165 = vector.shape_cast %164 : vector<1x64x16xf32> to vector<64x16xf32>
    %cst_176 = arith.constant dense<0.000000e+00> : vector<12x16xf32>
    %166 = tpu.matmul %154, %165, %cst_176 {dimension_numbers = #tpu.dot_dimension_numbers<[1], [0], [0], [1], [0, 0, 1, 1], [], []>} : vector<12x64xf32>, vector<64x16xf32>, vector<12x16xf32> -> vector<12x16xf32>
    %167 = arith.maximumf %157, %160 : vector<12x16xf32>
    %168 = arith.maximumf %163, %166 : vector<12x16xf32>
    %169 = arith.maximumf %167, %168 : vector<12x16xf32>
    %cst_177 = arith.constant 0.000000e+00 : f32
    %170 = vector.broadcast %cst_177 : f32 to vector<16x16xf32>
    %c0_178 = arith.constant 0 : index
    %c0_179 = arith.constant 0 : index
    %c0_180 = arith.constant 0 : index
    %171 = vector.load %arg4[%c0_178, %c0_179, %c0_180] : memref<9x16x16xf32, #tpu.memory_space<vmem>>, vector<1x16x16xf32>
    %172 = vector.shape_cast %171 : vector<1x16x16xf32> to vector<16x16xf32>
    %cst_181 = arith.constant dense<0.000000e+00> : vector<12x16xf32>
    %173 = tpu.matmul %169, %172, %cst_181 {dimension_numbers = #tpu.dot_dimension_numbers<[1], [0], [0], [1], [0, 0, 1, 1], [], []>} : vector<12x16xf32>, vector<16x16xf32>, vector<12x16xf32> -> vector<12x16xf32>
    %c0_182 = arith.constant 0 : index
    %c0_183 = arith.constant 0 : index
    %c0_184 = arith.constant 0 : index
    %174 = vector.load %arg13[%c0_182, %c0_183, %c0_184] : memref<9x16x12xf32, #tpu.memory_space<vmem>>, vector<1x16x12xf32>
    %175 = vector.shape_cast %174 : vector<1x16x12xf32> to vector<16x12xf32>
    %cst_185 = arith.constant dense<0.000000e+00> : vector<16x16xf32>
    %176 = tpu.matmul %175, %173, %cst_185 {dimension_numbers = #tpu.dot_dimension_numbers<[1], [0], [0], [1], [0, 0, 1, 1], [], []>} : vector<16x12xf32>, vector<12x16xf32>, vector<16x16xf32> -> vector<16x16xf32>
    %177 = arith.addf %170, %176 : vector<16x16xf32>
    %c1_186 = arith.constant 1 : index
    %c0_187 = arith.constant 0 : index
    %c0_188 = arith.constant 0 : index
    %178 = vector.load %arg4[%c1_186, %c0_187, %c0_188] : memref<9x16x16xf32, #tpu.memory_space<vmem>>, vector<1x16x16xf32>
    %179 = vector.shape_cast %178 : vector<1x16x16xf32> to vector<16x16xf32>
    %cst_189 = arith.constant dense<0.000000e+00> : vector<12x16xf32>
    %180 = tpu.matmul %169, %179, %cst_189 {dimension_numbers = #tpu.dot_dimension_numbers<[1], [0], [0], [1], [0, 0, 1, 1], [], []>} : vector<12x16xf32>, vector<16x16xf32>, vector<12x16xf32> -> vector<12x16xf32>
    %c1_190 = arith.constant 1 : index
    %c0_191 = arith.constant 0 : index
    %c0_192 = arith.constant 0 : index
    %181 = vector.load %arg13[%c1_190, %c0_191, %c0_192] : memref<9x16x12xf32, #tpu.memory_space<vmem>>, vector<1x16x12xf32>
    %182 = vector.shape_cast %181 : vector<1x16x12xf32> to vector<16x12xf32>
    %cst_193 = arith.constant dense<0.000000e+00> : vector<16x16xf32>
    %183 = tpu.matmul %182, %180, %cst_193 {dimension_numbers = #tpu.dot_dimension_numbers<[1], [0], [0], [1], [0, 0, 1, 1], [], []>} : vector<16x12xf32>, vector<12x16xf32>, vector<16x16xf32> -> vector<16x16xf32>
    %184 = arith.addf %177, %183 : vector<16x16xf32>
    %c2_194 = arith.constant 2 : index
    %c0_195 = arith.constant 0 : index
    %c0_196 = arith.constant 0 : index
    %185 = vector.load %arg4[%c2_194, %c0_195, %c0_196] : memref<9x16x16xf32, #tpu.memory_space<vmem>>, vector<1x16x16xf32>
    %186 = vector.shape_cast %185 : vector<1x16x16xf32> to vector<16x16xf32>
    %cst_197 = arith.constant dense<0.000000e+00> : vector<12x16xf32>
    %187 = tpu.matmul %169, %186, %cst_197 {dimension_numbers = #tpu.dot_dimension_numbers<[1], [0], [0], [1], [0, 0, 1, 1], [], []>} : vector<12x16xf32>, vector<16x16xf32>, vector<12x16xf32> -> vector<12x16xf32>
    %c2_198 = arith.constant 2 : index
    %c0_199 = arith.constant 0 : index
    %c0_200 = arith.constant 0 : index
    %188 = vector.load %arg13[%c2_198, %c0_199, %c0_200] : memref<9x16x12xf32, #tpu.memory_space<vmem>>, vector<1x16x12xf32>
    %189 = vector.shape_cast %188 : vector<1x16x12xf32> to vector<16x12xf32>
    %cst_201 = arith.constant dense<0.000000e+00> : vector<16x16xf32>
    %190 = tpu.matmul %189, %187, %cst_201 {dimension_numbers = #tpu.dot_dimension_numbers<[1], [0], [0], [1], [0, 0, 1, 1], [], []>} : vector<16x12xf32>, vector<12x16xf32>, vector<16x16xf32> -> vector<16x16xf32>
    %191 = arith.addf %184, %190 : vector<16x16xf32>
    %c3_202 = arith.constant 3 : index
    %c0_203 = arith.constant 0 : index
    %c0_204 = arith.constant 0 : index
    %192 = vector.load %arg4[%c3_202, %c0_203, %c0_204] : memref<9x16x16xf32, #tpu.memory_space<vmem>>, vector<1x16x16xf32>
    %193 = vector.shape_cast %192 : vector<1x16x16xf32> to vector<16x16xf32>
    %cst_205 = arith.constant dense<0.000000e+00> : vector<12x16xf32>
    %194 = tpu.matmul %169, %193, %cst_205 {dimension_numbers = #tpu.dot_dimension_numbers<[1], [0], [0], [1], [0, 0, 1, 1], [], []>} : vector<12x16xf32>, vector<16x16xf32>, vector<12x16xf32> -> vector<12x16xf32>
    %c3_206 = arith.constant 3 : index
    %c0_207 = arith.constant 0 : index
    %c0_208 = arith.constant 0 : index
    %195 = vector.load %arg13[%c3_206, %c0_207, %c0_208] : memref<9x16x12xf32, #tpu.memory_space<vmem>>, vector<1x16x12xf32>
    %196 = vector.shape_cast %195 : vector<1x16x12xf32> to vector<16x12xf32>
    %cst_209 = arith.constant dense<0.000000e+00> : vector<16x16xf32>
    %197 = tpu.matmul %196, %194, %cst_209 {dimension_numbers = #tpu.dot_dimension_numbers<[1], [0], [0], [1], [0, 0, 1, 1], [], []>} : vector<16x12xf32>, vector<12x16xf32>, vector<16x16xf32> -> vector<16x16xf32>
    %198 = arith.addf %191, %197 : vector<16x16xf32>
    %c4_210 = arith.constant 4 : index
    %c0_211 = arith.constant 0 : index
    %c0_212 = arith.constant 0 : index
    %199 = vector.load %arg4[%c4_210, %c0_211, %c0_212] : memref<9x16x16xf32, #tpu.memory_space<vmem>>, vector<1x16x16xf32>
    %200 = vector.shape_cast %199 : vector<1x16x16xf32> to vector<16x16xf32>
    %cst_213 = arith.constant dense<0.000000e+00> : vector<12x16xf32>
    %201 = tpu.matmul %169, %200, %cst_213 {dimension_numbers = #tpu.dot_dimension_numbers<[1], [0], [0], [1], [0, 0, 1, 1], [], []>} : vector<12x16xf32>, vector<16x16xf32>, vector<12x16xf32> -> vector<12x16xf32>
    %c4_214 = arith.constant 4 : index
    %c0_215 = arith.constant 0 : index
    %c0_216 = arith.constant 0 : index
    %202 = vector.load %arg13[%c4_214, %c0_215, %c0_216] : memref<9x16x12xf32, #tpu.memory_space<vmem>>, vector<1x16x12xf32>
    %203 = vector.shape_cast %202 : vector<1x16x12xf32> to vector<16x12xf32>
    %cst_217 = arith.constant dense<0.000000e+00> : vector<16x16xf32>
    %204 = tpu.matmul %203, %201, %cst_217 {dimension_numbers = #tpu.dot_dimension_numbers<[1], [0], [0], [1], [0, 0, 1, 1], [], []>} : vector<16x12xf32>, vector<12x16xf32>, vector<16x16xf32> -> vector<16x16xf32>
    %205 = arith.addf %198, %204 : vector<16x16xf32>
    %c5_218 = arith.constant 5 : index
    %c0_219 = arith.constant 0 : index
    %c0_220 = arith.constant 0 : index
    %206 = vector.load %arg4[%c5_218, %c0_219, %c0_220] : memref<9x16x16xf32, #tpu.memory_space<vmem>>, vector<1x16x16xf32>
    %207 = vector.shape_cast %206 : vector<1x16x16xf32> to vector<16x16xf32>
    %cst_221 = arith.constant dense<0.000000e+00> : vector<12x16xf32>
    %208 = tpu.matmul %169, %207, %cst_221 {dimension_numbers = #tpu.dot_dimension_numbers<[1], [0], [0], [1], [0, 0, 1, 1], [], []>} : vector<12x16xf32>, vector<16x16xf32>, vector<12x16xf32> -> vector<12x16xf32>
    %c5_222 = arith.constant 5 : index
    %c0_223 = arith.constant 0 : index
    %c0_224 = arith.constant 0 : index
    %209 = vector.load %arg13[%c5_222, %c0_223, %c0_224] : memref<9x16x12xf32, #tpu.memory_space<vmem>>, vector<1x16x12xf32>
    %210 = vector.shape_cast %209 : vector<1x16x12xf32> to vector<16x12xf32>
    %cst_225 = arith.constant dense<0.000000e+00> : vector<16x16xf32>
    %211 = tpu.matmul %210, %208, %cst_225 {dimension_numbers = #tpu.dot_dimension_numbers<[1], [0], [0], [1], [0, 0, 1, 1], [], []>} : vector<16x12xf32>, vector<12x16xf32>, vector<16x16xf32> -> vector<16x16xf32>
    %212 = arith.addf %205, %211 : vector<16x16xf32>
    %c6_226 = arith.constant 6 : index
    %c0_227 = arith.constant 0 : index
    %c0_228 = arith.constant 0 : index
    %213 = vector.load %arg4[%c6_226, %c0_227, %c0_228] : memref<9x16x16xf32, #tpu.memory_space<vmem>>, vector<1x16x16xf32>
    %214 = vector.shape_cast %213 : vector<1x16x16xf32> to vector<16x16xf32>
    %cst_229 = arith.constant dense<0.000000e+00> : vector<12x16xf32>
    %215 = tpu.matmul %169, %214, %cst_229 {dimension_numbers = #tpu.dot_dimension_numbers<[1], [0], [0], [1], [0, 0, 1, 1], [], []>} : vector<12x16xf32>, vector<16x16xf32>, vector<12x16xf32> -> vector<12x16xf32>
    %c6_230 = arith.constant 6 : index
    %c0_231 = arith.constant 0 : index
    %c0_232 = arith.constant 0 : index
    %216 = vector.load %arg13[%c6_230, %c0_231, %c0_232] : memref<9x16x12xf32, #tpu.memory_space<vmem>>, vector<1x16x12xf32>
    %217 = vector.shape_cast %216 : vector<1x16x12xf32> to vector<16x12xf32>
    %cst_233 = arith.constant dense<0.000000e+00> : vector<16x16xf32>
    %218 = tpu.matmul %217, %215, %cst_233 {dimension_numbers = #tpu.dot_dimension_numbers<[1], [0], [0], [1], [0, 0, 1, 1], [], []>} : vector<16x12xf32>, vector<12x16xf32>, vector<16x16xf32> -> vector<16x16xf32>
    %219 = arith.addf %212, %218 : vector<16x16xf32>
    %c7_234 = arith.constant 7 : index
    %c0_235 = arith.constant 0 : index
    %c0_236 = arith.constant 0 : index
    %220 = vector.load %arg4[%c7_234, %c0_235, %c0_236] : memref<9x16x16xf32, #tpu.memory_space<vmem>>, vector<1x16x16xf32>
    %221 = vector.shape_cast %220 : vector<1x16x16xf32> to vector<16x16xf32>
    %cst_237 = arith.constant dense<0.000000e+00> : vector<12x16xf32>
    %222 = tpu.matmul %169, %221, %cst_237 {dimension_numbers = #tpu.dot_dimension_numbers<[1], [0], [0], [1], [0, 0, 1, 1], [], []>} : vector<12x16xf32>, vector<16x16xf32>, vector<12x16xf32> -> vector<12x16xf32>
    %c7_238 = arith.constant 7 : index
    %c0_239 = arith.constant 0 : index
    %c0_240 = arith.constant 0 : index
    %223 = vector.load %arg13[%c7_238, %c0_239, %c0_240] : memref<9x16x12xf32, #tpu.memory_space<vmem>>, vector<1x16x12xf32>
    %224 = vector.shape_cast %223 : vector<1x16x12xf32> to vector<16x12xf32>
    %cst_241 = arith.constant dense<0.000000e+00> : vector<16x16xf32>
    %225 = tpu.matmul %224, %222, %cst_241 {dimension_numbers = #tpu.dot_dimension_numbers<[1], [0], [0], [1], [0, 0, 1, 1], [], []>} : vector<16x12xf32>, vector<12x16xf32>, vector<16x16xf32> -> vector<16x16xf32>
    %226 = arith.addf %219, %225 : vector<16x16xf32>
    %c8_242 = arith.constant 8 : index
    %c0_243 = arith.constant 0 : index
    %c0_244 = arith.constant 0 : index
    %227 = vector.load %arg4[%c8_242, %c0_243, %c0_244] : memref<9x16x16xf32, #tpu.memory_space<vmem>>, vector<1x16x16xf32>
    %228 = vector.shape_cast %227 : vector<1x16x16xf32> to vector<16x16xf32>
    %cst_245 = arith.constant dense<0.000000e+00> : vector<12x16xf32>
    %229 = tpu.matmul %169, %228, %cst_245 {dimension_numbers = #tpu.dot_dimension_numbers<[1], [0], [0], [1], [0, 0, 1, 1], [], []>} : vector<12x16xf32>, vector<16x16xf32>, vector<12x16xf32> -> vector<12x16xf32>
    %c8_246 = arith.constant 8 : index
    %c0_247 = arith.constant 0 : index
    %c0_248 = arith.constant 0 : index
    %230 = vector.load %arg13[%c8_246, %c0_247, %c0_248] : memref<9x16x12xf32, #tpu.memory_space<vmem>>, vector<1x16x12xf32>
    %231 = vector.shape_cast %230 : vector<1x16x12xf32> to vector<16x12xf32>
    %cst_249 = arith.constant dense<0.000000e+00> : vector<16x16xf32>
    %232 = tpu.matmul %231, %229, %cst_249 {dimension_numbers = #tpu.dot_dimension_numbers<[1], [0], [0], [1], [0, 0, 1, 1], [], []>} : vector<16x12xf32>, vector<12x16xf32>, vector<16x16xf32> -> vector<16x16xf32>
    %233 = arith.addf %226, %232 : vector<16x16xf32>
    %c0_250 = arith.constant 0 : index
    %c0_251 = arith.constant 0 : index
    %234 = vector.load %arg14[%c0_250, %c0_251] : memref<16x1xf32, #tpu.memory_space<vmem>>, vector<16x1xf32>
    %235 = vector.broadcast %234 : vector<16x1xf32> to vector<16x16xf32>
    %236 = arith.addf %233, %235 : vector<16x16xf32>
    %cst_252 = arith.constant 0.000000e+00 : f32
    %237 = vector.broadcast %cst_252 : f32 to vector<16x16xf32>
    %238 = arith.maximumf %236, %237 : vector<16x16xf32>
    %c0_253 = arith.constant 0 : index
    %c0_254 = arith.constant 0 : index
    %239 = vector.load %arg7[%c0_253, %c0_254] : memref<16x64xf32, #tpu.memory_space<vmem>>, vector<16x64xf32>
    %cst_255 = arith.constant dense<0.000000e+00> : vector<16x64xf32>
    %240 = tpu.matmul %238, %239, %cst_255 {dimension_numbers = #tpu.dot_dimension_numbers<[1], [0], [0], [1], [0, 0, 1, 1], [], []>} : vector<16x16xf32>, vector<16x64xf32>, vector<16x64xf32> -> vector<16x64xf32>
    %cst_256 = arith.constant 0.000000e+00 : f32
    %241 = vector.broadcast %cst_256 : f32 to vector<12x64xf32>
    %c0_257 = arith.constant 0 : index
    %c0_258 = arith.constant 0 : index
    %c0_259 = arith.constant 0 : index
    %242 = vector.load %arg3[%c0_257, %c0_258, %c0_259] : memref<9x64x64xf32, #tpu.memory_space<vmem>>, vector<1x64x64xf32>
    %243 = vector.shape_cast %242 : vector<1x64x64xf32> to vector<64x64xf32>
    %cst_260 = arith.constant dense<0.000000e+00> : vector<16x64xf32>
    %244 = tpu.matmul %240, %243, %cst_260 {dimension_numbers = #tpu.dot_dimension_numbers<[1], [0], [0], [1], [0, 0, 1, 1], [], []>} : vector<16x64xf32>, vector<64x64xf32>, vector<16x64xf32> -> vector<16x64xf32>
    %c0_261 = arith.constant 0 : index
    %c0_262 = arith.constant 0 : index
    %c0_263 = arith.constant 0 : index
    %245 = vector.load %arg15[%c0_261, %c0_262, %c0_263] : memref<9x12x16xf32, #tpu.memory_space<vmem>>, vector<1x12x16xf32>
    %246 = vector.shape_cast %245 : vector<1x12x16xf32> to vector<12x16xf32>
    %cst_264 = arith.constant dense<0.000000e+00> : vector<12x64xf32>
    %247 = tpu.matmul %246, %244, %cst_264 {dimension_numbers = #tpu.dot_dimension_numbers<[1], [0], [0], [1], [0, 0, 1, 1], [], []>} : vector<12x16xf32>, vector<16x64xf32>, vector<12x64xf32> -> vector<12x64xf32>
    %248 = arith.addf %241, %247 : vector<12x64xf32>
    %c1_265 = arith.constant 1 : index
    %c0_266 = arith.constant 0 : index
    %c0_267 = arith.constant 0 : index
    %249 = vector.load %arg3[%c1_265, %c0_266, %c0_267] : memref<9x64x64xf32, #tpu.memory_space<vmem>>, vector<1x64x64xf32>
    %250 = vector.shape_cast %249 : vector<1x64x64xf32> to vector<64x64xf32>
    %cst_268 = arith.constant dense<0.000000e+00> : vector<16x64xf32>
    %251 = tpu.matmul %240, %250, %cst_268 {dimension_numbers = #tpu.dot_dimension_numbers<[1], [0], [0], [1], [0, 0, 1, 1], [], []>} : vector<16x64xf32>, vector<64x64xf32>, vector<16x64xf32> -> vector<16x64xf32>
    %c1_269 = arith.constant 1 : index
    %c0_270 = arith.constant 0 : index
    %c0_271 = arith.constant 0 : index
    %252 = vector.load %arg15[%c1_269, %c0_270, %c0_271] : memref<9x12x16xf32, #tpu.memory_space<vmem>>, vector<1x12x16xf32>
    %253 = vector.shape_cast %252 : vector<1x12x16xf32> to vector<12x16xf32>
    %cst_272 = arith.constant dense<0.000000e+00> : vector<12x64xf32>
    %254 = tpu.matmul %253, %251, %cst_272 {dimension_numbers = #tpu.dot_dimension_numbers<[1], [0], [0], [1], [0, 0, 1, 1], [], []>} : vector<12x16xf32>, vector<16x64xf32>, vector<12x64xf32> -> vector<12x64xf32>
    %255 = arith.addf %248, %254 : vector<12x64xf32>
    %c2_273 = arith.constant 2 : index
    %c0_274 = arith.constant 0 : index
    %c0_275 = arith.constant 0 : index
    %256 = vector.load %arg3[%c2_273, %c0_274, %c0_275] : memref<9x64x64xf32, #tpu.memory_space<vmem>>, vector<1x64x64xf32>
    %257 = vector.shape_cast %256 : vector<1x64x64xf32> to vector<64x64xf32>
    %cst_276 = arith.constant dense<0.000000e+00> : vector<16x64xf32>
    %258 = tpu.matmul %240, %257, %cst_276 {dimension_numbers = #tpu.dot_dimension_numbers<[1], [0], [0], [1], [0, 0, 1, 1], [], []>} : vector<16x64xf32>, vector<64x64xf32>, vector<16x64xf32> -> vector<16x64xf32>
    %c2_277 = arith.constant 2 : index
    %c0_278 = arith.constant 0 : index
    %c0_279 = arith.constant 0 : index
    %259 = vector.load %arg15[%c2_277, %c0_278, %c0_279] : memref<9x12x16xf32, #tpu.memory_space<vmem>>, vector<1x12x16xf32>
    %260 = vector.shape_cast %259 : vector<1x12x16xf32> to vector<12x16xf32>
    %cst_280 = arith.constant dense<0.000000e+00> : vector<12x64xf32>
    %261 = tpu.matmul %260, %258, %cst_280 {dimension_numbers = #tpu.dot_dimension_numbers<[1], [0], [0], [1], [0, 0, 1, 1], [], []>} : vector<12x16xf32>, vector<16x64xf32>, vector<12x64xf32> -> vector<12x64xf32>
    %262 = arith.addf %255, %261 : vector<12x64xf32>
    %c3_281 = arith.constant 3 : index
    %c0_282 = arith.constant 0 : index
    %c0_283 = arith.constant 0 : index
    %263 = vector.load %arg3[%c3_281, %c0_282, %c0_283] : memref<9x64x64xf32, #tpu.memory_space<vmem>>, vector<1x64x64xf32>
    %264 = vector.shape_cast %263 : vector<1x64x64xf32> to vector<64x64xf32>
    %cst_284 = arith.constant dense<0.000000e+00> : vector<16x64xf32>
    %265 = tpu.matmul %240, %264, %cst_284 {dimension_numbers = #tpu.dot_dimension_numbers<[1], [0], [0], [1], [0, 0, 1, 1], [], []>} : vector<16x64xf32>, vector<64x64xf32>, vector<16x64xf32> -> vector<16x64xf32>
    %c3_285 = arith.constant 3 : index
    %c0_286 = arith.constant 0 : index
    %c0_287 = arith.constant 0 : index
    %266 = vector.load %arg15[%c3_285, %c0_286, %c0_287] : memref<9x12x16xf32, #tpu.memory_space<vmem>>, vector<1x12x16xf32>
    %267 = vector.shape_cast %266 : vector<1x12x16xf32> to vector<12x16xf32>
    %cst_288 = arith.constant dense<0.000000e+00> : vector<12x64xf32>
    %268 = tpu.matmul %267, %265, %cst_288 {dimension_numbers = #tpu.dot_dimension_numbers<[1], [0], [0], [1], [0, 0, 1, 1], [], []>} : vector<12x16xf32>, vector<16x64xf32>, vector<12x64xf32> -> vector<12x64xf32>
    %269 = arith.addf %262, %268 : vector<12x64xf32>
    %c4_289 = arith.constant 4 : index
    %c0_290 = arith.constant 0 : index
    %c0_291 = arith.constant 0 : index
    %270 = vector.load %arg3[%c4_289, %c0_290, %c0_291] : memref<9x64x64xf32, #tpu.memory_space<vmem>>, vector<1x64x64xf32>
    %271 = vector.shape_cast %270 : vector<1x64x64xf32> to vector<64x64xf32>
    %cst_292 = arith.constant dense<0.000000e+00> : vector<16x64xf32>
    %272 = tpu.matmul %240, %271, %cst_292 {dimension_numbers = #tpu.dot_dimension_numbers<[1], [0], [0], [1], [0, 0, 1, 1], [], []>} : vector<16x64xf32>, vector<64x64xf32>, vector<16x64xf32> -> vector<16x64xf32>
    %c4_293 = arith.constant 4 : index
    %c0_294 = arith.constant 0 : index
    %c0_295 = arith.constant 0 : index
    %273 = vector.load %arg15[%c4_293, %c0_294, %c0_295] : memref<9x12x16xf32, #tpu.memory_space<vmem>>, vector<1x12x16xf32>
    %274 = vector.shape_cast %273 : vector<1x12x16xf32> to vector<12x16xf32>
    %cst_296 = arith.constant dense<0.000000e+00> : vector<12x64xf32>
    %275 = tpu.matmul %274, %272, %cst_296 {dimension_numbers = #tpu.dot_dimension_numbers<[1], [0], [0], [1], [0, 0, 1, 1], [], []>} : vector<12x16xf32>, vector<16x64xf32>, vector<12x64xf32> -> vector<12x64xf32>
    %276 = arith.addf %269, %275 : vector<12x64xf32>
    %c5_297 = arith.constant 5 : index
    %c0_298 = arith.constant 0 : index
    %c0_299 = arith.constant 0 : index
    %277 = vector.load %arg3[%c5_297, %c0_298, %c0_299] : memref<9x64x64xf32, #tpu.memory_space<vmem>>, vector<1x64x64xf32>
    %278 = vector.shape_cast %277 : vector<1x64x64xf32> to vector<64x64xf32>
    %cst_300 = arith.constant dense<0.000000e+00> : vector<16x64xf32>
    %279 = tpu.matmul %240, %278, %cst_300 {dimension_numbers = #tpu.dot_dimension_numbers<[1], [0], [0], [1], [0, 0, 1, 1], [], []>} : vector<16x64xf32>, vector<64x64xf32>, vector<16x64xf32> -> vector<16x64xf32>
    %c5_301 = arith.constant 5 : index
    %c0_302 = arith.constant 0 : index
    %c0_303 = arith.constant 0 : index
    %280 = vector.load %arg15[%c5_301, %c0_302, %c0_303] : memref<9x12x16xf32, #tpu.memory_space<vmem>>, vector<1x12x16xf32>
    %281 = vector.shape_cast %280 : vector<1x12x16xf32> to vector<12x16xf32>
    %cst_304 = arith.constant dense<0.000000e+00> : vector<12x64xf32>
    %282 = tpu.matmul %281, %279, %cst_304 {dimension_numbers = #tpu.dot_dimension_numbers<[1], [0], [0], [1], [0, 0, 1, 1], [], []>} : vector<12x16xf32>, vector<16x64xf32>, vector<12x64xf32> -> vector<12x64xf32>
    %283 = arith.addf %276, %282 : vector<12x64xf32>
    %c6_305 = arith.constant 6 : index
    %c0_306 = arith.constant 0 : index
    %c0_307 = arith.constant 0 : index
    %284 = vector.load %arg3[%c6_305, %c0_306, %c0_307] : memref<9x64x64xf32, #tpu.memory_space<vmem>>, vector<1x64x64xf32>
    %285 = vector.shape_cast %284 : vector<1x64x64xf32> to vector<64x64xf32>
    %cst_308 = arith.constant dense<0.000000e+00> : vector<16x64xf32>
    %286 = tpu.matmul %240, %285, %cst_308 {dimension_numbers = #tpu.dot_dimension_numbers<[1], [0], [0], [1], [0, 0, 1, 1], [], []>} : vector<16x64xf32>, vector<64x64xf32>, vector<16x64xf32> -> vector<16x64xf32>
    %c6_309 = arith.constant 6 : index
    %c0_310 = arith.constant 0 : index
    %c0_311 = arith.constant 0 : index
    %287 = vector.load %arg15[%c6_309, %c0_310, %c0_311] : memref<9x12x16xf32, #tpu.memory_space<vmem>>, vector<1x12x16xf32>
    %288 = vector.shape_cast %287 : vector<1x12x16xf32> to vector<12x16xf32>
    %cst_312 = arith.constant dense<0.000000e+00> : vector<12x64xf32>
    %289 = tpu.matmul %288, %286, %cst_312 {dimension_numbers = #tpu.dot_dimension_numbers<[1], [0], [0], [1], [0, 0, 1, 1], [], []>} : vector<12x16xf32>, vector<16x64xf32>, vector<12x64xf32> -> vector<12x64xf32>
    %290 = arith.addf %283, %289 : vector<12x64xf32>
    %c7_313 = arith.constant 7 : index
    %c0_314 = arith.constant 0 : index
    %c0_315 = arith.constant 0 : index
    %291 = vector.load %arg3[%c7_313, %c0_314, %c0_315] : memref<9x64x64xf32, #tpu.memory_space<vmem>>, vector<1x64x64xf32>
    %292 = vector.shape_cast %291 : vector<1x64x64xf32> to vector<64x64xf32>
    %cst_316 = arith.constant dense<0.000000e+00> : vector<16x64xf32>
    %293 = tpu.matmul %240, %292, %cst_316 {dimension_numbers = #tpu.dot_dimension_numbers<[1], [0], [0], [1], [0, 0, 1, 1], [], []>} : vector<16x64xf32>, vector<64x64xf32>, vector<16x64xf32> -> vector<16x64xf32>
    %c7_317 = arith.constant 7 : index
    %c0_318 = arith.constant 0 : index
    %c0_319 = arith.constant 0 : index
    %294 = vector.load %arg15[%c7_317, %c0_318, %c0_319] : memref<9x12x16xf32, #tpu.memory_space<vmem>>, vector<1x12x16xf32>
    %295 = vector.shape_cast %294 : vector<1x12x16xf32> to vector<12x16xf32>
    %cst_320 = arith.constant dense<0.000000e+00> : vector<12x64xf32>
    %296 = tpu.matmul %295, %293, %cst_320 {dimension_numbers = #tpu.dot_dimension_numbers<[1], [0], [0], [1], [0, 0, 1, 1], [], []>} : vector<12x16xf32>, vector<16x64xf32>, vector<12x64xf32> -> vector<12x64xf32>
    %297 = arith.addf %290, %296 : vector<12x64xf32>
    %c8_321 = arith.constant 8 : index
    %c0_322 = arith.constant 0 : index
    %c0_323 = arith.constant 0 : index
    %298 = vector.load %arg3[%c8_321, %c0_322, %c0_323] : memref<9x64x64xf32, #tpu.memory_space<vmem>>, vector<1x64x64xf32>
    %299 = vector.shape_cast %298 : vector<1x64x64xf32> to vector<64x64xf32>
    %cst_324 = arith.constant dense<0.000000e+00> : vector<16x64xf32>
    %300 = tpu.matmul %240, %299, %cst_324 {dimension_numbers = #tpu.dot_dimension_numbers<[1], [0], [0], [1], [0, 0, 1, 1], [], []>} : vector<16x64xf32>, vector<64x64xf32>, vector<16x64xf32> -> vector<16x64xf32>
    %c8_325 = arith.constant 8 : index
    %c0_326 = arith.constant 0 : index
    %c0_327 = arith.constant 0 : index
    %301 = vector.load %arg15[%c8_325, %c0_326, %c0_327] : memref<9x12x16xf32, #tpu.memory_space<vmem>>, vector<1x12x16xf32>
    %302 = vector.shape_cast %301 : vector<1x12x16xf32> to vector<12x16xf32>
    %cst_328 = arith.constant dense<0.000000e+00> : vector<12x64xf32>
    %303 = tpu.matmul %302, %300, %cst_328 {dimension_numbers = #tpu.dot_dimension_numbers<[1], [0], [0], [1], [0, 0, 1, 1], [], []>} : vector<12x16xf32>, vector<16x64xf32>, vector<12x64xf32> -> vector<12x64xf32>
    %304 = arith.addf %297, %303 : vector<12x64xf32>
    %c0_329 = arith.constant 0 : index
    %c0_330 = arith.constant 0 : index
    %305 = vector.load %arg16[%c0_329, %c0_330] : memref<12x1xf32, #tpu.memory_space<vmem>>, vector<12x1xf32>
    %306 = vector.broadcast %305 : vector<12x1xf32> to vector<12x64xf32>
    %307 = arith.addf %304, %306 : vector<12x64xf32>
    %cst_331 = arith.constant 0.000000e+00 : f32
    %308 = vector.broadcast %cst_331 : f32 to vector<12x64xf32>
    %309 = arith.maximumf %307, %308 : vector<12x64xf32>
    %c0_332 = arith.constant 0 : index
    %c0_333 = arith.constant 0 : index
    %310 = vector.load %arg8[%c0_332, %c0_333] : memref<64x256xf32, #tpu.memory_space<vmem>>, vector<64x256xf32>
    %cst_334 = arith.constant dense<0.000000e+00> : vector<12x256xf32>
    %311 = tpu.matmul %309, %310, %cst_334 {dimension_numbers = #tpu.dot_dimension_numbers<[1], [0], [0], [1], [0, 0, 1, 1], [], []>} : vector<12x64xf32>, vector<64x256xf32>, vector<12x256xf32> -> vector<12x256xf32>
    %cst_335 = arith.constant 0.000000e+00 : f32
    %312 = vector.broadcast %cst_335 : f32 to vector<3x256xf32>
    %c0_336 = arith.constant 0 : index
    %c0_337 = arith.constant 0 : index
    %c0_338 = arith.constant 0 : index
    %313 = vector.load %arg2[%c0_336, %c0_337, %c0_338] : memref<9x256x256xf32, #tpu.memory_space<vmem>>, vector<1x256x256xf32>
    %314 = vector.shape_cast %313 : vector<1x256x256xf32> to vector<256x256xf32>
    %cst_339 = arith.constant dense<0.000000e+00> : vector<12x256xf32>
    %315 = tpu.matmul %311, %314, %cst_339 {dimension_numbers = #tpu.dot_dimension_numbers<[1], [0], [0], [1], [0, 0, 1, 1], [], []>} : vector<12x256xf32>, vector<256x256xf32>, vector<12x256xf32> -> vector<12x256xf32>
    %c0_340 = arith.constant 0 : index
    %c0_341 = arith.constant 0 : index
    %c0_342 = arith.constant 0 : index
    %316 = vector.load %arg17[%c0_340, %c0_341, %c0_342] : memref<9x3x12xf32, #tpu.memory_space<vmem>>, vector<1x3x12xf32>
    %317 = vector.shape_cast %316 : vector<1x3x12xf32> to vector<3x12xf32>
    %cst_343 = arith.constant dense<0.000000e+00> : vector<3x256xf32>
    %318 = tpu.matmul %317, %315, %cst_343 {dimension_numbers = #tpu.dot_dimension_numbers<[1], [0], [0], [1], [0, 0, 1, 1], [], []>} : vector<3x12xf32>, vector<12x256xf32>, vector<3x256xf32> -> vector<3x256xf32>
    %319 = arith.addf %312, %318 : vector<3x256xf32>
    %c1_344 = arith.constant 1 : index
    %c0_345 = arith.constant 0 : index
    %c0_346 = arith.constant 0 : index
    %320 = vector.load %arg2[%c1_344, %c0_345, %c0_346] : memref<9x256x256xf32, #tpu.memory_space<vmem>>, vector<1x256x256xf32>
    %321 = vector.shape_cast %320 : vector<1x256x256xf32> to vector<256x256xf32>
    %cst_347 = arith.constant dense<0.000000e+00> : vector<12x256xf32>
    %322 = tpu.matmul %311, %321, %cst_347 {dimension_numbers = #tpu.dot_dimension_numbers<[1], [0], [0], [1], [0, 0, 1, 1], [], []>} : vector<12x256xf32>, vector<256x256xf32>, vector<12x256xf32> -> vector<12x256xf32>
    %c1_348 = arith.constant 1 : index
    %c0_349 = arith.constant 0 : index
    %c0_350 = arith.constant 0 : index
    %323 = vector.load %arg17[%c1_348, %c0_349, %c0_350] : memref<9x3x12xf32, #tpu.memory_space<vmem>>, vector<1x3x12xf32>
    %324 = vector.shape_cast %323 : vector<1x3x12xf32> to vector<3x12xf32>
    %cst_351 = arith.constant dense<0.000000e+00> : vector<3x256xf32>
    %325 = tpu.matmul %324, %322, %cst_351 {dimension_numbers = #tpu.dot_dimension_numbers<[1], [0], [0], [1], [0, 0, 1, 1], [], []>} : vector<3x12xf32>, vector<12x256xf32>, vector<3x256xf32> -> vector<3x256xf32>
    %326 = arith.addf %319, %325 : vector<3x256xf32>
    %c2_352 = arith.constant 2 : index
    %c0_353 = arith.constant 0 : index
    %c0_354 = arith.constant 0 : index
    %327 = vector.load %arg2[%c2_352, %c0_353, %c0_354] : memref<9x256x256xf32, #tpu.memory_space<vmem>>, vector<1x256x256xf32>
    %328 = vector.shape_cast %327 : vector<1x256x256xf32> to vector<256x256xf32>
    %cst_355 = arith.constant dense<0.000000e+00> : vector<12x256xf32>
    %329 = tpu.matmul %311, %328, %cst_355 {dimension_numbers = #tpu.dot_dimension_numbers<[1], [0], [0], [1], [0, 0, 1, 1], [], []>} : vector<12x256xf32>, vector<256x256xf32>, vector<12x256xf32> -> vector<12x256xf32>
    %c2_356 = arith.constant 2 : index
    %c0_357 = arith.constant 0 : index
    %c0_358 = arith.constant 0 : index
    %330 = vector.load %arg17[%c2_356, %c0_357, %c0_358] : memref<9x3x12xf32, #tpu.memory_space<vmem>>, vector<1x3x12xf32>
    %331 = vector.shape_cast %330 : vector<1x3x12xf32> to vector<3x12xf32>
    %cst_359 = arith.constant dense<0.000000e+00> : vector<3x256xf32>
    %332 = tpu.matmul %331, %329, %cst_359 {dimension_numbers = #tpu.dot_dimension_numbers<[1], [0], [0], [1], [0, 0, 1, 1], [], []>} : vector<3x12xf32>, vector<12x256xf32>, vector<3x256xf32> -> vector<3x256xf32>
    %333 = arith.addf %326, %332 : vector<3x256xf32>
    %c3_360 = arith.constant 3 : index
    %c0_361 = arith.constant 0 : index
    %c0_362 = arith.constant 0 : index
    %334 = vector.load %arg2[%c3_360, %c0_361, %c0_362] : memref<9x256x256xf32, #tpu.memory_space<vmem>>, vector<1x256x256xf32>
    %335 = vector.shape_cast %334 : vector<1x256x256xf32> to vector<256x256xf32>
    %cst_363 = arith.constant dense<0.000000e+00> : vector<12x256xf32>
    %336 = tpu.matmul %311, %335, %cst_363 {dimension_numbers = #tpu.dot_dimension_numbers<[1], [0], [0], [1], [0, 0, 1, 1], [], []>} : vector<12x256xf32>, vector<256x256xf32>, vector<12x256xf32> -> vector<12x256xf32>
    %c3_364 = arith.constant 3 : index
    %c0_365 = arith.constant 0 : index
    %c0_366 = arith.constant 0 : index
    %337 = vector.load %arg17[%c3_364, %c0_365, %c0_366] : memref<9x3x12xf32, #tpu.memory_space<vmem>>, vector<1x3x12xf32>
    %338 = vector.shape_cast %337 : vector<1x3x12xf32> to vector<3x12xf32>
    %cst_367 = arith.constant dense<0.000000e+00> : vector<3x256xf32>
    %339 = tpu.matmul %338, %336, %cst_367 {dimension_numbers = #tpu.dot_dimension_numbers<[1], [0], [0], [1], [0, 0, 1, 1], [], []>} : vector<3x12xf32>, vector<12x256xf32>, vector<3x256xf32> -> vector<3x256xf32>
    %340 = arith.addf %333, %339 : vector<3x256xf32>
    %c4_368 = arith.constant 4 : index
    %c0_369 = arith.constant 0 : index
    %c0_370 = arith.constant 0 : index
    %341 = vector.load %arg2[%c4_368, %c0_369, %c0_370] : memref<9x256x256xf32, #tpu.memory_space<vmem>>, vector<1x256x256xf32>
    %342 = vector.shape_cast %341 : vector<1x256x256xf32> to vector<256x256xf32>
    %cst_371 = arith.constant dense<0.000000e+00> : vector<12x256xf32>
    %343 = tpu.matmul %311, %342, %cst_371 {dimension_numbers = #tpu.dot_dimension_numbers<[1], [0], [0], [1], [0, 0, 1, 1], [], []>} : vector<12x256xf32>, vector<256x256xf32>, vector<12x256xf32> -> vector<12x256xf32>
    %c4_372 = arith.constant 4 : index
    %c0_373 = arith.constant 0 : index
    %c0_374 = arith.constant 0 : index
    %344 = vector.load %arg17[%c4_372, %c0_373, %c0_374] : memref<9x3x12xf32, #tpu.memory_space<vmem>>, vector<1x3x12xf32>
    %345 = vector.shape_cast %344 : vector<1x3x12xf32> to vector<3x12xf32>
    %cst_375 = arith.constant dense<0.000000e+00> : vector<3x256xf32>
    %346 = tpu.matmul %345, %343, %cst_375 {dimension_numbers = #tpu.dot_dimension_numbers<[1], [0], [0], [1], [0, 0, 1, 1], [], []>} : vector<3x12xf32>, vector<12x256xf32>, vector<3x256xf32> -> vector<3x256xf32>
    %347 = arith.addf %340, %346 : vector<3x256xf32>
    %c5_376 = arith.constant 5 : index
    %c0_377 = arith.constant 0 : index
    %c0_378 = arith.constant 0 : index
    %348 = vector.load %arg2[%c5_376, %c0_377, %c0_378] : memref<9x256x256xf32, #tpu.memory_space<vmem>>, vector<1x256x256xf32>
    %349 = vector.shape_cast %348 : vector<1x256x256xf32> to vector<256x256xf32>
    %cst_379 = arith.constant dense<0.000000e+00> : vector<12x256xf32>
    %350 = tpu.matmul %311, %349, %cst_379 {dimension_numbers = #tpu.dot_dimension_numbers<[1], [0], [0], [1], [0, 0, 1, 1], [], []>} : vector<12x256xf32>, vector<256x256xf32>, vector<12x256xf32> -> vector<12x256xf32>
    %c5_380 = arith.constant 5 : index
    %c0_381 = arith.constant 0 : index
    %c0_382 = arith.constant 0 : index
    %351 = vector.load %arg17[%c5_380, %c0_381, %c0_382] : memref<9x3x12xf32, #tpu.memory_space<vmem>>, vector<1x3x12xf32>
    %352 = vector.shape_cast %351 : vector<1x3x12xf32> to vector<3x12xf32>
    %cst_383 = arith.constant dense<0.000000e+00> : vector<3x256xf32>
    %353 = tpu.matmul %352, %350, %cst_383 {dimension_numbers = #tpu.dot_dimension_numbers<[1], [0], [0], [1], [0, 0, 1, 1], [], []>} : vector<3x12xf32>, vector<12x256xf32>, vector<3x256xf32> -> vector<3x256xf32>
    %354 = arith.addf %347, %353 : vector<3x256xf32>
    %c6_384 = arith.constant 6 : index
    %c0_385 = arith.constant 0 : index
    %c0_386 = arith.constant 0 : index
    %355 = vector.load %arg2[%c6_384, %c0_385, %c0_386] : memref<9x256x256xf32, #tpu.memory_space<vmem>>, vector<1x256x256xf32>
    %356 = vector.shape_cast %355 : vector<1x256x256xf32> to vector<256x256xf32>
    %cst_387 = arith.constant dense<0.000000e+00> : vector<12x256xf32>
    %357 = tpu.matmul %311, %356, %cst_387 {dimension_numbers = #tpu.dot_dimension_numbers<[1], [0], [0], [1], [0, 0, 1, 1], [], []>} : vector<12x256xf32>, vector<256x256xf32>, vector<12x256xf32> -> vector<12x256xf32>
    %c6_388 = arith.constant 6 : index
    %c0_389 = arith.constant 0 : index
    %c0_390 = arith.constant 0 : index
    %358 = vector.load %arg17[%c6_388, %c0_389, %c0_390] : memref<9x3x12xf32, #tpu.memory_space<vmem>>, vector<1x3x12xf32>
    %359 = vector.shape_cast %358 : vector<1x3x12xf32> to vector<3x12xf32>
    %cst_391 = arith.constant dense<0.000000e+00> : vector<3x256xf32>
    %360 = tpu.matmul %359, %357, %cst_391 {dimension_numbers = #tpu.dot_dimension_numbers<[1], [0], [0], [1], [0, 0, 1, 1], [], []>} : vector<3x12xf32>, vector<12x256xf32>, vector<3x256xf32> -> vector<3x256xf32>
    %361 = arith.addf %354, %360 : vector<3x256xf32>
    %c7_392 = arith.constant 7 : index
    %c0_393 = arith.constant 0 : index
    %c0_394 = arith.constant 0 : index
    %362 = vector.load %arg2[%c7_392, %c0_393, %c0_394] : memref<9x256x256xf32, #tpu.memory_space<vmem>>, vector<1x256x256xf32>
    %363 = vector.shape_cast %362 : vector<1x256x256xf32> to vector<256x256xf32>
    %cst_395 = arith.constant dense<0.000000e+00> : vector<12x256xf32>
    %364 = tpu.matmul %311, %363, %cst_395 {dimension_numbers = #tpu.dot_dimension_numbers<[1], [0], [0], [1], [0, 0, 1, 1], [], []>} : vector<12x256xf32>, vector<256x256xf32>, vector<12x256xf32> -> vector<12x256xf32>
    %c7_396 = arith.constant 7 : index
    %c0_397 = arith.constant 0 : index
    %c0_398 = arith.constant 0 : index
    %365 = vector.load %arg17[%c7_396, %c0_397, %c0_398] : memref<9x3x12xf32, #tpu.memory_space<vmem>>, vector<1x3x12xf32>
    %366 = vector.shape_cast %365 : vector<1x3x12xf32> to vector<3x12xf32>
    %cst_399 = arith.constant dense<0.000000e+00> : vector<3x256xf32>
    %367 = tpu.matmul %366, %364, %cst_399 {dimension_numbers = #tpu.dot_dimension_numbers<[1], [0], [0], [1], [0, 0, 1, 1], [], []>} : vector<3x12xf32>, vector<12x256xf32>, vector<3x256xf32> -> vector<3x256xf32>
    %368 = arith.addf %361, %367 : vector<3x256xf32>
    %c8_400 = arith.constant 8 : index
    %c0_401 = arith.constant 0 : index
    %c0_402 = arith.constant 0 : index
    %369 = vector.load %arg2[%c8_400, %c0_401, %c0_402] : memref<9x256x256xf32, #tpu.memory_space<vmem>>, vector<1x256x256xf32>
    %370 = vector.shape_cast %369 : vector<1x256x256xf32> to vector<256x256xf32>
    %cst_403 = arith.constant dense<0.000000e+00> : vector<12x256xf32>
    %371 = tpu.matmul %311, %370, %cst_403 {dimension_numbers = #tpu.dot_dimension_numbers<[1], [0], [0], [1], [0, 0, 1, 1], [], []>} : vector<12x256xf32>, vector<256x256xf32>, vector<12x256xf32> -> vector<12x256xf32>
    %c8_404 = arith.constant 8 : index
    %c0_405 = arith.constant 0 : index
    %c0_406 = arith.constant 0 : index
    %372 = vector.load %arg17[%c8_404, %c0_405, %c0_406] : memref<9x3x12xf32, #tpu.memory_space<vmem>>, vector<1x3x12xf32>
    %373 = vector.shape_cast %372 : vector<1x3x12xf32> to vector<3x12xf32>
    %cst_407 = arith.constant dense<0.000000e+00> : vector<3x256xf32>
    %374 = tpu.matmul %373, %371, %cst_407 {dimension_numbers = #tpu.dot_dimension_numbers<[1], [0], [0], [1], [0, 0, 1, 1], [], []>} : vector<3x12xf32>, vector<12x256xf32>, vector<3x256xf32> -> vector<3x256xf32>
    %375 = arith.addf %368, %374 : vector<3x256xf32>
    %c0_408 = arith.constant 0 : index
    %c0_409 = arith.constant 0 : index
    %376 = vector.load %arg18[%c0_408, %c0_409] : memref<3x1xf32, #tpu.memory_space<vmem>>, vector<3x1xf32>
    %377 = vector.broadcast %376 : vector<3x1xf32> to vector<3x256xf32>
    %378 = arith.addf %375, %377 : vector<3x256xf32>
    %cst_410 = arith.constant 0.000000e+00 : f32
    %379 = vector.broadcast %cst_410 : f32 to vector<3x256xf32>
    %380 = arith.maximumf %378, %379 : vector<3x256xf32>
    %c0_411 = arith.constant 0 : index
    %c0_412 = arith.constant 0 : index
    %c0_413 = arith.constant 0 : index
    %381 = vector.load %arg19[%c0_411, %c0_412, %c0_413] : memref<1x3x256xf32, #tpu.memory_space<vmem>>, vector<1x3x256xf32>
    %382 = vector.shape_cast %381 : vector<1x3x256xf32> to vector<3x256xf32>
    %383 = vector.shape_cast %380 : vector<3x256xf32> to vector<1x3x256xf32>
    tpu.vector_store %arg19[%c0_411, %c0_412, %c0_413], %383 {strides = array<i32>} : memref<1x3x256xf32, #tpu.memory_space<vmem>>, vector<1x3x256xf32>,
    return
  }
  func.func @transform_0(%arg0: i32) -> (i32, i32, i32) {
    %c0_i32 = arith.constant 0 : i32
    %c0_i32_0 = arith.constant 0 : i32
    %c0_i32_1 = arith.constant 0 : i32
    return %arg0, %c0_i32, %c0_i32_0 : i32, i32, i32
  }
  func.func @transform_1(%arg0: i32) -> (i32, i32, i32) {
    %c0_i32 = arith.constant 0 : i32
    %c0_i32_0 = arith.constant 0 : i32
    %c0_i32_1 = arith.constant 0 : i32
    %c0_i32_2 = arith.constant 0 : i32
    return %c0_i32, %c0_i32_0, %c0_i32_1 : i32, i32, i32
  }
  func.func @transform_2(%arg0: i32) -> (i32, i32, i32) {
    %c0_i32 = arith.constant 0 : i32
    %c0_i32_0 = arith.constant 0 : i32
    %c0_i32_1 = arith.constant 0 : i32
    %c0_i32_2 = arith.constant 0 : i32
    return %c0_i32, %c0_i32_0, %c0_i32_1 : i32, i32, i32
  }
  func.func @transform_3(%arg0: i32) -> (i32, i32, i32) {
    %c0_i32 = arith.constant 0 : i32
    %c0_i32_0 = arith.constant 0 : i32
    %c0_i32_1 = arith.constant 0 : i32
    %c0_i32_2 = arith.constant 0 : i32
    return %c0_i32, %c0_i32_0, %c0_i32_1 : i32, i32, i32
  }
  func.func @transform_4(%arg0: i32) -> (i32, i32, i32) {
    %c0_i32 = arith.constant 0 : i32
    %c0_i32_0 = arith.constant 0 : i32
    %c0_i32_1 = arith.constant 0 : i32
    %c0_i32_2 = arith.constant 0 : i32
    return %c0_i32, %c0_i32_0, %c0_i32_1 : i32, i32, i32
  }
  func.func @transform_5(%arg0: i32) -> (i32, i32, i32) {
    %c0_i32 = arith.constant 0 : i32
    %c0_i32_0 = arith.constant 0 : i32
    %c0_i32_1 = arith.constant 0 : i32
    %c0_i32_2 = arith.constant 0 : i32
    return %c0_i32, %c0_i32_0, %c0_i32_1 : i32, i32, i32
  }
  func.func @transform_6(%arg0: i32) -> (i32, i32) {
    %c0_i32 = arith.constant 0 : i32
    %c0_i32_0 = arith.constant 0 : i32
    %c0_i32_1 = arith.constant 0 : i32
    return %c0_i32, %c0_i32_0 : i32, i32
  }
  func.func @transform_7(%arg0: i32) -> (i32, i32) {
    %c0_i32 = arith.constant 0 : i32
    %c0_i32_0 = arith.constant 0 : i32
    %c0_i32_1 = arith.constant 0 : i32
    return %c0_i32, %c0_i32_0 : i32, i32
  }
  func.func @transform_8(%arg0: i32) -> (i32, i32, i32) {
    %c0_i32 = arith.constant 0 : i32
    %c0_i32_0 = arith.constant 0 : i32
    %c0_i32_1 = arith.constant 0 : i32
    %c0_i32_2 = arith.constant 0 : i32
    return %c0_i32, %c0_i32_0, %c0_i32_1 : i32, i32, i32
  }
  func.func @transform_9(%arg0: i32) -> (i32, i32) {
    %c0_i32 = arith.constant 0 : i32
    %c0_i32_0 = arith.constant 0 : i32
    %c0_i32_1 = arith.constant 0 : i32
    return %c0_i32, %c0_i32_0 : i32, i32
  }
  func.func @transform_10(%arg0: i32) -> (i32, i32, i32) {
    %c0_i32 = arith.constant 0 : i32
    %c0_i32_0 = arith.constant 0 : i32
    %c0_i32_1 = arith.constant 0 : i32
    %c0_i32_2 = arith.constant 0 : i32
    return %c0_i32, %c0_i32_0, %c0_i32_1 : i32, i32, i32
  }
  func.func @transform_11(%arg0: i32) -> (i32, i32) {
    %c0_i32 = arith.constant 0 : i32
    %c0_i32_0 = arith.constant 0 : i32
    %c0_i32_1 = arith.constant 0 : i32
    return %c0_i32, %c0_i32_0 : i32, i32
  }
  func.func @transform_12(%arg0: i32) -> (i32, i32, i32) {
    %c0_i32 = arith.constant 0 : i32
    %c0_i32_0 = arith.constant 0 : i32
    %c0_i32_1 = arith.constant 0 : i32
    %c0_i32_2 = arith.constant 0 : i32
    return %c0_i32, %c0_i32_0, %c0_i32_1 : i32, i32, i32
  }
  func.func @transform_13(%arg0: i32) -> (i32, i32) {
    %c0_i32 = arith.constant 0 : i32
    %c0_i32_0 = arith.constant 0 : i32
    %c0_i32_1 = arith.constant 0 : i32
    return %c0_i32, %c0_i32_0 : i32, i32
  }
  func.func @transform_14(%arg0: i32) -> (i32, i32, i32) {
    %c0_i32 = arith.constant 0 : i32
    %c0_i32_0 = arith.constant 0 : i32
    %c0_i32_1 = arith.constant 0 : i32
    %c0_i32_2 = arith.constant 0 : i32
    return %c0_i32, %c0_i32_0, %c0_i32_1 : i32, i32, i32
  }
  func.func @transform_15(%arg0: i32) -> (i32, i32) {
    %c0_i32 = arith.constant 0 : i32
    %c0_i32_0 = arith.constant 0 : i32
    %c0_i32_1 = arith.constant 0 : i32
    return %c0_i32, %c0_i32_0 : i32, i32
  }
  func.func @transform_16(%arg0: i32) -> (i32, i32, i32) {
    %c0_i32 = arith.constant 0 : i32
    %c0_i32_0 = arith.constant 0 : i32
    %c0_i32_1 = arith.constant 0 : i32
    %c0_i32_2 = arith.constant 0 : i32
    return %c0_i32, %c0_i32_0, %c0_i32_1 : i32, i32, i32
  }
  func.func @transform_17(%arg0: i32) -> (i32, i32) {
    %c0_i32 = arith.constant 0 : i32
    %c0_i32_0 = arith.constant 0 : i32
    %c0_i32_1 = arith.constant 0 : i32
    return %c0_i32, %c0_i32_0 : i32, i32
  }
  func.func @transform_18(%arg0: i32) -> (i32, i32, i32) {
    %c0_i32 = arith.constant 0 : i32
    %c0_i32_0 = arith.constant 0 : i32
    %c0_i32_1 = arith.constant 0 : i32
    return %arg0, %c0_i32, %c0_i32_0 : i32, i32, i32
  }
}

</mosaic_0001>

<bundles_post_ra>
// kernel: autoencoder_forward.1
= control target key start
LH: loop header
LB: loop body
LE: loop exit
PB: predicated region body
PF: predicated region fallthrough
CT: control target
= control target key end

     0   :  { %s16123_s0 = inlined_call_operand.vmem [shape: f32[2,3,256], index: 0, kind: input, shape index: {}]   ;;  %s16124_s1 = inlined_call_operand.hbm [shape: f32[9,256,256], index: 1, kind: input, shape index: {}]   ;;  %s16125_s2 = inlined_call_operand.hbm [shape: f32[9,64,64], index: 2, kind: input, shape index: {}]   ;;  %s16126_s3 = inlined_call_operand.hbm [shape: f32[9,16,16], index: 3, kind: input, shape index: {}]   ;;  %s16127_s4 = inlined_call_operand.vmem [shape: f32[4,256,64], index: 4, kind: input, shape index: {}]   ;;  %s16128_s5 = inlined_call_operand.vmem [shape: f32[4,64,16], index: 5, kind: input, shape index: {}]   ;;  %s16129_s6 = inlined_call_operand.hbm [shape: f32[16,64], index: 6, kind: input, shape index: {}]   ;;  %s16130_s7 = inlined_call_operand.hbm [shape: f32[64,256], index: 7, kind: input, shape index: {}]   ;;  %s16131_s8 = inlined_call_operand.vmem [shape: f32[9,8,3], index: 8, kind: input, shape index: {}]   ;;  %s16132_s9 = inlined_call_operand.vmem [shape: f32[8,1], index: 9, kind: input, shape index: {}]   ;;  %s16133_s10 = inlined_call_operand.vmem [shape: f32[9,12,8], index: 10, kind: input, shape index: {}]   ;;  %s16134_s11 = inlined_call_operand.vmem [shape: f32[12,1], index: 11, kind: input, shape index: {}]   ;;  %s16135_s12 = inlined_call_operand.hbm [shape: f32[9,16,12], index: 12, kind: input, shape index: {}]   ;;  %s16136_s13 = inlined_call_operand.vmem [shape: f32[16,1], index: 13, kind: input, shape index: {}]   ;;  %s16137_s14 = inlined_call_operand.vmem [shape: f32[9,12,16], index: 14, kind: input, shape index: {}]   ;;  %s16138_s15 = inlined_call_operand.vmem [shape: f32[12,1], index: 15, kind: input, shape index: {}]   ;;  %s16139_s16 = inlined_call_operand.vmem [shape: f32[9,3,12], index: 16, kind: input, shape index: {}]   ;;  %s16140_s17 = inlined_call_operand.vmem [shape: f32[3,1], index: 17, kind: input, shape index: {}]   ;;  %s16141_s18 = inlined_call_operand.vmem [shape: f32[2,3,256], index: 18, kind: output, shape index: {}]  }
   0x1   :  { %16440 = sst [smem:[#allocation298_spill]] %s16123_s0 }
   0x2   :  { %16441 = sst [smem:[#allocation299_spill]] %s16124_s1 }
   0x3   :  { %16442 = sst [smem:[#allocation300_spill]] %s16125_s2 }
   0x4   :  { %16443 = sst [smem:[#allocation301_spill]] %s16126_s3 }
   0x5   :  { %16444 = sst [smem:[#allocation302_spill]] %s16129_s6 }
   0x6   :  { %16445 = sst [smem:[#allocation303_spill]] %s16137_s14 }
   0x7   :  { %16446 = sst [smem:[#allocation304_spill]] %s16139_s16 }
   0x8   :  { %16447 = sst [smem:[#allocation305_spill]] %s16140_s17 }
   0x9   :  { %16448 = sst [smem:[#allocation306_spill]] %s16141_s18 }
   0xa   :  { %23 = vsyncpa [#allocation3], 0 }
   0xb   :  { %24 = vsyncpa [#allocation5], 0 }
   0xc   :  { %25 = vsyncpa [#allocation8], 0 }
   0xd   :  { %26 = vsyncpa [#allocation11], 0  ;;  %s13436_s27 = smov 0  }
   0xe LB: > { %16449 = sst [smem:[#allocation16_spill]] %s13324_s27  ;;  %s13326_s28 = smov [#allocation4]   ;;  %s13324_s27 = sphi %s13436_s27, %s32_s27  }
   0xf   : > { %s471_s29 = sshll.u32 %s13326_s28, 4  ;;  %s13442_s30 = sadd.s32 4294967295, %s13324_s27   ;;  %s13447_s29 = int_to_ptr.vmem [resolvable:$true] %s471_s29 }
  0x10   : > { %p9661_p0 = scmp.ge.s32.totalorder %s13324_s27, 1  ;;  %p446_p1 = scmp.lt.s32.totalorder %s13324_s27, 3 }
  0x11   : > { %p16151_p2 = scmp.eq.s32.totalorder %s13442_s30, 0  ;;  %s13327_s19 = smov [#allocation7]  }
  0x12   : > { %p13449_p3 = pnand %p9661_p0, %p446_p1  ;;  %s503_s1 = sshll.u32 %s13327_s19, 4  ;;  %s13455_s1 = int_to_ptr.vmem [resolvable:$true] %s503_s1 }
  0x13   : > { %s13328_s21 = smov [#allocation2]   ;;  %s16452_s24 = sld [smem:[#allocation300_spill]] }
  0x14   : > { %s16450_s0 = scalar_select %p13449_p3, 1, 0 }
  0x15   : > { %p13075_p4 = pneg %p13449_p3  ;;  %s458_s22 = sshll.u32 %s13328_s21, 4  ;;  %s13463_s22 = int_to_ptr.vmem [resolvable:$true] %s458_s22 }
  0x17   : > { %p13459_p5 = pnand %p16151_p2, %p13075_p4 }
  0x19   : > { %s13134_s25 = scalar_lea.hbm %s16452_s24, 9216  ;;  %p13473_p7 = pneg %p13459_p5 }
  0x1a   : > { %p13135_p6 = scmp.ne.s32.totalorder %s16452_s24, %s13134_s25  ;;  %p13141_p10 = scmp.lt.u32.totalorder %s13134_s25, %s16452_s24 }
  0x1c   : > { %p13137_p8 = pnand %p13473_p7, %p13135_p6 }
  0x1e   : > { %p13138_p9 = pneg %p13137_p8 }
  0x20   : > { %p13143_p11 = pnand %p13141_p10, %p13138_p9 }
  0x22   : > { %13146 = shalt.err (!%p13143_p11)
}
  0x23   : > { %s13147_s2 = scalar_lea.vmem %s13447_s29, 9216  ;;  %p13155_p1 = scmp.lt.s32.totalorder %s13447_s29, %s13447_s29 }
  0x24   : > { %p13148_p12 = scmp.ne.s32.totalorder %s13447_s29, %s13147_s2  ;;  %p13156_p4 = scmp.lt.s32.totalorder %s13147_s2, %s13147_s2 }
  0x26   : > { %p13150_p13 = pnand %p13148_p12, %p13473_p7  ;;  %p13157_p6 = por %p13156_p4, %p13155_p1 }
  0x28   : > { %p13151_p0 = pneg %p13150_p13 }
  0x2a   : > { %p13158_p8 = pnand %p13157_p6, %p13151_p0 }
  0x2c   : > { %13161 = shalt.err (!%p13158_p8)
}
  0x2d   : > { %s16147_s23 = smov 128   ;;  %s16149_s27 = smov 8  }
  0x2e   : > { %13081 = dma.hbm_to_vmem [thread:$0]  (!%p13459_p5), %s16452_s24, 9216, %s13447_s29, [#allocation5], %s16147_s23, %s16147_s23, %s16149_s27  }
  0x2f   : > { %s16454_s6 = sld [smem:[#allocation302_spill]] }
  0x35   : > { %s13162_s2 = scalar_lea.hbm %s16454_s6, 256 }
  0x36   : > { %p13163_p9 = scmp.ne.s32.totalorder %s16454_s6, %s13162_s2  ;;  %p13169_p12 = scmp.lt.u32.totalorder %s13162_s2, %s16454_s6 }
  0x38   : > { %p13165_p10 = pnand %p13163_p9, %p13473_p7 }
  0x3a   : > { %p13166_p11 = pneg %p13165_p10 }
  0x3c   : > { %p13171_p13 = pnand %p13169_p12, %p13166_p11 }
  0x3e   : > { %13174 = shalt.err (!%p13171_p13)
}
  0x3f   : > { %s13175_s29 = scalar_lea.vmem %s13455_s1, 256  ;;  %p13183_p6 = scmp.lt.s32.totalorder %s13455_s1, %s13455_s1 }
  0x40   : > { %p13176_p0 = scmp.ne.s32.totalorder %s13455_s1, %s13175_s29  ;;  %p13184_p8 = scmp.lt.s32.totalorder %s13175_s29, %s13175_s29 }
  0x42   : > { %p13178_p1 = pnand %p13176_p0, %p13473_p7  ;;  %p13185_p9 = por %p13184_p8, %p13183_p6 }
  0x44   : > { %p13179_p4 = pneg %p13178_p1 }
  0x46   : > { %p13186_p10 = pnand %p13185_p9, %p13179_p4 }
  0x48   : > { %13189 = shalt.err (!%p13186_p10)
}
  0x49   : > { %13087 = dma.hbm_to_vmem [thread:$0]  (!%p13459_p5), %s16454_s6, 256, %s13455_s1, [#allocation8], %s16147_s23, %s16147_s23, %s16149_s27  }
  0x4a   : > { %s16455_s25 = sld [smem:[#allocation299_spill]] }
  0x50   : > { %s13190_s26 = scalar_lea.hbm %s16455_s25, 73728 }
  0x51   : > { %p13191_p11 = scmp.ne.s32.totalorder %s16455_s25, %s13190_s26  ;;  %p13197_p0 = scmp.lt.u32.totalorder %s13190_s26, %s16455_s25 }
  0x53   : > { %p13193_p12 = pnand %p13191_p11, %p13473_p7 }
  0x55   : > { %p13194_p13 = pneg %p13193_p12 }
  0x57   : > { %p13199_p1 = pnand %p13197_p0, %p13194_p13 }
  0x59   : > { %13202 = shalt.err (!%p13199_p1)
}
  0x5a   : > { %s13203_s1 = scalar_lea.vmem %s13463_s22, 73728  ;;  %p13211_p9 = scmp.lt.s32.totalorder %s13463_s22, %s13463_s22 }
  0x5b   : > { %p13204_p4 = scmp.ne.s32.totalorder %s13463_s22, %s13203_s1  ;;  %p13212_p10 = scmp.lt.s32.totalorder %s13203_s1, %s13203_s1 }
  0x5d   : > { %p13206_p6 = pnand %p13204_p4, %p13473_p7  ;;  %p13213_p11 = por %p13212_p10, %p13211_p9 }
  0x5f   : > { %p13207_p8 = pneg %p13206_p6 }
  0x61   : > { %p13214_p12 = pnand %p13213_p11, %p13207_p8 }
  0x63   : > { %13217 = shalt.err (!%p13214_p12)
}
  0x64   : > { %s16153_s14 = smov 256   ;;  %s13332_s16 = smov 16  }
  0x65   : > { %13078 = dma.hbm_to_vmem [thread:$0]  (!%p13459_p5), %s16455_s25, 73728, %s13463_s22, [#allocation3], %s16153_s14, %s16153_s14, %s13332_s16  }
  0x66   : > { %s13333_s26 = smov [#allocation6]   ;;  %s13334_s21 = smov [#allocation9]  }
  0x67   : > { %s484_s28 = sshll.u32 %s13333_s26, 4  ;;  %s516_s2 = sshll.u32 %s13334_s21, 4  ;;  %s485_s28 = int_to_ptr.vmem [resolvable:$true] %s484_s28  ;;  %s13549_s2 = int_to_ptr.vmem [resolvable:$true] %s516_s2 }
  0x68   : > { %s16456_s3 = sld [smem:[#allocation301_spill]] }
  0x6e   : > { %s13218_s23 = scalar_lea.hbm %s16456_s3, 2304 }
  0x6f   : > { %p13219_p13 = scmp.ne.s32.totalorder %s16456_s3, %s13218_s23  ;;  %p13225_p4 = scmp.lt.u32.totalorder %s13218_s23, %s16456_s3 }
  0x71   : > { %p13221_p0 = pnand %p13219_p13, %p13473_p7 }
  0x73   : > { %p13222_p1 = pneg %p13221_p0 }
  0x75   : > { %p13227_p6 = pnand %p13225_p4, %p13222_p1 }
  0x77   : > { %13230 = shalt.err (!%p13227_p6)
}
  0x78   : > { %s13231_s18 = scalar_lea.vmem %s485_s28, 2304  ;;  %p13239_p11 = scmp.lt.s32.totalorder %s485_s28, %s485_s28 }
  0x79   : > { %p13232_p8 = scmp.ne.s32.totalorder %s485_s28, %s13231_s18  ;;  %p13240_p12 = scmp.lt.s32.totalorder %s13231_s18, %s13231_s18 }
  0x7b   : > { %p13234_p9 = pnand %p13232_p8, %p13473_p7  ;;  %p13241_p2 = por %p13240_p12, %p13239_p11 }
  0x7d   : > { %p13235_p10 = pneg %p13234_p9 }
  0x7f   : > { %p13242_p3 = pnand %p13241_p2, %p13235_p10 }
  0x81   : > { %13245 = shalt.err (!%p13242_p3)
}
  0x82   : > { %s16457_s6 = smov 8   ;;  %s16458_s27 = smov 128  }
  0x83   : > { %13084 = dma.hbm_to_vmem [thread:$0]  (!%p13459_p5), %s16456_s3, 2304, %s485_s28, [#allocation5], %s16458_s27, %s16458_s27, %s16457_s6  }
  0x84   : > { %s13246_s1 = scalar_lea.hbm %s16130_s7, 2048 }
  0x85   : > { %p13247_p13 = scmp.ne.s32.totalorder %s16130_s7, %s13246_s1  ;;  %p13253_p0 = scmp.lt.u32.totalorder %s13246_s1, %s16130_s7 }
  0x87   : > { %p13249_p2 = pnand %p13247_p13, %p13473_p7 }
  0x89   : > { %p13250_p3 = pneg %p13249_p2 }
  0x8b   : > { %p13255_p1 = pnand %p13253_p0, %p13250_p3 }
  0x8d   : > { %13258 = shalt.err (!%p13255_p1)
}
  0x8e   : > { %s13259_s28 = scalar_lea.vmem %s13549_s2, 2048  ;;  %p13267_p9 = scmp.lt.s32.totalorder %s13549_s2, %s13549_s2 }
  0x8f   : > { %p13260_p4 = scmp.ne.s32.totalorder %s13549_s2, %s13259_s28  ;;  %p13268_p10 = scmp.lt.s32.totalorder %s13259_s28, %s13259_s28 }
  0x91   : > { %p13262_p6 = pnand %p13260_p4, %p13473_p7  ;;  %p13269_p11 = por %p13268_p10, %p13267_p9 }
  0x93   : > { %p13263_p8 = pneg %p13262_p6 }
  0x95   : > { %p13270_p12 = pnand %p13269_p11, %p13263_p8 }
  0x97   : > { %13273 = shalt.err (!%p13270_p12)
}
  0x98   : > { %s16459_s14 = smov 256   ;;  %s13335_s21 = smov [#allocation10]  }
  0x99   : > { %13090 = dma.hbm_to_vmem [thread:$0]  (!%p13459_p5), %s16130_s7, 2048, %s13549_s2, [#allocation8], %s16459_s14, %s16459_s14, %s13332_s16  }
  0x9a   : > { %s541_s29 = sshll.u32 %s13335_s21, 4  ;;  %s13274_s22 = scalar_lea.hbm %s16135_s12, 2304  ;;  %s542_s29 = int_to_ptr.vmem [resolvable:$true] %s541_s29 }
  0x9b   : > { %p13275_p13 = scmp.ne.s32.totalorder %s16135_s12, %s13274_s22  ;;  %p13281_p0 = scmp.lt.u32.totalorder %s13274_s22, %s16135_s12 }
  0x9d   : > { %p13277_p2 = pnand %p13275_p13, %p13473_p7 }
  0x9f   : > { %p13278_p3 = pneg %p13277_p2 }
  0xa1   : > { %p13283_p1 = pnand %p13281_p0, %p13278_p3 }
  0xa3   : > { %13286 = shalt.err (!%p13283_p1)
}
  0xa4   : > { %s13287_s16 = scalar_lea.vmem %s542_s29, 2304  ;;  %p13295_p9 = scmp.lt.s32.totalorder %s542_s29, %s542_s29 }
  0xa5   : > { %p13288_p4 = scmp.ne.s32.totalorder %s542_s29, %s13287_s16  ;;  %p13296_p10 = scmp.lt.s32.totalorder %s13287_s16, %s13287_s16 }
  0xa7   : > { %p13290_p6 = pnand %p13288_p4, %p13473_p7  ;;  %p13297_p11 = por %p13296_p10, %p13295_p9 }
  0xa9   : > { %p13291_p8 = pneg %p13290_p6 }
  0xab   : > { %p13298_p12 = pnand %p13297_p11, %p13291_p8 }
  0xad   : > { %13301 = shalt.err (!%p13298_p12)
}
  0xae   : > { %13093 = dma.hbm_to_vmem [thread:$0]  (!%p13459_p5), %s16135_s12, 2304, %s542_s29, [#allocation11], %s16458_s27, %s16458_s27, %s16457_s6  }
  0xaf   : > { %p16460_p13 = scmp.ne.s32.totalorder %s16450_s0, 0 }
  0xb1   : > { %580 = sbr.rel (%p16460_p13) target bundleno = 7031 (0x1b77), region = 92 }
  0xb8   : > { %p16461_p7 = scmp.eq.s32.totalorder %s13442_s30, 0 }
  0xba   : > { %13307 = dma.done.wait (%p16461_p7), [#allocation3], 73728   ;;  %p16462_p2 = pmov %p16461_p7 }
  0xbc   : > { %13309 = vsyncadd (%p16462_p2), [#allocation3], 4294893568  ;;  %p16463_p3 = pmov %p16462_p2 }
  0xbd   : > { %p16464_p0 = pmov %p16462_p2 }
  0xbe   : > { %13311 = dma.done.wait (%p16463_p3), [#allocation5], 11520  }
  0xbf   : > { %13313 = vsyncadd (%p16464_p0), [#allocation5], 4294955776  ;;  %p16465_p1 = pmov %p16464_p0 }
  0xc0   : > { %p16466_p5 = pmov %p16464_p0 }
  0xc1   : > { %13315 = dma.done.wait (%p16465_p1), [#allocation8], 2304  }
  0xc2   : > { %13317 = vsyncadd (%p16466_p5), [#allocation8], 4294964992  ;;  %p16467_p4 = pmov %p16464_p0 }
  0xc3   : > { %p16468_p6 = pmov %p16464_p0 }
  0xc4   : > { %13319 = dma.done.wait (%p16467_p4), [#allocation11], 2304  }
  0xc5   : > { %13321 = vsyncadd (%p16468_p6), [#allocation11], 4294964992  ;;  %v806_v0 = vld [vmem:[#allocation2 + $0x208] sm:$0xff]  ;;  %v808_v1 = vld [vmem:[#allocation2 + $0x218] sm:$0xff]  ;;  %p654_p8 = scmp.lt.s32.totalorder %s13442_s30, 1  ;;  %s16478_s2 = sld [smem:[#allocation298_spill]] }
  0xc6   : > { %v805_v2 = vld [vmem:[#allocation2 + $0x200] sm:$0xff]  ;;  %v13637_v3 = vpack.c.bf16 %v808_v1, %v806_v0  ;;  %v807_v4 = vld [vmem:[#allocation2 + $0x210] sm:$0xff]  ;;  %v810_v5 = vld [vmem:[#allocation2 + $0x228] sm:$0xff]  ;;  %vm946_vm0 = vcmask 1042432   ;;  %vm942_vm1 = vcmask 23552   ;;  %vm13339_vm2 = vmmov 0  }
  0xc7   : > { %v812_v6 = vld [vmem:[#allocation2 + $0x238] sm:$0xff]  ;;  %v13639_v7 = vpack.c.bf16 %v807_v4, %v805_v2  ;;  %v809_v9 = vld [vmem:[#allocation2 + $0x220] sm:$0xff]  ;;  %v811_v10 = vld [vmem:[#allocation2 + $0x230] sm:$0xff]  ;;  %s17042_s30 = smov (!%p654_p8, %s13442_s30), 1  ;;  %vm3076_vm3 = vcmask 523264   ;;  %vm3234_vm4 = vcmask 64512  }
  0xc8   : > { %v13641_v8 = vpack.c.bf16 %v812_v6, %v810_v5  ;;  %v814_v11 = vld [vmem:[#allocation2 + $0x248] sm:$0xff]  ;;  %11240 = vmatprep.subr.bf16.mxu1 %v13637_v3  ;;  %v816_v12 = vld [vmem:[#allocation2 + $0x258] sm:$0xff]  ;;  %v13645_v13 = vpack.c.bf16 %v811_v10, %v809_v9  ;;  %v813_v15 = vld [vmem:[#allocation2 + $0x240] sm:$0xff]  ;;  %s10024_s0 = sshll.u32 %s17042_s30, 3  ;;  %s16753_s22 = sld [smem:[#allocation305_spill]]  ;;  %vm4917_vm5 = vcmask 130048  }
  0xc9   : > { %11242 = vmatpush1.bf16.msra.mxu1 %v13639_v7  ;;  %v13648_v14 = vpack.c.bf16 %v816_v12, %v814_v11  ;;  %v815_v16 = vld [vmem:[#allocation2 + $0x250] sm:$0xff]  ;;  %v818_v17 = vld [vmem:[#allocation2 + $0x268] sm:$0xff]  ;;  %v820_v18 = vld [vmem:[#allocation2 + $0x278] sm:$0xff]  ;;  %vm5082_vm6 = vcmask 97280   ;;  %vm5089_vm7 = vcmask 1043456   ;;  %vm13340_vm8 = vmmov 1  }
  0xca   : > { %11244 = vmatprep.subr.bf16.mxu1 %v13641_v8  ;;  %v13651_v19 = vpack.c.bf16 %v815_v16, %v813_v15  ;;  %v13654_v20 = vpack.c.bf16 %v820_v18, %v818_v17  ;;  %v817_v21 = vld [vmem:[#allocation2 + $0x260] sm:$0xff]  ;;  %v819_v22 = vld [vmem:[#allocation2 + $0x270] sm:$0xff]  ;;  %v822_v23 = vld [vmem:[#allocation2 + $0x288] sm:$0xff]  ;;  %s16756_s19 = sld [smem:[#allocation303_spill]]  ;;  %s17039_s23 = sld [smem:[#allocation306_spill]] }
  0xcb   : > { %v824_v24 = vld [vmem:[#allocation2 + $0x298] sm:$0xff]  ;;  %v13658_v25 = vpack.c.bf16 %v819_v22, %v817_v21  ;;  %v821_v27 = vld [vmem:[#allocation2 + $0x280] sm:$0xff]  ;;  %v823_v28 = vld [vmem:[#allocation2 + $0x290] sm:$0xff]  ;;  %s13691_s6 = scalar_lea.vmem %s16478_s2, %s10024_s0 }
  0xcc   : > { %v13661_v26 = vpack.c.bf16 %v824_v24, %v822_v23  ;;  %v826_v29 = vld [vmem:[#allocation2 + $0x2a8] sm:$0xff]  ;;  %v828_v30 = vld [vmem:[#allocation2 + $0x2b8] sm:$0xff]  ;;  %v13667_v31 = vpack.c.bf16 %v823_v28, %v821_v27  ;;  %v825_v33 = vld [vmem:[#allocation2 + $0x2a0] sm:$0xff] }
  0xcd   : > { %11246 = vmatpush1.bf16.msra.mxu1 %v13645_v13  ;;  %16469 = vst [vmem:[#allocation17_spill] sm:$0xff] %v13658_v25  ;;  %v13670_v32 = vpack.c.bf16 %v828_v30, %v826_v29  ;;  %v827_v34 = vld [vmem:[#allocation2 + $0x2b0] sm:$0xff]  ;;  %v830_v35 = vld [vmem:[#allocation2 + $0x2c8] sm:$0xff]  ;;  %v832_v36 = vld [vmem:[#allocation2 + $0x2d8] sm:$0xff] }
  0xce   : > { %11248 = vmatprep.subr.bf16.mxu1 %v13648_v14  ;;  %16470 = vst [vmem:[#allocation18_spill] sm:$0xff] %v13661_v26  ;;  %16471 = vst [vmem:[#allocation19_spill] sm:$0xff] %v13667_v31  ;;  %v666_v37 = vld [vmem:[#allocation2 + $0x8] sm:$0xff]  ;;  %v668_v38 = vld [vmem:[#allocation2 + $0x18] sm:$0xff]  ;;  %v13674_v41 = vpack.c.bf16 %v827_v34, %v825_v33  ;;  %v13681_v46 = vpack.c.bf16 %v832_v36, %v830_v35 }
  0xcf   : > { %16472 = vst [vmem:[#allocation20_spill] sm:$0xff] %v13670_v32  ;;  %v665_v39 = vld [vmem:[#allocation2] sm:$0xff]  ;;  %v667_v40 = vld [vmem:[#allocation2 + $0x10] sm:$0xff]  ;;  %v13676_v44 = vpack.c.bf16 %v668_v38, %v666_v37  ;;  %v834_v47 = vld [vmem:[#allocation2 + $0x2e8] sm:$0xff] }
  0xd0   : > { %16473 = vst [vmem:[#allocation21_spill] sm:$0xff] %v13674_v41  ;;  %v829_v42 = vld [vmem:[#allocation2 + $0x2c0] sm:$0xff]  ;;  %v831_v43 = vld [vmem:[#allocation2 + $0x2d0] sm:$0xff]  ;;  %v13678_v45 = vpack.c.bf16 %v667_v40, %v665_v39  ;;  %16476 = vst [vmem:[#allocation24_spill] sm:$0xff] %v13681_v46  ;;  %s663_s21 = scalar_lea.vmem %s17039_s23, %s10024_s0 }
  0xd1   : > { %11250 = vmatpush1.bf16.msra.mxu1 %v13651_v19  ;;  %16474 = vst [vmem:[#allocation22_spill] sm:$0xff] %v13676_v44  ;;  %v670_v48 = vld [vmem:[#allocation2 + $0x28] sm:$0xff]  ;;  %v672_v49 = vld [vmem:[#allocation2 + $0x38] sm:$0xff]  ;;  %11176 = vmatprep.subr.bf16.mxu0 %v13676_v44  ;;  %v669_v52 = vld [vmem:[#allocation2 + $0x20] sm:$0xff]  ;;  %v13697_v56 = vpack.c.bf16 %v831_v43, %v829_v42 }
  0xd2   : > { %11252 = vmatprep.subr.bf16.mxu1 %v13654_v20  ;;  %16475 = vst [vmem:[#allocation23_spill] sm:$0xff] %v13678_v45  ;;  %v836_v50 = vld [vmem:[#allocation2 + $0x2f8] sm:$0xff]  ;;  %v13684_v51 = vpack.c.bf16 %v672_v49, %v670_v48  ;;  %v671_v53 = vld [vmem:[#allocation2 + $0x30] sm:$0xff]  ;;  %v833_v54 = vld [vmem:[#allocation2 + $0x2e0] sm:$0xff]  ;;  %11178 = vmatpush1.bf16.msra.mxu0 %v13678_v45 }
  0xd3   : > { %v13694_v55 = vpack.c.bf16 %v671_v53, %v669_v52  ;;  %16480 = vst [vmem:[#allocation27_spill] sm:$0xff] %v13697_v56  ;;  %v674_v57 = vld [vmem:[#allocation2 + $0x48] sm:$0xff]  ;;  %v676_v58 = vld [vmem:[#allocation2 + $0x58] sm:$0xff]  ;;  %v673_v59 = vld [vmem:[#allocation2 + $0x40] sm:$0xff]  ;;  %v13701_v60 = vpack.c.bf16 %v836_v50, %v834_v47 }
  0xd4   : > { %16477 = vst [vmem:[#allocation25_spill] sm:$0xff] %v13684_v51  ;;  %11180 = vmatprep.subr.bf16.mxu0 %v13684_v51  ;;  %v835_v61 = vld [vmem:[#allocation2 + $0x2f0] sm:$0xff]  ;;  %v13703_v62 = vpack.c.bf16 %v676_v58, %v674_v57  ;;  %v13706_v0 = vld [vmem:[%s13691_s6] sm:$0x77]  ;;  %v838_v1 = vld [vmem:[#allocation2 + $0x308] sm:$0xff] }
  0xd5   : > { %11254 = vmatpush1.bf16.msra.mxu1 %v13658_v25  ;;  %16479 = vst [vmem:[#allocation26_spill] sm:$0xff] %v13694_v55  ;;  %16481 = vst [vmem:[#allocation28_spill] sm:$0xff] %v13701_v60  ;;  %v675_v63 = vld [vmem:[#allocation2 + $0x50] sm:$0xff]  ;;  %v840_v2 = vld [vmem:[#allocation2 + $0x318] sm:$0xff]  ;;  %v13710_v4 = vcombine.high %v13706_v0, %v13706_v0  ;;  %v13716_v10 = vpack.c.bf16 %v835_v61, %v833_v54 }
  0xd6   : > { %11256 = vmatprep.subr.bf16.mxu1 %v13661_v26  ;;  %16482 = vst [vmem:[#allocation29_spill] sm:$0xff] %v13703_v62  ;;  %11182 = vmatpush1.bf16.msra.mxu0 %v13694_v55  ;;  %v13713_v5 = vpack.c.bf16 %v675_v63, %v673_v59  ;;  %v678_v6 = vld [vmem:[#allocation2 + $0x68] sm:$0xff]  ;;  %v680_v9 = vld [vmem:[#allocation2 + $0x78] sm:$0xff]  ;;  %v677_v12 = vld [vmem:[#allocation2 + $0x60] sm:$0xff]  ;;  %v13722_v16 = vpack.c.bf16 %v840_v2, %v838_v1 }
  0xd7   : > { %16484 = vst [vmem:[#allocation31_spill] sm:$0xff] %v13716_v10  ;;  %11184 = vmatprep.subr.bf16.mxu0 %v13703_v62  ;;  %v13719_v11 = vpack.c.bf16 %v680_v9, %v678_v6  ;;  %v679_v15 = vld [vmem:[#allocation2 + $0x70] sm:$0xff]  ;;  %v837_v17 = vld [vmem:[#allocation2 + $0x300] sm:$0xff]  ;;  %933 = vmatprep.mubr.f32.mxu1 %v13710_v4  ;;  %v682_v21 = vld [vmem:[#allocation2 + $0x88] sm:$0xff] }
  0xd8   : > { %16483 = vst [vmem:[#allocation30_spill] sm:$0xff] %v13713_v5  ;;  %16486 = vst [vmem:[#allocation33_spill] sm:$0xff] %v13722_v16  ;;  %v839_v18 = vld [vmem:[#allocation2 + $0x310] sm:$0xff]  ;;  %v842_v22 = vld [vmem:[#allocation2 + $0x328] sm:$0xff]  ;;  %796 = vmatprep.mubr.f32.mxu0 %v13710_v4  ;;  %v13727_v27 = vpack.c.bf16 %v679_v15, %v677_v12 }
  0xd9   : > { %11258 = vmatpush1.bf16.msra.mxu1 %v13667_v31  ;;  %16485 = vst [vmem:[#allocation32_spill] sm:$0xff] %v13719_v11  ;;  %v844_v23 = vld [vmem:[#allocation2 + $0x338] sm:$0xff]  ;;  %v13730_v28 = vpack.c.bf16 %v839_v18, %v837_v17  ;;  %v841_v29 = vld [vmem:[#allocation2 + $0x320] sm:$0xff]  ;;  %v683_v34 = vld [vmem:[#allocation2 + $0x90] sm:$0xff] }
  0xda   : > { %11260 = vmatprep.subr.bf16.mxu1 %v13670_v32  ;;  %v684_v24 = vld [vmem:[#allocation2 + $0x98] sm:$0xff]  ;;  %11186 = vmatpush1.bf16.msra.mxu0 %v13713_v5  ;;  %16487 = vst [vmem:[#allocation34_spill] sm:$0xff] %v13727_v27  ;;  %v681_v33 = vld [vmem:[#allocation2 + $0x80] sm:$0xff]  ;;  %v13736_v35 = vpack.c.bf16 %v844_v23, %v842_v22  ;;  %v843_v36 = vld [vmem:[#allocation2 + $0x330] sm:$0xff] }
  0xdb   : > { %16488 = vst [vmem:[#allocation35_spill] sm:$0xff] %v13730_v28  ;;  %11188 = vmatprep.subr.bf16.mxu0 %v13719_v11  ;;  %v13733_v30 = vpack.c.bf16 %v684_v24, %v682_v21  ;;  %v686_v37 = vld [vmem:[#allocation2 + $0xa8] sm:$0xff]  ;;  %v688_v38 = vld [vmem:[#allocation2 + $0xb8] sm:$0xff]  ;;  %v13739_v42 = vpack.c.bf16 %v683_v34, %v681_v33  ;;  %v13742_v43 = vpack.c.bf16 %v843_v36, %v841_v29  ;;  %v845_v47 = vld [vmem:[#allocation2 + $0x340] sm:$0xff] }
  0xdc   : > { %16490 = vst [vmem:[#allocation37_spill] sm:$0xff] %v13736_v35  ;;  %v846_v39 = vld [vmem:[#allocation2 + $0x348] sm:$0xff]  ;;  %v848_v40 = vld [vmem:[#allocation2 + $0x358] sm:$0xff]  ;;  %v13745_v48 = vpack.c.bf16 %v688_v38, %v686_v37  ;;  %v685_v49 = vld [vmem:[#allocation2 + $0xa0] sm:$0xff] }
  0xdd   : > { %11262 = vmatpush1.bf16.msra.mxu1 %v13674_v41  ;;  %16489 = vst [vmem:[#allocation36_spill] sm:$0xff] %v13733_v30  ;;  %16491 = vst [vmem:[#allocation38_spill] sm:$0xff] %v13739_v42  ;;  %v687_v50 = vld [vmem:[#allocation2 + $0xb0] sm:$0xff]  ;;  %v13748_v52 = vpack.c.bf16 %v848_v40, %v846_v39  ;;  %v690_v54 = vld [vmem:[#allocation2 + $0xc8] sm:$0xff] }
  0xde   : > { %11264 = vmatprep.subr.bf16.mxu1 %v13681_v46  ;;  %11190 = vmatpush1.bf16.msra.mxu0 %v13727_v27  ;;  %16492 = vst [vmem:[#allocation39_spill] sm:$0xff] %v13742_v43  ;;  %16493 = vst [vmem:[#allocation40_spill] sm:$0xff] %v13745_v48  ;;  %v847_v53 = vld [vmem:[#allocation2 + $0x350] sm:$0xff]  ;;  %v692_v57 = vld [vmem:[#allocation2 + $0xd8] sm:$0xff]  ;;  %v13751_v61 = vpack.c.bf16 %v687_v50, %v685_v49 }
  0xdf   : > { %11192 = vmatprep.subr.bf16.mxu0 %v13733_v30  ;;  %16494 = vst [vmem:[#allocation41_spill] sm:$0xff] %v13748_v52  ;;  %v850_v58 = vld [vmem:[#allocation2 + $0x368] sm:$0xff]  ;;  %v852_v59 = vld [vmem:[#allocation2 + $0x378] sm:$0xff]  ;;  %v13754_v63 = vpack.c.bf16 %v847_v53, %v845_v47  ;;  %v849_v1 = vld [vmem:[#allocation2 + $0x360] sm:$0xff]  ;;  %v13757_v2 = vpack.c.bf16 %v692_v57, %v690_v54 }
  0xe0   : > { %16495 = vst [vmem:[#allocation42_spill] sm:$0xff] %v13751_v61  ;;  %v689_v6 = vld [vmem:[#allocation2 + $0xc0] sm:$0xff]  ;;  %v691_v9 = vld [vmem:[#allocation2 + $0xd0] sm:$0xff]  ;;  %v13760_v12 = vpack.c.bf16 %v852_v59, %v850_v58  ;;  %v694_v17 = vld [vmem:[#allocation2 + $0xe8] sm:$0xff] }
  0xe1   : > { %11266 = vmatpush1.bf16.msra.mxu1 %v13697_v56  ;;  %16496 = vst [vmem:[#allocation43_spill] sm:$0xff] %v13754_v63  ;;  %16497 = vst [vmem:[#allocation44_spill] sm:$0xff] %v13757_v2  ;;  %v851_v15 = vld [vmem:[#allocation2 + $0x370] sm:$0xff]  ;;  %v696_v18 = vld [vmem:[#allocation2 + $0xf8] sm:$0xff]  ;;  %v13763_v23 = vpack.c.bf16 %v691_v9, %v689_v6 }
  0xe2   : > { %11268 = vmatprep.subr.bf16.mxu1 %v13701_v60  ;;  %11194 = vmatpush1.bf16.msra.mxu0 %v13739_v42  ;;  %16498 = vst [vmem:[#allocation45_spill] sm:$0xff] %v13760_v12  ;;  %v854_v21 = vld [vmem:[#allocation2 + $0x388] sm:$0xff]  ;;  %v856_v22 = vld [vmem:[#allocation2 + $0x398] sm:$0xff]  ;;  %v13766_v24 = vpack.c.bf16 %v851_v15, %v849_v1  ;;  %v853_v29 = vld [vmem:[#allocation2 + $0x380] sm:$0xff]  ;;  %v13769_v33 = vpack.c.bf16 %v696_v18, %v694_v17 }
  0xe3   : > { %11196 = vmatprep.subr.bf16.mxu0 %v13745_v48  ;;  %16499 = vst [vmem:[#allocation46_spill] sm:$0xff] %v13763_v23  ;;  %v693_v34 = vld [vmem:[#allocation2 + $0xe0] sm:$0xff]  ;;  %v695_v36 = vld [vmem:[#allocation2 + $0xf0] sm:$0xff]  ;;  %v13772_v37 = vpack.c.bf16 %v856_v22, %v854_v21  ;;  %v698_v39 = vld [vmem:[#allocation2 + $0x108] sm:$0xff] }
  0xe4   : > { %16500 = vst [vmem:[#allocation47_spill] sm:$0xff] %v13766_v24  ;;  %16501 = vst [vmem:[#allocation48_spill] sm:$0xff] %v13769_v33  ;;  %v855_v38 = vld [vmem:[#allocation2 + $0x390] sm:$0xff]  ;;  %v700_v40 = vld [vmem:[#allocation2 + $0x118] sm:$0xff]  ;;  %v13775_v50 = vpack.c.bf16 %v695_v36, %v693_v34 }
  0xe5   : > { %11270 = vmatpush1.bf16.msra.mxu1 %v13716_v10  ;;  %16502 = vst [vmem:[#allocation49_spill] sm:$0xff] %v13772_v37  ;;  %v858_v47 = vld [vmem:[#allocation2 + $0x3a8] sm:$0xff]  ;;  %v860_v49 = vld [vmem:[#allocation2 + $0x3b8] sm:$0xff]  ;;  %v13778_v53 = vpack.c.bf16 %v855_v38, %v853_v29  ;;  %v857_v54 = vld [vmem:[#allocation2 + $0x3a0] sm:$0xff]  ;;  %v13781_v57 = vpack.c.bf16 %v700_v40, %v698_v39 }
  0xe6   : > { %11272 = vmatprep.subr.bf16.mxu1 %v13722_v16  ;;  %11198 = vmatpush1.bf16.msra.mxu0 %v13751_v61  ;;  %16503 = vst [vmem:[#allocation50_spill] sm:$0xff] %v13775_v50  ;;  %v697_v58 = vld [vmem:[#allocation2 + $0x100] sm:$0xff]  ;;  %v699_v59 = vld [vmem:[#allocation2 + $0x110] sm:$0xff]  ;;  %v13784_v1 = vpack.c.bf16 %v860_v49, %v858_v47  ;;  %v702_v9 = vld [vmem:[#allocation2 + $0x128] sm:$0xff] }
  0xe7   : > { %11200 = vmatprep.subr.bf16.mxu0 %v13757_v2  ;;  %16504 = vst [vmem:[#allocation51_spill] sm:$0xff] %v13778_v53  ;;  %16505 = vst [vmem:[#allocation52_spill] sm:$0xff] %v13781_v57  ;;  %v859_v6 = vld [vmem:[#allocation2 + $0x3b0] sm:$0xff]  ;;  %v704_v15 = vld [vmem:[#allocation2 + $0x138] sm:$0xff]  ;;  %v13787_v21 = vpack.c.bf16 %v699_v59, %v697_v58 }
  0xe8   : > { %16506 = vst [vmem:[#allocation53_spill] sm:$0xff] %v13784_v1  ;;  %v862_v17 = vld [vmem:[#allocation2 + $0x3c8] sm:$0xff]  ;;  %v864_v18 = vld [vmem:[#allocation2 + $0x3d8] sm:$0xff]  ;;  %v13790_v22 = vpack.c.bf16 %v859_v6, %v857_v54  ;;  %v861_v29 = vld [vmem:[#allocation2 + $0x3c0] sm:$0xff]  ;;  %v13793_v34 = vpack.c.bf16 %v704_v15, %v702_v9 }
  0xe9   : > { %11274 = vmatpush1.bf16.msra.mxu1 %v13730_v28  ;;  %16507 = vst [vmem:[#allocation54_spill] sm:$0xff] %v13787_v21  ;;  %v701_v36 = vld [vmem:[#allocation2 + $0x120] sm:$0xff]  ;;  %v703_v38 = vld [vmem:[#allocation2 + $0x130] sm:$0xff]  ;;  %v13796_v39 = vpack.c.bf16 %v864_v18, %v862_v17  ;;  %v706_v47 = vld [vmem:[#allocation2 + $0x148] sm:$0xff] }
  0xea   : > { %11276 = vmatprep.subr.bf16.mxu1 %v13736_v35  ;;  %11202 = vmatpush1.bf16.msra.mxu0 %v13763_v23  ;;  %16508 = vst [vmem:[#allocation55_spill] sm:$0xff] %v13790_v22  ;;  %16509 = vst [vmem:[#allocation56_spill] sm:$0xff] %v13793_v34  ;;  %v863_v40 = vld [vmem:[#allocation2 + $0x3d0] sm:$0xff]  ;;  %v708_v49 = vld [vmem:[#allocation2 + $0x158] sm:$0xff]  ;;  %v13799_v54 = vpack.c.bf16 %v703_v38, %v701_v36 }
  0xeb   : > { %11204 = vmatprep.subr.bf16.mxu0 %v13769_v33  ;;  %16510 = vst [vmem:[#allocation57_spill] sm:$0xff] %v13796_v39  ;;  %v866_v58 = vld [vmem:[#allocation2 + $0x3e8] sm:$0xff]  ;;  %v868_v59 = vld [vmem:[#allocation2 + $0x3f8] sm:$0xff]  ;;  %v13802_v6 = vpack.c.bf16 %v863_v40, %v861_v29  ;;  %v865_v9 = vld [vmem:[#allocation2 + $0x3e0] sm:$0xff]  ;;  %v13805_v15 = vpack.c.bf16 %v708_v49, %v706_v47 }
  0xec   : > { %16511 = vst [vmem:[#allocation58_spill] sm:$0xff] %v13799_v54  ;;  %v705_v17 = vld [vmem:[#allocation2 + $0x140] sm:$0xff]  ;;  %v707_v18 = vld [vmem:[#allocation2 + $0x150] sm:$0xff]  ;;  %v710_v33 = vld [vmem:[#allocation2 + $0x168] sm:$0xff] }
  0xed   : > { %11278 = vmatpush1.bf16.msra.mxu1 %v13742_v43  ;;  %16512 = vst [vmem:[#allocation59_spill] sm:$0xff] %v13802_v6  ;;  %16513 = vst [vmem:[#allocation60_spill] sm:$0xff] %v13805_v15  ;;  %v1106_v36 = vld [vmem:[#allocation2 + $0x408] sm:$0xff]  ;;  %v1108_v38 = vld [vmem:[#allocation2 + $0x418] sm:$0xff]  ;;  %v13811_v29 = vpack.c.bf16 %v707_v18, %v705_v17 }
  0xee   : > { %11280 = vmatprep.subr.bf16.mxu1 %v13748_v52  ;;  %11206 = vmatpush1.bf16.msra.mxu0 %v13775_v50  ;;  %v867_v50 = vld [vmem:[#allocation2 + $0x3f0] sm:$0xff]  ;;  %v1105_v47 = vld [vmem:[#allocation2 + $0x400] sm:$0xff]  ;;  %v714_v2 = vld [vmem:[#allocation2 + $0x188] sm:$0xff] }
  0xef   : > { %11208 = vmatprep.subr.bf16.mxu0 %v13781_v57  ;;  %v13808_v57 = vpack.c.bf16 %v868_v59, %v866_v58  ;;  %16515 = vst [vmem:[#allocation62_spill] sm:$0xff] %v13811_v29  ;;  %v13814_v40 = vpack.c.bf16 %v867_v50, %v865_v9  ;;  %v709_v58 = vld [vmem:[#allocation2 + $0x160] sm:$0xff]  ;;  %v711_v59 = vld [vmem:[#allocation2 + $0x170] sm:$0xff]  ;;  %v1110_v17 = vld [vmem:[#allocation2 + $0x428] sm:$0xff] }
  0xf0   : > { %v1107_v23 = vld [vmem:[#allocation2 + $0x410] sm:$0xff]  ;;  %v1112_v18 = vld [vmem:[#allocation2 + $0x438] sm:$0xff]  ;;  %v13823_v50 = vpack.c.bf16 %v711_v59, %v709_v58  ;;  %v718_v48 = vld [vmem:[#allocation2 + $0x1a8] sm:$0xff] }
  0xf1   : > { %11282 = vmatpush1.bf16.msra.mxu1 %v13754_v63  ;;  %16514 = vst [vmem:[#allocation61_spill] sm:$0xff] %v13808_v57  ;;  %16516 = vst [vmem:[#allocation63_spill] sm:$0xff] %v13814_v40  ;;  %v13826_v9 = vpack.c.bf16 %v1107_v23, %v1105_v47  ;;  %v1111_v61 = vld [vmem:[#allocation2 + $0x430] sm:$0xff]  ;;  %v1114_v58 = vld [vmem:[#allocation2 + $0x448] sm:$0xff] }
  0xf2   : > { %11284 = vmatprep.subr.bf16.mxu1 %v13760_v12  ;;  %11210 = vmatpush1.bf16.msra.mxu0 %v13787_v21  ;;  %v712_v21 = vld [vmem:[#allocation2 + $0x178] sm:$0xff]  ;;  %16519 = vst [vmem:[#allocation66_spill] sm:$0xff] %v13823_v50  ;;  %v1115_v42 = vld [vmem:[#allocation2 + $0x450] sm:$0xff]  ;;  %v722_v30 = vld [vmem:[#allocation2 + $0x1c8] sm:$0xff] }
  0xf3   : > { %11212 = vmatprep.subr.bf16.mxu0 %v13793_v34  ;;  %v13817_v49 = vpack.c.bf16 %v712_v21, %v710_v33  ;;  %v13820_v34 = vpack.c.bf16 %v1108_v38, %v1106_v36  ;;  %16520 = vst [vmem:[#allocation67_spill] sm:$0xff] %v13826_v9  ;;  %v1109_v33 = vld [vmem:[#allocation2 + $0x420] sm:$0xff]  ;;  %v715_v38 = vld [vmem:[#allocation2 + $0x190] sm:$0xff]  ;;  %v1116_v59 = vld [vmem:[#allocation2 + $0x458] sm:$0xff] }
  0xf4   : > { %v713_v36 = vld [vmem:[#allocation2 + $0x180] sm:$0xff]  ;;  %v3155_v27 = vld [vmem:[#allocation4 + $0x50] sm:$0xff]  ;;  %v3156_v11 = vld [vmem:[#allocation4 + $0x58] sm:$0xff] }
  0xf5   : > { %11286 = vmatpush1.bf16.msra.mxu1 %v13766_v24  ;;  %16517 = vst [vmem:[#allocation64_spill] sm:$0xff] %v13817_v49  ;;  %16518 = vst [vmem:[#allocation65_spill] sm:$0xff] %v13820_v34  ;;  %v13836_v23 = vpack.c.bf16 %v715_v38, %v713_v36  ;;  %v1118_v36 = vld [vmem:[#allocation2 + $0x468] sm:$0xff]  ;;  %v1120_v38 = vld [vmem:[#allocation2 + $0x478] sm:$0xff] }
  0xf6   : > { %11288 = vmatprep.subr.bf16.mxu1 %v13772_v37  ;;  %11214 = vmatpush1.bf16.msra.mxu0 %v13799_v54  ;;  %v716_v54 = vld [vmem:[#allocation2 + $0x198] sm:$0xff]  ;;  %v9825_v12 = vld [vmem:[%s16133_s10 + $0x30] sm:$0xff]  ;;  %v4572_v10 = vld [vmem:[%s16128_s5 + $0x20] sm:$0xff] }
  0xf7   : > { %11216 = vmatprep.subr.bf16.mxu0 %v13805_v15  ;;  %v13829_v21 = vpack.c.bf16 %v716_v54, %v714_v2  ;;  %v13832_v15 = vpack.c.bf16 %v1112_v18, %v1110_v17  ;;  %16523 = vst [vmem:[#allocation70_spill] sm:$0xff] %v13836_v23  ;;  %v13839_v2 = vpack.c.bf16 %v1111_v61, %v1109_v33  ;;  %v1113_v54 = vld [vmem:[#allocation2 + $0x440] sm:$0xff]  ;;  %v719_v18 = vld [vmem:[#allocation2 + $0x1b0] sm:$0xff]  ;;  %v3900_v55 = vld [vmem:[#allocation4 + $0x178] sm:$0xff] }
  0xf8   : > { %v717_v17 = vld [vmem:[#allocation2 + $0x1a0] sm:$0xff]  ;;  %v4390_v35 = vld [vmem:[#allocation4 + $0x210] sm:$0xff]  ;;  %v4391_v28 = vld [vmem:[#allocation4 + $0x218] sm:$0xff] }
  0xf9   : > { %11290 = vmatpush1.bf16.msra.mxu1 %v13778_v53  ;;  %16521 = vst [vmem:[#allocation68_spill] sm:$0xff] %v13829_v21  ;;  %16522 = vst [vmem:[#allocation69_spill] sm:$0xff] %v13832_v15  ;;  %v13849_v61 = vpack.c.bf16 %v719_v18, %v717_v17  ;;  %v1122_v17 = vld [vmem:[#allocation2 + $0x488] sm:$0xff]  ;;  %v1124_v18 = vld [vmem:[#allocation2 + $0x498] sm:$0xff] }
  0xfa   : > { %11292 = vmatprep.subr.bf16.mxu1 %v13784_v1  ;;  %11218 = vmatpush1.bf16.msra.mxu0 %v13811_v29  ;;  %v720_v29 = vld [vmem:[#allocation2 + $0x1b8] sm:$0xff]  ;;  %16524 = vst [vmem:[#allocation71_spill] sm:$0xff] %v13839_v2  ;;  %v9858_v46 = vld [vmem:[%s16128_s5 + $0x50] sm:$0xff]  ;;  %vm15419_vm9 = vmpackc.low %vm5089_vm7, %vm13340_vm8 }
  0xfb   : > { %11220 = vmatprep.subr.bf16.mxu0 %v13817_v49  ;;  %v13842_v47 = vpack.c.bf16 %v720_v29, %v718_v48  ;;  %v13845_v49 = vpack.c.bf16 %v1116_v59, %v1114_v58  ;;  %16527 = vst [vmem:[#allocation74_spill] sm:$0xff] %v13849_v61  ;;  %v13852_v48 = vpack.c.bf16 %v1115_v42, %v1113_v54  ;;  %v1117_v29 = vld [vmem:[#allocation2 + $0x460] sm:$0xff]  ;;  %v723_v59 = vld [vmem:[#allocation2 + $0x1d0] sm:$0xff]  ;;  %v3566_v1 = vld [vmem:[#allocation4 + $0xd8] sm:$0xff] }
  0xfc   : > { %v721_v58 = vld [vmem:[#allocation2 + $0x1c0] sm:$0xff]  ;;  %v3570_v53 = vld [vmem:[#allocation4 + $0xf8] sm:$0xff] }
  0xfd   : > { %11294 = vmatpush1.bf16.msra.mxu1 %v13790_v22  ;;  %16525 = vst [vmem:[#allocation72_spill] sm:$0xff] %v13842_v47  ;;  %16526 = vst [vmem:[#allocation73_spill] sm:$0xff] %v13845_v49  ;;  %v13861_v42 = vpack.c.bf16 %v723_v59, %v721_v58  ;;  %v1130_v59 = vld [vmem:[#allocation2 + $0x4c8] sm:$0xff]  ;;  %v3565_v22 = vld [vmem:[#allocation4 + $0xd0] sm:$0xff] }
  0xfe   : > { %11296 = vmatprep.subr.bf16.mxu1 %v13796_v39  ;;  %11222 = vmatpush1.bf16.msra.mxu0 %v13823_v50  ;;  %v724_v50 = vld [vmem:[#allocation2 + $0x1d8] sm:$0xff]  ;;  %16528 = vst [vmem:[#allocation75_spill] sm:$0xff] %v13852_v48 }
  0xff   : > { %11224 = vmatprep.subr.bf16.mxu0 %v13829_v21  ;;  %v13855_v33 = vpack.c.bf16 %v724_v50, %v722_v30  ;;  %v726_v21 = vld [vmem:[#allocation2 + $0x1e8] sm:$0xff]  ;;  %16531 = vst [vmem:[#allocation78_spill] sm:$0xff] %v13861_v42  ;;  %v725_v50 = vld [vmem:[#allocation2 + $0x1e0] sm:$0xff] }
 0x101   : > { %11298 = vmatpush1.bf16.msra.mxu1 %v13802_v6  ;;  %16529 = vst [vmem:[#allocation76_spill] sm:$0xff] %v13855_v33 }
 0x102   : > { %11300 = vmatprep.subr.bf16.mxu1 %v13808_v57  ;;  %11226 = vmatpush1.bf16.msra.mxu0 %v13836_v23  ;;  %v728_v23 = vld [vmem:[#allocation2 + $0x1f8] sm:$0xff]  ;;  %v9821_v57 = vld [vmem:[%s16133_s10 + $0x28] sm:$0xf] }
 0x103   : > { %11228 = vmatprep.subr.bf16.mxu0 %v13842_v47  ;;  %v13867_v30 = vpack.c.bf16 %v728_v23, %v726_v21  ;;  %v1126_v47 = vld [vmem:[#allocation2 + $0x4a8] sm:$0xff]  ;;  %v1125_v23 = vld [vmem:[#allocation2 + $0x4a0] sm:$0xff] }
 0x105   : > { %11302 = vmatpush1.bf16.msra.mxu1 %v13814_v40  ;;  %16533 = vst [vmem:[#allocation80_spill] sm:$0xff] %v13867_v30 }
 0x106   : > { %11304 = vmatprep.subr.bf16.mxu1 %v13820_v34  ;;  %11230 = vmatpush1.bf16.msra.mxu0 %v13849_v61  ;;  %v1128_v61 = vld [vmem:[#allocation2 + $0x4b8] sm:$0xff] }
 0x107   : > { %11232 = vmatprep.subr.bf16.mxu0 %v13855_v33  ;;  %v13880_v21 = vpack.c.bf16 %v1128_v61, %v1126_v47  ;;  %v4230_v34 = vld [vmem:[#allocation4 + $0x1f8] sm:$0xff] }
 0x108   : > { %934 = vmatmul.mubr.f32.vlgmr.msra.gmra.mrb[0].mxu1 %v13706_v0 }
 0x109   : > { %11306 = vmatpush1.bf16.msra.mxu1 %v13826_v9  ;;  %1233 = vmatprep.mubr.f32.mxu1 %v13710_v4  ;;  %v1119_v9 = vld [vmem:[#allocation2 + $0x470] sm:$0xff]  ;;  %16537 = vst [vmem:[#allocation84_spill] sm:$0xff] %v13880_v21 }
 0x10a   : > { %11308 = vmatprep.subr.bf16.mxu1 %v13832_v15  ;;  %v13858_v15 = vpack.c.bf16 %v1120_v38, %v1118_v36  ;;  %v13864_v54 = vpack.c.bf16 %v1119_v9, %v1117_v29  ;;  %v727_v36 = vld [vmem:[#allocation2 + $0x1f0] sm:$0xff]  ;;  %v13870_v38 = vpack.c.bf16 %v1124_v18, %v1122_v17  ;;  %11234 = vmatpush1.bf16.msra.mxu0 %v13861_v42  ;;  %v1132_v17 = vld [vmem:[#allocation2 + $0x4d8] sm:$0xff]  ;;  %v9783_v42 = vld [vmem:[%s16127_s4 + $0x320] sm:$0xff] }
 0x10b   : > { %v13873_v58 = vpack.c.bf16 %v727_v36, %v725_v50  ;;  %11236 = vmatprep.subr.bf16.mxu0 %v13867_v30  ;;  %v1127_v29 = vld [vmem:[#allocation2 + $0x4b0] sm:$0xff]  ;;  %v1134_v36 = vld [vmem:[#allocation2 + $0x4e8] sm:$0xff] }
 0x10c   : > { %16530 = vst [vmem:[#allocation77_spill] sm:$0xff] %v13858_v15  ;;  %16532 = vst [vmem:[#allocation79_spill] sm:$0xff] %v13864_v54  ;;  %v13884_v18 = vpack.c.bf16 %v1127_v29, %v1125_v23  ;;  %v1131_v50 = vld [vmem:[#allocation2 + $0x4d0] sm:$0xff]  ;;  %v1133_v23 = vld [vmem:[#allocation2 + $0x4e0] sm:$0xff] }
 0x10d   : > { %11310 = vmatpush1.bf16.msra.mxu1 %v13839_v2  ;;  %16534 = vst [vmem:[#allocation81_spill] sm:$0xff] %v13870_v38  ;;  %v1123_v2 = vld [vmem:[#allocation2 + $0x490] sm:$0xff]  ;;  %16535 = vst [vmem:[#allocation82_spill] sm:$0xff] %v13873_v58 }
 0x10e   : > { %11312 = vmatprep.subr.bf16.mxu1 %v13845_v49  ;;  %v1121_v49 = vld [vmem:[#allocation2 + $0x480] sm:$0xff]  ;;  %11238 = vmatpush1.bf16.msra.mxu0 %v13873_v58  ;;  %16538 = vst [vmem:[#allocation85_spill] sm:$0xff] %v13884_v18  ;;  %v1135_v29 = vld [vmem:[#allocation2 + $0x4f0] sm:$0xff] }
 0x10f   : > { %v13876_v9 = vpack.c.bf16 %v1123_v2, %v1121_v49  ;;  %v13887_v49 = vpack.c.bf16 %v1132_v17, %v1130_v59  ;;  %v1129_v2 = vld [vmem:[#allocation2 + $0x4c0] sm:$0xff]  ;;  %v13897_v59 = vpack.c.bf16 %v1135_v29, %v1133_v23  ;;  %v1146_v23 = vld [vmem:[#allocation2 + $0x548] sm:$0xff]  ;;  %v1148_v29 = vld [vmem:[#allocation2 + $0x558] sm:$0xff] }
 0x110   : > { %v13891_v47 = vpack.c.bf16 %v1131_v50, %v1129_v2  ;;  %v1142_v2 = vld [vmem:[#allocation2 + $0x528] sm:$0xff]  ;;  %v1144_v50 = vld [vmem:[#allocation2 + $0x538] sm:$0xff] }
 0x111   : > { %11314 = vmatpush1.bf16.msra.mxu1 %v13852_v48  ;;  %16536 = vst [vmem:[#allocation83_spill] sm:$0xff] %v13876_v9  ;;  %16539 = vst [vmem:[#allocation86_spill] sm:$0xff] %v13887_v49  ;;  %797 = vmatmul.mubr.f32.vlgmr.msra.gmra.mrb[0].mxu0 %v13706_v0  ;;  %v2048_v48 = vld [vmem:[#allocation2 + $0xdf8] sm:$0xff] }
 0x112   : > { %11316 = vmatprep.subr.bf16.mxu1 %v13858_v15  ;;  %16540 = vst [vmem:[#allocation87_spill] sm:$0xff] %v13891_v47  ;;  %16542 = vst [vmem:[#allocation89_spill] sm:$0xff] %v13897_v59  ;;  %v1336_v15 = vld [vmem:[#allocation2 + $0x658] sm:$0xff] }
 0x115   : > { %11318 = vmatpush1.bf16.msra.mxu1 %v13864_v54  ;;  %v1137_v54 = vld [vmem:[#allocation2 + $0x500] sm:$0xff] }
 0x116   : > { %11320 = vmatprep.subr.bf16.mxu1 %v13870_v38  ;;  %v1136_v38 = vld [vmem:[#allocation2 + $0x4f8] sm:$0xff] }
 0x117   : > { %v13894_v61 = vpack.c.bf16 %v1136_v38, %v1134_v36  ;;  %v13906_v36 = vpack.c.bf16 %v1144_v50, %v1142_v2 }
 0x119   : > { %11322 = vmatpush1.bf16.msra.mxu1 %v13876_v9  ;;  %16541 = vst [vmem:[#allocation88_spill] sm:$0xff] %v13894_v61  ;;  %v1138_v9 = vld [vmem:[#allocation2 + $0x508] sm:$0xff]  ;;  %16545 = vst [vmem:[#allocation92_spill] sm:$0xff] %v13906_v36 }
 0x11a   : > { %11324 = vmatprep.subr.bf16.mxu1 %v13880_v21  ;;  %v1140_v21 = vld [vmem:[#allocation2 + $0x518] sm:$0xff] }
 0x11b   : > { %v13900_v17 = vpack.c.bf16 %v1140_v21, %v1138_v9  ;;  %v13912_v21 = vpack.c.bf16 %v1148_v29, %v1146_v23 }
 0x11d   : > { %11326 = vmatpush1.bf16.msra.mxu1 %v13884_v18  ;;  %16543 = vst [vmem:[#allocation90_spill] sm:$0xff] %v13900_v17  ;;  %v1139_v18 = vld [vmem:[#allocation2 + $0x510] sm:$0xff]  ;;  %16547 = vst [vmem:[#allocation94_spill] sm:$0xff] %v13912_v21 }
 0x11e   : > { %11328 = vmatprep.subr.bf16.mxu1 %v13887_v49  ;;  %v13903_v38 = vpack.c.bf16 %v1139_v18, %v1137_v54  ;;  %v1141_v49 = vld [vmem:[#allocation2 + $0x520] sm:$0xff]  ;;  %v1150_v54 = vld [vmem:[#allocation2 + $0x568] sm:$0xff]  ;;  %v1152_v18 = vld [vmem:[#allocation2 + $0x578] sm:$0xff] }
 0x11f   : > { %v13918_v50 = vpack.c.bf16 %v1152_v18, %v1150_v54 }
 0x120   : > { %16544 = vst [vmem:[#allocation91_spill] sm:$0xff] %v13903_v38 }
 0x121   : > { %11330 = vmatpush1.bf16.msra.mxu1 %v13891_v47  ;;  %v1143_v47 = vld [vmem:[#allocation2 + $0x530] sm:$0xff]  ;;  %16549 = vst [vmem:[#allocation96_spill] sm:$0xff] %v13918_v50 }
 0x122   : > { %11332 = vmatprep.subr.bf16.mxu1 %v13894_v61  ;;  %v13909_v9 = vpack.c.bf16 %v1143_v47, %v1141_v49  ;;  %v1145_v61 = vld [vmem:[#allocation2 + $0x540] sm:$0xff]  ;;  %v1154_v49 = vld [vmem:[#allocation2 + $0x588] sm:$0xff]  ;;  %v1156_v47 = vld [vmem:[#allocation2 + $0x598] sm:$0xff] }
 0x123   : > { %v13924_v29 = vpack.c.bf16 %v1156_v47, %v1154_v49 }
 0x124   : > { %16546 = vst [vmem:[#allocation93_spill] sm:$0xff] %v13909_v9 }
 0x125   : > { %11334 = vmatpush1.bf16.msra.mxu1 %v13897_v59  ;;  %v1147_v59 = vld [vmem:[#allocation2 + $0x550] sm:$0xff]  ;;  %16551 = vst [vmem:[#allocation98_spill] sm:$0xff] %v13924_v29 }
 0x126   : > { %11336 = vmatprep.subr.bf16.mxu1 %v13900_v17  ;;  %v13915_v2 = vpack.c.bf16 %v1147_v59, %v1145_v61  ;;  %v1149_v17 = vld [vmem:[#allocation2 + $0x560] sm:$0xff]  ;;  %v1158_v61 = vld [vmem:[#allocation2 + $0x5a8] sm:$0xff]  ;;  %v1160_v59 = vld [vmem:[#allocation2 + $0x5b8] sm:$0xff] }
 0x127   : > { %v13930_v18 = vpack.c.bf16 %v1160_v59, %v1158_v61 }
 0x128   : > { %16548 = vst [vmem:[#allocation95_spill] sm:$0xff] %v13915_v2 }
 0x129   : > { %11338 = vmatpush1.bf16.msra.mxu1 %v13903_v38  ;;  %v1151_v38 = vld [vmem:[#allocation2 + $0x570] sm:$0xff]  ;;  %16553 = vst [vmem:[#allocation100_spill] sm:$0xff] %v13930_v18 }
 0x12a   : > { %11340 = vmatprep.subr.bf16.mxu1 %v13906_v36  ;;  %v13921_v23 = vpack.c.bf16 %v1151_v38, %v1149_v17  ;;  %v1153_v36 = vld [vmem:[#allocation2 + $0x580] sm:$0xff]  ;;  %v1162_v17 = vld [vmem:[#allocation2 + $0x5c8] sm:$0xff]  ;;  %v1164_v38 = vld [vmem:[#allocation2 + $0x5d8] sm:$0xff] }
 0x12b   : > { %v13936_v47 = vpack.c.bf16 %v1164_v38, %v1162_v17  ;;  %v1545_v17 = vld [vmem:[#allocation2 + $0x800] sm:$0xff]  ;;  %v1547_v38 = vld [vmem:[#allocation2 + $0x810] sm:$0xff] }
 0x12c   : > { %16550 = vst [vmem:[#allocation97_spill] sm:$0xff] %v13921_v23 }
 0x12d   : > { %11342 = vmatpush1.bf16.msra.mxu1 %v13909_v9  ;;  %v1155_v9 = vld [vmem:[#allocation2 + $0x590] sm:$0xff]  ;;  %16555 = vst [vmem:[#allocation102_spill] sm:$0xff] %v13936_v47 }
 0x12e   : > { %11344 = vmatprep.subr.bf16.mxu1 %v13912_v21  ;;  %v13927_v54 = vpack.c.bf16 %v1155_v9, %v1153_v36  ;;  %v1157_v21 = vld [vmem:[#allocation2 + $0x5a0] sm:$0xff]  ;;  %v1166_v36 = vld [vmem:[#allocation2 + $0x5e8] sm:$0xff]  ;;  %v1168_v9 = vld [vmem:[#allocation2 + $0x5f8] sm:$0xff] }
 0x12f   : > { %v13942_v59 = vpack.c.bf16 %v1168_v9, %v1166_v36  ;;  %v13954_v9 = vpack.c.bf16 %v1547_v38, %v1545_v17  ;;  %v1555_v17 = vld [vmem:[#allocation2 + $0x850] sm:$0xff] }
 0x130   : > { %16552 = vst [vmem:[#allocation99_spill] sm:$0xff] %v13927_v54 }
 0x131   : > { %11346 = vmatpush1.bf16.msra.mxu1 %v13915_v2  ;;  %v1159_v2 = vld [vmem:[#allocation2 + $0x5b0] sm:$0xff]  ;;  %16557 = vst [vmem:[#allocation104_spill] sm:$0xff] %v13942_v59  ;;  %16560 = vst [vmem:[#allocation107_spill] sm:$0xff] %v13954_v9 }
 0x132   : > { %11348 = vmatprep.subr.bf16.mxu1 %v13918_v50  ;;  %v13933_v49 = vpack.c.bf16 %v1159_v2, %v1157_v21  ;;  %v1161_v50 = vld [vmem:[#allocation2 + $0x5c0] sm:$0xff]  ;;  %v16202_v2 = vmov 0.0  }
 0x133   : > { %1017 = vmatprep.mubr.f32.mxu0 %v16202_v2  ;;  %v1554_v2 = vld [vmem:[#allocation2 + $0x848] sm:$0xff] }
 0x134   : > { %16554 = vst [vmem:[#allocation101_spill] sm:$0xff] %v13933_v49 }
 0x135   : > { %11350 = vmatpush1.bf16.msra.mxu1 %v13921_v23  ;;  %v1163_v23 = vld [vmem:[#allocation2 + $0x5d0] sm:$0xff] }
 0x136   : > { %11352 = vmatprep.subr.bf16.mxu1 %v13924_v29  ;;  %v13939_v61 = vpack.c.bf16 %v1163_v23, %v1161_v50  ;;  %v1165_v29 = vld [vmem:[#allocation2 + $0x5e0] sm:$0xff]  ;;  %v1546_v50 = vld [vmem:[#allocation2 + $0x808] sm:$0xff]  ;;  %v1548_v23 = vld [vmem:[#allocation2 + $0x818] sm:$0xff] }
 0x137   : > { %v13952_v36 = vpack.c.bf16 %v1548_v23, %v1546_v50  ;;  %v1556_v50 = vld [vmem:[#allocation2 + $0x858] sm:$0xff]  ;;  %v1553_v23 = vld [vmem:[#allocation2 + $0x840] sm:$0xff] }
 0x138   : > { %16556 = vst [vmem:[#allocation103_spill] sm:$0xff] %v13939_v61  ;;  %v13964_v38 = vpack.c.bf16 %v1556_v50, %v1554_v2  ;;  %v1564_v2 = vld [vmem:[#allocation2 + $0x898] sm:$0xff]  ;;  %v1561_v50 = vld [vmem:[#allocation2 + $0x880] sm:$0xff] }
 0x139   : > { %11354 = vmatpush1.bf16.msra.mxu1 %v13927_v54  ;;  %v1167_v54 = vld [vmem:[#allocation2 + $0x5f0] sm:$0xff]  ;;  %16559 = vst [vmem:[#allocation106_spill] sm:$0xff] %v13952_v36 }
 0x13a   : > { %11356 = vmatprep.subr.bf16.mxu1 %v13930_v18  ;;  %v13945_v21 = vpack.c.bf16 %v1167_v54, %v1165_v29  ;;  %v1550_v29 = vld [vmem:[#allocation2 + $0x828] sm:$0xff]  ;;  %v1552_v54 = vld [vmem:[#allocation2 + $0x838] sm:$0xff]  ;;  %16563 = vst [vmem:[#allocation110_spill] sm:$0xff] %v13964_v38 }
 0x13b   : > { %v1334_v18 = vld [vmem:[#allocation2 + $0x648] sm:$0xff] }
 0x13c   : > { %16558 = vst [vmem:[#allocation105_spill] sm:$0xff] %v13945_v21 }
 0x13d   : > { %11358 = vmatpush1.bf16.msra.mxu1 %v13933_v49 }
 0x13e   : > { %11360 = vmatprep.subr.bf16.mxu1 %v13936_v47 }
 0x141   : > { %11362 = vmatpush1.bf16.msra.mxu1 %v13939_v61  ;;  %v13958_v61 = vpack.c.bf16 %v1552_v54, %v1550_v29  ;;  %v1560_v29 = vld [vmem:[#allocation2 + $0x878] sm:$0xff] }
 0x142   : > { %11364 = vmatprep.subr.bf16.mxu1 %v13942_v59  ;;  %v1551_v59 = vld [vmem:[#allocation2 + $0x830] sm:$0xff] }
 0x143   : > { %16561 = vst [vmem:[#allocation108_spill] sm:$0xff] %v13958_v61 }
 0x145   : > { %11366 = vmatpush1.bf16.msra.mxu1 %v13945_v21  ;;  %v1549_v21 = vld [vmem:[#allocation2 + $0x820] sm:$0xff] }
 0x146   : > { %11432 = vmatprep.subr.bf16.mxu1 %v13952_v36  ;;  %v13960_v47 = vpack.c.bf16 %v1551_v59, %v1549_v21  ;;  %v13966_v36 = vpack.c.bf16 %v1555_v17, %v1553_v23  ;;  %v1557_v59 = vld [vmem:[#allocation2 + $0x860] sm:$0xff]  ;;  %v1559_v21 = vld [vmem:[#allocation2 + $0x870] sm:$0xff] }
 0x147   : > { %v1563_v23 = vld [vmem:[#allocation2 + $0x890] sm:$0xff] }
 0x148   : > { %1234 = vmatmul.mubr.f32.vlgmr.msra.gmra.mrb[2].mxu1 %v13706_v0  ;;  %16562 = vst [vmem:[#allocation109_spill] sm:$0xff] %v13960_v47  ;;  %16564 = vst [vmem:[#allocation111_spill] sm:$0xff] %v13966_v36 }
 0x149   : > { %1673 = vmatprep.mubr.f32.mxu1 %v13710_v4  ;;  %11434 = vmatpush1.bf16.msra.mxu1 %v13954_v9  ;;  %v1558_v9 = vld [vmem:[#allocation2 + $0x868] sm:$0xff] }
 0x14a   : > { %11436 = vmatprep.subr.bf16.mxu1 %v13958_v61  ;;  %v13970_v54 = vpack.c.bf16 %v1560_v29, %v1558_v9  ;;  %v13972_v61 = vpack.c.bf16 %v1559_v21, %v1557_v59  ;;  %v1568_v9 = vld [vmem:[#allocation2 + $0x8b8] sm:$0xff]  ;;  %v1565_v29 = vld [vmem:[#allocation2 + $0x8a0] sm:$0xff]  ;;  %v1567_v59 = vld [vmem:[#allocation2 + $0x8b0] sm:$0xff] }
 0x14c   : > { %16565 = vst [vmem:[#allocation112_spill] sm:$0xff] %v13970_v54  ;;  %16566 = vst [vmem:[#allocation113_spill] sm:$0xff] %v13972_v61 }
 0x14d   : > { %11438 = vmatpush1.bf16.msra.mxu1 %v13960_v47  ;;  %v1562_v47 = vld [vmem:[#allocation2 + $0x888] sm:$0xff] }
 0x14e   : > { %11440 = vmatprep.subr.bf16.mxu1 %v13964_v38  ;;  %v13976_v17 = vpack.c.bf16 %v1564_v2, %v1562_v47  ;;  %v13978_v38 = vpack.c.bf16 %v1563_v23, %v1561_v50  ;;  %v1572_v47 = vld [vmem:[#allocation2 + $0x8d8] sm:$0xff]  ;;  %v1569_v2 = vld [vmem:[#allocation2 + $0x8c0] sm:$0xff]  ;;  %v1571_v50 = vld [vmem:[#allocation2 + $0x8d0] sm:$0xff] }
 0x150   : > { %16567 = vst [vmem:[#allocation114_spill] sm:$0xff] %v13976_v17  ;;  %16568 = vst [vmem:[#allocation115_spill] sm:$0xff] %v13978_v38 }
 0x151   : > { %11442 = vmatpush1.bf16.msra.mxu1 %v13966_v36  ;;  %v1566_v36 = vld [vmem:[#allocation2 + $0x8a8] sm:$0xff] }
 0x152   : > { %11444 = vmatprep.subr.bf16.mxu1 %v13970_v54  ;;  %v13982_v21 = vpack.c.bf16 %v1568_v9, %v1566_v36  ;;  %v13984_v54 = vpack.c.bf16 %v1567_v59, %v1565_v29  ;;  %v1576_v36 = vld [vmem:[#allocation2 + $0x8f8] sm:$0xff]  ;;  %v1573_v9 = vld [vmem:[#allocation2 + $0x8e0] sm:$0xff]  ;;  %v1575_v29 = vld [vmem:[#allocation2 + $0x8f0] sm:$0xff] }
 0x154   : > { %16569 = vst [vmem:[#allocation116_spill] sm:$0xff] %v13982_v21  ;;  %16570 = vst [vmem:[#allocation117_spill] sm:$0xff] %v13984_v54 }
 0x155   : > { %11446 = vmatpush1.bf16.msra.mxu1 %v13972_v61  ;;  %v1570_v61 = vld [vmem:[#allocation2 + $0x8c8] sm:$0xff] }
 0x156   : > { %11448 = vmatprep.subr.bf16.mxu1 %v13976_v17  ;;  %v13988_v23 = vpack.c.bf16 %v1572_v47, %v1570_v61  ;;  %v13990_v17 = vpack.c.bf16 %v1571_v50, %v1569_v2  ;;  %v1580_v61 = vld [vmem:[#allocation2 + $0x918] sm:$0xff]  ;;  %v1577_v47 = vld [vmem:[#allocation2 + $0x900] sm:$0xff]  ;;  %v1579_v2 = vld [vmem:[#allocation2 + $0x910] sm:$0xff] }
 0x158   : > { %16571 = vst [vmem:[#allocation118_spill] sm:$0xff] %v13988_v23  ;;  %16572 = vst [vmem:[#allocation119_spill] sm:$0xff] %v13990_v17 }
 0x159   : > { %11450 = vmatpush1.bf16.msra.mxu1 %v13978_v38  ;;  %v1574_v38 = vld [vmem:[#allocation2 + $0x8e8] sm:$0xff] }
 0x15a   : > { %11452 = vmatprep.subr.bf16.mxu1 %v13982_v21  ;;  %v13994_v59 = vpack.c.bf16 %v1576_v36, %v1574_v38  ;;  %v13996_v21 = vpack.c.bf16 %v1575_v29, %v1573_v9  ;;  %v1584_v38 = vld [vmem:[#allocation2 + $0x938] sm:$0xff]  ;;  %v1581_v36 = vld [vmem:[#allocation2 + $0x920] sm:$0xff]  ;;  %v1583_v9 = vld [vmem:[#allocation2 + $0x930] sm:$0xff] }
 0x15c   : > { %16573 = vst [vmem:[#allocation120_spill] sm:$0xff] %v13994_v59  ;;  %16574 = vst [vmem:[#allocation121_spill] sm:$0xff] %v13996_v21 }
 0x15d   : > { %11454 = vmatpush1.bf16.msra.mxu1 %v13984_v54  ;;  %v1578_v54 = vld [vmem:[#allocation2 + $0x908] sm:$0xff] }
 0x15e   : > { %11456 = vmatprep.subr.bf16.mxu1 %v13988_v23  ;;  %v14000_v50 = vpack.c.bf16 %v1580_v61, %v1578_v54  ;;  %v14002_v23 = vpack.c.bf16 %v1579_v2, %v1577_v47  ;;  %v1588_v54 = vld [vmem:[#allocation2 + $0x958] sm:$0xff]  ;;  %v1585_v61 = vld [vmem:[#allocation2 + $0x940] sm:$0xff]  ;;  %v1587_v47 = vld [vmem:[#allocation2 + $0x950] sm:$0xff] }
 0x160   : > { %16575 = vst [vmem:[#allocation122_spill] sm:$0xff] %v14000_v50  ;;  %16576 = vst [vmem:[#allocation123_spill] sm:$0xff] %v14002_v23 }
 0x161   : > { %11458 = vmatpush1.bf16.msra.mxu1 %v13990_v17  ;;  %v1582_v17 = vld [vmem:[#allocation2 + $0x928] sm:$0xff] }
 0x162   : > { %11460 = vmatprep.subr.bf16.mxu1 %v13994_v59  ;;  %v14006_v29 = vpack.c.bf16 %v1584_v38, %v1582_v17  ;;  %v14008_v59 = vpack.c.bf16 %v1583_v9, %v1581_v36  ;;  %v1592_v17 = vld [vmem:[#allocation2 + $0x978] sm:$0xff]  ;;  %v1589_v38 = vld [vmem:[#allocation2 + $0x960] sm:$0xff]  ;;  %v1591_v36 = vld [vmem:[#allocation2 + $0x970] sm:$0xff] }
 0x164   : > { %16577 = vst [vmem:[#allocation124_spill] sm:$0xff] %v14006_v29  ;;  %16578 = vst [vmem:[#allocation125_spill] sm:$0xff] %v14008_v59 }
 0x165   : > { %11462 = vmatpush1.bf16.msra.mxu1 %v13996_v21  ;;  %v1586_v21 = vld [vmem:[#allocation2 + $0x948] sm:$0xff] }
 0x166   : > { %11464 = vmatprep.subr.bf16.mxu1 %v14000_v50  ;;  %v14012_v2 = vpack.c.bf16 %v1588_v54, %v1586_v21  ;;  %v14014_v50 = vpack.c.bf16 %v1587_v47, %v1585_v61  ;;  %v1596_v21 = vld [vmem:[#allocation2 + $0x998] sm:$0xff]  ;;  %v1593_v54 = vld [vmem:[#allocation2 + $0x980] sm:$0xff]  ;;  %v1595_v61 = vld [vmem:[#allocation2 + $0x990] sm:$0xff] }
 0x168   : > { %16579 = vst [vmem:[#allocation126_spill] sm:$0xff] %v14012_v2  ;;  %16580 = vst [vmem:[#allocation127_spill] sm:$0xff] %v14014_v50 }
 0x169   : > { %11466 = vmatpush1.bf16.msra.mxu1 %v14002_v23  ;;  %v1590_v23 = vld [vmem:[#allocation2 + $0x968] sm:$0xff] }
 0x16a   : > { %11468 = vmatprep.subr.bf16.mxu1 %v14006_v29  ;;  %v14018_v9 = vpack.c.bf16 %v1592_v17, %v1590_v23  ;;  %v14020_v29 = vpack.c.bf16 %v1591_v36, %v1589_v38  ;;  %v1600_v23 = vld [vmem:[#allocation2 + $0x9b8] sm:$0xff]  ;;  %v1597_v17 = vld [vmem:[#allocation2 + $0x9a0] sm:$0xff]  ;;  %v1599_v38 = vld [vmem:[#allocation2 + $0x9b0] sm:$0xff] }
 0x16c   : > { %16581 = vst [vmem:[#allocation128_spill] sm:$0xff] %v14018_v9  ;;  %16582 = vst [vmem:[#allocation129_spill] sm:$0xff] %v14020_v29 }
 0x16d   : > { %11470 = vmatpush1.bf16.msra.mxu1 %v14008_v59  ;;  %v1594_v59 = vld [vmem:[#allocation2 + $0x988] sm:$0xff] }
 0x16e   : > { %11472 = vmatprep.subr.bf16.mxu1 %v14012_v2  ;;  %v14024_v47 = vpack.c.bf16 %v1596_v21, %v1594_v59  ;;  %v14026_v2 = vpack.c.bf16 %v1595_v61, %v1593_v54  ;;  %v1604_v59 = vld [vmem:[#allocation2 + $0x9d8] sm:$0xff]  ;;  %v1601_v21 = vld [vmem:[#allocation2 + $0x9c0] sm:$0xff]  ;;  %v1603_v54 = vld [vmem:[#allocation2 + $0x9d0] sm:$0xff] }
 0x170   : > { %16583 = vst [vmem:[#allocation130_spill] sm:$0xff] %v14024_v47  ;;  %16584 = vst [vmem:[#allocation131_spill] sm:$0xff] %v14026_v2 }
 0x171   : > { %11474 = vmatpush1.bf16.msra.mxu1 %v14014_v50  ;;  %v1598_v50 = vld [vmem:[#allocation2 + $0x9a8] sm:$0xff] }
 0x172   : > { %11476 = vmatprep.subr.bf16.mxu1 %v14018_v9  ;;  %v14030_v36 = vpack.c.bf16 %v1600_v23, %v1598_v50  ;;  %v14032_v9 = vpack.c.bf16 %v1599_v38, %v1597_v17  ;;  %v9680_v50 = vld [vmem:[%s16131_s8 + $0x8] sm:$0xff]  ;;  %v1608_v17 = vld [vmem:[#allocation2 + $0x9f8] sm:$0xff]  ;;  %v1605_v38 = vld [vmem:[#allocation2 + $0x9e0] sm:$0xff] }
 0x173   : > { %v1606_v23 = vld [vmem:[#allocation2 + $0x9e8] sm:$0xff] }
 0x174   : > { %16585 = vst [vmem:[#allocation132_spill] sm:$0xff] %v14030_v36  ;;  %16586 = vst [vmem:[#allocation133_spill] sm:$0xff] %v14032_v9 }
 0x175   : > { %11478 = vmatpush1.bf16.msra.mxu1 %v14020_v29  ;;  %v1602_v29 = vld [vmem:[#allocation2 + $0x9c8] sm:$0xff] }
 0x176   : > { %11480 = vmatprep.subr.bf16.mxu1 %v14024_v47  ;;  %v14036_v47 = vpack.c.bf16 %v1604_v59, %v1602_v29  ;;  %v14047_v29 = vpack.c.bf16 %v1608_v17, %v1606_v23  ;;  %v1607_v59 = vld [vmem:[#allocation2 + $0x9f0] sm:$0xff]  ;;  %v803_v23 = vld [vmem:[%s16131_s8] sm:$0xff]  ;;  %v1328_v17 = vld [vmem:[#allocation2 + $0x618] sm:$0xff] }
 0x178   : > { %16587 = vst [vmem:[#allocation134_spill] sm:$0xff] %v14036_v47  ;;  %16589 = vst [vmem:[#allocation136_spill] sm:$0xff] %v14047_v29 }
 0x179   : > { %11482 = vmatpush1.bf16.msra.mxu1 %v14026_v2  ;;  %v14038_v2 = vpack.c.bf16 %v1603_v54, %v1601_v21  ;;  %v14050_v21 = vpack.c.bf16 %v1607_v59, %v1605_v38  ;;  %v16591_v54 = vmov 0.0   ;;  %v1325_v38 = vld [vmem:[#allocation2 + $0x600] sm:$0xff]  ;;  %v1330_v59 = vld [vmem:[#allocation2 + $0x628] sm:$0xff] }
 0x17a   : > { %11484 = vmatprep.subr.bf16.mxu1 %v14030_v36  ;;  %v1331_v36 = vld [vmem:[#allocation2 + $0x630] sm:$0xff] }
 0x17b   : > { %16588 = vst [vmem:[#allocation135_spill] sm:$0xff] %v14038_v2  ;;  %16590 = vst [vmem:[#allocation137_spill] sm:$0xff] %v14050_v21 }
 0x17d   : > { %11486 = vmatpush1.bf16.msra.mxu1 %v14032_v9 }
 0x17e   : > { %11488 = vmatprep.subr.bf16.mxu1 %v14036_v47 }
 0x181   : > { %11490 = vmatpush1.bf16.msra.mxu1 %v14038_v2 }
 0x182   : > { %11492 = vmatprep.subr.bf16.mxu1 %v14047_v29 }
 0x185   : > { %11494 = vmatpush1.bf16.msra.mxu1 %v14050_v21  ;;  %v1332_v21 = vld [vmem:[#allocation2 + $0x638] sm:$0xff] }
 0x188   : > { %1674 = vmatmul.mubr.f32.vlgmr.msra.gmra.mrb[4].mxu1 %v13706_v0  ;;  %v1327_v0 = vld [vmem:[#allocation2 + $0x610] sm:$0xff] }
 0x189   : > { %2113 = vmatprep.mubr.f32.mxu1 %v13710_v4  ;;  %v14069_v9 = vpack.c.bf16 %v1327_v0, %v1325_v38  ;;  %v1338_v38 = vld [vmem:[#allocation2 + $0x668] sm:$0xff] }
 0x18b   : > { %16593 = vst [vmem:[#allocation139_spill] sm:$0xff] %v14069_v9 }
 0x1db   : > { %v935_v61 = vpop.f32.mrb[0].mxu1 }
 0x1dc   : > { %v937_v49 = vpop.f32.mrb[1].mxu1 }
 0x1dd   : > { %9681 = vmatprep.subr.msk.mxu0 %vm946_vm0, %v937_v49 }
 0x1de   : > { %9682 = vmatpush1.msk.msra.mxu0 %vm946_vm0, %v935_v61 }
 0x1df   : > { %9683 = vmatmul.mubr.msk.f32.vlgmr.msra.gmra.mrb[2].mxu0 %vm942_vm1, %v9680_v50  ;;  %v1326_v50 = vld [vmem:[#allocation2 + $0x608] sm:$0xff] }
 0x1e0   : > { %1097 = vmatprep.mubr.f32.mxu0 %v16591_v54  ;;  %v14064_v2 = vpack.c.bf16 %v1328_v17, %v1326_v50  ;;  %v1335_v17 = vld [vmem:[#allocation2 + $0x650] sm:$0xff] }
 0x1e2   : > { %16592 = vst [vmem:[#allocation138_spill] sm:$0xff] %v14064_v2 }
 0x1e4   : > { %v798_v49 = vpop.f32.mrb[0].mxu0 }
 0x1e5   : > { %v800_v61 = vpop.f32.mrb[1].mxu0 }
 0x1e6   : > { %9684 = vmatprep.subr.msk.mxu0 %vm946_vm0, %v800_v61  ;;  %v9687_v61 = vld [vmem:[%s16131_s8 + $0x10] sm:$0xff] }
 0x1e7   : > { %9685 = vmatpush1.msk.msra.mxu0 %vm946_vm0, %v798_v49  ;;  %v14072_v49 = vpack.c.bf16 %v1332_v21, %v1330_v59  ;;  %v1333_v21 = vld [vmem:[#allocation2 + $0x640] sm:$0xff] }
 0x1e8   : > { %9686 = vmatmul.mubr.msk.f32.vlgmr.msra.gmra.mrb[2].mxu0 %vm942_vm1, %v803_v23  ;;  %v1329_v23 = vld [vmem:[#allocation2 + $0x620] sm:$0xff]  ;;  %v14085_v0 = vpack.c.bf16 %v1335_v17, %v1333_v21  ;;  %v1346_v21 = vld [vmem:[#allocation2 + $0x6a8] sm:$0xff]  ;;  %v1348_v17 = vld [vmem:[#allocation2 + $0x6b8] sm:$0xff] }
 0x1e9   : > { %1315 = vmatprep.mubr.f32.mxu0 %v16591_v54  ;;  %16594 = vst [vmem:[#allocation140_spill] sm:$0xff] %v14072_v49  ;;  %v14078_v50 = vpack.c.bf16 %v1331_v36, %v1329_v23  ;;  %v1337_v36 = vld [vmem:[#allocation2 + $0x660] sm:$0xff]  ;;  %v1342_v23 = vld [vmem:[#allocation2 + $0x688] sm:$0xff] }
 0x1ea   : > { %16597 = vst [vmem:[#allocation143_spill] sm:$0xff] %v14085_v0 }
 0x1eb   : > { %16595 = vst [vmem:[#allocation141_spill] sm:$0xff] %v14078_v50 }
 0x21b   : > { %v1235_v29 = vpop.f32.mrb[2].mxu1 }
 0x21c   : > { %v1237_v47 = vpop.f32.mrb[3].mxu1 }
 0x21d   : > { %9688 = vmatprep.subr.msk.mxu0 %vm946_vm0, %v1237_v47  ;;  %v14082_v47 = vpack.c.bf16 %v1336_v15, %v1334_v18 }
 0x21e   : > { %9689 = vmatpush1.msk.msra.mxu0 %vm946_vm0, %v1235_v29  ;;  %v1340_v29 = vld [vmem:[#allocation2 + $0x678] sm:$0xff] }
 0x21f   : > { %11368 = vmatprep.subr.bf16.mxu0 %v14064_v2  ;;  %9690 = vmatmul.mubr.msk.f32.vlgmr.msra.gmra.mrb[2].mxu0 %vm942_vm1, %v9687_v61  ;;  %16596 = vst [vmem:[#allocation142_spill] sm:$0xff] %v14082_v47  ;;  %v14088_v59 = vpack.c.bf16 %v1340_v29, %v1338_v38  ;;  %v1339_v61 = vld [vmem:[#allocation2 + $0x670] sm:$0xff]  ;;  %v14100_v29 = vpack.c.bf16 %v1348_v17, %v1346_v21  ;;  %v1994_v2 = vld [vmem:[#allocation2 + $0xc48] sm:$0xff] }
 0x220   : > { %11370 = vmatpush1.bf16.msra.mxu0 %v14069_v9  ;;  %1453 = vmatprep.mubr.f32.mxu0 %v13710_v4  ;;  %v1344_v9 = vld [vmem:[#allocation2 + $0x698] sm:$0xff]  ;;  %v14091_v15 = vpack.c.bf16 %v1339_v61, %v1337_v36  ;;  %v1350_v36 = vld [vmem:[#allocation2 + $0x6c8] sm:$0xff] }
 0x221   : > { %11372 = vmatprep.subr.bf16.mxu0 %v14072_v49  ;;  %16598 = vst [vmem:[#allocation144_spill] sm:$0xff] %v14088_v59  ;;  %v14094_v18 = vpack.c.bf16 %v1344_v9, %v1342_v23  ;;  %v1341_v49 = vld [vmem:[#allocation2 + $0x680] sm:$0xff]  ;;  %16602 = vst [vmem:[#allocation148_spill] sm:$0xff] %v14100_v29  ;;  %v1352_v61 = vld [vmem:[#allocation2 + $0x6d8] sm:$0xff] }
 0x222   : > { %16599 = vst [vmem:[#allocation145_spill] sm:$0xff] %v14091_v15  ;;  %v14106_v23 = vpack.c.bf16 %v1352_v61, %v1350_v36 }
 0x223   : > { %16600 = vst [vmem:[#allocation146_spill] sm:$0xff] %v14094_v18 }
 0x224   : > { %11374 = vmatpush1.bf16.msra.mxu0 %v14078_v50  ;;  %v1343_v50 = vld [vmem:[#allocation2 + $0x690] sm:$0xff]  ;;  %16604 = vst [vmem:[#allocation150_spill] sm:$0xff] %v14106_v23 }
 0x225   : > { %11376 = vmatprep.subr.bf16.mxu0 %v14082_v47  ;;  %v14097_v38 = vpack.c.bf16 %v1343_v50, %v1341_v49  ;;  %v1345_v47 = vld [vmem:[#allocation2 + $0x6a0] sm:$0xff]  ;;  %v1354_v49 = vld [vmem:[#allocation2 + $0x6e8] sm:$0xff]  ;;  %v1356_v50 = vld [vmem:[#allocation2 + $0x6f8] sm:$0xff] }
 0x226   : > { %v14112_v17 = vpack.c.bf16 %v1356_v50, %v1354_v49 }
 0x227   : > { %16601 = vst [vmem:[#allocation147_spill] sm:$0xff] %v14097_v38 }
 0x228   : > { %11378 = vmatpush1.bf16.msra.mxu0 %v14085_v0  ;;  %v1347_v0 = vld [vmem:[#allocation2 + $0x6b0] sm:$0xff]  ;;  %16606 = vst [vmem:[#allocation152_spill] sm:$0xff] %v14112_v17 }
 0x229   : > { %11380 = vmatprep.subr.bf16.mxu0 %v14088_v59  ;;  %v14103_v9 = vpack.c.bf16 %v1347_v0, %v1345_v47  ;;  %v1349_v59 = vld [vmem:[#allocation2 + $0x6c0] sm:$0xff]  ;;  %v1358_v47 = vld [vmem:[#allocation2 + $0x708] sm:$0xff]  ;;  %v1360_v0 = vld [vmem:[#allocation2 + $0x718] sm:$0xff] }
 0x22a   : > { %v14118_v61 = vpack.c.bf16 %v1360_v0, %v1358_v47 }
 0x22b   : > { %16603 = vst [vmem:[#allocation149_spill] sm:$0xff] %v14103_v9 }
 0x22c   : > { %11382 = vmatpush1.bf16.msra.mxu0 %v14091_v15  ;;  %v1351_v15 = vld [vmem:[#allocation2 + $0x6d0] sm:$0xff]  ;;  %16608 = vst [vmem:[#allocation154_spill] sm:$0xff] %v14118_v61 }
 0x22d   : > { %11384 = vmatprep.subr.bf16.mxu0 %v14094_v18  ;;  %v14109_v21 = vpack.c.bf16 %v1351_v15, %v1349_v59  ;;  %v1353_v18 = vld [vmem:[#allocation2 + $0x6e0] sm:$0xff]  ;;  %v1362_v59 = vld [vmem:[#allocation2 + $0x728] sm:$0xff]  ;;  %v1364_v15 = vld [vmem:[#allocation2 + $0x738] sm:$0xff] }
 0x22e   : > { %v14124_v50 = vpack.c.bf16 %v1364_v15, %v1362_v59 }
 0x22f   : > { %16605 = vst [vmem:[#allocation151_spill] sm:$0xff] %v14109_v21 }
 0x230   : > { %11386 = vmatpush1.bf16.msra.mxu0 %v14097_v38  ;;  %v1355_v38 = vld [vmem:[#allocation2 + $0x6f0] sm:$0xff]  ;;  %16610 = vst [vmem:[#allocation156_spill] sm:$0xff] %v14124_v50 }
 0x231   : > { %11388 = vmatprep.subr.bf16.mxu0 %v14100_v29  ;;  %v14115_v36 = vpack.c.bf16 %v1355_v38, %v1353_v18  ;;  %v1357_v29 = vld [vmem:[#allocation2 + $0x700] sm:$0xff]  ;;  %v1366_v18 = vld [vmem:[#allocation2 + $0x748] sm:$0xff]  ;;  %v1368_v38 = vld [vmem:[#allocation2 + $0x758] sm:$0xff] }
 0x232   : > { %v14130_v0 = vpack.c.bf16 %v1368_v38, %v1366_v18 }
 0x233   : > { %16607 = vst [vmem:[#allocation153_spill] sm:$0xff] %v14115_v36 }
 0x234   : > { %11390 = vmatpush1.bf16.msra.mxu0 %v14103_v9  ;;  %v1359_v9 = vld [vmem:[#allocation2 + $0x710] sm:$0xff]  ;;  %16612 = vst [vmem:[#allocation158_spill] sm:$0xff] %v14130_v0 }
 0x235   : > { %11392 = vmatprep.subr.bf16.mxu0 %v14106_v23  ;;  %v14121_v49 = vpack.c.bf16 %v1359_v9, %v1357_v29  ;;  %v1361_v23 = vld [vmem:[#allocation2 + $0x720] sm:$0xff]  ;;  %v1370_v29 = vld [vmem:[#allocation2 + $0x768] sm:$0xff]  ;;  %v1372_v9 = vld [vmem:[#allocation2 + $0x778] sm:$0xff] }
 0x236   : > { %v14136_v15 = vpack.c.bf16 %v1372_v9, %v1370_v29 }
 0x237   : > { %16609 = vst [vmem:[#allocation155_spill] sm:$0xff] %v14121_v49 }
 0x238   : > { %11394 = vmatpush1.bf16.msra.mxu0 %v14109_v21  ;;  %v1363_v21 = vld [vmem:[#allocation2 + $0x730] sm:$0xff]  ;;  %16614 = vst [vmem:[#allocation160_spill] sm:$0xff] %v14136_v15 }
 0x239   : > { %11396 = vmatprep.subr.bf16.mxu0 %v14112_v17  ;;  %v14127_v47 = vpack.c.bf16 %v1363_v21, %v1361_v23  ;;  %v1365_v17 = vld [vmem:[#allocation2 + $0x740] sm:$0xff]  ;;  %v1374_v23 = vld [vmem:[#allocation2 + $0x788] sm:$0xff]  ;;  %v1376_v21 = vld [vmem:[#allocation2 + $0x798] sm:$0xff] }
 0x23a   : > { %v14142_v38 = vpack.c.bf16 %v1376_v21, %v1374_v23 }
 0x23b   : > { %16611 = vst [vmem:[#allocation157_spill] sm:$0xff] %v14127_v47 }
 0x23c   : > { %11398 = vmatpush1.bf16.msra.mxu0 %v14115_v36  ;;  %v1367_v36 = vld [vmem:[#allocation2 + $0x750] sm:$0xff]  ;;  %16616 = vst [vmem:[#allocation162_spill] sm:$0xff] %v14142_v38 }
 0x23d   : > { %11400 = vmatprep.subr.bf16.mxu0 %v14118_v61  ;;  %v14133_v59 = vpack.c.bf16 %v1367_v36, %v1365_v17  ;;  %v1369_v61 = vld [vmem:[#allocation2 + $0x760] sm:$0xff]  ;;  %v1378_v17 = vld [vmem:[#allocation2 + $0x7a8] sm:$0xff]  ;;  %v1380_v36 = vld [vmem:[#allocation2 + $0x7b8] sm:$0xff] }
 0x23e   : > { %v14148_v9 = vpack.c.bf16 %v1380_v36, %v1378_v17 }
 0x23f   : > { %16613 = vst [vmem:[#allocation159_spill] sm:$0xff] %v14133_v59 }
 0x240   : > { %11402 = vmatpush1.bf16.msra.mxu0 %v14121_v49  ;;  %v1371_v49 = vld [vmem:[#allocation2 + $0x770] sm:$0xff]  ;;  %16618 = vst [vmem:[#allocation164_spill] sm:$0xff] %v14148_v9 }
 0x241   : > { %11404 = vmatprep.subr.bf16.mxu0 %v14124_v50  ;;  %v14139_v18 = vpack.c.bf16 %v1371_v49, %v1369_v61  ;;  %v1373_v50 = vld [vmem:[#allocation2 + $0x780] sm:$0xff]  ;;  %v1382_v61 = vld [vmem:[#allocation2 + $0x7c8] sm:$0xff]  ;;  %v1384_v49 = vld [vmem:[#allocation2 + $0x7d8] sm:$0xff] }
 0x242   : > { %v14154_v21 = vpack.c.bf16 %v1384_v49, %v1382_v61  ;;  %v14168_v61 = vld [vmem:[%s13691_s6] sm:$0x77]  ;;  %v1986_v49 = vld [vmem:[#allocation2 + $0xc08] sm:$0xff] }
 0x243   : > { %16615 = vst [vmem:[#allocation161_spill] sm:$0xff] %v14139_v18 }
 0x244   : > { %11406 = vmatpush1.bf16.msra.mxu0 %v14127_v47  ;;  %v1375_v47 = vld [vmem:[#allocation2 + $0x790] sm:$0xff]  ;;  %16620 = vst [vmem:[#allocation166_spill] sm:$0xff] %v14154_v21 }
 0x245   : > { %11408 = vmatprep.subr.bf16.mxu0 %v14130_v0  ;;  %v14145_v29 = vpack.c.bf16 %v1375_v47, %v1373_v50  ;;  %v1377_v0 = vld [vmem:[#allocation2 + $0x7a0] sm:$0xff]  ;;  %v1383_v50 = vld [vmem:[#allocation2 + $0x7d0] sm:$0xff]  ;;  %v1386_v47 = vld [vmem:[#allocation2 + $0x7e8] sm:$0xff] }
 0x247   : > { %16617 = vst [vmem:[#allocation163_spill] sm:$0xff] %v14145_v29 }
 0x248   : > { %11410 = vmatpush1.bf16.msra.mxu0 %v14133_v59  ;;  %v1379_v59 = vld [vmem:[#allocation2 + $0x7b0] sm:$0xff] }
 0x249   : > { %11412 = vmatprep.subr.bf16.mxu0 %v14136_v15  ;;  %v14151_v23 = vpack.c.bf16 %v1379_v59, %v1377_v0  ;;  %v1388_v15 = vld [vmem:[#allocation2 + $0x7f8] sm:$0xff]  ;;  %v1387_v0 = vld [vmem:[#allocation2 + $0x7f0] sm:$0xff] }
 0x24a   : > { %v14160_v36 = vpack.c.bf16 %v1388_v15, %v1386_v47  ;;  %v1985_v47 = vld [vmem:[#allocation2 + $0xc00] sm:$0xff] }
 0x24b   : > { %16619 = vst [vmem:[#allocation165_spill] sm:$0xff] %v14151_v23 }
 0x24c   : > { %11414 = vmatpush1.bf16.msra.mxu0 %v14139_v18  ;;  %v1381_v18 = vld [vmem:[#allocation2 + $0x7c0] sm:$0xff]  ;;  %16622 = vst [vmem:[#allocation168_spill] sm:$0xff] %v14160_v36 }
 0x24d   : > { %11416 = vmatprep.subr.bf16.mxu0 %v14142_v38  ;;  %v14157_v17 = vpack.c.bf16 %v1383_v50, %v1381_v18  ;;  %v1988_v50 = vld [vmem:[#allocation2 + $0xc18] sm:$0xff] }
 0x24f   : > { %16621 = vst [vmem:[#allocation167_spill] sm:$0xff] %v14157_v17 }
 0x250   : > { %11418 = vmatpush1.bf16.msra.mxu0 %v14145_v29  ;;  %v1385_v29 = vld [vmem:[#allocation2 + $0x7e0] sm:$0xff] }
 0x251   : > { %11420 = vmatprep.subr.bf16.mxu0 %v14148_v9  ;;  %v14163_v59 = vpack.c.bf16 %v1387_v0, %v1385_v29  ;;  %v14176_v29 = vpack.c.bf16 %v1988_v50, %v1986_v49  ;;  %v1996_v49 = vld [vmem:[#allocation2 + $0xc58] sm:$0xff]  ;;  %v1995_v50 = vld [vmem:[#allocation2 + $0xc50] sm:$0xff] }
 0x253   : > { %16623 = vst [vmem:[#allocation169_spill] sm:$0xff] %v14163_v59  ;;  %16624 = vst [vmem:[#allocation170_spill] sm:$0xff] %v14176_v29  ;;  %11560 = vmatprep.subr.bf16.mxu1 %v14176_v29 }
 0x254   : > { %11422 = vmatpush1.bf16.msra.mxu0 %v14151_v23  ;;  %v1991_v23 = vld [vmem:[#allocation2 + $0xc30] sm:$0xff] }
 0x255   : > { %11424 = vmatprep.subr.bf16.mxu0 %v14154_v21  ;;  %v1989_v21 = vld [vmem:[#allocation2 + $0xc20] sm:$0xff] }
 0x256   : > { %v14184_v38 = vpack.c.bf16 %v1991_v23, %v1989_v21  ;;  %v1997_v23 = vld [vmem:[#allocation2 + $0xc60] sm:$0xff]  ;;  %v1999_v21 = vld [vmem:[#allocation2 + $0xc70] sm:$0xff] }
 0x258   : > { %11426 = vmatpush1.bf16.msra.mxu0 %v14157_v17  ;;  %v1987_v17 = vld [vmem:[#allocation2 + $0xc10] sm:$0xff]  ;;  %16627 = vst [vmem:[#allocation173_spill] sm:$0xff] %v14184_v38 }
 0x259   : > { %11428 = vmatprep.subr.bf16.mxu0 %v14160_v36  ;;  %v14178_v0 = vpack.c.bf16 %v1987_v17, %v1985_v47  ;;  %v1992_v36 = vld [vmem:[#allocation2 + $0xc38] sm:$0xff]  ;;  %v1993_v17 = vld [vmem:[#allocation2 + $0xc40] sm:$0xff]  ;;  %v14188_v47 = vpack.c.bf16 %v1996_v49, %v1994_v2 }
 0x25a   : > { %v14190_v29 = vpack.c.bf16 %v1995_v50, %v1993_v17  ;;  %v2004_v2 = vld [vmem:[#allocation2 + $0xc98] sm:$0xff]  ;;  %v2001_v49 = vld [vmem:[#allocation2 + $0xc80] sm:$0xff]  ;;  %v2003_v17 = vld [vmem:[#allocation2 + $0xc90] sm:$0xff] }
 0x25b   : > { %v14172_v18 = vpop.f32.mrb[4].mxu1  ;;  %16625 = vst [vmem:[#allocation171_spill] sm:$0xff] %v14178_v0  ;;  %11562 = vmatpush1.bf16.msra.mxu1 %v14178_v0  ;;  %16628 = vst [vmem:[#allocation174_spill] sm:$0xff] %v14188_v47  ;;  %v1998_v0 = vld [vmem:[#allocation2 + $0xc68] sm:$0xff] }
 0x25c   : > { %11430 = vmatpush1.bf16.msra.mxu0 %v14163_v59  ;;  %v14174_v15 = vpop.f32.mrb[5].mxu1  ;;  %v1990_v59 = vld [vmem:[#allocation2 + $0xc28] sm:$0xff]  ;;  %16629 = vst [vmem:[#allocation175_spill] sm:$0xff] %v14190_v29 }
 0x25d   : > { %v14182_v9 = vpack.c.bf16 %v1992_v36, %v1990_v59  ;;  %v2000_v36 = vld [vmem:[#allocation2 + $0xc78] sm:$0xff] }
 0x25e   : > { %v14194_v59 = vpack.c.bf16 %v2000_v36, %v1998_v0  ;;  %v2008_v0 = vld [vmem:[#allocation2 + $0xcb8] sm:$0xff]  ;;  %v2005_v36 = vld [vmem:[#allocation2 + $0xca0] sm:$0xff] }
 0x25f   : > { %1454 = vmatmul.mubr.f32.vlgmr.msra.gmra.mrb[4].mxu0 %v14168_v61  ;;  %16626 = vst [vmem:[#allocation172_spill] sm:$0xff] %v14182_v9  ;;  %11564 = vmatprep.subr.bf16.mxu1 %v14182_v9  ;;  %v14196_v9 = vpack.c.bf16 %v1999_v21, %v1997_v23  ;;  %v2007_v23 = vld [vmem:[#allocation2 + $0xcb0] sm:$0xff] }
 0x260   : > { %1535 = vmatprep.mubr.f32.mxu0 %v16591_v54  ;;  %11566 = vmatpush1.bf16.msra.mxu1 %v14184_v38  ;;  %16630 = vst [vmem:[#allocation176_spill] sm:$0xff] %v14194_v59  ;;  %v2002_v38 = vld [vmem:[#allocation2 + $0xc88] sm:$0xff] }
 0x261   : > { %11568 = vmatprep.subr.bf16.mxu1 %v14188_v47  ;;  %16631 = vst [vmem:[#allocation177_spill] sm:$0xff] %v14196_v9  ;;  %v14200_v50 = vpack.c.bf16 %v2004_v2, %v2002_v38  ;;  %v14202_v47 = vpack.c.bf16 %v2003_v17, %v2001_v49  ;;  %v2012_v38 = vld [vmem:[#allocation2 + $0xcd8] sm:$0xff]  ;;  %v2009_v2 = vld [vmem:[#allocation2 + $0xcc0] sm:$0xff]  ;;  %v2011_v49 = vld [vmem:[#allocation2 + $0xcd0] sm:$0xff] }
 0x263   : > { %16632 = vst [vmem:[#allocation178_spill] sm:$0xff] %v14200_v50  ;;  %16633 = vst [vmem:[#allocation179_spill] sm:$0xff] %v14202_v47 }
 0x264   : > { %11570 = vmatpush1.bf16.msra.mxu1 %v14190_v29  ;;  %v2006_v29 = vld [vmem:[#allocation2 + $0xca8] sm:$0xff] }
 0x265   : > { %11572 = vmatprep.subr.bf16.mxu1 %v14194_v59  ;;  %v14206_v21 = vpack.c.bf16 %v2008_v0, %v2006_v29  ;;  %v14208_v59 = vpack.c.bf16 %v2007_v23, %v2005_v36  ;;  %v2016_v29 = vld [vmem:[#allocation2 + $0xcf8] sm:$0xff]  ;;  %v2013_v0 = vld [vmem:[#allocation2 + $0xce0] sm:$0xff]  ;;  %v2015_v36 = vld [vmem:[#allocation2 + $0xcf0] sm:$0xff] }
 0x267   : > { %16634 = vst [vmem:[#allocation180_spill] sm:$0xff] %v14206_v21  ;;  %16635 = vst [vmem:[#allocation181_spill] sm:$0xff] %v14208_v59 }
 0x268   : > { %11574 = vmatpush1.bf16.msra.mxu1 %v14196_v9  ;;  %v2010_v9 = vld [vmem:[#allocation2 + $0xcc8] sm:$0xff] }
 0x269   : > { %11576 = vmatprep.subr.bf16.mxu1 %v14200_v50  ;;  %v14212_v17 = vpack.c.bf16 %v2012_v38, %v2010_v9  ;;  %v14214_v50 = vpack.c.bf16 %v2011_v49, %v2009_v2  ;;  %v2020_v9 = vld [vmem:[#allocation2 + $0xd18] sm:$0xff]  ;;  %v2017_v38 = vld [vmem:[#allocation2 + $0xd00] sm:$0xff]  ;;  %v2019_v2 = vld [vmem:[#allocation2 + $0xd10] sm:$0xff] }
 0x26b   : > { %16636 = vst [vmem:[#allocation182_spill] sm:$0xff] %v14212_v17  ;;  %16637 = vst [vmem:[#allocation183_spill] sm:$0xff] %v14214_v50 }
 0x26c   : > { %11578 = vmatpush1.bf16.msra.mxu1 %v14202_v47  ;;  %v2014_v47 = vld [vmem:[#allocation2 + $0xce8] sm:$0xff] }
 0x26d   : > { %11580 = vmatprep.subr.bf16.mxu1 %v14206_v21  ;;  %v14218_v23 = vpack.c.bf16 %v2016_v29, %v2014_v47  ;;  %v14220_v21 = vpack.c.bf16 %v2015_v36, %v2013_v0  ;;  %v2024_v47 = vld [vmem:[#allocation2 + $0xd38] sm:$0xff]  ;;  %v2021_v29 = vld [vmem:[#allocation2 + $0xd20] sm:$0xff]  ;;  %v2023_v0 = vld [vmem:[#allocation2 + $0xd30] sm:$0xff] }
 0x26f   : > { %16638 = vst [vmem:[#allocation184_spill] sm:$0xff] %v14218_v23  ;;  %16639 = vst [vmem:[#allocation185_spill] sm:$0xff] %v14220_v21 }
 0x270   : > { %11582 = vmatpush1.bf16.msra.mxu1 %v14208_v59  ;;  %v2018_v59 = vld [vmem:[#allocation2 + $0xd08] sm:$0xff] }
 0x271   : > { %11584 = vmatprep.subr.bf16.mxu1 %v14212_v17  ;;  %v14224_v49 = vpack.c.bf16 %v2020_v9, %v2018_v59  ;;  %v14226_v17 = vpack.c.bf16 %v2019_v2, %v2017_v38  ;;  %v2028_v59 = vld [vmem:[#allocation2 + $0xd58] sm:$0xff]  ;;  %v2025_v9 = vld [vmem:[#allocation2 + $0xd40] sm:$0xff]  ;;  %v2027_v38 = vld [vmem:[#allocation2 + $0xd50] sm:$0xff] }
 0x273   : > { %16640 = vst [vmem:[#allocation186_spill] sm:$0xff] %v14224_v49  ;;  %16641 = vst [vmem:[#allocation187_spill] sm:$0xff] %v14226_v17 }
 0x274   : > { %11586 = vmatpush1.bf16.msra.mxu1 %v14214_v50  ;;  %v2022_v50 = vld [vmem:[#allocation2 + $0xd28] sm:$0xff] }
 0x275   : > { %11588 = vmatprep.subr.bf16.mxu1 %v14218_v23  ;;  %v14230_v36 = vpack.c.bf16 %v2024_v47, %v2022_v50  ;;  %v14232_v23 = vpack.c.bf16 %v2023_v0, %v2021_v29  ;;  %v2032_v50 = vld [vmem:[#allocation2 + $0xd78] sm:$0xff]  ;;  %v2029_v47 = vld [vmem:[#allocation2 + $0xd60] sm:$0xff]  ;;  %v2031_v29 = vld [vmem:[#allocation2 + $0xd70] sm:$0xff] }
 0x277   : > { %16642 = vst [vmem:[#allocation188_spill] sm:$0xff] %v14230_v36  ;;  %16643 = vst [vmem:[#allocation189_spill] sm:$0xff] %v14232_v23 }
 0x278   : > { %11590 = vmatpush1.bf16.msra.mxu1 %v14220_v21  ;;  %v2026_v21 = vld [vmem:[#allocation2 + $0xd48] sm:$0xff] }
 0x279   : > { %11592 = vmatprep.subr.bf16.mxu1 %v14224_v49  ;;  %v14236_v2 = vpack.c.bf16 %v2028_v59, %v2026_v21  ;;  %v14238_v49 = vpack.c.bf16 %v2027_v38, %v2025_v9  ;;  %v2036_v21 = vld [vmem:[#allocation2 + $0xd98] sm:$0xff]  ;;  %v2033_v59 = vld [vmem:[#allocation2 + $0xd80] sm:$0xff]  ;;  %v2035_v9 = vld [vmem:[#allocation2 + $0xd90] sm:$0xff] }
 0x27b   : > { %16644 = vst [vmem:[#allocation190_spill] sm:$0xff] %v14236_v2  ;;  %16645 = vst [vmem:[#allocation191_spill] sm:$0xff] %v14238_v49 }
 0x27c   : > { %11594 = vmatpush1.bf16.msra.mxu1 %v14226_v17  ;;  %v2030_v17 = vld [vmem:[#allocation2 + $0xd68] sm:$0xff] }
 0x27d   : > { %11596 = vmatprep.subr.bf16.mxu1 %v14230_v36  ;;  %v14242_v0 = vpack.c.bf16 %v2032_v50, %v2030_v17  ;;  %v14244_v36 = vpack.c.bf16 %v2031_v29, %v2029_v47  ;;  %v2040_v17 = vld [vmem:[#allocation2 + $0xdb8] sm:$0xff]  ;;  %v2037_v50 = vld [vmem:[#allocation2 + $0xda0] sm:$0xff]  ;;  %v2039_v47 = vld [vmem:[#allocation2 + $0xdb0] sm:$0xff] }
 0x27f   : > { %16646 = vst [vmem:[#allocation192_spill] sm:$0xff] %v14242_v0  ;;  %16647 = vst [vmem:[#allocation193_spill] sm:$0xff] %v14244_v36 }
 0x280   : > { %11598 = vmatpush1.bf16.msra.mxu1 %v14232_v23  ;;  %v2034_v23 = vld [vmem:[#allocation2 + $0xd88] sm:$0xff] }
 0x281   : > { %11600 = vmatprep.subr.bf16.mxu1 %v14236_v2  ;;  %v14248_v38 = vpack.c.bf16 %v2036_v21, %v2034_v23  ;;  %v14250_v2 = vpack.c.bf16 %v2035_v9, %v2033_v59  ;;  %v2044_v23 = vld [vmem:[#allocation2 + $0xdd8] sm:$0xff]  ;;  %v2041_v21 = vld [vmem:[#allocation2 + $0xdc0] sm:$0xff]  ;;  %v2043_v59 = vld [vmem:[#allocation2 + $0xdd0] sm:$0xff] }
 0x283   : > { %16648 = vst [vmem:[#allocation194_spill] sm:$0xff] %v14248_v38  ;;  %16649 = vst [vmem:[#allocation195_spill] sm:$0xff] %v14250_v2 }
 0x284   : > { %11602 = vmatpush1.bf16.msra.mxu1 %v14238_v49  ;;  %v2038_v49 = vld [vmem:[#allocation2 + $0xda8] sm:$0xff] }
 0x285   : > { %11604 = vmatprep.subr.bf16.mxu1 %v14242_v0  ;;  %v14254_v29 = vpack.c.bf16 %v2040_v17, %v2038_v49  ;;  %v14256_v0 = vpack.c.bf16 %v2039_v47, %v2037_v50  ;;  %v2045_v17 = vld [vmem:[#allocation2 + $0xde0] sm:$0xff]  ;;  %v2047_v50 = vld [vmem:[#allocation2 + $0xdf0] sm:$0xff] }
 0x286   : > { %v14268_v47 = vpack.c.bf16 %v2047_v50, %v2045_v17  ;;  %v1765_v17 = vld [vmem:[#allocation2 + $0xa00] sm:$0xff]  ;;  %v1767_v50 = vld [vmem:[#allocation2 + $0xa10] sm:$0xff] }
 0x287   : > { %16650 = vst [vmem:[#allocation196_spill] sm:$0xff] %v14254_v29  ;;  %16651 = vst [vmem:[#allocation197_spill] sm:$0xff] %v14256_v0 }
 0x288   : > { %11606 = vmatpush1.bf16.msra.mxu1 %v14244_v36  ;;  %v2042_v36 = vld [vmem:[#allocation2 + $0xdc8] sm:$0xff]  ;;  %16655 = vst [vmem:[#allocation201_spill] sm:$0xff] %v14268_v47 }
 0x289   : > { %11608 = vmatprep.subr.bf16.mxu1 %v14248_v38  ;;  %v14260_v9 = vpack.c.bf16 %v2044_v23, %v2042_v36  ;;  %v14262_v38 = vpack.c.bf16 %v2043_v59, %v2041_v21  ;;  %v1766_v36 = vld [vmem:[#allocation2 + $0xa08] sm:$0xff]  ;;  %v1768_v23 = vld [vmem:[#allocation2 + $0xa18] sm:$0xff] }
 0x28b   : > { %16652 = vst [vmem:[#allocation198_spill] sm:$0xff] %v14260_v9  ;;  %16653 = vst [vmem:[#allocation199_spill] sm:$0xff] %v14262_v38 }
 0x28c   : > { %11610 = vmatpush1.bf16.msra.mxu1 %v14250_v2  ;;  %v2046_v2 = vld [vmem:[#allocation2 + $0xde8] sm:$0xff] }
 0x28d   : > { %11612 = vmatprep.subr.bf16.mxu1 %v14254_v29  ;;  %v14266_v49 = vpack.c.bf16 %v2048_v48, %v2046_v2  ;;  %v9691_v48 = vld [vmem:[%s16131_s8 + $0x18] sm:$0xff]  ;;  %v14278_v2 = vpack.c.bf16 %v1768_v23, %v1766_v36  ;;  %v9695_v36 = vld [vmem:[%s16131_s8 + $0x20] sm:$0xff]  ;;  %v14291_v23 = vpack.c.bf16 %v1767_v50, %v1765_v17  ;;  %v1775_v50 = vld [vmem:[#allocation2 + $0xa50] sm:$0xff] }
 0x28e   : > { %v1773_v17 = vld [vmem:[#allocation2 + $0xa40] sm:$0xff]  ;;  %v9800_v29 = vld [vmem:[%s16127_s4 + $0x3a8] sm:$0xff] }
 0x28f   : > { %16654 = vst [vmem:[#allocation200_spill] sm:$0xff] %v14266_v49  ;;  %16656 = vst [vmem:[#allocation202_spill] sm:$0xff] %v14278_v2 }
 0x290   : > { %11614 = vmatpush1.bf16.msra.mxu1 %v14256_v0  ;;  %16657 = vst [vmem:[#allocation203_spill] sm:$0xff] %v14291_v23  ;;  %v1784_v0 = vld [vmem:[#allocation2 + $0xa98] sm:$0xff] }
 0x291   : > { %11616 = vmatprep.subr.bf16.mxu1 %v14260_v9  ;;  %v14304_v9 = vpack.c.bf16 %v1775_v50, %v1773_v17  ;;  %v1786_v17 = vld [vmem:[#allocation2 + $0xaa8] sm:$0xff]  ;;  %v1788_v50 = vld [vmem:[#allocation2 + $0xab8] sm:$0xff] }
 0x293   : > { %16661 = vst [vmem:[#allocation207_spill] sm:$0xff] %v14304_v9 }
 0x294   : > { %11618 = vmatpush1.bf16.msra.mxu1 %v14262_v38 }
 0x295   : > { %11620 = vmatprep.subr.bf16.mxu1 %v14266_v49  ;;  %v1774_v49 = vld [vmem:[#allocation2 + $0xa48] sm:$0xff] }
 0x298   : > { %11622 = vmatpush1.bf16.msra.mxu1 %v14268_v47  ;;  %v1770_v47 = vld [vmem:[#allocation2 + $0xa28] sm:$0xff] }
 0x29b   : > { %2114 = vmatmul.mubr.f32.vlgmr.msra.gmra.mrb[6].mxu1 %v14168_v61 }
 0x29c   : > { %2553 = vmatprep.mubr.f32.mxu1 %v13710_v4 }
 0x332   : > { %v1455_v21 = vpop.f32.mrb[4].mxu0 }
 0x333   : > { %v1457_v59 = vpop.f32.mrb[5].mxu0 }
 0x334   : > { %9692 = vmatprep.subr.msk.mxu0 %vm946_vm0, %v1457_v59  ;;  %v1772_v59 = vld [vmem:[#allocation2 + $0xa38] sm:$0xff] }
 0x335   : > { %9693 = vmatpush1.msk.msra.mxu0 %vm946_vm0, %v1455_v21  ;;  %v14293_v21 = vpack.c.bf16 %v1772_v59, %v1770_v47  ;;  %v1778_v47 = vld [vmem:[#allocation2 + $0xa68] sm:$0xff]  ;;  %v1780_v59 = vld [vmem:[#allocation2 + $0xa78] sm:$0xff] }
 0x336   : > { %9694 = vmatmul.mubr.msk.f32.vlgmr.msra.gmra.mrb[2].mxu0 %vm942_vm1, %v9691_v48  ;;  %9696 = vmatprep.subr.msk.mxu0 %vm946_vm0, %v14174_v15  ;;  %v1769_v15 = vld [vmem:[#allocation2 + $0xa20] sm:$0xff]  ;;  %v1771_v48 = vld [vmem:[#allocation2 + $0xa30] sm:$0xff] }
 0x337   : > { %9697 = vmatpush1.msk.msra.mxu0 %vm946_vm0, %v14172_v18  ;;  %1755 = vmatprep.mubr.f32.mxu0 %v16591_v54  ;;  %16658 = vst [vmem:[#allocation204_spill] sm:$0xff] %v14293_v21  ;;  %v1776_v18 = vld [vmem:[#allocation2 + $0xa58] sm:$0xff] }
 0x338   : > { %11496 = vmatprep.subr.bf16.mxu0 %v14278_v2  ;;  %v14297_v2 = vpack.c.bf16 %v1771_v48, %v1769_v15  ;;  %v14301_v38 = vpack.c.bf16 %v1776_v18, %v1774_v49  ;;  %v1777_v15 = vld [vmem:[#allocation2 + $0xa60] sm:$0xff]  ;;  %v1779_v48 = vld [vmem:[#allocation2 + $0xa70] sm:$0xff] }
 0x339   : > { %v14310_v49 = vpack.c.bf16 %v1779_v48, %v1777_v15  ;;  %v1790_v15 = vld [vmem:[#allocation2 + $0xac8] sm:$0xff]  ;;  %v1792_v48 = vld [vmem:[#allocation2 + $0xad8] sm:$0xff] }
 0x33a   : > { %16659 = vst [vmem:[#allocation205_spill] sm:$0xff] %v14297_v2  ;;  %16660 = vst [vmem:[#allocation206_spill] sm:$0xff] %v14301_v38 }
 0x33b   : > { %16663 = vst [vmem:[#allocation209_spill] sm:$0xff] %v14310_v49 }
 0x33e   : > { %9698 = vmatmul.mubr.msk.f32.vlgmr.msra.gmra.mrb[2].mxu0 %vm942_vm1, %v9695_v36  ;;  %v14307_v36 = vpack.c.bf16 %v1780_v59, %v1778_v47  ;;  %v14319_v59 = vpack.c.bf16 %v1788_v50, %v1786_v17 }
 0x33f   : > { %11498 = vmatpush1.bf16.msra.mxu0 %v14291_v23  ;;  %1893 = vmatprep.mubr.f32.mxu0 %v13710_v4  ;;  %v1782_v23 = vld [vmem:[#allocation2 + $0xa88] sm:$0xff] }
 0x340   : > { %11500 = vmatprep.subr.bf16.mxu0 %v14293_v21  ;;  %16662 = vst [vmem:[#allocation208_spill] sm:$0xff] %v14307_v36  ;;  %v14313_v18 = vpack.c.bf16 %v1784_v0, %v1782_v23  ;;  %v1781_v21 = vld [vmem:[#allocation2 + $0xa80] sm:$0xff]  ;;  %16666 = vst [vmem:[#allocation212_spill] sm:$0xff] %v14319_v59  ;;  %v14325_v23 = vpack.c.bf16 %v1792_v48, %v1790_v15 }
 0x342   : > { %16664 = vst [vmem:[#allocation210_spill] sm:$0xff] %v14313_v18  ;;  %16668 = vst [vmem:[#allocation214_spill] sm:$0xff] %v14325_v23 }
 0x343   : > { %11502 = vmatpush1.bf16.msra.mxu0 %v14297_v2  ;;  %v1783_v2 = vld [vmem:[#allocation2 + $0xa90] sm:$0xff] }
 0x344   : > { %11504 = vmatprep.subr.bf16.mxu0 %v14301_v38  ;;  %v14316_v47 = vpack.c.bf16 %v1783_v2, %v1781_v21  ;;  %v1785_v38 = vld [vmem:[#allocation2 + $0xaa0] sm:$0xff]  ;;  %v1794_v2 = vld [vmem:[#allocation2 + $0xae8] sm:$0xff]  ;;  %v1796_v21 = vld [vmem:[#allocation2 + $0xaf8] sm:$0xff] }
 0x345   : > { %v14331_v50 = vpack.c.bf16 %v1796_v21, %v1794_v2 }
 0x346   : > { %16665 = vst [vmem:[#allocation211_spill] sm:$0xff] %v14316_v47 }
 0x347   : > { %11506 = vmatpush1.bf16.msra.mxu0 %v14304_v9  ;;  %v1787_v9 = vld [vmem:[#allocation2 + $0xab0] sm:$0xff]  ;;  %16670 = vst [vmem:[#allocation216_spill] sm:$0xff] %v14331_v50 }
 0x348   : > { %11508 = vmatprep.subr.bf16.mxu0 %v14307_v36  ;;  %v14322_v0 = vpack.c.bf16 %v1787_v9, %v1785_v38  ;;  %v1789_v36 = vld [vmem:[#allocation2 + $0xac0] sm:$0xff]  ;;  %v1798_v38 = vld [vmem:[#allocation2 + $0xb08] sm:$0xff]  ;;  %v1800_v9 = vld [vmem:[#allocation2 + $0xb18] sm:$0xff] }
 0x349   : > { %v14337_v48 = vpack.c.bf16 %v1800_v9, %v1798_v38 }
 0x34a   : > { %16667 = vst [vmem:[#allocation213_spill] sm:$0xff] %v14322_v0 }
 0x34b   : > { %11510 = vmatpush1.bf16.msra.mxu0 %v14310_v49  ;;  %v1791_v49 = vld [vmem:[#allocation2 + $0xad0] sm:$0xff]  ;;  %16672 = vst [vmem:[#allocation218_spill] sm:$0xff] %v14337_v48 }
 0x34c   : > { %11512 = vmatprep.subr.bf16.mxu0 %v14313_v18  ;;  %v14328_v17 = vpack.c.bf16 %v1791_v49, %v1789_v36  ;;  %v1793_v18 = vld [vmem:[#allocation2 + $0xae0] sm:$0xff]  ;;  %v1802_v36 = vld [vmem:[#allocation2 + $0xb28] sm:$0xff]  ;;  %v1804_v49 = vld [vmem:[#allocation2 + $0xb38] sm:$0xff] }
 0x34d   : > { %v14343_v21 = vpack.c.bf16 %v1804_v49, %v1802_v36 }
 0x34e   : > { %16669 = vst [vmem:[#allocation215_spill] sm:$0xff] %v14328_v17 }
 0x34f   : > { %11514 = vmatpush1.bf16.msra.mxu0 %v14316_v47  ;;  %v1795_v47 = vld [vmem:[#allocation2 + $0xaf0] sm:$0xff]  ;;  %16674 = vst [vmem:[#allocation220_spill] sm:$0xff] %v14343_v21 }
 0x350   : > { %11516 = vmatprep.subr.bf16.mxu0 %v14319_v59  ;;  %v14334_v15 = vpack.c.bf16 %v1795_v47, %v1793_v18  ;;  %v1797_v59 = vld [vmem:[#allocation2 + $0xb00] sm:$0xff]  ;;  %v1806_v18 = vld [vmem:[#allocation2 + $0xb48] sm:$0xff]  ;;  %v1808_v47 = vld [vmem:[#allocation2 + $0xb58] sm:$0xff] }
 0x351   : > { %v14349_v9 = vpack.c.bf16 %v1808_v47, %v1806_v18 }
 0x352   : > { %16671 = vst [vmem:[#allocation217_spill] sm:$0xff] %v14334_v15 }
 0x353   : > { %11518 = vmatpush1.bf16.msra.mxu0 %v14322_v0  ;;  %v1799_v0 = vld [vmem:[#allocation2 + $0xb10] sm:$0xff]  ;;  %16676 = vst [vmem:[#allocation222_spill] sm:$0xff] %v14349_v9 }
 0x354   : > { %11520 = vmatprep.subr.bf16.mxu0 %v14325_v23  ;;  %v14340_v2 = vpack.c.bf16 %v1799_v0, %v1797_v59  ;;  %v1801_v23 = vld [vmem:[#allocation2 + $0xb20] sm:$0xff]  ;;  %v1810_v59 = vld [vmem:[#allocation2 + $0xb68] sm:$0xff]  ;;  %v1812_v0 = vld [vmem:[#allocation2 + $0xb78] sm:$0xff] }
 0x355   : > { %v14355_v49 = vpack.c.bf16 %v1812_v0, %v1810_v59 }
 0x356   : > { %16673 = vst [vmem:[#allocation219_spill] sm:$0xff] %v14340_v2 }
 0x357   : > { %11522 = vmatpush1.bf16.msra.mxu0 %v14328_v17  ;;  %v1803_v17 = vld [vmem:[#allocation2 + $0xb30] sm:$0xff]  ;;  %16678 = vst [vmem:[#allocation224_spill] sm:$0xff] %v14355_v49 }
 0x358   : > { %11524 = vmatprep.subr.bf16.mxu0 %v14331_v50  ;;  %v14346_v38 = vpack.c.bf16 %v1803_v17, %v1801_v23  ;;  %v1805_v50 = vld [vmem:[#allocation2 + $0xb40] sm:$0xff]  ;;  %v1814_v23 = vld [vmem:[#allocation2 + $0xb88] sm:$0xff]  ;;  %v1816_v17 = vld [vmem:[#allocation2 + $0xb98] sm:$0xff] }
 0x359   : > { %v14361_v47 = vpack.c.bf16 %v1816_v17, %v1814_v23 }
 0x35a   : > { %16675 = vst [vmem:[#allocation221_spill] sm:$0xff] %v14346_v38 }
 0x35b   : > { %11526 = vmatpush1.bf16.msra.mxu0 %v14334_v15  ;;  %v1807_v15 = vld [vmem:[#allocation2 + $0xb50] sm:$0xff]  ;;  %16680 = vst [vmem:[#allocation226_spill] sm:$0xff] %v14361_v47 }
 0x35c   : > { %11528 = vmatprep.subr.bf16.mxu0 %v14337_v48  ;;  %v14352_v36 = vpack.c.bf16 %v1807_v15, %v1805_v50  ;;  %v1809_v48 = vld [vmem:[#allocation2 + $0xb60] sm:$0xff]  ;;  %v1818_v50 = vld [vmem:[#allocation2 + $0xba8] sm:$0xff]  ;;  %v1820_v15 = vld [vmem:[#allocation2 + $0xbb8] sm:$0xff] }
 0x35d   : > { %v14367_v0 = vpack.c.bf16 %v1820_v15, %v1818_v50 }
 0x35e   : > { %16677 = vst [vmem:[#allocation223_spill] sm:$0xff] %v14352_v36 }
 0x35f   : > { %11530 = vmatpush1.bf16.msra.mxu0 %v14340_v2  ;;  %v1811_v2 = vld [vmem:[#allocation2 + $0xb70] sm:$0xff]  ;;  %16682 = vst [vmem:[#allocation228_spill] sm:$0xff] %v14367_v0 }
 0x360   : > { %11532 = vmatprep.subr.bf16.mxu0 %v14343_v21  ;;  %v14358_v18 = vpack.c.bf16 %v1811_v2, %v1809_v48  ;;  %v1813_v21 = vld [vmem:[#allocation2 + $0xb80] sm:$0xff]  ;;  %v1822_v48 = vld [vmem:[#allocation2 + $0xbc8] sm:$0xff]  ;;  %v1824_v2 = vld [vmem:[#allocation2 + $0xbd8] sm:$0xff] }
 0x361   : > { %v14373_v17 = vpack.c.bf16 %v1824_v2, %v1822_v48  ;;  %v2428_v48 = vld [vmem:[#allocation2 + $0x1018] sm:$0xff] }
 0x362   : > { %16679 = vst [vmem:[#allocation225_spill] sm:$0xff] %v14358_v18 }
 0x363   : > { %11534 = vmatpush1.bf16.msra.mxu0 %v14346_v38  ;;  %v1815_v38 = vld [vmem:[#allocation2 + $0xb90] sm:$0xff]  ;;  %16684 = vst [vmem:[#allocation230_spill] sm:$0xff] %v14373_v17 }
 0x364   : > { %11536 = vmatprep.subr.bf16.mxu0 %v14349_v9  ;;  %v14364_v59 = vpack.c.bf16 %v1815_v38, %v1813_v21  ;;  %v1817_v9 = vld [vmem:[#allocation2 + $0xba0] sm:$0xff]  ;;  %v1826_v21 = vld [vmem:[#allocation2 + $0xbe8] sm:$0xff]  ;;  %v1828_v38 = vld [vmem:[#allocation2 + $0xbf8] sm:$0xff] }
 0x365   : > { %v14379_v15 = vpack.c.bf16 %v1828_v38, %v1826_v21  ;;  %v2425_v21 = vld [vmem:[#allocation2 + $0x1000] sm:$0xff]  ;;  %v2427_v38 = vld [vmem:[#allocation2 + $0x1010] sm:$0xff] }
 0x366   : > { %16681 = vst [vmem:[#allocation227_spill] sm:$0xff] %v14364_v59 }
 0x367   : > { %11538 = vmatpush1.bf16.msra.mxu0 %v14352_v36  ;;  %v1819_v36 = vld [vmem:[#allocation2 + $0xbb0] sm:$0xff]  ;;  %16686 = vst [vmem:[#allocation232_spill] sm:$0xff] %v14379_v15 }
 0x368   : > { %11540 = vmatprep.subr.bf16.mxu0 %v14355_v49  ;;  %v14370_v23 = vpack.c.bf16 %v1819_v36, %v1817_v9  ;;  %v1821_v49 = vld [vmem:[#allocation2 + $0xbc0] sm:$0xff] }
 0x36a   : > { %16683 = vst [vmem:[#allocation229_spill] sm:$0xff] %v14370_v23 }
 0x36b   : > { %11542 = vmatpush1.bf16.msra.mxu0 %v14358_v18  ;;  %v1823_v18 = vld [vmem:[#allocation2 + $0xbd0] sm:$0xff] }
 0x36c   : > { %11544 = vmatprep.subr.bf16.mxu0 %v14361_v47  ;;  %v14376_v50 = vpack.c.bf16 %v1823_v18, %v1821_v49  ;;  %v1825_v47 = vld [vmem:[#allocation2 + $0xbe0] sm:$0xff]  ;;  %v2426_v18 = vld [vmem:[#allocation2 + $0x1008] sm:$0xff] }
 0x36d   : > { %v14392_v2 = vpack.c.bf16 %v2428_v48, %v2426_v18  ;;  %v2434_v18 = vld [vmem:[#allocation2 + $0x1048] sm:$0xff]  ;;  %v2436_v48 = vld [vmem:[#allocation2 + $0x1058] sm:$0xff] }
 0x36e   : > { %16685 = vst [vmem:[#allocation231_spill] sm:$0xff] %v14376_v50  ;;  %v14388_v36 = vpop.f32.mrb[6].mxu1 }
 0x36f   : > { %11546 = vmatpush1.bf16.msra.mxu0 %v14364_v59  ;;  %v1827_v59 = vld [vmem:[#allocation2 + $0xbf0] sm:$0xff]  ;;  %v14390_v49 = vpop.f32.mrb[7].mxu1  ;;  %16688 = vst [vmem:[#allocation234_spill] sm:$0xff] %v14392_v2  ;;  %11688 = vmatprep.subr.bf16.mxu1 %v14392_v2 }
 0x370   : > { %11548 = vmatprep.subr.bf16.mxu0 %v14367_v0  ;;  %v14382_v9 = vpack.c.bf16 %v1827_v59, %v1825_v47  ;;  %v14394_v47 = vpack.c.bf16 %v2427_v38, %v2425_v21  ;;  %v2430_v59 = vld [vmem:[#allocation2 + $0x1028] sm:$0xff]  ;;  %v14404_v21 = vpack.c.bf16 %v2436_v48, %v2434_v18  ;;  %v2433_v38 = vld [vmem:[#allocation2 + $0x1040] sm:$0xff]  ;;  %v2435_v0 = vld [vmem:[#allocation2 + $0x1050] sm:$0xff] }
 0x371   : > { %v14406_v2 = vpack.c.bf16 %v2435_v0, %v2433_v38  ;;  %v2442_v18 = vld [vmem:[#allocation2 + $0x1088] sm:$0xff]  ;;  %v2444_v48 = vld [vmem:[#allocation2 + $0x1098] sm:$0xff]  ;;  %v2441_v38 = vld [vmem:[#allocation2 + $0x1080] sm:$0xff] }
 0x372   : > { %16687 = vst [vmem:[#allocation233_spill] sm:$0xff] %v14382_v9  ;;  %16689 = vst [vmem:[#allocation235_spill] sm:$0xff] %v14394_v47  ;;  %11690 = vmatpush1.bf16.msra.mxu1 %v14394_v47  ;;  %v14416_v0 = vpack.c.bf16 %v2444_v48, %v2442_v18  ;;  %v2450_v18 = vld [vmem:[#allocation2 + $0x10c8] sm:$0xff]  ;;  %v2452_v48 = vld [vmem:[#allocation2 + $0x10d8] sm:$0xff] }
 0x373   : > { %11550 = vmatpush1.bf16.msra.mxu0 %v14370_v23  ;;  %16692 = vst [vmem:[#allocation238_spill] sm:$0xff] %v14404_v21  ;;  %16693 = vst [vmem:[#allocation239_spill] sm:$0xff] %v14406_v2 }
 0x374   : > { %11552 = vmatprep.subr.bf16.mxu0 %v14373_v17  ;;  %v2431_v17 = vld [vmem:[#allocation2 + $0x1030] sm:$0xff]  ;;  %16696 = vst [vmem:[#allocation242_spill] sm:$0xff] %v14416_v0 }
 0x377   : > { %11554 = vmatpush1.bf16.msra.mxu0 %v14376_v50  ;;  %v2429_v50 = vld [vmem:[#allocation2 + $0x1020] sm:$0xff] }
 0x378   : > { %11556 = vmatprep.subr.bf16.mxu0 %v14379_v15  ;;  %v14400_v23 = vpack.c.bf16 %v2431_v17, %v2429_v50  ;;  %v2437_v50 = vld [vmem:[#allocation2 + $0x1060] sm:$0xff] }
 0x37a   : > { %16691 = vst [vmem:[#allocation237_spill] sm:$0xff] %v14400_v23 }
 0x37b   : > { %11558 = vmatpush1.bf16.msra.mxu0 %v14382_v9  ;;  %v2432_v9 = vld [vmem:[#allocation2 + $0x1038] sm:$0xff] }
 0x37c   : > { %v14398_v15 = vpack.c.bf16 %v2432_v9, %v2430_v59  ;;  %v2438_v9 = vld [vmem:[#allocation2 + $0x1068] sm:$0xff]  ;;  %v2440_v59 = vld [vmem:[#allocation2 + $0x1078] sm:$0xff] }
 0x37d   : > { %v14410_v17 = vpack.c.bf16 %v2440_v59, %v2438_v9  ;;  %v2446_v9 = vld [vmem:[#allocation2 + $0x10a8] sm:$0xff]  ;;  %v2448_v59 = vld [vmem:[#allocation2 + $0x10b8] sm:$0xff] }
 0x37e   : > { %1894 = vmatmul.mubr.f32.vlgmr.msra.gmra.mrb[6].mxu0 %v14168_v61  ;;  %16690 = vst [vmem:[#allocation236_spill] sm:$0xff] %v14398_v15  ;;  %11692 = vmatprep.subr.bf16.mxu1 %v14398_v15  ;;  %v2439_v15 = vld [vmem:[#allocation2 + $0x1070] sm:$0xff] }
 0x37f   : > { %1975 = vmatprep.mubr.f32.mxu0 %v16591_v54  ;;  %11694 = vmatpush1.bf16.msra.mxu1 %v14400_v23  ;;  %16694 = vst [vmem:[#allocation240_spill] sm:$0xff] %v14410_v17  ;;  %v14412_v47 = vpack.c.bf16 %v2439_v15, %v2437_v50  ;;  %v14422_v15 = vpack.c.bf16 %v2448_v59, %v2446_v9  ;;  %v2445_v50 = vld [vmem:[#allocation2 + $0x10a0] sm:$0xff]  ;;  %v2454_v9 = vld [vmem:[#allocation2 + $0x10e8] sm:$0xff]  ;;  %v2456_v59 = vld [vmem:[#allocation2 + $0x10f8] sm:$0xff] }
 0x380   : > { %11696 = vmatprep.subr.bf16.mxu1 %v14404_v21  ;;  %v2443_v21 = vld [vmem:[#allocation2 + $0x1090] sm:$0xff] }
 0x381   : > { %16695 = vst [vmem:[#allocation241_spill] sm:$0xff] %v14412_v47  ;;  %v14418_v23 = vpack.c.bf16 %v2443_v21, %v2441_v38  ;;  %16698 = vst [vmem:[#allocation244_spill] sm:$0xff] %v14422_v15  ;;  %v14428_v21 = vpack.c.bf16 %v2452_v48, %v2450_v18  ;;  %v2449_v38 = vld [vmem:[#allocation2 + $0x10c0] sm:$0xff]  ;;  %v2458_v18 = vld [vmem:[#allocation2 + $0x1108] sm:$0xff] }
 0x382   : > { %v2460_v48 = vld [vmem:[#allocation2 + $0x1118] sm:$0xff] }
 0x383   : > { %11698 = vmatpush1.bf16.msra.mxu1 %v14406_v2  ;;  %16697 = vst [vmem:[#allocation243_spill] sm:$0xff] %v14418_v23  ;;  %16700 = vst [vmem:[#allocation246_spill] sm:$0xff] %v14428_v21 }
 0x384   : > { %11700 = vmatprep.subr.bf16.mxu1 %v14410_v17  ;;  %v2447_v17 = vld [vmem:[#allocation2 + $0x10b0] sm:$0xff] }
 0x385   : > { %v14424_v2 = vpack.c.bf16 %v2447_v17, %v2445_v50  ;;  %v14434_v17 = vpack.c.bf16 %v2456_v59, %v2454_v9  ;;  %v2453_v50 = vld [vmem:[#allocation2 + $0x10e0] sm:$0xff]  ;;  %v2462_v9 = vld [vmem:[#allocation2 + $0x1128] sm:$0xff]  ;;  %v2464_v59 = vld [vmem:[#allocation2 + $0x1138] sm:$0xff] }
 0x387   : > { %11702 = vmatpush1.bf16.msra.mxu1 %v14412_v47  ;;  %16699 = vst [vmem:[#allocation245_spill] sm:$0xff] %v14424_v2  ;;  %16702 = vst [vmem:[#allocation248_spill] sm:$0xff] %v14434_v17 }
 0x388   : > { %11704 = vmatprep.subr.bf16.mxu1 %v14416_v0  ;;  %v2451_v0 = vld [vmem:[#allocation2 + $0x10d0] sm:$0xff] }
 0x389   : > { %v14430_v47 = vpack.c.bf16 %v2451_v0, %v2449_v38  ;;  %v14440_v0 = vpack.c.bf16 %v2460_v48, %v2458_v18  ;;  %v2457_v38 = vld [vmem:[#allocation2 + $0x1100] sm:$0xff]  ;;  %v2466_v18 = vld [vmem:[#allocation2 + $0x1148] sm:$0xff]  ;;  %v2468_v48 = vld [vmem:[#allocation2 + $0x1158] sm:$0xff] }
 0x38b   : > { %11706 = vmatpush1.bf16.msra.mxu1 %v14418_v23  ;;  %16701 = vst [vmem:[#allocation247_spill] sm:$0xff] %v14430_v47  ;;  %16704 = vst [vmem:[#allocation250_spill] sm:$0xff] %v14440_v0 }
 0x38c   : > { %11708 = vmatprep.subr.bf16.mxu1 %v14422_v15  ;;  %v2455_v15 = vld [vmem:[#allocation2 + $0x10f0] sm:$0xff] }
 0x38d   : > { %v14436_v23 = vpack.c.bf16 %v2455_v15, %v2453_v50  ;;  %v14446_v15 = vpack.c.bf16 %v2464_v59, %v2462_v9  ;;  %v2461_v50 = vld [vmem:[#allocation2 + $0x1120] sm:$0xff]  ;;  %v2470_v9 = vld [vmem:[#allocation2 + $0x1168] sm:$0xff]  ;;  %v2472_v59 = vld [vmem:[#allocation2 + $0x1178] sm:$0xff] }
 0x38f   : > { %11710 = vmatpush1.bf16.msra.mxu1 %v14424_v2  ;;  %16703 = vst [vmem:[#allocation249_spill] sm:$0xff] %v14436_v23  ;;  %16706 = vst [vmem:[#allocation252_spill] sm:$0xff] %v14446_v15 }
 0x390   : > { %11712 = vmatprep.subr.bf16.mxu1 %v14428_v21  ;;  %v2459_v21 = vld [vmem:[#allocation2 + $0x1110] sm:$0xff] }
 0x391   : > { %v14442_v2 = vpack.c.bf16 %v2459_v21, %v2457_v38  ;;  %v14452_v21 = vpack.c.bf16 %v2468_v48, %v2466_v18  ;;  %v2465_v38 = vld [vmem:[#allocation2 + $0x1140] sm:$0xff]  ;;  %v2474_v18 = vld [vmem:[#allocation2 + $0x1188] sm:$0xff]  ;;  %v2476_v48 = vld [vmem:[#allocation2 + $0x1198] sm:$0xff] }
 0x393   : > { %11714 = vmatpush1.bf16.msra.mxu1 %v14430_v47  ;;  %16705 = vst [vmem:[#allocation251_spill] sm:$0xff] %v14442_v2  ;;  %16708 = vst [vmem:[#allocation254_spill] sm:$0xff] %v14452_v21 }
 0x394   : > { %11716 = vmatprep.subr.bf16.mxu1 %v14434_v17  ;;  %v2463_v17 = vld [vmem:[#allocation2 + $0x1130] sm:$0xff] }
 0x395   : > { %v14448_v47 = vpack.c.bf16 %v2463_v17, %v2461_v50  ;;  %v14458_v17 = vpack.c.bf16 %v2472_v59, %v2470_v9  ;;  %v2469_v50 = vld [vmem:[#allocation2 + $0x1160] sm:$0xff]  ;;  %v2478_v9 = vld [vmem:[#allocation2 + $0x11a8] sm:$0xff]  ;;  %v2480_v59 = vld [vmem:[#allocation2 + $0x11b8] sm:$0xff] }
 0x397   : > { %11718 = vmatpush1.bf16.msra.mxu1 %v14436_v23  ;;  %16707 = vst [vmem:[#allocation253_spill] sm:$0xff] %v14448_v47  ;;  %16710 = vst [vmem:[#allocation256_spill] sm:$0xff] %v14458_v17 }
 0x398   : > { %11720 = vmatprep.subr.bf16.mxu1 %v14440_v0  ;;  %v2467_v0 = vld [vmem:[#allocation2 + $0x1150] sm:$0xff] }
 0x399   : > { %v14454_v23 = vpack.c.bf16 %v2467_v0, %v2465_v38  ;;  %v14464_v0 = vpack.c.bf16 %v2476_v48, %v2474_v18  ;;  %v2473_v38 = vld [vmem:[#allocation2 + $0x1180] sm:$0xff]  ;;  %v2482_v18 = vld [vmem:[#allocation2 + $0x11c8] sm:$0xff]  ;;  %v2484_v48 = vld [vmem:[#allocation2 + $0x11d8] sm:$0xff] }
 0x39b   : > { %11722 = vmatpush1.bf16.msra.mxu1 %v14442_v2  ;;  %16709 = vst [vmem:[#allocation255_spill] sm:$0xff] %v14454_v23  ;;  %16712 = vst [vmem:[#allocation258_spill] sm:$0xff] %v14464_v0 }
 0x39c   : > { %11724 = vmatprep.subr.bf16.mxu1 %v14446_v15  ;;  %v2471_v15 = vld [vmem:[#allocation2 + $0x1170] sm:$0xff] }
 0x39d   : > { %v14460_v2 = vpack.c.bf16 %v2471_v15, %v2469_v50  ;;  %v14470_v15 = vpack.c.bf16 %v2480_v59, %v2478_v9  ;;  %v2477_v50 = vld [vmem:[#allocation2 + $0x11a0] sm:$0xff]  ;;  %v2486_v9 = vld [vmem:[#allocation2 + $0x11e8] sm:$0xff]  ;;  %v2488_v59 = vld [vmem:[#allocation2 + $0x11f8] sm:$0xff] }
 0x39f   : > { %11726 = vmatpush1.bf16.msra.mxu1 %v14448_v47  ;;  %16711 = vst [vmem:[#allocation257_spill] sm:$0xff] %v14460_v2  ;;  %16714 = vst [vmem:[#allocation260_spill] sm:$0xff] %v14470_v15 }
 0x3a0   : > { %11728 = vmatprep.subr.bf16.mxu1 %v14452_v21  ;;  %v2475_v21 = vld [vmem:[#allocation2 + $0x1190] sm:$0xff] }
 0x3a1   : > { %v14466_v47 = vpack.c.bf16 %v2475_v21, %v2473_v38  ;;  %v14476_v21 = vpack.c.bf16 %v2484_v48, %v2482_v18  ;;  %v2481_v38 = vld [vmem:[#allocation2 + $0x11c0] sm:$0xff]  ;;  %v2208_v18 = vld [vmem:[#allocation2 + $0xe18] sm:$0xff] }
 0x3a3   : > { %11730 = vmatpush1.bf16.msra.mxu1 %v14454_v23  ;;  %16713 = vst [vmem:[#allocation259_spill] sm:$0xff] %v14466_v47  ;;  %16716 = vst [vmem:[#allocation262_spill] sm:$0xff] %v14476_v21 }
 0x3a4   : > { %11732 = vmatprep.subr.bf16.mxu1 %v14458_v17  ;;  %v2479_v17 = vld [vmem:[#allocation2 + $0x11b0] sm:$0xff] }
 0x3a5   : > { %v14472_v23 = vpack.c.bf16 %v2479_v17, %v2477_v50  ;;  %v14482_v17 = vpack.c.bf16 %v2488_v59, %v2486_v9  ;;  %v2485_v50 = vld [vmem:[#allocation2 + $0x11e0] sm:$0xff]  ;;  %v2210_v59 = vld [vmem:[#allocation2 + $0xe28] sm:$0xff] }
 0x3a7   : > { %11734 = vmatpush1.bf16.msra.mxu1 %v14460_v2  ;;  %16715 = vst [vmem:[#allocation261_spill] sm:$0xff] %v14472_v23  ;;  %16718 = vst [vmem:[#allocation264_spill] sm:$0xff] %v14482_v17 }
 0x3a8   : > { %11736 = vmatprep.subr.bf16.mxu1 %v14464_v0  ;;  %v2483_v0 = vld [vmem:[#allocation2 + $0x11d0] sm:$0xff] }
 0x3a9   : > { %v14478_v2 = vpack.c.bf16 %v2483_v0, %v2481_v38  ;;  %v2206_v0 = vld [vmem:[#allocation2 + $0xe08] sm:$0xff] }
 0x3aa   : > { %v14493_v9 = vpack.c.bf16 %v2208_v18, %v2206_v0  ;;  %v9703_v0 = vld [vmem:[%s16131_s8 + $0x30] sm:$0xff] }
 0x3ab   : > { %11738 = vmatpush1.bf16.msra.mxu1 %v14466_v47  ;;  %16717 = vst [vmem:[#allocation263_spill] sm:$0xff] %v14478_v2 }
 0x3ac   : > { %11740 = vmatprep.subr.bf16.mxu1 %v14470_v15  ;;  %v2487_v15 = vld [vmem:[#allocation2 + $0x11f0] sm:$0xff]  ;;  %16720 = vst [vmem:[#allocation266_spill] sm:$0xff] %v14493_v9 }
 0x3ad   : > { %v14484_v47 = vpack.c.bf16 %v2487_v15, %v2485_v50  ;;  %v2207_v15 = vld [vmem:[#allocation2 + $0xe10] sm:$0xff]  ;;  %v2212_v50 = vld [vmem:[#allocation2 + $0xe38] sm:$0xff] }
 0x3af   : > { %11742 = vmatpush1.bf16.msra.mxu1 %v14472_v23  ;;  %16719 = vst [vmem:[#allocation265_spill] sm:$0xff] %v14484_v47  ;;  %v9781_v23 = vld [vmem:[%s16127_s4 + $0x310] sm:$0xff] }
 0x3b0   : > { %11744 = vmatprep.subr.bf16.mxu1 %v14476_v21 }
 0x3b3   : > { %11746 = vmatpush1.bf16.msra.mxu1 %v14478_v2  ;;  %v9699_v2 = vld [vmem:[%s16131_s8 + $0x28] sm:$0xff] }
 0x3b4   : > { %11748 = vmatprep.subr.bf16.mxu1 %v14482_v17 }
 0x3b7   : > { %11750 = vmatpush1.bf16.msra.mxu1 %v14484_v47 }
 0x3ba   : > { %2554 = vmatmul.mubr.f32.vlgmr.msra.gmra.mrb[8].mxu1 %v14168_v61  ;;  %v2205_v61 = vld [vmem:[#allocation2 + $0xe00] sm:$0xff] }
 0x3bb   : > { %v14506_v18 = vpack.c.bf16 %v2207_v15, %v2205_v61  ;;  %v2213_v61 = vld [vmem:[#allocation2 + $0xe40] sm:$0xff]  ;;  %v2215_v15 = vld [vmem:[#allocation2 + $0xe50] sm:$0xff] }
 0x3bc   : > { %v14519_v17 = vpack.c.bf16 %v2215_v15, %v2213_v61  ;;  %v2226_v61 = vld [vmem:[#allocation2 + $0xea8] sm:$0xff]  ;;  %v2228_v15 = vld [vmem:[#allocation2 + $0xeb8] sm:$0xff] }
 0x3bd   : > { %16721 = vst [vmem:[#allocation267_spill] sm:$0xff] %v14506_v18 }
 0x3be   : > { %16725 = vst [vmem:[#allocation271_spill] sm:$0xff] %v14519_v17 }
 0x451   : > { %v1895_v48 = vpop.f32.mrb[6].mxu0 }
 0x452   : > { %v1897_v38 = vpop.f32.mrb[7].mxu0 }
 0x453   : > { %9700 = vmatprep.subr.msk.mxu0 %vm946_vm0, %v1897_v38  ;;  %v2214_v38 = vld [vmem:[#allocation2 + $0xe48] sm:$0xff] }
 0x454   : > { %9701 = vmatpush1.msk.msra.mxu0 %vm946_vm0, %v1895_v48  ;;  %v2211_v48 = vld [vmem:[#allocation2 + $0xe30] sm:$0xff] }
 0x455   : > { %9702 = vmatmul.mubr.msk.f32.vlgmr.msra.gmra.mrb[2].mxu0 %vm942_vm1, %v9699_v2  ;;  %9704 = vmatprep.subr.msk.mxu0 %vm946_vm0, %v14390_v49  ;;  %v14508_v2 = vpack.c.bf16 %v2212_v50, %v2210_v59  ;;  %v2209_v49 = vld [vmem:[#allocation2 + $0xe20] sm:$0xff]  ;;  %v2218_v59 = vld [vmem:[#allocation2 + $0xe68] sm:$0xff]  ;;  %v2220_v50 = vld [vmem:[#allocation2 + $0xe78] sm:$0xff] }
 0x456   : > { %9705 = vmatpush1.msk.msra.mxu0 %vm946_vm0, %v14388_v36  ;;  %2195 = vmatprep.mubr.f32.mxu0 %v16591_v54  ;;  %v2216_v36 = vld [vmem:[#allocation2 + $0xe58] sm:$0xff] }
 0x457   : > { %11624 = vmatprep.subr.bf16.mxu0 %v14493_v9  ;;  %16722 = vst [vmem:[#allocation268_spill] sm:$0xff] %v14508_v2  ;;  %v14512_v9 = vpack.c.bf16 %v2211_v48, %v2209_v49  ;;  %v14516_v47 = vpack.c.bf16 %v2216_v36, %v2214_v38  ;;  %v2217_v49 = vld [vmem:[#allocation2 + $0xe60] sm:$0xff]  ;;  %v2219_v48 = vld [vmem:[#allocation2 + $0xe70] sm:$0xff] }
 0x458   : > { %v14525_v38 = vpack.c.bf16 %v2219_v48, %v2217_v49  ;;  %v2230_v49 = vld [vmem:[#allocation2 + $0xec8] sm:$0xff]  ;;  %v2232_v48 = vld [vmem:[#allocation2 + $0xed8] sm:$0xff] }
 0x459   : > { %16723 = vst [vmem:[#allocation269_spill] sm:$0xff] %v14512_v9  ;;  %16724 = vst [vmem:[#allocation270_spill] sm:$0xff] %v14516_v47 }
 0x45a   : > { %16727 = vst [vmem:[#allocation273_spill] sm:$0xff] %v14525_v38 }
 0x45d   : > { %9706 = vmatmul.mubr.msk.f32.vlgmr.msra.gmra.mrb[2].mxu0 %vm942_vm1, %v9703_v0  ;;  %v14522_v0 = vpack.c.bf16 %v2220_v50, %v2218_v59  ;;  %v14534_v50 = vpack.c.bf16 %v2228_v15, %v2226_v61 }
 0x45e   : > { %11626 = vmatpush1.bf16.msra.mxu0 %v14506_v18  ;;  %2333 = vmatprep.mubr.f32.mxu0 %v13710_v4  ;;  %v2222_v18 = vld [vmem:[#allocation2 + $0xe88] sm:$0xff]  ;;  %v2224_v4 = vld [vmem:[#allocation2 + $0xe98] sm:$0xff] }
 0x45f   : > { %11628 = vmatprep.subr.bf16.mxu0 %v14508_v2  ;;  %16726 = vst [vmem:[#allocation272_spill] sm:$0xff] %v14522_v0  ;;  %v14528_v36 = vpack.c.bf16 %v2224_v4, %v2222_v18  ;;  %v2221_v2 = vld [vmem:[#allocation2 + $0xe80] sm:$0xff]  ;;  %16730 = vst [vmem:[#allocation276_spill] sm:$0xff] %v14534_v50  ;;  %v14540_v4 = vpack.c.bf16 %v2232_v48, %v2230_v49 }
 0x461   : > { %16728 = vst [vmem:[#allocation274_spill] sm:$0xff] %v14528_v36  ;;  %16732 = vst [vmem:[#allocation278_spill] sm:$0xff] %v14540_v4 }
 0x462   : > { %11630 = vmatpush1.bf16.msra.mxu0 %v14512_v9  ;;  %v2223_v9 = vld [vmem:[#allocation2 + $0xe90] sm:$0xff] }
 0x463   : > { %11632 = vmatprep.subr.bf16.mxu0 %v14516_v47  ;;  %v14531_v59 = vpack.c.bf16 %v2223_v9, %v2221_v2  ;;  %v2225_v47 = vld [vmem:[#allocation2 + $0xea0] sm:$0xff]  ;;  %v2234_v9 = vld [vmem:[#allocation2 + $0xee8] sm:$0xff]  ;;  %v2236_v2 = vld [vmem:[#allocation2 + $0xef8] sm:$0xff] }
 0x464   : > { %v14546_v15 = vpack.c.bf16 %v2236_v2, %v2234_v9 }
 0x465   : > { %16729 = vst [vmem:[#allocation275_spill] sm:$0xff] %v14531_v59 }
 0x466   : > { %11634 = vmatpush1.bf16.msra.mxu0 %v14519_v17  ;;  %v2227_v17 = vld [vmem:[#allocation2 + $0xeb0] sm:$0xff]  ;;  %16734 = vst [vmem:[#allocation280_spill] sm:$0xff] %v14546_v15 }
 0x467   : > { %11636 = vmatprep.subr.bf16.mxu0 %v14522_v0  ;;  %v14537_v18 = vpack.c.bf16 %v2227_v17, %v2225_v47  ;;  %v2229_v0 = vld [vmem:[#allocation2 + $0xec0] sm:$0xff]  ;;  %v2238_v47 = vld [vmem:[#allocation2 + $0xf08] sm:$0xff]  ;;  %v2240_v17 = vld [vmem:[#allocation2 + $0xf18] sm:$0xff] }
 0x468   : > { %v14552_v48 = vpack.c.bf16 %v2240_v17, %v2238_v47 }
 0x469   : > { %16731 = vst [vmem:[#allocation277_spill] sm:$0xff] %v14537_v18 }
 0x46a   : > { %11638 = vmatpush1.bf16.msra.mxu0 %v14525_v38  ;;  %v2231_v38 = vld [vmem:[#allocation2 + $0xed0] sm:$0xff]  ;;  %16736 = vst [vmem:[#allocation282_spill] sm:$0xff] %v14552_v48 }
 0x46b   : > { %11640 = vmatprep.subr.bf16.mxu0 %v14528_v36  ;;  %v14543_v61 = vpack.c.bf16 %v2231_v38, %v2229_v0  ;;  %v2233_v36 = vld [vmem:[#allocation2 + $0xee0] sm:$0xff]  ;;  %v2242_v0 = vld [vmem:[#allocation2 + $0xf28] sm:$0xff]  ;;  %v2244_v38 = vld [vmem:[#allocation2 + $0xf38] sm:$0xff] }
 0x46c   : > { %v14558_v2 = vpack.c.bf16 %v2244_v38, %v2242_v0 }
 0x46d   : > { %16733 = vst [vmem:[#allocation279_spill] sm:$0xff] %v14543_v61 }
 0x46e   : > { %11642 = vmatpush1.bf16.msra.mxu0 %v14531_v59  ;;  %v2235_v59 = vld [vmem:[#allocation2 + $0xef0] sm:$0xff]  ;;  %16738 = vst [vmem:[#allocation284_spill] sm:$0xff] %v14558_v2 }
 0x46f   : > { %11644 = vmatprep.subr.bf16.mxu0 %v14534_v50  ;;  %v14549_v49 = vpack.c.bf16 %v2235_v59, %v2233_v36  ;;  %v2237_v50 = vld [vmem:[#allocation2 + $0xf00] sm:$0xff]  ;;  %v2246_v36 = vld [vmem:[#allocation2 + $0xf48] sm:$0xff]  ;;  %v2248_v59 = vld [vmem:[#allocation2 + $0xf58] sm:$0xff] }
 0x470   : > { %v14564_v17 = vpack.c.bf16 %v2248_v59, %v2246_v36 }
 0x471   : > { %16735 = vst [vmem:[#allocation281_spill] sm:$0xff] %v14549_v49 }
 0x472   : > { %11646 = vmatpush1.bf16.msra.mxu0 %v14537_v18  ;;  %v2239_v18 = vld [vmem:[#allocation2 + $0xf10] sm:$0xff]  ;;  %16740 = vst [vmem:[#allocation286_spill] sm:$0xff] %v14564_v17 }
 0x473   : > { %11648 = vmatprep.subr.bf16.mxu0 %v14540_v4  ;;  %v14555_v9 = vpack.c.bf16 %v2239_v18, %v2237_v50  ;;  %v2241_v4 = vld [vmem:[#allocation2 + $0xf20] sm:$0xff]  ;;  %v2250_v50 = vld [vmem:[#allocation2 + $0xf68] sm:$0xff]  ;;  %v2252_v18 = vld [vmem:[#allocation2 + $0xf78] sm:$0xff] }
 0x474   : > { %v14570_v38 = vpack.c.bf16 %v2252_v18, %v2250_v50 }
 0x475   : > { %16737 = vst [vmem:[#allocation283_spill] sm:$0xff] %v14555_v9 }
 0x476   : > { %11650 = vmatpush1.bf16.msra.mxu0 %v14543_v61  ;;  %v2243_v61 = vld [vmem:[#allocation2 + $0xf30] sm:$0xff]  ;;  %16742 = vst [vmem:[#allocation288_spill] sm:$0xff] %v14570_v38 }
 0x477   : > { %11652 = vmatprep.subr.bf16.mxu0 %v14546_v15  ;;  %v14561_v47 = vpack.c.bf16 %v2243_v61, %v2241_v4  ;;  %v2245_v15 = vld [vmem:[#allocation2 + $0xf40] sm:$0xff]  ;;  %v2254_v4 = vld [vmem:[#allocation2 + $0xf88] sm:$0xff]  ;;  %v2256_v61 = vld [vmem:[#allocation2 + $0xf98] sm:$0xff] }
 0x478   : > { %v14576_v59 = vpack.c.bf16 %v2256_v61, %v2254_v4 }
 0x479   : > { %16739 = vst [vmem:[#allocation285_spill] sm:$0xff] %v14561_v47 }
 0x47a   : > { %11654 = vmatpush1.bf16.msra.mxu0 %v14549_v49  ;;  %v2247_v49 = vld [vmem:[#allocation2 + $0xf50] sm:$0xff]  ;;  %16744 = vst [vmem:[#allocation290_spill] sm:$0xff] %v14576_v59 }
 0x47b   : > { %11656 = vmatprep.subr.bf16.mxu0 %v14552_v48  ;;  %v14567_v0 = vpack.c.bf16 %v2247_v49, %v2245_v15  ;;  %v2249_v48 = vld [vmem:[#allocation2 + $0xf60] sm:$0xff]  ;;  %v2258_v15 = vld [vmem:[#allocation2 + $0xfa8] sm:$0xff]  ;;  %v2260_v49 = vld [vmem:[#allocation2 + $0xfb8] sm:$0xff] }
 0x47c   : > { %v14582_v18 = vpack.c.bf16 %v2260_v49, %v2258_v15 }
 0x47d   : > { %16741 = vst [vmem:[#allocation287_spill] sm:$0xff] %v14567_v0 }
 0x47e   : > { %11658 = vmatpush1.bf16.msra.mxu0 %v14555_v9  ;;  %v2251_v9 = vld [vmem:[#allocation2 + $0xf70] sm:$0xff]  ;;  %16746 = vst [vmem:[#allocation292_spill] sm:$0xff] %v14582_v18 }
 0x47f   : > { %11660 = vmatprep.subr.bf16.mxu0 %v14558_v2  ;;  %v14573_v36 = vpack.c.bf16 %v2251_v9, %v2249_v48  ;;  %v2253_v2 = vld [vmem:[#allocation2 + $0xf80] sm:$0xff]  ;;  %v2262_v48 = vld [vmem:[#allocation2 + $0xfc8] sm:$0xff]  ;;  %v2264_v9 = vld [vmem:[#allocation2 + $0xfd8] sm:$0xff] }
 0x480   : > { %v14588_v61 = vpack.c.bf16 %v2264_v9, %v2262_v48  ;;  %v13133_v48 = vld [vmem:[%s13691_s6] sm:$0x77]  ;;  %s16925_s6 = sld [smem:[#allocation304_spill]] }
 0x481   : > { %16743 = vst [vmem:[#allocation289_spill] sm:$0xff] %v14573_v36 }
 0x482   : > { %11662 = vmatpush1.bf16.msra.mxu0 %v14561_v47  ;;  %v2255_v47 = vld [vmem:[#allocation2 + $0xf90] sm:$0xff]  ;;  %16748 = vst [vmem:[#allocation294_spill] sm:$0xff] %v14588_v61 }
 0x483   : > { %11664 = vmatprep.subr.bf16.mxu0 %v14564_v17  ;;  %v14579_v50 = vpack.c.bf16 %v2255_v47, %v2253_v2  ;;  %v2257_v17 = vld [vmem:[#allocation2 + $0xfa0] sm:$0xff]  ;;  %v2263_v2 = vld [vmem:[#allocation2 + $0xfd0] sm:$0xff]  ;;  %v2266_v47 = vld [vmem:[#allocation2 + $0xfe8] sm:$0xff] }
 0x485   : > { %16745 = vst [vmem:[#allocation291_spill] sm:$0xff] %v14579_v50 }
 0x486   : > { %11666 = vmatpush1.bf16.msra.mxu0 %v14567_v0  ;;  %v2259_v0 = vld [vmem:[#allocation2 + $0xfb0] sm:$0xff] }
 0x487   : > { %11668 = vmatprep.subr.bf16.mxu0 %v14570_v38  ;;  %v14585_v4 = vpack.c.bf16 %v2259_v0, %v2257_v17  ;;  %v2268_v38 = vld [vmem:[#allocation2 + $0xff8] sm:$0xff]  ;;  %v2267_v17 = vld [vmem:[#allocation2 + $0xff0] sm:$0xff] }
 0x488   : > { %v14594_v49 = vpack.c.bf16 %v2268_v38, %v2266_v47  ;;  %v2644_v38 = vld [vmem:[%s16132_s9] sm:$0xff]  ;;  %v9732_v47 = vld [vmem:[%s16127_s4 + $0x188] sm:$0xff] }
 0x489   : > { %16747 = vst [vmem:[#allocation293_spill] sm:$0xff] %v14585_v4 }
 0x48a   : > { %11670 = vmatpush1.bf16.msra.mxu0 %v14573_v36  ;;  %v2261_v36 = vld [vmem:[#allocation2 + $0xfc0] sm:$0xff]  ;;  %16750 = vst [vmem:[#allocation296_spill] sm:$0xff] %v14594_v49 }
 0x48b   : > { %11672 = vmatprep.subr.bf16.mxu0 %v14576_v59  ;;  %v14591_v15 = vpack.c.bf16 %v2263_v2, %v2261_v36  ;;  %v13337_v2 = vmov 0  }
 0x48c   : > { %13129 = vset.pattern.permute.xlu0 %v13337_v2  ;;  %13130 = vset.pattern.permute.xlu1 %v13337_v2 }
 0x48d   : > { %16749 = vst [vmem:[#allocation295_spill] sm:$0xff] %v14591_v15  ;;  %v14603_v36 = vpop.f32.mrb[8].mxu1  ;;  %2647 = vperm.xlu0 %13129, %v2644_v38   ;;  %v9716_v38 = vld [vmem:[%s16127_s4 + $0x108] sm:$0xff] }
 0x48e   : > { %11674 = vmatpush1.bf16.msra.mxu0 %v14579_v50  ;;  %v2265_v50 = vld [vmem:[#allocation2 + $0xfe0] sm:$0xff]  ;;  %v14605_v9 = vpop.f32.mrb[9].mxu1 }
 0x48f   : > { %11676 = vmatprep.subr.bf16.mxu0 %v14582_v18  ;;  %v14597_v0 = vpack.c.bf16 %v2267_v17, %v2265_v50  ;;  %v9731_v50 = vld [vmem:[%s16127_s4 + $0x180] sm:$0xff] }
 0x490   : > { %v4552_v17 = vld [vmem:[%s16134_s11] sm:$0xff] }
 0x491   : > { %16751 = vst [vmem:[#allocation297_spill] sm:$0xff] %v14597_v0  ;;  %4556 = vperm.xlu0 %13129, %v4552_v17   ;;  %v9719_v17 = vld [vmem:[%s16127_s4 + $0x120] sm:$0xff] }
 0x492   : > { %11678 = vmatpush1.bf16.msra.mxu0 %v14585_v4 }
 0x493   : > { %11680 = vmatprep.subr.bf16.mxu0 %v14588_v61  ;;  %v9735_v61 = vld [vmem:[%s16127_s4 + $0x1a0] sm:$0xff] }
 0x496   : > { %11682 = vmatpush1.bf16.msra.mxu0 %v14591_v15  ;;  %v9734_v15 = vld [vmem:[%s16127_s4 + $0x198] sm:$0xff] }
 0x497   : > { %11684 = vmatprep.subr.bf16.mxu0 %v14594_v49  ;;  %v9733_v49 = vld [vmem:[%s16127_s4 + $0x190] sm:$0xff] }
 0x49a   : > { %11686 = vmatpush1.bf16.msra.mxu0 %v14597_v0  ;;  %v9715_v0 = vld [vmem:[%s16127_s4 + $0x100] sm:$0xff] }
 0x49b   : > { %v11785_v2 = vpack.c.bf16 %v9716_v38, %v9715_v0  ;;  %v9718_v0 = vld [vmem:[%s16127_s4 + $0x118] sm:$0xff]  ;;  %v6422_v38 = vld [vmem:[%s16136_s13 + $0x8] sm:$0xff] }
 0x49c   : > { %6430 = vperm.xlu0 %13129, %v6422_v38   ;;  %v9721_v38 = vld [vmem:[%s16127_s4 + $0x130] sm:$0xff] }
 0x49d   : > { %2334 = vmatmul.mubr.f32.vlgmr.msra.gmra.mrb[8].mxu0 %v13133_v48  ;;  %v11783_v48 = vpack.c.bf16 %v9732_v47, %v9731_v50  ;;  %v11787_v50 = vpack.c.bf16 %v9734_v15, %v9733_v49  ;;  %v9717_v47 = vld [vmem:[%s16127_s4 + $0x110] sm:$0xff]  ;;  %v9736_v15 = vld [vmem:[%s16127_s4 + $0x1a8] sm:$0xff] }
 0x49e   : > { %2415 = vmatprep.mubr.f32.mxu0 %v16591_v54  ;;  %v11791_v49 = vpack.c.bf16 %v9736_v15, %v9735_v61  ;;  %v7971_v61 = vld [vmem:[%s16138_s15 + $0x8] sm:$0xf] }
 0x49f   : > { %11784 = vmatprep.subr.bf16.mxu1 %v11783_v48  ;;  %v11789_v48 = vpack.c.bf16 %v9718_v0, %v9717_v47  ;;  %v9737_v0 = vld [vmem:[%s16127_s4 + $0x1b0] sm:$0xff] }
 0x4a0   : > { %11786 = vmatpush3.bf16.msra.mxu1 %v11785_v2  ;;  %v9720_v2 = vld [vmem:[%s16127_s4 + $0x128] sm:$0xff]  ;;  %7979 = vperm.xlu0 %13129, %v7971_v61  }
 0x4a1   : > { %11788 = vmatprep.subr.bf16.mxu1 %v11787_v50  ;;  %v11793_v47 = vpack.c.bf16 %v9720_v2, %v9719_v17  ;;  %v9738_v50 = vld [vmem:[%s16127_s4 + $0x1b8] sm:$0xff]  ;;  %v9739_v2 = vld [vmem:[%s16127_s4 + $0x1c0] sm:$0xff]  ;;  %v9724_v61 = vld [vmem:[%s16127_s4 + $0x148] sm:$0xff] }
 0x4a2   : > { %v11795_v15 = vpack.c.bf16 %v9738_v50, %v9737_v0  ;;  %v9723_v50 = vld [vmem:[%s16127_s4 + $0x140] sm:$0xff] }
 0x4a4   : > { %11790 = vmatpush3.bf16.msra.mxu1 %v11789_v48  ;;  %v9722_v48 = vld [vmem:[%s16127_s4 + $0x138] sm:$0xff] }
 0x4a5   : > { %11792 = vmatprep.subr.bf16.mxu1 %v11791_v49  ;;  %v11797_v17 = vpack.c.bf16 %v9722_v48, %v9721_v38  ;;  %v9740_v49 = vld [vmem:[%s16127_s4 + $0x1c8] sm:$0xff]  ;;  %v9741_v38 = vld [vmem:[%s16127_s4 + $0x1d0] sm:$0xff]  ;;  %v9742_v48 = vld [vmem:[%s16127_s4 + $0x1d8] sm:$0xff] }
 0x4a6   : > { %v11799_v0 = vpack.c.bf16 %v9740_v49, %v9739_v2  ;;  %v9725_v2 = vld [vmem:[%s16127_s4 + $0x150] sm:$0xff]  ;;  %v9726_v49 = vld [vmem:[%s16127_s4 + $0x158] sm:$0xff] }
 0x4a8   : > { %11794 = vmatpush3.bf16.msra.mxu1 %v11793_v47  ;;  %v11801_v47 = vpack.c.bf16 %v9724_v61, %v9723_v50  ;;  %v9743_v50 = vld [vmem:[%s16127_s4 + $0x1e0] sm:$0xff]  ;;  %v9744_v61 = vld [vmem:[%s16127_s4 + $0x1e8] sm:$0xff] }
 0x4a9   : > { %11796 = vmatprep.subr.bf16.mxu1 %v11795_v15  ;;  %v11803_v15 = vpack.c.bf16 %v9742_v48, %v9741_v38  ;;  %v9727_v38 = vld [vmem:[%s16127_s4 + $0x160] sm:$0xff]  ;;  %v9728_v48 = vld [vmem:[%s16127_s4 + $0x168] sm:$0xff] }
 0x4ac   : > { %11798 = vmatpush3.bf16.msra.mxu1 %v11797_v17  ;;  %v11805_v17 = vpack.c.bf16 %v9726_v49, %v9725_v2  ;;  %v2670_v2 = vld [vmem:[%s16127_s4 + $0x80] sm:$0xff] }
 0x4ad   : > { %11800 = vmatprep.subr.bf16.mxu1 %v11799_v0  ;;  %v11807_v0 = vpack.c.bf16 %v9744_v61, %v9743_v50  ;;  %v9707_v61 = vld [vmem:[%s16131_s8 + $0x38] sm:$0xff] }
 0x4b0   : > { %11802 = vmatpush3.bf16.msra.mxu1 %v11801_v47  ;;  %v11809_v47 = vpack.c.bf16 %v9728_v48, %v9727_v38  ;;  %v2655_v38 = vld [vmem:[%s16127_s4 + $0x8] sm:$0xff]  ;;  %v2672_v48 = vld [vmem:[%s16127_s4 + $0x90] sm:$0xff] }
 0x4b1   : > { %11804 = vmatprep.subr.bf16.mxu1 %v11803_v15  ;;  %v2671_v15 = vld [vmem:[%s16127_s4 + $0x88] sm:$0xff] }
 0x4b4   : > { %11806 = vmatpush3.bf16.msra.mxu1 %v11805_v17  ;;  %v11751_v17 = vpack.c.bf16 %v2671_v15, %v2670_v2  ;;  %v2656_v15 = vld [vmem:[%s16127_s4 + $0x10] sm:$0xff] }
 0x4b5   : > { %11808 = vmatprep.subr.bf16.mxu1 %v11807_v0  ;;  %v2654_v0 = vld [vmem:[%s16127_s4] sm:$0xff] }
 0x4b8   : > { %11810 = vmatpush3.bf16.msra.mxu1 %v11809_v47  ;;  %v11753_v47 = vpack.c.bf16 %v2655_v38, %v2654_v0  ;;  %v2658_v38 = vld [vmem:[%s16127_s4 + $0x20] sm:$0xff] }
 0x570   : > { %v2335_v49 = vpop.f32.mrb[8].mxu0 }
 0x571   : > { %v2337_v50 = vpop.f32.mrb[9].mxu0 }
 0x572   : > { %9708 = vmatprep.subr.msk.mxu0 %vm946_vm0, %v2337_v50  ;;  %v2674_v50 = vld [vmem:[%s16127_s4 + $0xa0] sm:$0xff] }
 0x573   : > { %9709 = vmatpush1.msk.msra.mxu0 %vm946_vm0, %v2335_v49  ;;  %v2657_v49 = vld [vmem:[%s16127_s4 + $0x18] sm:$0xff] }
 0x574   : > { %9710 = vmatmul.mubr.msk.f32.vlgmr.msra.gmra.mrb[2].mxu0 %vm942_vm1, %v9707_v61  ;;  %9712 = vmatprep.subr.msk.mxu0 %vm946_vm0, %v14605_v9  ;;  %v2673_v9 = vld [vmem:[%s16127_s4 + $0x98] sm:$0xff]  ;;  %v2675_v61 = vld [vmem:[%s16127_s4 + $0xa8] sm:$0xff] }
 0x575   : > { %9713 = vmatpush1.msk.msra.mxu0 %vm946_vm0, %v14603_v36  ;;  %2635 = vmatprep.mubr.f32.mxu0 %v16591_v54  ;;  %v9711_v36 = vld [vmem:[%s16131_s8 + $0x40] sm:$0xff]  ;;  %v11755_v2 = vpack.c.bf16 %v2673_v9, %v2672_v48  ;;  %v11759_v0 = vpack.c.bf16 %v2675_v61, %v2674_v50  ;;  %v2659_v48 = vld [vmem:[%s16127_s4 + $0x28] sm:$0xff]  ;;  %v2676_v9 = vld [vmem:[%s16127_s4 + $0xb0] sm:$0xff] }
 0x576   : > { %11752 = vmatprep.subr.bf16.mxu0 %v11751_v17  ;;  %v11757_v17 = vpack.c.bf16 %v2657_v49, %v2656_v15  ;;  %v2660_v15 = vld [vmem:[%s16127_s4 + $0x30] sm:$0xff]  ;;  %v2661_v49 = vld [vmem:[%s16127_s4 + $0x38] sm:$0xff]  ;;  %v2678_v50 = vld [vmem:[%s16127_s4 + $0xc0] sm:$0xff] }
 0x577   : > { %v2679_v61 = vld [vmem:[%s16127_s4 + $0xc8] sm:$0xff] }
 0x57c   : > { %9714 = vmatmul.mubr.msk.f32.vlgmr.msra.gmra.mrb[2].mxu0 %vm942_vm1, %v9711_v36  ;;  %v2677_v36 = vld [vmem:[%s16127_s4 + $0xb8] sm:$0xff] }
 0x57d   : > { %11754 = vmatpush3.bf16.msra.mxu0 %v11753_v47  ;;  %v11761_v47 = vpack.c.bf16 %v2659_v48, %v2658_v38  ;;  %v2662_v38 = vld [vmem:[%s16127_s4 + $0x40] sm:$0xff]  ;;  %v2663_v48 = vld [vmem:[%s16127_s4 + $0x48] sm:$0xff] }
 0x57e   : > { %11756 = vmatprep.subr.bf16.mxu0 %v11755_v2  ;;  %v11763_v2 = vpack.c.bf16 %v2677_v36, %v2676_v9  ;;  %v2680_v9 = vld [vmem:[%s16127_s4 + $0xd0] sm:$0xff]  ;;  %v2681_v36 = vld [vmem:[%s16127_s4 + $0xd8] sm:$0xff] }
 0x581   : > { %11758 = vmatpush3.bf16.msra.mxu0 %v11757_v17  ;;  %v11765_v17 = vpack.c.bf16 %v2661_v49, %v2660_v15  ;;  %v2664_v15 = vld [vmem:[%s16127_s4 + $0x50] sm:$0xff]  ;;  %v2665_v49 = vld [vmem:[%s16127_s4 + $0x58] sm:$0xff] }
 0x582   : > { %11760 = vmatprep.subr.bf16.mxu0 %v11759_v0  ;;  %v11767_v0 = vpack.c.bf16 %v2679_v61, %v2678_v50  ;;  %v2682_v50 = vld [vmem:[%s16127_s4 + $0xe0] sm:$0xff]  ;;  %v2683_v61 = vld [vmem:[%s16127_s4 + $0xe8] sm:$0xff] }
 0x585   : > { %11762 = vmatpush3.bf16.msra.mxu0 %v11761_v47  ;;  %v11769_v47 = vpack.c.bf16 %v2663_v48, %v2662_v38  ;;  %v2666_v38 = vld [vmem:[%s16127_s4 + $0x60] sm:$0xff]  ;;  %v2667_v48 = vld [vmem:[%s16127_s4 + $0x68] sm:$0xff] }
 0x586   : > { %11764 = vmatprep.subr.bf16.mxu0 %v11763_v2  ;;  %v11771_v2 = vpack.c.bf16 %v2681_v36, %v2680_v9  ;;  %v11777_v9 = vpack.c.bf16 %v2667_v48, %v2666_v38  ;;  %v2684_v36 = vld [vmem:[%s16127_s4 + $0xf0] sm:$0xff]  ;;  %v9730_v48 = vld [vmem:[%s16127_s4 + $0x178] sm:$0xff] }
 0x587   : > { %v9729_v38 = vld [vmem:[%s16127_s4 + $0x170] sm:$0xff] }
 0x589   : > { %11766 = vmatpush3.bf16.msra.mxu0 %v11765_v17  ;;  %v11773_v17 = vpack.c.bf16 %v2665_v49, %v2664_v15  ;;  %v9746_v49 = vld [vmem:[%s16127_s4 + $0x1f8] sm:$0xff] }
 0x58a   : > { %11768 = vmatprep.subr.bf16.mxu0 %v11767_v0  ;;  %v11775_v0 = vpack.c.bf16 %v2683_v61, %v2682_v50  ;;  %v2668_v50 = vld [vmem:[%s16127_s4 + $0x70] sm:$0xff]  ;;  %v2669_v61 = vld [vmem:[%s16127_s4 + $0x78] sm:$0xff] }
 0x58d   : > { %11770 = vmatpush3.bf16.msra.mxu0 %v11769_v47  ;;  %v2685_v47 = vld [vmem:[%s16127_s4 + $0xf8] sm:$0xff] }
 0x58e   : > { %11772 = vmatprep.subr.bf16.mxu0 %v11771_v2  ;;  %v9745_v2 = vld [vmem:[%s16127_s4 + $0x1f0] sm:$0xff]  ;;  %v11779_v15 = vpack.c.bf16 %v2685_v47, %v2684_v36  ;;  %v9763_v36 = vld [vmem:[%s16127_s4 + $0x280] sm:$0xff]  ;;  %v9764_v47 = vld [vmem:[%s16127_s4 + $0x288] sm:$0xff] }
 0x591   : > { %11774 = vmatpush3.bf16.msra.mxu0 %v11773_v17  ;;  %v11811_v17 = vpack.c.bf16 %v9746_v49, %v9745_v2  ;;  %v9795_v2 = vld [vmem:[%s16127_s4 + $0x380] sm:$0xff]  ;;  %v11815_v49 = vpack.c.bf16 %v9764_v47, %v9763_v36  ;;  %v9780_v47 = vld [vmem:[%s16127_s4 + $0x308] sm:$0xff] }
 0x592   : > { %11776 = vmatprep.subr.bf16.mxu0 %v11775_v0  ;;  %v11781_v0 = vpack.c.bf16 %v2669_v61, %v2668_v50  ;;  %v2648_v61 = vpop.permute.xlu0 %2647  ;;  %v9779_v36 = vld [vmem:[%s16127_s4 + $0x300] sm:$0xff] }
 0x593   : > { %11812 = vmatprep.subr.bf16.mxu1 %v11811_v17  ;;  %v11849_v59 = vpack.c.bf16 %v9780_v47, %v9779_v36  ;;  %v9799_v47 = vld [vmem:[%s16127_s4 + $0x3a0] sm:$0xff] }
 0x594   : > { %v11855_v30 = vpack.c.bf16 %v9800_v29, %v9799_v47  ;;  %v9801_v29 = vld [vmem:[%s16127_s4 + $0x3b0] sm:$0xff]  ;;  %v9771_v47 = vld [vmem:[%s16127_s4 + $0x2c0] sm:$0xff] }
 0x595   : > { %11778 = vmatpush3.bf16.msra.mxu0 %v11777_v9  ;;  %v11813_v9 = vpack.c.bf16 %v9730_v48, %v9729_v38 }
 0x596   : > { %11780 = vmatprep.subr.bf16.mxu0 %v11779_v15  ;;  %v9796_v15 = vld [vmem:[%s16127_s4 + $0x388] sm:$0xff] }
 0x597   : > { %11814 = vmatpush3.bf16.msra.mxu1 %v11813_v9  ;;  %v11847_v50 = vpack.c.bf16 %v9796_v15, %v9795_v2  ;;  %v9748_v9 = vld [vmem:[%s16127_s4 + $0x208] sm:$0xff]  ;;  %v9766_v15 = vld [vmem:[%s16127_s4 + $0x298] sm:$0xff] }
 0x599   : > { %11782 = vmatpush3.bf16.msra.mxu0 %v11781_v0  ;;  %11848 = vmatprep.subr.bf16.mxu1 %v11847_v50  ;;  %v9747_v0 = vld [vmem:[%s16127_s4 + $0x200] sm:$0xff]  ;;  %v9797_v50 = vld [vmem:[%s16127_s4 + $0x390] sm:$0xff] }
 0x59a   : > { %11816 = vmatprep.subr.bf16.mxu0 %v11815_v49  ;;  %v9765_v49 = vld [vmem:[%s16127_s4 + $0x290] sm:$0xff]  ;;  %v11817_v18 = vpack.c.bf16 %v9748_v9, %v9747_v0  ;;  %v9767_v0 = vld [vmem:[%s16127_s4 + $0x2a0] sm:$0xff] }
 0x59b   : > { %v11819_v9 = vpack.c.bf16 %v9766_v15, %v9765_v49 }
 0x64f   : > { %v2637_v17 = vpop.f32.mrb[2].mxu0 }
 0x650   : > { %v2650_v38 = vadd.f32 %v2648_v61, %v2637_v17  ;;  %v2639_v48 = vpop.f32.mrb[3].mxu0  ;;  %v9798_v17 = vld [vmem:[%s16127_s4 + $0x398] sm:$0xff] }
 0x651   : > { %v2651_v2 = vadd.f32 %v2648_v61, %v2639_v48  ;;  %v9749_v61 = vld [vmem:[%s16127_s4 + $0x210] sm:$0xff]  ;;  %v9750_v48 = vld [vmem:[%s16127_s4 + $0x218] sm:$0xff]  ;;  %v11851_v36 = vpack.c.bf16 %v9798_v17, %v9797_v50  ;;  %v9751_v50 = vld [vmem:[%s16127_s4 + $0x220] sm:$0xff] }
 0x652   : > { %v14868_v21 = vmax.f32 %v2650_v38, 0.0  ;;  %v9768_v38 = vld [vmem:[%s16127_s4 + $0x2a8] sm:$0xff]  ;;  %v11821_v49 = vpack.c.bf16 %v9750_v48, %v9749_v61 }
 0x653   : > { %v2653_v4 = vmax.f32 %v2651_v2, 0.0  ;;  %v9782_v2 = vld [vmem:[%s16127_s4 + $0x318] sm:$0xff]  ;;  %v9752_v17 = vld [vmem:[%s16127_s4 + $0x228] sm:$0xff]  ;;  %v11823_v58 = vpack.c.bf16 %v9768_v38, %v9767_v0  ;;  %v9785_v38 = vld [vmem:[%s16127_s4 + $0x330] sm:$0xff] }
 0x654   : > { %v11853_v15 = vpack.c.bf16 %v9782_v2, %v9781_v23  ;;  %v9784_v23 = vld [vmem:[%s16127_s4 + $0x328] sm:$0xff]  ;;  %v11825_v61 = vpack.c.bf16 %v9752_v17, %v9751_v50  ;;  %v9753_v2 = vld [vmem:[%s16127_s4 + $0x230] sm:$0xff]  ;;  %v9754_v0 = vld [vmem:[%s16127_s4 + $0x238] sm:$0xff] }
 0x655   : > { %2750 = vmatprep.mubr.f32.mxu0 %v2653_v4  ;;  %2853 = vmatprep.mubr.f32.mxu1 %v2653_v4  ;;  %v11857_v48 = vpack.c.bf16 %v9784_v23, %v9783_v42  ;;  %v9786_v42 = vld [vmem:[%s16127_s4 + $0x338] sm:$0xff]  ;;  %v9755_v17 = vld [vmem:[%s16127_s4 + $0x240] sm:$0xff]  ;;  %v9756_v23 = vld [vmem:[%s16127_s4 + $0x248] sm:$0xff] }
 0x656   : > { %2751 = vmatmul.mubr.f32.vlgmr.msra.gmra.mrb[10].mxu0 %v14868_v21  ;;  %2854 = vmatmul.mubr.f32.vlgmr.msra.gmra.mrb[10].mxu1 %v14868_v21  ;;  %v11861_v50 = vpack.c.bf16 %v9786_v42, %v9785_v38  ;;  %v9757_v38 = vld [vmem:[%s16127_s4 + $0x250] sm:$0xff]  ;;  %v9758_v42 = vld [vmem:[%s16127_s4 + $0x258] sm:$0xff] }
 0x657   : > { %11818 = vmatpush3.bf16.msra.mxu0 %v11817_v18  ;;  %11850 = vmatpush3.bf16.msra.mxu1 %v11849_v59  ;;  %v9769_v59 = vld [vmem:[%s16127_s4 + $0x2b0] sm:$0xff]  ;;  %v9770_v18 = vld [vmem:[%s16127_s4 + $0x2b8] sm:$0xff] }
 0x658   : > { %2956 = vmatprep.mubr.f32.mxu0 %v2653_v4  ;;  %3059 = vmatprep.mubr.f32.mxu1 %v2653_v4  ;;  %v9802_v4 = vld [vmem:[%s16127_s4 + $0x3b8] sm:$0xff] }
 0x659   : > { %11820 = vmatprep.subr.bf16.mxu0 %v11819_v9  ;;  %11852 = vmatprep.subr.bf16.mxu1 %v11851_v36  ;;  %v11827_v9 = vpack.c.bf16 %v9770_v18, %v9769_v59  ;;  %v11859_v36 = vpack.c.bf16 %v9802_v4, %v9801_v29  ;;  %v9787_v29 = vld [vmem:[%s16127_s4 + $0x340] sm:$0xff]  ;;  %v9788_v4 = vld [vmem:[%s16127_s4 + $0x348] sm:$0xff] }
 0x65b   : > { %11822 = vmatpush3.bf16.msra.mxu0 %v11821_v49  ;;  %11854 = vmatpush3.bf16.msra.mxu1 %v11853_v15  ;;  %v9772_v49 = vld [vmem:[%s16127_s4 + $0x2c8] sm:$0xff]  ;;  %v11829_v15 = vpack.c.bf16 %v9754_v0, %v9753_v2  ;;  %v9805_v2 = vld [vmem:[%s16127_s4 + $0x3d0] sm:$0xff]  ;;  %v9806_v0 = vld [vmem:[%s16127_s4 + $0x3d8] sm:$0xff] }
 0x65c   : > { %11824 = vmatprep.subr.bf16.mxu0 %v11823_v58  ;;  %11856 = vmatprep.subr.bf16.mxu1 %v11855_v30  ;;  %v9803_v30 = vld [vmem:[%s16127_s4 + $0x3c0] sm:$0xff]  ;;  %v9804_v58 = vld [vmem:[%s16127_s4 + $0x3c8] sm:$0xff]  ;;  %v11831_v59 = vpack.c.bf16 %v9772_v49, %v9771_v47  ;;  %v11867_v49 = vpack.c.bf16 %v9806_v0, %v9805_v2 }
 0x65d   : > { %v11863_v18 = vpack.c.bf16 %v9804_v58, %v9803_v30  ;;  %v9789_v30 = vld [vmem:[%s16127_s4 + $0x350] sm:$0xff]  ;;  %v9790_v58 = vld [vmem:[%s16127_s4 + $0x358] sm:$0xff]  ;;  %v9791_v2 = vld [vmem:[%s16127_s4 + $0x360] sm:$0xff] }
 0x65e   : > { %v9792_v0 = vld [vmem:[%s16127_s4 + $0x368] sm:$0xff] }
 0x65f   : > { %11826 = vmatpush3.bf16.msra.mxu0 %v11825_v61  ;;  %11858 = vmatpush3.bf16.msra.mxu1 %v11857_v48  ;;  %v9773_v61 = vld [vmem:[%s16127_s4 + $0x2d0] sm:$0xff]  ;;  %v9774_v48 = vld [vmem:[%s16127_s4 + $0x2d8] sm:$0xff] }
 0x660   : > { %11828 = vmatprep.subr.bf16.mxu0 %v11827_v9  ;;  %11860 = vmatprep.subr.bf16.mxu1 %v11859_v36  ;;  %v11833_v9 = vpack.c.bf16 %v9756_v23, %v9755_v17  ;;  %v11865_v36 = vpack.c.bf16 %v9788_v4, %v9787_v29  ;;  %v11835_v47 = vpack.c.bf16 %v9774_v48, %v9773_v61  ;;  %v9807_v17 = vld [vmem:[%s16127_s4 + $0x3e0] sm:$0xff]  ;;  %v9808_v23 = vld [vmem:[%s16127_s4 + $0x3e8] sm:$0xff] }
 0x661   : > { %v9759_v29 = vld [vmem:[%s16127_s4 + $0x260] sm:$0xff]  ;;  %v9760_v4 = vld [vmem:[%s16127_s4 + $0x268] sm:$0xff]  ;;  %v11871_v48 = vpack.c.bf16 %v9808_v23, %v9807_v17  ;;  %v9793_v17 = vld [vmem:[%s16127_s4 + $0x370] sm:$0xff] }
 0x662   : > { %v9794_v23 = vld [vmem:[%s16127_s4 + $0x378] sm:$0xff] }
 0x663   : > { %11830 = vmatpush3.bf16.msra.mxu0 %v11829_v15  ;;  %11862 = vmatpush3.bf16.msra.mxu1 %v11861_v50  ;;  %v9775_v15 = vld [vmem:[%s16127_s4 + $0x2e0] sm:$0xff]  ;;  %v9776_v50 = vld [vmem:[%s16127_s4 + $0x2e8] sm:$0xff] }
 0x664   : > { %11832 = vmatprep.subr.bf16.mxu0 %v11831_v59  ;;  %11864 = vmatprep.subr.bf16.mxu1 %v11863_v18  ;;  %v11837_v59 = vpack.c.bf16 %v9758_v42, %v9757_v38  ;;  %v11869_v18 = vpack.c.bf16 %v9790_v58, %v9789_v30  ;;  %v11839_v61 = vpack.c.bf16 %v9776_v50, %v9775_v15  ;;  %v9809_v38 = vld [vmem:[%s16127_s4 + $0x3f0] sm:$0xff]  ;;  %v9810_v42 = vld [vmem:[%s16127_s4 + $0x3f8] sm:$0xff] }
 0x665   : > { %v9761_v30 = vld [vmem:[%s16127_s4 + $0x270] sm:$0xff]  ;;  %v11875_v15 = vpack.c.bf16 %v9810_v42, %v9809_v38  ;;  %v9762_v50 = vld [vmem:[%s16127_s4 + $0x278] sm:$0xff] }
 0x666   : > { %v3074_v42 = vld [vmem:[#allocation4 + $0x30] sm:$0xff] }
 0x667   : > { %11834 = vmatpush3.bf16.msra.mxu0 %v11833_v9  ;;  %11866 = vmatpush3.bf16.msra.mxu1 %v11865_v36  ;;  %v9777_v9 = vld [vmem:[%s16127_s4 + $0x2f0] sm:$0xff]  ;;  %v9778_v36 = vld [vmem:[%s16127_s4 + $0x2f8] sm:$0xff] }
 0x668   : > { %11836 = vmatprep.subr.bf16.mxu0 %v11835_v47  ;;  %11868 = vmatprep.subr.bf16.mxu1 %v11867_v49  ;;  %v11841_v47 = vpack.c.bf16 %v9760_v4, %v9759_v29  ;;  %v11873_v49 = vpack.c.bf16 %v9792_v0, %v9791_v2  ;;  %v11843_v58 = vpack.c.bf16 %v9778_v36, %v9777_v9  ;;  %v3068_v29 = vld [vmem:[#allocation4] sm:$0xff]  ;;  %v3069_v4 = vld [vmem:[#allocation4 + $0x8] sm:$0xff]  ;;  %v3071_v0 = vld [vmem:[#allocation4 + $0x18] sm:$0xff] }
 0x669   : > { %v15025_v2 = vpack.c.bf16 %v3069_v4, %v3068_v29  ;;  %v3073_v36 = vld [vmem:[#allocation4 + $0x28] sm:$0xff] }
 0x66b   : > { %11838 = vmatpush3.bf16.msra.mxu0 %v11837_v59  ;;  %11870 = vmatpush3.bf16.msra.mxu1 %v11869_v18  ;;  %v11845_v59 = vpack.c.bf16 %v9762_v50, %v9761_v30  ;;  %v11877_v18 = vpack.c.bf16 %v9794_v23, %v9793_v17 }
 0x66c   : > { %11840 = vmatprep.subr.bf16.mxu0 %v11839_v61  ;;  %11872 = vmatprep.subr.bf16.mxu1 %v11871_v48  ;;  %v3070_v61 = vld [vmem:[#allocation4 + $0x10] sm:$0xff]  ;;  %v16403_v48 = vmov 0.0|0.0  }
 0x66d   : > { %v15028_v9 = vpack.c.bf16 %v3071_v0, %v3070_v61 }
 0x66f   : > { %11842 = vmatpush3.bf16.msra.mxu0 %v11841_v47  ;;  %11874 = vmatpush3.bf16.msra.mxu1 %v11873_v49  ;;  %v3075_v47 = vld [vmem:[#allocation4 + $0x38] sm:$0xff] }
 0x670   : > { %11844 = vmatprep.subr.bf16.mxu0 %v11843_v58  ;;  %11876 = vmatprep.subr.bf16.mxu1 %v11875_v15  ;;  %v15037_v49 = vpack.c.bf16 %v3075_v47, %v3074_v42  ;;  %v3154_v42 = vld [vmem:[#allocation4 + $0x48] sm:$0xff] }
 0x673   : > { %11846 = vmatpush3.bf16.msra.mxu0 %v11845_v59  ;;  %11878 = vmatpush3.bf16.msra.mxu1 %v11877_v18 }
 0x674   : > { %11879 = vmatprep.subr.bf16.mxu0 %v16403_v48 }
 0x676   : > { %2957 = vmatmul.mubr.f32.vlgmr.msra.gmra.mrb[12].mxu0 %v14868_v21  ;;  %3060 = vmatmul.mubr.f32.vlgmr.msra.gmra.mrb[12].mxu1 %v14868_v21  ;;  %v3072_v21 = vld [vmem:[#allocation4 + $0x20] sm:$0xff] }
 0x677   : > { %11881 = vmatpush3.bf16.msra.mxu0 %v15025_v2  ;;  %v15033_v38 = vpack.c.bf16 %v3073_v36, %v3072_v21  ;;  %10532 = vmatprep.mubr.msk.f32.mxu0 %vm13339_vm2, %v16591_v54  ;;  %v3153_v36 = vld [vmem:[#allocation4 + $0x40] sm:$0xff] }
 0x678   : > { %11882 = vmatprep.subr.bf16.mxu0 %v16403_v48 }
 0x67b   : > { %11884 = vmatpush3.bf16.msra.mxu0 %v15028_v9 }
 0x67c   : > { %11885 = vmatprep.subr.bf16.mxu0 %v16403_v48 }
 0x67f   : > { %11887 = vmatpush3.bf16.msra.mxu0 %v15033_v38 }
 0x680   : > { %11888 = vmatprep.subr.bf16.mxu0 %v16403_v48 }
 0x683   : > { %11890 = vmatpush3.bf16.msra.mxu0 %v15037_v49 }
 0x684   : > { %11891 = vmatprep.subr.bf16.mxu0 %v16403_v48  ;;  %v15043_v48 = vpack.c.bf16 %v3154_v42, %v3153_v36  ;;  %v3398_v36 = vld [vmem:[#allocation4 + $0x80] sm:$0xff]  ;;  %v3399_v42 = vld [vmem:[#allocation4 + $0x88] sm:$0xff] }
 0x729   : > { %v10058_v30 = vpop.f32.mrb[10].mxu0  ;;  %v10093_v58 = vpop.f32.mrb[10].mxu1 }
 0x72a   : > { %v10059_v15 = vpop.f32.mrb[11].mxu0  ;;  %v10094_v50 = vpop.f32.mrb[11].mxu1 }
 0x72b   : > { %v10060_v17 = vadd.f32 %v10059_v15, %v10058_v30  ;;  %v10095_v23 = vadd.f32 %v10094_v50, %v10093_v58  ;;  %v15050_v30 = vpack.c.bf16 %v3156_v11, %v3155_v27  ;;  %v16752_v58 = vmov 0.0|0.0   ;;  %v3157_v15 = vld [vmem:[#allocation4 + $0x60] sm:$0xff]  ;;  %v3158_v50 = vld [vmem:[#allocation4 + $0x68] sm:$0xff]  ;;  %v9813_v11 = vld [vmem:[%s16133_s10 + $0x10] sm:$0xff] }
 0x72d   : > { %v3065_v59 = vmax.f32 %v10060_v17, %v10095_v23  ;;  %v15056_v17 = vpack.c.bf16 %v3158_v50, %v3157_v15  ;;  %v3159_v23 = vld [vmem:[#allocation4 + $0x70] sm:$0xff]  ;;  %v15082_v15 = vpack.c.bf16 %v3399_v42, %v3398_v36  ;;  %v3729_v36 = vld [vmem:[#allocation4 + $0x108] sm:$0xff] }
 0x72e   : > { %v3400_v50 = vld [vmem:[#allocation4 + $0x90] sm:$0xff] }
 0x749   : > { %v10128_v18 = vpop.f32.mrb[12].mxu0  ;;  %v10163_v29 = vpop.f32.mrb[12].mxu1 }
 0x74a   : > { %v10129_v4 = vpop.f32.mrb[13].mxu0  ;;  %v10164_v61 = vpop.f32.mrb[13].mxu1 }
 0x74b   : > { %v10130_v0 = vadd.f32 %v10129_v4, %v10128_v18  ;;  %v10165_v21 = vadd.f32 %v10164_v61, %v10163_v29  ;;  %v9814_v61 = vld [vmem:[%s16133_s10 + $0x18] sm:$0xf] }
 0x74d   : > { %v3066_v47 = vmax.f32 %v10130_v0, %v10165_v21  ;;  %v3150_v21 = vld [vmem:[%s16133_s10] sm:$0xff] }
 0x74f   : > { %v15045_v33 = vmax.f32 %v3065_v59, %v3066_v47  ;;  %v3160_v59 = vld [vmem:[#allocation4 + $0x78] sm:$0xff]  ;;  %v3151_v47 = vld [vmem:[%s16133_s10 + $0x8] sm:$0xf] }
 0x750   : > { %v15060_v18 = vpack.c.bf16 %v3160_v59, %v3159_v23  ;;  %v3401_v23 = vld [vmem:[#allocation4 + $0x98] sm:$0xff] }
 0x751   : > { %10533 = vmatmul.mubr.msk.f32.vlgmr.msra.gmra.mrb[14].mxu0 %vm3076_vm3, %v15045_v33  ;;  %v15086_v59 = vpack.c.bf16 %v3401_v23, %v3400_v50  ;;  %v3731_v50 = vld [vmem:[#allocation4 + $0x118] sm:$0xff] }
 0x752   : > { %11893 = vmatpush3.bf16.msra.mxu0 %v15043_v48  ;;  %10551 = vmatprep.mubr.msk.f32.mxu0 %vm13339_vm2, %v16591_v54 }
 0x753   : > { %11894 = vmatprep.subr.bf16.mxu0 %v16752_v58 }
 0x756   : > { %11896 = vmatpush3.bf16.msra.mxu0 %v15050_v30 }
 0x757   : > { %11897 = vmatprep.subr.bf16.mxu0 %v16752_v58 }
 0x75a   : > { %11899 = vmatpush3.bf16.msra.mxu0 %v15056_v17 }
 0x75b   : > { %11900 = vmatprep.subr.bf16.mxu0 %v16752_v58 }
 0x75e   : > { %11902 = vmatpush3.bf16.msra.mxu0 %v15060_v18 }
 0x761   : > { %10552 = vmatmul.mubr.msk.f32.vlgmr.msra.gmra.mrb[16].mxu0 %vm3076_vm3, %v15045_v33 }
 0x762   : > { %10556 = vmatprep.mubr.msk.f32.mxu0 %vm3234_vm4, %v9813_v11  ;;  %v3402_v11 = vld [vmem:[#allocation4 + $0xa0] sm:$0xff] }
 0x824   : > { %v3146_v27 = vpop.f32.mrb[14].mxu0 }
 0x825   : > { %v10534_v29 = vpop.f32.mrb[15].mxu0 }
 0x834   : > { %v3227_v4 = vpop.f32.mrb[16].mxu0 }
 0x835   : > { %v10553_v0 = vpop.f32.mrb[17].mxu0  ;;  %10554 = vmatprep.subr.mxu0 %v3227_v4 }
 0x836   : > { %10555 = vmatpush3.msra.mxu0 %v3227_v4  ;;  %v3404_v4 = vld [vmem:[#allocation4 + $0xb0] sm:$0xff] }
 0x837   : > { %10557 = vmatmul.mubr.msk.f32.vlgmr.msra.gmra.mrb[18].mxu0 %vm3234_vm4, %v9814_v61  ;;  %10559 = vmatprep.subr.mxu0 %v3146_v27  ;;  %v3405_v61 = vld [vmem:[#allocation4 + $0xb8] sm:$0xff] }
 0x838   : > { %10560 = vmatpush3.msra.mxu0 %v3146_v27  ;;  %10561 = vmatprep.mubr.msk.f32.mxu0 %vm3234_vm4, %v3150_v21  ;;  %v3403_v27 = vld [vmem:[#allocation4 + $0xa8] sm:$0xff]  ;;  %v15096_v0 = vpack.c.bf16 %v3405_v61, %v3404_v4  ;;  %v3728_v21 = vld [vmem:[#allocation4 + $0x100] sm:$0xff]  ;;  %v3734_v61 = vld [vmem:[#allocation4 + $0x130] sm:$0xff] }
 0x839   : > { %11903 = vmatprep.subr.bf16.mxu0 %v16752_v58  ;;  %v15092_v29 = vpack.c.bf16 %v3403_v27, %v3402_v11  ;;  %v15100_v42 = vpack.c.bf16 %v3729_v36, %v3728_v21  ;;  %v3732_v11 = vld [vmem:[#allocation4 + $0x120] sm:$0xff]  ;;  %v3733_v27 = vld [vmem:[#allocation4 + $0x128] sm:$0xff]  ;;  %v3735_v21 = vld [vmem:[#allocation4 + $0x138] sm:$0xff] }
 0x83a   : > { %v15112_v4 = vpack.c.bf16 %v3733_v27, %v3732_v11  ;;  %v15116_v36 = vpack.c.bf16 %v3735_v21, %v3734_v61  ;;  %v3895_v11 = vld [vmem:[#allocation4 + $0x150] sm:$0xff]  ;;  %v3896_v27 = vld [vmem:[#allocation4 + $0x158] sm:$0xff]  ;;  %v3897_v61 = vld [vmem:[#allocation4 + $0x160] sm:$0xff] }
 0x83b   : > { %v15126_v62 = vpack.c.bf16 %v3896_v27, %v3895_v11  ;;  %v3898_v21 = vld [vmem:[#allocation4 + $0x168] sm:$0xff]  ;;  %v4223_v11 = vld [vmem:[#allocation4 + $0x1c0] sm:$0xff] }
 0x83c   : > { %v4224_v27 = vld [vmem:[#allocation4 + $0x1c8] sm:$0xff] }
 0x83d   : > { %v15140_v45 = vpack.c.bf16 %v4224_v27, %v4223_v11  ;;  %v4229_v27 = vld [vmem:[#allocation4 + $0x1f0] sm:$0xff] }
 0x83e   : > { %v15156_v40 = vpack.c.bf16 %v4230_v34, %v4229_v27  ;;  %v3564_v34 = vld [vmem:[#allocation4 + $0xc8] sm:$0xff] }
 0x83f   : > { %10562 = vmatmul.mubr.msk.f32.vlgmr.msra.gmra.mrb[18].mxu0 %vm3234_vm4, %v3151_v47  ;;  %v3730_v47 = vld [vmem:[#allocation4 + $0x110] sm:$0xff] }
 0x840   : > { %11905 = vmatpush3.bf16.msra.mxu0 %v15082_v15  ;;  %10580 = vmatprep.mubr.msk.f32.mxu0 %vm13339_vm2, %v16591_v54  ;;  %v15106_v23 = vpack.c.bf16 %v3731_v50, %v3730_v47  ;;  %v3893_v47 = vld [vmem:[#allocation4 + $0x140] sm:$0xff]  ;;  %v3894_v50 = vld [vmem:[#allocation4 + $0x148] sm:$0xff] }
 0x841   : > { %11906 = vmatprep.subr.bf16.mxu0 %v16752_v58  ;;  %v15120_v5 = vpack.c.bf16 %v3894_v50, %v3893_v47  ;;  %v15132_v47 = vpack.c.bf16 %v3898_v21, %v3897_v61  ;;  %v3899_v50 = vld [vmem:[#allocation4 + $0x170] sm:$0xff]  ;;  %v4226_v21 = vld [vmem:[#allocation4 + $0x1d8] sm:$0xff] }
 0x842   : > { %v15136_v51 = vpack.c.bf16 %v3900_v55, %v3899_v50  ;;  %v4225_v61 = vld [vmem:[#allocation4 + $0x1d0] sm:$0xff]  ;;  %v4227_v55 = vld [vmem:[#allocation4 + $0x1e0] sm:$0xff]  ;;  %v4228_v50 = vld [vmem:[#allocation4 + $0x1e8] sm:$0xff] }
 0x843   : > { %v15146_v44 = vpack.c.bf16 %v4226_v21, %v4225_v61  ;;  %v15152_v11 = vpack.c.bf16 %v4228_v50, %v4227_v55  ;;  %v9820_v61 = vld [vmem:[%s16133_s10 + $0x20] sm:$0xff] }
 0x844   : > { %11908 = vmatpush3.bf16.msra.mxu0 %v15086_v59  ;;  %10585 = vmatprep.mubr.msk.f32.mxu1 %vm3234_vm4, %v9820_v61  ;;  %v3563_v50 = vld [vmem:[#allocation4 + $0xc0] sm:$0xff]  ;;  %v15178_v61 = vpack.c.bf16 %v3566_v1, %v3565_v22 }
 0x845   : > { %11909 = vmatprep.subr.bf16.mxu0 %v16752_v58  ;;  %v15173_v6 = vpack.c.bf16 %v3564_v34, %v3563_v50  ;;  %v3567_v50 = vld [vmem:[#allocation4 + $0xe0] sm:$0xff]  ;;  %v3568_v34 = vld [vmem:[#allocation4 + $0xe8] sm:$0xff] }
 0x848   : > { %11911 = vmatpush3.bf16.msra.mxu0 %v15092_v29 }
 0x849   : > { %11912 = vmatprep.subr.bf16.mxu0 %v16752_v58 }
 0x84c   : > { %11914 = vmatpush3.bf16.msra.mxu0 %v15096_v0 }
 0x84d   : > { %11927 = vmatprep.subr.bf16.mxu0 %v16752_v58 }
 0x84f   : > { %10581 = vmatmul.mubr.msk.f32.vlgmr.msra.gmra.mrb[20].mxu0 %vm3076_vm3, %v15045_v33 }
 0x850   : > { %11929 = vmatpush3.bf16.msra.mxu0 %v15100_v42  ;;  %10628 = vmatprep.mubr.msk.f32.mxu0 %vm13339_vm2, %v16591_v54 }
 0x851   : > { %11930 = vmatprep.subr.bf16.mxu0 %v16752_v58 }
 0x854   : > { %11932 = vmatpush3.bf16.msra.mxu0 %v15106_v23 }
 0x855   : > { %11933 = vmatprep.subr.bf16.mxu0 %v16752_v58 }
 0x858   : > { %11935 = vmatpush3.bf16.msra.mxu0 %v15112_v4 }
 0x859   : > { %11936 = vmatprep.subr.bf16.mxu0 %v16752_v58 }
 0x85c   : > { %11938 = vmatpush3.bf16.msra.mxu0 %v15116_v36 }
 0x85d   : > { %11939 = vmatprep.subr.bf16.mxu0 %v16752_v58 }
 0x85f   : > { %10629 = vmatmul.mubr.msk.f32.vlgmr.msra.gmra.mrb[22].mxu0 %vm3076_vm3, %v15045_v33 }
 0x860   : > { %11941 = vmatpush3.bf16.msra.mxu0 %v15120_v5  ;;  %10652 = vmatprep.mubr.msk.f32.mxu0 %vm13339_vm2, %v16591_v54 }
 0x861   : > { %11942 = vmatprep.subr.bf16.mxu0 %v16752_v58 }
 0x864   : > { %11944 = vmatpush3.bf16.msra.mxu0 %v15126_v62 }
 0x865   : > { %11945 = vmatprep.subr.bf16.mxu0 %v16752_v58 }
 0x868   : > { %11947 = vmatpush3.bf16.msra.mxu0 %v15132_v47 }
 0x869   : > { %11948 = vmatprep.subr.bf16.mxu0 %v16752_v58 }
 0x86c   : > { %11950 = vmatpush3.bf16.msra.mxu0 %v15136_v51 }
 0x86d   : > { %11963 = vmatprep.subr.bf16.mxu0 %v16752_v58 }
 0x86f   : > { %10653 = vmatmul.mubr.msk.f32.vlgmr.msra.gmra.mrb[24].mxu0 %vm3076_vm3, %v15045_v33 }
 0x870   : > { %11965 = vmatpush3.bf16.msra.mxu0 %v15140_v45  ;;  %10700 = vmatprep.mubr.msk.f32.mxu0 %vm13339_vm2, %v16591_v54 }
 0x871   : > { %11966 = vmatprep.subr.bf16.mxu0 %v16752_v58 }
 0x874   : > { %11968 = vmatpush3.bf16.msra.mxu0 %v15146_v44 }
 0x875   : > { %11969 = vmatprep.subr.bf16.mxu0 %v16752_v58 }
 0x878   : > { %11971 = vmatpush3.bf16.msra.mxu0 %v15152_v11 }
 0x879   : > { %11972 = vmatprep.subr.bf16.mxu0 %v16752_v58 }
 0x87c   : > { %11974 = vmatpush3.bf16.msra.mxu0 %v15156_v40 }
 0x87f   : > { %10701 = vmatmul.mubr.msk.f32.vlgmr.msra.gmra.mrb[26].mxu0 %vm3076_vm3, %v15045_v33 }
 0x912   : > { %v15166_v21 = vpop.f32.mrb[18].mxu0 }
 0x913   : > { %v15168_v55 = vpop.f32.mrb[19].mxu0 }
 0x922   : > { %v3472_v27 = vpop.f32.mrb[20].mxu0 }
 0x923   : > { %v10582_v39 = vpop.f32.mrb[21].mxu0  ;;  %10583 = vmatprep.subr.mxu1 %v3472_v27 }
 0x924   : > { %10584 = vmatpush3.msra.mxu1 %v3472_v27  ;;  %v15184_v39 = vpack.c.bf16 %v3568_v34, %v3567_v50  ;;  %v3569_v27 = vld [vmem:[#allocation4 + $0xf0] sm:$0xff] }
 0x925   : > { %11915 = vmatprep.subr.bf16.mxu1 %v16752_v58  ;;  %10586 = vmatmul.mubr.msk.f32.vlgmr.msra.gmra.mrb[14].mxu1 %vm3234_vm4, %v9821_v57  ;;  %v15188_v57 = vpack.c.bf16 %v3570_v53, %v3569_v27  ;;  %v9826_v27 = vld [vmem:[%s16133_s10 + $0x38] sm:$0xf] }
 0x926   : > { %11917 = vmatpush3.bf16.msra.mxu1 %v15173_v6  ;;  %10604 = vmatprep.mubr.msk.f32.mxu1 %vm13339_vm2, %v16591_v54 }
 0x927   : > { %11918 = vmatprep.subr.bf16.mxu1 %v16752_v58 }
 0x92a   : > { %11920 = vmatpush3.bf16.msra.mxu1 %v15178_v61 }
 0x92b   : > { %11921 = vmatprep.subr.bf16.mxu1 %v16752_v58 }
 0x92e   : > { %11923 = vmatpush3.bf16.msra.mxu1 %v15184_v39 }
 0x92f   : > { %11924 = vmatprep.subr.bf16.mxu1 %v16752_v58 }
 0x932   : > { %11926 = vmatpush3.bf16.msra.mxu1 %v15188_v57  ;;  %v3802_v1 = vpop.f32.mrb[22].mxu0 }
 0x933   : > { %v10630_v22 = vpop.f32.mrb[23].mxu0 }
 0x934   : > { %v9830_v22 = vld [vmem:[%s16133_s10 + $0x40] sm:$0xff] }
 0x935   : > { %10605 = vmatmul.mubr.msk.f32.vlgmr.msra.gmra.mrb[16].mxu1 %vm3076_vm3, %v15045_v33 }
 0x936   : > { %10609 = vmatprep.mubr.msk.f32.mxu1 %vm3234_vm4, %v9825_v12  ;;  %v9831_v12 = vld [vmem:[%s16133_s10 + $0x48] sm:$0xf] }
 0x942   : > { %v3967_v37 = vpop.f32.mrb[24].mxu0 }
 0x943   : > { %v10654_v50 = vpop.f32.mrb[25].mxu0 }
 0x944   : > { %v9836_v50 = vld [vmem:[%s16133_s10 + $0x58] sm:$0xf] }
 0x952   : > { %v4297_v34 = vpop.f32.mrb[26].mxu0 }
 0x953   : > { %v10702_v24 = vpop.f32.mrb[27].mxu0 }
 0x954   : > { %v4058_v24 = vld [vmem:[#allocation4 + $0x180] sm:$0xff] }
 0xa08   : > { %v3637_v53 = vpop.f32.mrb[16].mxu1 }
 0xa09   : > { %v10606_v63 = vpop.f32.mrb[17].mxu1  ;;  %10607 = vmatprep.subr.mxu1 %v3637_v53 }
 0xa0a   : > { %10608 = vmatpush3.msra.mxu1 %v3637_v53  ;;  %v9835_v63 = vld [vmem:[%s16133_s10 + $0x50] sm:$0xff] }
 0xa0b   : > { %10610 = vmatmul.mubr.msk.f32.vlgmr.msra.gmra.mrb[14].mxu1 %vm3234_vm4, %v9826_v27  ;;  %10631 = vmatprep.subr.mxu1 %v3802_v1  ;;  %v4060_v27 = vld [vmem:[#allocation4 + $0x190] sm:$0xff] }
 0xa0c   : > { %10632 = vmatpush3.msra.mxu1 %v3802_v1  ;;  %10633 = vmatprep.mubr.msk.f32.mxu1 %vm3234_vm4, %v9830_v22  ;;  %v4059_v1 = vld [vmem:[#allocation4 + $0x188] sm:$0xff]  ;;  %v4061_v22 = vld [vmem:[#allocation4 + $0x198] sm:$0xff] }
 0xa0d   : > { %10655 = vmatprep.subr.mxu1 %v3967_v37  ;;  %v15218_v53 = vpack.c.bf16 %v4059_v1, %v4058_v24  ;;  %v4064_v24 = vld [vmem:[#allocation4 + $0x1b0] sm:$0xff]  ;;  %v4065_v1 = vld [vmem:[#allocation4 + $0x1b8] sm:$0xff] }
 0xa13   : > { %10634 = vmatmul.mubr.msk.f32.vlgmr.msra.gmra.mrb[14].mxu1 %vm3234_vm4, %v9831_v12  ;;  %v15222_v12 = vpack.c.bf16 %v4061_v22, %v4060_v27  ;;  %v9840_v27 = vld [vmem:[%s16133_s10 + $0x60] sm:$0xff] }
 0xa14   : > { %10656 = vmatpush3.msra.mxu1 %v3967_v37  ;;  %10657 = vmatprep.mubr.msk.f32.mxu1 %vm3234_vm4, %v9835_v63  ;;  %v4062_v37 = vld [vmem:[#allocation4 + $0x1a0] sm:$0xff]  ;;  %v4063_v63 = vld [vmem:[#allocation4 + $0x1a8] sm:$0xff] }
 0xa15   : > { %11951 = vmatprep.subr.bf16.mxu1 %v16752_v58  ;;  %v15228_v52 = vpack.c.bf16 %v4063_v63, %v4062_v37  ;;  %v9841_v37 = vld [vmem:[%s16133_s10 + $0x68] sm:$0xf] }
 0xa1b   : > { %10658 = vmatmul.mubr.msk.f32.vlgmr.msra.gmra.mrb[14].mxu1 %vm3234_vm4, %v9836_v50  ;;  %v15232_v50 = vpack.c.bf16 %v4065_v1, %v4064_v24  ;;  %v9845_v24 = vld [vmem:[%s16133_s10 + $0x70] sm:$0xff]  ;;  %v4388_v1 = vld [vmem:[#allocation4 + $0x200] sm:$0xff] }
 0xa1c   : > { %11953 = vmatpush3.bf16.msra.mxu1 %v15218_v53  ;;  %10676 = vmatprep.mubr.msk.f32.mxu1 %vm13339_vm2, %v16591_v54 }
 0xa1d   : > { %11954 = vmatprep.subr.bf16.mxu1 %v16752_v58 }
 0xa20   : > { %11956 = vmatpush3.bf16.msra.mxu1 %v15222_v12 }
 0xa21   : > { %11957 = vmatprep.subr.bf16.mxu1 %v16752_v58 }
 0xa24   : > { %11959 = vmatpush3.bf16.msra.mxu1 %v15228_v52 }
 0xa25   : > { %11960 = vmatprep.subr.bf16.mxu1 %v16752_v58 }
 0xa28   : > { %11962 = vmatpush3.bf16.msra.mxu1 %v15232_v50 }
 0xa2b   : > { %10677 = vmatmul.mubr.msk.f32.vlgmr.msra.gmra.mrb[18].mxu1 %vm3076_vm3, %v15045_v33 }
 0xa2c   : > { %10681 = vmatprep.mubr.msk.f32.mxu1 %vm3234_vm4, %v9840_v27  ;;  %v4389_v27 = vld [vmem:[#allocation4 + $0x208] sm:$0xff] }
 0xa2d   : > { %v15254_v43 = vpack.c.bf16 %v4389_v27, %v4388_v1  ;;  %v4394_v1 = vld [vmem:[#allocation4 + $0x230] sm:$0xff]  ;;  %v4395_v27 = vld [vmem:[#allocation4 + $0x238] sm:$0xff] }
 0xafe   : > { %v4132_v22 = vpop.f32.mrb[18].mxu1 }
 0xaff   : > { %v10678_v63 = vpop.f32.mrb[19].mxu1  ;;  %10679 = vmatprep.subr.mxu1 %v4132_v22 }
 0xb00   : > { %10680 = vmatpush3.msra.mxu1 %v4132_v22  ;;  %v9846_v63 = vld [vmem:[%s16133_s10 + $0x78] sm:$0xf]  ;;  %v15258_v22 = vpack.c.bf16 %v4391_v28, %v4390_v35  ;;  %v9850_v28 = vld [vmem:[%s16133_s10 + $0x80] sm:$0xff]  ;;  %v4553_v35 = vld [vmem:[%s16134_s11 + $0x8] sm:$0xf] }
 0xb01   : > { %10682 = vmatmul.mubr.msk.f32.vlgmr.msra.gmra.mrb[14].mxu1 %vm3234_vm4, %v9841_v37  ;;  %10703 = vmatprep.subr.mxu1 %v4297_v34  ;;  %v4393_v37 = vld [vmem:[#allocation4 + $0x228] sm:$0xff] }
 0xb02   : > { %10704 = vmatpush3.msra.mxu1 %v4297_v34  ;;  %10705 = vmatprep.mubr.msk.f32.mxu1 %vm3234_vm4, %v9845_v24  ;;  %v4392_v34 = vld [vmem:[#allocation4 + $0x220] sm:$0xff] }
 0xb03   : > { %11975 = vmatprep.subr.bf16.mxu1 %v16752_v58  ;;  %v15264_v24 = vpack.c.bf16 %v4393_v37, %v4392_v34  ;;  %4561 = vperm.xlu1 %13130, %v4553_v35   ;;  %v4569_v34 = vld [vmem:[%s16128_s5 + $0x8] sm:$0xff]  ;;  %v7970_v35 = vld [vmem:[%s16138_s15] sm:$0xff] }
 0xb09   : > { %10706 = vmatmul.mubr.msk.f32.vlgmr.msra.gmra.mrb[14].mxu1 %vm3234_vm4, %v9846_v63  ;;  %v15268_v63 = vpack.c.bf16 %v4395_v27, %v4394_v1  ;;  %v4570_v1 = vld [vmem:[%s16128_s5 + $0x10] sm:$0xff]  ;;  %v4571_v27 = vld [vmem:[%s16128_s5 + $0x18] sm:$0xff] }
 0xb0a   : > { %11977 = vmatpush3.bf16.msra.mxu1 %v15254_v43  ;;  %10724 = vmatprep.mubr.msk.f32.mxu1 %vm13339_vm2, %v16591_v54 }
 0xb0b   : > { %11978 = vmatprep.subr.bf16.mxu1 %v16752_v58 }
 0xb0e   : > { %11980 = vmatpush3.bf16.msra.mxu1 %v15258_v22 }
 0xb0f   : > { %11981 = vmatprep.subr.bf16.mxu1 %v16752_v58 }
 0xb12   : > { %11983 = vmatpush3.bf16.msra.mxu1 %v15264_v24 }
 0xb13   : > { %11984 = vmatprep.subr.bf16.mxu1 %v16752_v58  ;;  %v4568_v58 = vld [vmem:[%s16128_s5] sm:$0xff] }
 0xb14   : > { %v11987_v37 = vpack.c.bf16 %v4569_v34, %v4568_v58  ;;  %v9529_v58 = vld [vmem:[%s16753_s22] sm:$0x7] }
 0xb15   : > { %v9866_v34 = vld [vmem:[%s16128_s5 + $0x80] sm:$0xff] }
 0xb16   : > { %11986 = vmatpush3.bf16.msra.mxu1 %v15268_v63  ;;  %11988 = vmatprep.subr.bf16.mxu0 %v11987_v37 }
 0xb17   : > { %11990 = vmatpush3.bf16.msra.mxu0 %v11987_v37  ;;  %v9868_v37 = vld [vmem:[%s16128_s5 + $0x90] sm:$0xff] }
 0xb19   : > { %10725 = vmatmul.mubr.msk.f32.vlgmr.msra.gmra.mrb[20].mxu1 %vm3076_vm3, %v15045_v33  ;;  %v6421_v33 = vld [vmem:[%s16136_s13] sm:$0xff] }
 0xb1a   : > { %10729 = vmatprep.mubr.msk.f32.mxu1 %vm3234_vm4, %v9850_v28  ;;  %v11991_v28 = vpack.c.bf16 %v4571_v27, %v4570_v1  ;;  %6425 = vperm.xlu1 %13130, %v6421_v33   ;;  %v9867_v33 = vld [vmem:[%s16128_s5 + $0x88] sm:$0xff]  ;;  %v9869_v1 = vld [vmem:[%s16128_s5 + $0x98] sm:$0xff] }
 0xb1b   : > { %v12019_v27 = vpack.c.bf16 %v9867_v33, %v9866_v34  ;;  %v12023_v16 = vpack.c.bf16 %v9869_v1, %v9868_v37  ;;  %v4573_v34 = vld [vmem:[%s16128_s5 + $0x28] sm:$0xff]  ;;  %v9870_v37 = vld [vmem:[%s16128_s5 + $0xa0] sm:$0xff] }
 0xb1c   : > { %11992 = vmatprep.subr.bf16.mxu0 %v11991_v28  ;;  %v11995_v33 = vpack.c.bf16 %v4573_v34, %v4572_v10  ;;  %v9871_v1 = vld [vmem:[%s16128_s5 + $0xa8] sm:$0xff]  ;;  %v4575_v10 = vld [vmem:[%s16128_s5 + $0x38] sm:$0xff] }
 0xb1d   : > { %11994 = vmatpush3.bf16.msra.mxu0 %v11991_v28 }
 0xb1e   : > { %7974 = vperm.xlu1 %13130, %v7970_v35   ;;  %v9851_v35 = vld [vmem:[%s16133_s10 + $0x88] sm:$0xf]  ;;  %11996 = vmatprep.subr.bf16.mxu0 %v11995_v33 }
 0xb21   : > { %11998 = vmatpush3.bf16.msra.mxu0 %v11995_v33  ;;  %v9856_v33 = vld [vmem:[%s16128_s5 + $0x40] sm:$0xff] }
 0xb22   : > { %9532 = vperm.xlu1 %13130, %v9529_v58  }
 0xb82   : > { %v4562_v60 = vpop.permute.xlu1 %4561 }
 0xbec   : > { %v4462_v28 = vpop.f32.mrb[20].mxu1 }
 0xbed   : > { %v10726_v58 = vpop.f32.mrb[21].mxu1  ;;  %10727 = vmatprep.subr.mxu1 %v4462_v28 }
 0xbee   : > { %10728 = vmatpush3.msra.mxu1 %v4462_v28  ;;  %v9873_v58 = vld [vmem:[%s16128_s5 + $0xb8] sm:$0xff] }
 0xbef   : > { %10730 = vmatmul.mubr.msk.f32.vlgmr.msra.gmra.mrb[14].mxu1 %vm3234_vm4, %v9851_v35  ;;  %12020 = vmatprep.subr.bf16.mxu1 %v12019_v27  ;;  %v9872_v35 = vld [vmem:[%s16128_s5 + $0xb0] sm:$0xff] }
 0xbf0   : > { %12022 = vmatpush3.bf16.msra.mxu1 %v12019_v27  ;;  %v12027_v27 = vpack.c.bf16 %v9871_v1, %v9870_v37  ;;  %v12031_v34 = vpack.c.bf16 %v9873_v58, %v9872_v35  ;;  %v9857_v37 = vld [vmem:[%s16128_s5 + $0x48] sm:$0xff] }
 0xbf1   : > { %12024 = vmatprep.subr.bf16.mxu1 %v12023_v16  ;;  %v12003_v1 = vpack.c.bf16 %v9857_v37, %v9856_v33 }
 0xbf4   : > { %12026 = vmatpush3.bf16.msra.mxu1 %v12023_v16  ;;  %v4574_v16 = vld [vmem:[%s16128_s5 + $0x30] sm:$0xff] }
 0xbf5   : > { %12028 = vmatprep.subr.bf16.mxu1 %v12027_v27  ;;  %v11999_v28 = vpack.c.bf16 %v4575_v10, %v4574_v16 }
 0xbf7   : > { %12000 = vmatprep.subr.bf16.mxu0 %v11999_v28 }
 0xbf8   : > { %12030 = vmatpush3.bf16.msra.mxu1 %v12027_v27  ;;  %12002 = vmatpush3.bf16.msra.mxu0 %v11999_v28  ;;  %v4557_v28 = vpop.permute.xlu0 %4556 }
 0xbf9   : > { %12032 = vmatprep.subr.bf16.mxu1 %v12031_v34  ;;  %12004 = vmatprep.subr.bf16.mxu0 %v12003_v1 }
 0xbfc   : > { %12034 = vmatpush3.bf16.msra.mxu1 %v12031_v34  ;;  %v9859_v34 = vld [vmem:[%s16128_s5 + $0x58] sm:$0xff] }
 0xbfd   : > { %v12007_v41 = vpack.c.bf16 %v9859_v34, %v9858_v46  ;;  %v9881_v34 = vld [vmem:[%s16128_s5 + $0xe8] sm:$0xff] }
 0xcc2   : > { %v10731_v27 = vpop.f32.mrb[14].mxu1 }
 0xcc3   : > { %v12971_v16 = vadd.f32 %v10731_v27, %v15166_v21  ;;  %v4541_v10 = vpop.f32.mrb[15].mxu1  ;;  %v9861_v21 = vld [vmem:[%s16128_s5 + $0x68] sm:$0xff] }
 0xcc4   : > { %v12972_v35 = vadd.f32 %v4541_v10, %v15168_v55  ;;  %v9863_v55 = vld [vmem:[%s16128_s5 + $0x78] sm:$0xff] }
 0xcc5   : > { %v4565_v58 = vadd.f32 %v12971_v16, %v4562_v60  ;;  %v9860_v60 = vld [vmem:[%s16128_s5 + $0x60] sm:$0xff] }
 0xcc6   : > { %v4564_v56 = vadd.f32 %v12972_v35, %v4557_v28  ;;  %v12011_v46 = vpack.c.bf16 %v9861_v21, %v9860_v60  ;;  %v9876_v16 = vld [vmem:[%s16128_s5 + $0xc0] sm:$0xff]  ;;  %v9878_v35 = vld [vmem:[%s16128_s5 + $0xd0] sm:$0xff] }
 0xcc7   : > { %v4567_v37 = vmax.f32 %v4565_v58, 0.0  ;;  %v9880_v58 = vld [vmem:[%s16128_s5 + $0xe0] sm:$0xff]  ;;  %v9882_v21 = vld [vmem:[%s16128_s5 + $0xf0] sm:$0xff] }
 0xcc8   : > { %v4566_v33 = vmax.f32 %v4564_v56, 0.0  ;;  %v9862_v56 = vld [vmem:[%s16128_s5 + $0x70] sm:$0xff]  ;;  %v12043_v60 = vpack.c.bf16 %v9881_v34, %v9880_v58  ;;  %v5421_v34 = vld [vmem:[#allocation6 + $0x38] sm:$0xff] }
 0xcc9   : > { %v12015_v27 = vpack.c.bf16 %v9863_v55, %v9862_v56  ;;  %v4915_v55 = vld [vmem:[#allocation6] sm:$0xff]  ;;  %v5420_v58 = vld [vmem:[#allocation6 + $0x30] sm:$0xff] }
 0xcca   : > { %10748 = vmatprep.mubr.msk.f32.mxu0 %vm3076_vm3, %v4566_v33  ;;  %10786 = vmatprep.mubr.msk.f32.mxu1 %vm3076_vm3, %v4566_v33 }
 0xccb   : > { %10749 = vmatmul.mubr.msk.f32.vlgmr.msra.gmra.mrb[28].mxu0 %vm3076_vm3, %v4567_v37  ;;  %10787 = vmatmul.mubr.msk.f32.vlgmr.msra.gmra.mrb[22].mxu1 %vm3076_vm3, %v4567_v37 }
 0xccc   : > { %12006 = vmatpush3.bf16.msra.mxu0 %v12003_v1  ;;  %10767 = vmatprep.mubr.msk.f32.mxu0 %vm3076_vm3, %v4566_v33  ;;  %v9877_v1 = vld [vmem:[%s16128_s5 + $0xc8] sm:$0xff] }
 0xccd   : > { %12008 = vmatprep.subr.bf16.mxu0 %v12007_v41  ;;  %v12035_v10 = vpack.c.bf16 %v9877_v1, %v9876_v16  ;;  %v5254_v1 = vld [vmem:[#allocation6 + $0x28] sm:$0xff] }
 0xcd0   : > { %12010 = vmatpush3.bf16.msra.mxu0 %v12007_v41  ;;  %v9879_v41 = vld [vmem:[%s16128_s5 + $0xd8] sm:$0xff] }
 0xcd1   : > { %12012 = vmatprep.subr.bf16.mxu0 %v12011_v46  ;;  %v12039_v28 = vpack.c.bf16 %v9879_v41, %v9878_v35  ;;  %v5002_v35 = vld [vmem:[#allocation6 + $0x10] sm:$0xff]  ;;  %v5003_v41 = vld [vmem:[#allocation6 + $0x18] sm:$0xff] }
 0xcd4   : > { %12014 = vmatpush3.bf16.msra.mxu0 %v12011_v46  ;;  %v9883_v46 = vld [vmem:[%s16128_s5 + $0xf8] sm:$0xff] }
 0xcd5   : > { %12016 = vmatprep.subr.bf16.mxu0 %v12015_v27  ;;  %v12047_v56 = vpack.c.bf16 %v9883_v46, %v9882_v21 }
 0xcd8   : > { %12018 = vmatpush3.bf16.msra.mxu0 %v12015_v27  ;;  %v5253_v27 = vld [vmem:[#allocation6 + $0x20] sm:$0xff] }
 0xcd9   : > { %12036 = vmatprep.subr.bf16.mxu0 %v12035_v10 }
 0xcdb   : > { %10768 = vmatmul.mubr.msk.f32.vlgmr.msra.gmra.mrb[30].mxu0 %vm3076_vm3, %v4567_v37 }
 0xcdc   : > { %12038 = vmatpush3.bf16.msra.mxu0 %v12035_v10  ;;  %10805 = vmatprep.mubr.msk.f32.mxu0 %vm3076_vm3, %v4566_v33  ;;  %v4916_v33 = vld [vmem:[#allocation6 + $0x8] sm:$0xff]  ;;  %v12071_v10 = vpack.c.bf16 %v5254_v1, %v5253_v27 }
 0xcdd   : > { %12040 = vmatprep.subr.bf16.mxu0 %v12039_v28  ;;  %v12051_v16 = vpack.c.bf16 %v4916_v33, %v4915_v55 }
 0xcdf   : > { %12052 = vmatprep.subr.bf16.mxu1 %v12051_v16 }
 0xce0   : > { %12042 = vmatpush3.bf16.msra.mxu0 %v12039_v28  ;;  %12054 = vmatpush3.bf16.msra.mxu1 %v12051_v16  ;;  %v12055_v28 = vpack.c.bf16 %v5003_v41, %v5002_v35  ;;  %v5588_v35 = vld [vmem:[#allocation6 + $0x48] sm:$0xff] }
 0xce1   : > { %12044 = vmatprep.subr.bf16.mxu0 %v12043_v60 }
 0xce2   : > { %12056 = vmatprep.subr.bf16.mxu1 %v12055_v28 }
 0xce4   : > { %12046 = vmatpush3.bf16.msra.mxu0 %v12043_v60  ;;  %v12081_v60 = vpack.c.bf16 %v5421_v34, %v5420_v58  ;;  %v5755_v34 = vld [vmem:[#allocation6 + $0x58] sm:$0xff] }
 0xce5   : > { %12048 = vmatprep.subr.bf16.mxu0 %v12047_v56 }
 0xce8   : > { %12050 = vmatpush3.bf16.msra.mxu0 %v12047_v56 }
 0xce9   : > { %12072 = vmatprep.subr.bf16.mxu0 %v12071_v10 }
 0xceb   : > { %10806 = vmatmul.mubr.msk.f32.vlgmr.msra.gmra.mrb[32].mxu0 %vm3076_vm3, %v4567_v37 }
 0xcec   : > { %12074 = vmatpush3.bf16.msra.mxu0 %v12071_v10  ;;  %v5587_v10 = vld [vmem:[#allocation6 + $0x40] sm:$0xff] }
 0xced   : > { %12082 = vmatprep.subr.bf16.mxu0 %v12081_v60  ;;  %v12091_v58 = vpack.c.bf16 %v5588_v35, %v5587_v10 }
 0xd9e   : > { %v10750_v21 = vpop.f32.mrb[28].mxu0  ;;  %v10788_v37 = vpop.f32.mrb[22].mxu1 }
 0xd9f   : > { %v4648_v46 = vpop.f32.mrb[29].mxu0  ;;  %v4816_v56 = vpop.f32.mrb[23].mxu1 }
 0xdae   : > { %v10769_v32 = vpop.f32.mrb[30].mxu0 }
 0xdaf   : > { %v4910_v55 = vmax.f32 %v10750_v21, %v10769_v32  ;;  %v4732_v33 = vpop.f32.mrb[31].mxu0  ;;  %v5754_v32 = vld [vmem:[#allocation6 + $0x50] sm:$0xff]  ;;  %v5922_v21 = vld [vmem:[#allocation6 + $0x68] sm:$0xff] }
 0xdb0   : > { %v4909_v27 = vmax.f32 %v4648_v46, %v4732_v33  ;;  %v6088_v46 = vld [vmem:[#allocation6 + $0x70] sm:$0xff] }
 0xdbe   : > { %v10807_v1 = vpop.f32.mrb[32].mxu0 }
 0xdbf   : > { %v4912_v31 = vmax.f32 %v10788_v37, %v10807_v1  ;;  %v4900_v16 = vpop.f32.mrb[33].mxu0 }
 0xdc0   : > { %v4911_v26 = vmax.f32 %v4816_v56, %v4900_v16  ;;  %v6255_v56 = vld [vmem:[#allocation6 + $0x80] sm:$0xff] }
 0xdc1   : > { %v4914_v25 = vmax.f32 %v4910_v55, %v4912_v31  ;;  %v12101_v31 = vpack.c.bf16 %v5755_v34, %v5754_v32  ;;  %v6256_v55 = vld [vmem:[#allocation6 + $0x88] sm:$0xff] }
 0xdc2   : > { %v4913_v41 = vmax.f32 %v4909_v27, %v4911_v26  ;;  %v5921_v26 = vld [vmem:[#allocation6 + $0x60] sm:$0xff]  ;;  %v12131_v33 = vpack.c.bf16 %v6256_v55, %v6255_v56  ;;  %v5080_v27 = vld [vmem:[#allocation10 + $0x10] sm:$0xff] }
 0xdc3   : > { %v12111_v37 = vpack.c.bf16 %v5922_v21, %v5921_v26  ;;  %v4999_v56 = vld [vmem:[#allocation10] sm:$0xff] }
 0xdc4   : > { %10812 = vmatprep.mubr.msk.f32.mxu1 %vm4917_vm5, %v4913_v41  ;;  %10840 = vmatprep.mubr.msk.f32.mxu0 %vm4917_vm5, %v4913_v41 }
 0xdc5   : > { %10813 = vmatmul.mubr.msk.f32.vlgmr.msra.gmra.mrb[24].mxu1 %vm4917_vm5, %v4914_v25  ;;  %10841 = vmatmul.mubr.msk.f32.vlgmr.msra.gmra.mrb[34].mxu0 %vm4917_vm5, %v4914_v25 }
 0xdc6   : > { %12058 = vmatpush3.bf16.msra.mxu1 %v12055_v28  ;;  %10819 = vmatprep.mubr.msk.f32.mxu1 %vm4917_vm5, %v4913_v41  ;;  %v6089_v28 = vld [vmem:[#allocation6 + $0x78] sm:$0xff] }
 0xdc7   : > { %12084 = vmatpush3.bf16.msra.mxu0 %v12081_v60  ;;  %10854 = vmatprep.mubr.msk.f32.mxu0 %vm4917_vm5, %v4913_v41  ;;  %v12121_v60 = vpack.c.bf16 %v6089_v28, %v6088_v46  ;;  %v5081_v28 = vld [vmem:[#allocation10 + $0x18] sm:$0xff] }
 0xdc8   : > { %12092 = vmatprep.subr.bf16.mxu0 %v12091_v58 }
 0xdc9   : > { %10820 = vmatmul.mubr.msk.f32.vlgmr.msra.gmra.mrb[26].mxu1 %vm4917_vm5, %v4914_v25 }
 0xdca   : > { %10855 = vmatmul.mubr.msk.f32.vlgmr.msra.gmra.mrb[36].mxu0 %vm4917_vm5, %v4914_v25  ;;  %10826 = vmatprep.mubr.msk.f32.mxu1 %vm5082_vm6, %v5080_v27 }
 0xdcb   : > { %12094 = vmatpush3.bf16.msra.mxu0 %v12091_v58  ;;  %10868 = vmatprep.mubr.msk.f32.mxu0 %vm4917_vm5, %v4913_v41 }
 0xdcc   : > { %12102 = vmatprep.subr.bf16.mxu0 %v12101_v31 }
 0xdce   : > { %10869 = vmatmul.mubr.msk.f32.vlgmr.msra.gmra.mrb[38].mxu0 %vm4917_vm5, %v4914_v25 }
 0xdcf   : > { %12104 = vmatpush3.bf16.msra.mxu0 %v12101_v31  ;;  %10882 = vmatprep.mubr.msk.f32.mxu0 %vm4917_vm5, %v4913_v41 }
 0xdd0   : > { %12112 = vmatprep.subr.bf16.mxu0 %v12111_v37 }
 0xdd2   : > { %10883 = vmatmul.mubr.msk.f32.vlgmr.msra.gmra.mrb[40].mxu0 %vm4917_vm5, %v4914_v25 }
 0xdd3   : > { %12114 = vmatpush3.bf16.msra.mxu0 %v12111_v37  ;;  %10896 = vmatprep.mubr.msk.f32.mxu0 %vm4917_vm5, %v4913_v41 }
 0xdd4   : > { %12122 = vmatprep.subr.bf16.mxu0 %v12121_v60 }
 0xdd6   : > { %10897 = vmatmul.mubr.msk.f32.vlgmr.msra.gmra.mrb[42].mxu0 %vm4917_vm5, %v4914_v25 }
 0xdd7   : > { %12124 = vmatpush3.bf16.msra.mxu0 %v12121_v60  ;;  %10910 = vmatprep.mubr.msk.f32.mxu0 %vm4917_vm5, %v4913_v41 }
 0xdd8   : > { %12132 = vmatprep.subr.bf16.mxu0 %v12131_v33 }
 0xdda   : > { %10911 = vmatmul.mubr.msk.f32.vlgmr.msra.gmra.mrb[44].mxu0 %vm4917_vm5, %v4914_v25 }
 0xddb   : > { %12134 = vmatpush3.bf16.msra.mxu0 %v12131_v33  ;;  %10924 = vmatprep.mubr.msk.f32.mxu0 %vm4917_vm5, %v4913_v41 }
 0xdde   : > { %10925 = vmatmul.mubr.msk.f32.vlgmr.msra.gmra.mrb[46].mxu0 %vm4917_vm5, %v4914_v25 }
 0xe98   : > { %v10814_v1 = vpop.f32.mrb[24].mxu1  ;;  %v10842_v16 = vpop.f32.mrb[34].mxu0 }
 0xe99   : > { %v4990_v10 = vpop.f32.mrb[25].mxu1  ;;  %v5321_v35 = vpop.f32.mrb[35].mxu0 }
 0xe9a   : > { %v12065_v58 = vpack.c.bf16 %v10814_v1, %v4990_v10  ;;  %v12075_v32 = vpack.c.bf16 %v10842_v16, %v5321_v35  ;;  %v5000_v10 = vld [vmem:[#allocation10 + $0x8] sm:$0xff] }
 0xe9c   : > { %v10821_v34 = vpop.f32.mrb[26].mxu1 }
 0xe9d   : > { %v10856_v31 = vpop.f32.mrb[36].mxu0  ;;  %v5070_v26 = vpop.f32.mrb[27].mxu1 }
 0xe9e   : > { %v12059_v25 = vpack.c.bf16 %v10821_v34, %v5070_v26  ;;  %v5488_v41 = vpop.f32.mrb[37].mxu0  ;;  %v5331_v34 = vld [vmem:[#allocation10 + $0x20] sm:$0xff] }
 0xe9f   : > { %v12085_v37 = vpack.c.bf16 %v10856_v31, %v5488_v41 }
 0xea0   : > { %12061 = vmatprep.subr.msk.bf16.mxu1 %vm15419_vm9, %v12059_v25 }
 0xea1   : > { %v10870_v46 = vpop.f32.mrb[38].mxu0  ;;  %12064 = vmatpush3.bf16.msk.msra.mxu1 %vm15419_vm9, %v12059_v25 }
 0xea2   : > { %v5655_v60 = vpop.f32.mrb[39].mxu0  ;;  %12067 = vmatprep.subr.msk.bf16.mxu1 %vm15419_vm9, %v12065_v58 }
 0xea3   : > { %v12095_v55 = vpack.c.bf16 %v10870_v46, %v5655_v60  ;;  %v5332_v46 = vld [vmem:[#allocation10 + $0x28] sm:$0xff]  ;;  %v5498_v60 = vld [vmem:[#allocation10 + $0x30] sm:$0xff] }
 0xea4   : > { %10827 = vmatmul.mubr.msk.f32.vlgmr.msra.gmra.mrb[28].mxu1 %vm5082_vm6, %v5081_v28 }
 0xea5   : > { %v10884_v33 = vpop.f32.mrb[40].mxu0  ;;  %12070 = vmatpush3.bf16.msk.msra.mxu1 %vm15419_vm9, %v12065_v58  ;;  %10833 = vmatprep.mubr.msk.f32.mxu1 %vm5082_vm6, %v4999_v56 }
 0xea6   : > { %v5822_v27 = vpop.f32.mrb[41].mxu0  ;;  %12077 = vmatprep.subr.msk.bf16.mxu1 %vm15419_vm9, %v12075_v32 }
 0xea7   : > { %v12105_v1 = vpack.c.bf16 %v10884_v33, %v5822_v27  ;;  %v5665_v33 = vld [vmem:[#allocation10 + $0x40] sm:$0xff]  ;;  %v5666_v27 = vld [vmem:[#allocation10 + $0x48] sm:$0xff] }
 0xea9   : > { %v10898_v16 = vpop.f32.mrb[42].mxu0 }
 0xeaa   : > { %v5989_v35 = vpop.f32.mrb[43].mxu0 }
 0xeab   : > { %v12115_v31 = vpack.c.bf16 %v10898_v16, %v5989_v35  ;;  %v5832_v16 = vld [vmem:[#allocation10 + $0x50] sm:$0xff] }
 0xeac   : > { %10834 = vmatmul.mubr.msk.f32.vlgmr.msra.gmra.mrb[28].mxu1 %vm5082_vm6, %v5000_v10  ;;  %v5999_v10 = vld [vmem:[#allocation10 + $0x60] sm:$0xff]  ;;  %v6166_v35 = vld [vmem:[#allocation10 + $0x70] sm:$0xff] }
 0xead   : > { %12080 = vmatpush3.bf16.msk.msra.mxu1 %vm15419_vm9, %v12075_v32  ;;  %v10912_v26 = vpop.f32.mrb[44].mxu0  ;;  %10847 = vmatprep.mubr.msk.f32.mxu1 %vm5082_vm6, %v5331_v34  ;;  %v5499_v32 = vld [vmem:[#allocation10 + $0x38] sm:$0xff]  ;;  %v6333_v34 = vld [vmem:[#allocation10 + $0x80] sm:$0xff] }
 0xeae   : > { %12087 = vmatprep.subr.msk.bf16.mxu1 %vm15419_vm9, %v12085_v37  ;;  %v6156_v58 = vpop.f32.mrb[45].mxu0 }
 0xeaf   : > { %v12125_v25 = vpack.c.bf16 %v10912_v26, %v6156_v58  ;;  %v6437_v26 = vld [vmem:[#allocation7] sm:$0xff]  ;;  %v6438_v58 = vld [vmem:[#allocation7 + $0x8] sm:$0xff] }
 0xeb1   : > { %v10926_v41 = vpop.f32.mrb[46].mxu0 }
 0xeb2   : > { %v6323_v28 = vpop.f32.mrb[47].mxu0 }
 0xeb3   : > { %v12135_v56 = vpack.c.bf16 %v10926_v41, %v6323_v28 }
 0xeb4   : > { %10848 = vmatmul.mubr.msk.f32.vlgmr.msra.gmra.mrb[28].mxu1 %vm5082_vm6, %v5332_v46  ;;  %v6426_v46 = vpop.permute.xlu1 %6425 }
 0xeb5   : > { %12090 = vmatpush3.bf16.msk.msra.mxu1 %vm15419_vm9, %v12085_v37  ;;  %10861 = vmatprep.mubr.msk.f32.mxu1 %vm5082_vm6, %v5498_v60  ;;  %v5833_v37 = vld [vmem:[#allocation10 + $0x58] sm:$0xff] }
 0xeb6   : > { %12097 = vmatprep.subr.msk.bf16.mxu1 %vm15419_vm9, %v12095_v55 }
 0xebc   : > { %10862 = vmatmul.mubr.msk.f32.vlgmr.msra.gmra.mrb[28].mxu1 %vm5082_vm6, %v5499_v32 }
 0xebd   : > { %12100 = vmatpush3.bf16.msk.msra.mxu1 %vm15419_vm9, %v12095_v55  ;;  %10875 = vmatprep.mubr.msk.f32.mxu1 %vm5082_vm6, %v5665_v33  ;;  %v6000_v55 = vld [vmem:[#allocation10 + $0x68] sm:$0xff] }
 0xebe   : > { %12107 = vmatprep.subr.msk.bf16.mxu1 %vm15419_vm9, %v12105_v1 }
 0xec4   : > { %10876 = vmatmul.mubr.msk.f32.vlgmr.msra.gmra.mrb[28].mxu1 %vm5082_vm6, %v5666_v27 }
 0xec5   : > { %12110 = vmatpush3.bf16.msk.msra.mxu1 %vm15419_vm9, %v12105_v1  ;;  %10889 = vmatprep.mubr.msk.f32.mxu1 %vm5082_vm6, %v5832_v16  ;;  %v6167_v1 = vld [vmem:[#allocation10 + $0x78] sm:$0xff]  ;;  %v9951_v16 = vld [vmem:[%s16756_s19 + $0x30] sm:$0xff] }
 0xec6   : > { %12117 = vmatprep.subr.msk.bf16.mxu1 %vm15419_vm9, %v12115_v31 }
 0xecc   : > { %10890 = vmatmul.mubr.msk.f32.vlgmr.msra.gmra.mrb[28].mxu1 %vm5082_vm6, %v5833_v37 }
 0xecd   : > { %12120 = vmatpush3.bf16.msk.msra.mxu1 %vm15419_vm9, %v12115_v31  ;;  %10903 = vmatprep.mubr.msk.f32.mxu1 %vm5082_vm6, %v5999_v10  ;;  %v6334_v31 = vld [vmem:[#allocation10 + $0x88] sm:$0xff] }
 0xece   : > { %12127 = vmatprep.subr.msk.bf16.mxu1 %vm15419_vm9, %v12125_v25 }
 0xed4   : > { %10904 = vmatmul.mubr.msk.f32.vlgmr.msra.gmra.mrb[28].mxu1 %vm5082_vm6, %v6000_v55  ;;  %v9957_v55 = vld [vmem:[%s16756_s19 + $0x40] sm:$0xff] }
 0xed5   : > { %12130 = vmatpush3.bf16.msk.msra.mxu1 %vm15419_vm9, %v12125_v25  ;;  %10917 = vmatprep.mubr.msk.f32.mxu1 %vm5082_vm6, %v6166_v35  ;;  %v12141_v25 = vpack.c.bf16 %v6438_v58, %v6437_v26  ;;  %v9958_v35 = vld [vmem:[%s16756_s19 + $0x48] sm:$0xf]  ;;  %v9976_v58 = vld [vmem:[%s16756_s19 + $0x78] sm:$0xf] }
 0xed6   : > { %12137 = vmatprep.subr.msk.bf16.mxu1 %vm15419_vm9, %v12135_v56 }
 0xed7   : > { %12142 = vmatprep.subr.bf16.mxu0 %v12141_v25 }
 0xed8   : > { %12144 = vmatpush3.bf16.msra.mxu0 %v12141_v25  ;;  %v7987_v25 = vld [vmem:[#allocation9 + $0x8] sm:$0xff] }
 0xed9   : > { %12162 = vmatprep.subr.bf16.mxu0 %v15043_v48 }
 0xedc   : > { %10918 = vmatmul.mubr.msk.f32.vlgmr.msra.gmra.mrb[28].mxu1 %vm5082_vm6, %v6167_v1  ;;  %v9963_v1 = vld [vmem:[%s16756_s19 + $0x50] sm:$0xff] }
 0xedd   : > { %12140 = vmatpush3.bf16.msk.msra.mxu1 %vm15419_vm9, %v12135_v56  ;;  %10931 = vmatprep.mubr.msk.f32.mxu1 %vm5082_vm6, %v6333_v34  ;;  %v9964_v34 = vld [vmem:[%s16756_s19 + $0x58] sm:$0xf] }
 0xede   : > { %12146 = vmatprep.subr.bf16.mxu1 %v15025_v2 }
 0xee4   : > { %10932 = vmatmul.mubr.msk.f32.vlgmr.msra.gmra.mrb[28].mxu1 %vm5082_vm6, %v6334_v31 }
 0xee5   : > { %12148 = vmatpush3.bf16.msra.mxu1 %v15025_v2  ;;  %v6431_v2 = vpop.permute.xlu0 %6430 }
 0xee6   : > { %12150 = vmatprep.subr.bf16.mxu1 %v15028_v9 }
 0xee9   : > { %12152 = vmatpush3.bf16.msra.mxu1 %v15028_v9 }
 0xeea   : > { %12154 = vmatprep.subr.bf16.mxu1 %v15033_v38 }
 0xeed   : > { %12156 = vmatpush3.bf16.msra.mxu1 %v15033_v38 }
 0xeee   : > { %12158 = vmatprep.subr.bf16.mxu1 %v15037_v49 }
 0xef1   : > { %12160 = vmatpush3.bf16.msra.mxu1 %v15037_v49 }
 0xfb7   : > { %v10933_v41 = vpop.f32.mrb[28].mxu1 }
 0xfb8   : > { %v6434_v28 = vadd.f32 %v10933_v41, %v6431_v2  ;;  %v6410_v9 = vpop.f32.mrb[29].mxu1  ;;  %v7989_v2 = vld [vmem:[#allocation9 + $0x18] sm:$0xff] }
 0xfb9   : > { %v6433_v60 = vadd.f32 %v6426_v46, %v6410_v9  ;;  %v12325_v41 = vpack.c.bf16 %v7989_v2, %v7987_v25  ;;  %v7988_v46 = vld [vmem:[#allocation9 + $0x10] sm:$0xff]  ;;  %v16784_v25 = vld [vmem:[#allocation23_spill] sm:$0xff] }
 0xfba   : > { %v6436_v32 = vmax.f32 %v6434_v28, 0.0  ;;  %v7991_v28 = vld [vmem:[#allocation9 + $0x28] sm:$0xff] }
 0xfbb   : > { %v6435_v56 = vmax.f32 %v6433_v60, 0.0 }
 0xfbd   : > { %10938 = vmatprep.mubr.msk.f32.mxu0 %vm4917_vm5, %v6435_v56  ;;  %v7990_v56 = vld [vmem:[#allocation9 + $0x20] sm:$0xff] }
 0xfbe   : > { %10939 = vmatmul.mubr.msk.f32.vlgmr.msra.gmra.mrb[48].mxu0 %vm4917_vm5, %v6436_v32  ;;  %v7995_v32 = vld [vmem:[#allocation9 + $0x48] sm:$0xff] }
 0xfbf   : > { %12164 = vmatpush3.bf16.msra.mxu0 %v15043_v48 }
 0xfc0   : > { %12166 = vmatprep.subr.bf16.mxu0 %v15050_v30 }
 0xfc3   : > { %12168 = vmatpush3.bf16.msra.mxu0 %v15050_v30 }
 0xfc4   : > { %12170 = vmatprep.subr.bf16.mxu0 %v15056_v17 }
 0xfc7   : > { %12172 = vmatpush3.bf16.msra.mxu0 %v15056_v17  ;;  %v6601_v17 = vld [vmem:[%s16756_s19] sm:$0xff] }
 0xfc8   : > { %12174 = vmatprep.subr.bf16.mxu0 %v15060_v18 }
 0xfcb   : > { %12176 = vmatpush3.bf16.msra.mxu0 %v15060_v18  ;;  %v6602_v18 = vld [vmem:[%s16756_s19 + $0x8] sm:$0xf] }
 0xfcc   : > { %12186 = vmatprep.subr.bf16.mxu0 %v15082_v15 }
0x1091   : > { %v15495_v38 = vpop.f32.mrb[48].mxu0 }
0x1092   : > { %v15497_v49 = vpop.f32.mrb[49].mxu0 }
0x1093   : > { %10957 = vmatprep.mubr.msk.f32.mxu1 %vm3076_vm3, %v15497_v49  ;;  %10976 = vmatprep.mubr.msk.f32.mxu0 %vm3076_vm3, %v15497_v49 }
0x1094   : > { %10958 = vmatmul.mubr.msk.f32.vlgmr.msra.gmra.mrb[30].mxu1 %vm3076_vm3, %v15495_v38  ;;  %10977 = vmatmul.mubr.msk.f32.vlgmr.msra.gmra.mrb[50].mxu0 %vm3076_vm3, %v15495_v38 }
0x1095   : > { %12188 = vmatpush3.bf16.msra.mxu0 %v15082_v15  ;;  %11009 = vmatprep.mubr.msk.f32.mxu0 %vm3076_vm3, %v15497_v49  ;;  %v9945_v15 = vld [vmem:[%s16756_s19 + $0x20] sm:$0xff] }
0x1096   : > { %12190 = vmatprep.subr.bf16.mxu0 %v15086_v59 }
0x1099   : > { %12192 = vmatpush3.bf16.msra.mxu0 %v15086_v59 }
0x109a   : > { %12194 = vmatprep.subr.bf16.mxu0 %v15092_v29 }
0x109d   : > { %12196 = vmatpush3.bf16.msra.mxu0 %v15092_v29 }
0x109e   : > { %12198 = vmatprep.subr.bf16.mxu0 %v15096_v0 }
0x10a1   : > { %12200 = vmatpush3.bf16.msra.mxu0 %v15096_v0 }
0x10a2   : > { %12226 = vmatprep.subr.bf16.mxu0 %v15100_v42 }
0x10a4   : > { %11010 = vmatmul.mubr.msk.f32.vlgmr.msra.gmra.mrb[52].mxu0 %vm3076_vm3, %v15495_v38 }
0x10a5   : > { %12228 = vmatpush3.bf16.msra.mxu0 %v15100_v42  ;;  %11061 = vmatprep.mubr.msk.f32.mxu0 %vm3076_vm3, %v15497_v49  ;;  %v9946_v42 = vld [vmem:[%s16756_s19 + $0x28] sm:$0xf] }
0x10a6   : > { %12230 = vmatprep.subr.bf16.mxu0 %v15106_v23 }
0x10a9   : > { %12232 = vmatpush3.bf16.msra.mxu0 %v15106_v23 }
0x10aa   : > { %12234 = vmatprep.subr.bf16.mxu0 %v15112_v4 }
0x10ad   : > { %12236 = vmatpush3.bf16.msra.mxu0 %v15112_v4 }
0x10ae   : > { %12238 = vmatprep.subr.bf16.mxu0 %v15116_v36 }
0x10b1   : > { %12240 = vmatpush3.bf16.msra.mxu0 %v15116_v36 }
0x10b2   : > { %12246 = vmatprep.subr.bf16.mxu0 %v15120_v5 }
0x10b4   : > { %11062 = vmatmul.mubr.msk.f32.vlgmr.msra.gmra.mrb[54].mxu0 %vm3076_vm3, %v15495_v38 }
0x10b5   : > { %12248 = vmatpush3.bf16.msra.mxu0 %v15120_v5  ;;  %11087 = vmatprep.mubr.msk.f32.mxu0 %vm3076_vm3, %v15497_v49 }
0x10b6   : > { %12250 = vmatprep.subr.bf16.mxu0 %v15126_v62 }
0x10b9   : > { %12252 = vmatpush3.bf16.msra.mxu0 %v15126_v62 }
0x10ba   : > { %12254 = vmatprep.subr.bf16.mxu0 %v15132_v47 }
0x10bd   : > { %12256 = vmatpush3.bf16.msra.mxu0 %v15132_v47 }
0x10be   : > { %12258 = vmatprep.subr.bf16.mxu0 %v15136_v51 }
0x10c1   : > { %12260 = vmatpush3.bf16.msra.mxu0 %v15136_v51 }
0x10c2   : > { %12286 = vmatprep.subr.bf16.mxu0 %v15140_v45 }
0x10c4   : > { %11088 = vmatmul.mubr.msk.f32.vlgmr.msra.gmra.mrb[56].mxu0 %vm3076_vm3, %v15495_v38 }
0x10c5   : > { %12288 = vmatpush3.bf16.msra.mxu0 %v15140_v45  ;;  %11139 = vmatprep.mubr.msk.f32.mxu0 %vm3076_vm3, %v15497_v49  ;;  %v9937_v45 = vld [vmem:[%s16756_s19 + $0x10] sm:$0xff] }
0x10c6   : > { %12290 = vmatprep.subr.bf16.mxu0 %v15146_v44  ;;  %10983 = vmatprep.mubr.msk.f32.mxu1 %vm4917_vm5, %v9937_v45 }
0x10c9   : > { %12292 = vmatpush3.bf16.msra.mxu0 %v15146_v44 }
0x10ca   : > { %12294 = vmatprep.subr.bf16.mxu0 %v15152_v11 }
0x10cd   : > { %12296 = vmatpush3.bf16.msra.mxu0 %v15152_v11 }
0x10ce   : > { %12298 = vmatprep.subr.bf16.mxu0 %v15156_v40 }
0x10d1   : > { %12300 = vmatpush3.bf16.msra.mxu0 %v15156_v40  ;;  %v9938_v40 = vld [vmem:[%s16756_s19 + $0x18] sm:$0xf] }
0x10d2   : > { %12326 = vmatprep.subr.bf16.mxu0 %v12325_v41  ;;  %v16786_v41 = vld [vmem:[#allocation26_spill] sm:$0xff] }
0x10d4   : > { %11140 = vmatmul.mubr.msk.f32.vlgmr.msra.gmra.mrb[58].mxu0 %vm3076_vm3, %v15495_v38 }
0x10d5   : > { %8072 = vmatprep.mubr.f32.mxu0 %v16591_v54 }
0x1167   : > { %v10959_v44 = vpop.f32.mrb[30].mxu1  ;;  %v10978_v51 = vpop.f32.mrb[50].mxu0 }
0x1168   : > { %v6592_v62 = vpop.f32.mrb[31].mxu1  ;;  %v6669_v5 = vpop.f32.mrb[51].mxu0 }
0x1169   : > { %v12181_v48 = vpack.c.bf16 %v10959_v44, %v6592_v62  ;;  %v12177_v30 = vpack.c.bf16 %v10978_v51, %v6669_v5  ;;  %v7994_v44 = vld [vmem:[#allocation9 + $0x40] sm:$0xff]  ;;  %v7996_v51 = vld [vmem:[#allocation9 + $0x50] sm:$0xff] }
0x116a   : > { %v12335_v62 = vpack.c.bf16 %v7996_v51, %v7994_v44  ;;  %v16798_v44 = vld [vmem:[#allocation50_spill] sm:$0xff]  ;;  %v16799_v51 = vld [vmem:[#allocation52_spill] sm:$0xff] }
0x116b   : > { %12178 = vmatprep.subr.bf16.mxu1 %v12177_v30 }
0x116c   : > { %12180 = vmatpush3.bf16.msra.mxu1 %v12177_v30 }
0x116d   : > { %12182 = vmatprep.subr.bf16.mxu1 %v12181_v48 }
0x116f   : > { %10984 = vmatmul.mubr.msk.f32.vlgmr.msra.gmra.mrb[32].mxu1 %vm4917_vm5, %v9938_v40  ;;  %v9982_v40 = vld [vmem:[%s16756_s19 + $0x88] sm:$0xf] }
0x1170   : > { %12184 = vmatpush3.bf16.msra.mxu1 %v12181_v48  ;;  %10990 = vmatprep.mubr.msk.f32.mxu1 %vm4917_vm5, %v6601_v17  ;;  %v16757_v17 = vld [vmem:[#allocation17_spill] sm:$0xff] }
0x1177   : > { %v11011_v59 = vpop.f32.mrb[52].mxu0  ;;  %10991 = vmatmul.mubr.msk.f32.vlgmr.msra.gmra.mrb[32].mxu1 %vm4917_vm5, %v6602_v18  ;;  %v16758_v18 = vld [vmem:[#allocation18_spill] sm:$0xff] }
0x1178   : > { %v6909_v29 = vpop.f32.mrb[53].mxu0  ;;  %11016 = vmatprep.mubr.msk.f32.mxu1 %vm4917_vm5, %v9945_v15  ;;  %v16759_v15 = vld [vmem:[#allocation19_spill] sm:$0xff] }
0x1179   : > { %v12201_v0 = vpack.c.bf16 %v11011_v59, %v6909_v29  ;;  %v16761_v59 = vld [vmem:[#allocation21_spill] sm:$0xff] }
0x117a   : > { %v16768_v29 = vld [vmem:[#allocation37_spill] sm:$0xff] }
0x117b   : > { %12202 = vmatprep.subr.bf16.mxu1 %v12201_v0 }
0x117c   : > { %12204 = vmatpush3.bf16.msra.mxu1 %v12201_v0  ;;  %v16769_v0 = vld [vmem:[#allocation39_spill] sm:$0xff] }
0x117d   : > { %12206 = vmatprep.subr.bf16.mxu1 %v15173_v6 }
0x117f   : > { %11017 = vmatmul.mubr.msk.f32.vlgmr.msra.gmra.mrb[32].mxu1 %vm4917_vm5, %v9946_v42  ;;  %v16770_v42 = vld [vmem:[#allocation41_spill] sm:$0xff] }
0x1180   : > { %12208 = vmatpush3.bf16.msra.mxu1 %v15173_v6  ;;  %11035 = vmatprep.mubr.msk.f32.mxu1 %vm3076_vm3, %v15497_v49 }
0x1181   : > { %12210 = vmatprep.subr.bf16.mxu1 %v15178_v61 }
0x1184   : > { %12212 = vmatpush3.bf16.msra.mxu1 %v15178_v61 }
0x1185   : > { %12214 = vmatprep.subr.bf16.mxu1 %v15184_v39 }
0x1187   : > { %v11063_v23 = vpop.f32.mrb[54].mxu0 }
0x1188   : > { %12216 = vmatpush3.bf16.msra.mxu1 %v15184_v39  ;;  %v7231_v4 = vpop.f32.mrb[55].mxu0 }
0x1189   : > { %v12241_v36 = vpack.c.bf16 %v11063_v23, %v7231_v4  ;;  %12218 = vmatprep.subr.bf16.mxu1 %v15188_v57  ;;  %v16771_v23 = vld [vmem:[#allocation43_spill] sm:$0xff]  ;;  %v16772_v4 = vld [vmem:[#allocation45_spill] sm:$0xff] }
0x118c   : > { %12220 = vmatpush3.bf16.msra.mxu1 %v15188_v57  ;;  %v9952_v57 = vld [vmem:[%s16756_s19 + $0x38] sm:$0xf] }
0x118f   : > { %11036 = vmatmul.mubr.msk.f32.vlgmr.msra.gmra.mrb[34].mxu1 %vm3076_vm3, %v15495_v38 }
0x1190   : > { %11042 = vmatprep.mubr.msk.f32.mxu1 %vm4917_vm5, %v9951_v16  ;;  %v16780_v16 = vld [vmem:[#allocation61_spill] sm:$0xff] }
0x1197   : > { %v11089_v6 = vpop.f32.mrb[56].mxu0 }
0x1198   : > { %v7392_v47 = vpop.f32.mrb[57].mxu0 }
0x1199   : > { %v12261_v11 = vpack.c.bf16 %v11089_v6, %v7392_v47  ;;  %v16774_v6 = vld [vmem:[#allocation49_spill] sm:$0xff]  ;;  %v16775_v47 = vld [vmem:[#allocation51_spill] sm:$0xff] }
0x11a7   : > { %v11141_v33 = vpop.f32.mrb[58].mxu0 }
0x11a8   : > { %v7714_v27 = vpop.f32.mrb[59].mxu0 }
0x11a9   : > { %v12301_v61 = vpack.c.bf16 %v11141_v33, %v7714_v27  ;;  %v16777_v33 = vld [vmem:[#allocation55_spill] sm:$0xff]  ;;  %v16778_v27 = vld [vmem:[#allocation57_spill] sm:$0xff] }
0x1262   : > { %v11037_v39 = vpop.f32.mrb[34].mxu1 }
0x1263   : > { %v7070_v37 = vpop.f32.mrb[35].mxu1 }
0x1264   : > { %v12221_v10 = vpack.c.bf16 %v11037_v39, %v7070_v37  ;;  %v16781_v39 = vld [vmem:[#allocation63_spill] sm:$0xff]  ;;  %v16782_v37 = vld [vmem:[#allocation65_spill] sm:$0xff] }
0x1266   : > { %12222 = vmatprep.subr.bf16.mxu1 %v12221_v10 }
0x1267   : > { %12224 = vmatpush3.bf16.msra.mxu1 %v12221_v10  ;;  %v7999_v10 = vld [vmem:[#allocation9 + $0x68] sm:$0xff] }
0x1268   : > { %12242 = vmatprep.subr.bf16.mxu1 %v12241_v36 }
0x126a   : > { %11043 = vmatmul.mubr.msk.f32.vlgmr.msra.gmra.mrb[32].mxu1 %vm4917_vm5, %v9952_v57  ;;  %v8001_v57 = vld [vmem:[#allocation9 + $0x78] sm:$0xff] }
0x126b   : > { %12244 = vmatpush3.bf16.msra.mxu1 %v12241_v36  ;;  %11068 = vmatprep.mubr.msk.f32.mxu1 %vm4917_vm5, %v9957_v55  ;;  %v16773_v36 = vld [vmem:[#allocation47_spill] sm:$0xff]  ;;  %v12337_v55 = vpack.c.bf16 %v8001_v57, %v7999_v10  ;;  %v16828_v57 = vld [vmem:[#allocation88_spill] sm:$0xff] }
0x126c   : > { %12262 = vmatprep.subr.bf16.mxu1 %v12261_v11  ;;  %v16827_v10 = vld [vmem:[#allocation87_spill] sm:$0xff] }
0x1272   : > { %11069 = vmatmul.mubr.msk.f32.vlgmr.msra.gmra.mrb[32].mxu1 %vm4917_vm5, %v9958_v35  ;;  %v7998_v35 = vld [vmem:[#allocation9 + $0x60] sm:$0xff] }
0x1273   : > { %12264 = vmatpush3.bf16.msra.mxu1 %v12261_v11  ;;  %11094 = vmatprep.mubr.msk.f32.mxu1 %vm4917_vm5, %v9963_v1  ;;  %v16776_v11 = vld [vmem:[#allocation53_spill] sm:$0xff] }
0x1274   : > { %12266 = vmatprep.subr.bf16.mxu1 %v15218_v53  ;;  %v8000_v1 = vld [vmem:[#allocation9 + $0x70] sm:$0xff] }
0x127a   : > { %11095 = vmatmul.mubr.msk.f32.vlgmr.msra.gmra.mrb[32].mxu1 %vm4917_vm5, %v9964_v34  ;;  %v12339_v34 = vpack.c.bf16 %v8000_v1, %v7998_v35  ;;  %v16830_v35 = vld [vmem:[#allocation90_spill] sm:$0xff]  ;;  %v16831_v1 = vld [vmem:[#allocation91_spill] sm:$0xff] }
0x127b   : > { %12268 = vmatpush3.bf16.msra.mxu1 %v15218_v53  ;;  %11113 = vmatprep.mubr.msk.f32.mxu1 %vm3076_vm3, %v15497_v49  ;;  %v9969_v53 = vld [vmem:[%s16756_s19 + $0x60] sm:$0xff] }
0x127c   : > { %12270 = vmatprep.subr.bf16.mxu1 %v15222_v12 }
0x127f   : > { %12272 = vmatpush3.bf16.msra.mxu1 %v15222_v12 }
0x1280   : > { %12274 = vmatprep.subr.bf16.mxu1 %v15228_v52 }
0x1283   : > { %12276 = vmatpush3.bf16.msra.mxu1 %v15228_v52  ;;  %v9970_v52 = vld [vmem:[%s16756_s19 + $0x68] sm:$0xf] }
0x1284   : > { %12278 = vmatprep.subr.bf16.mxu1 %v15232_v50 }
0x1287   : > { %12280 = vmatpush3.bf16.msra.mxu1 %v15232_v50  ;;  %v9975_v50 = vld [vmem:[%s16756_s19 + $0x70] sm:$0xff] }
0x128a   : > { %11114 = vmatmul.mubr.msk.f32.vlgmr.msra.gmra.mrb[36].mxu1 %vm3076_vm3, %v15495_v38 }
0x128b   : > { %11120 = vmatprep.mubr.msk.f32.mxu1 %vm4917_vm5, %v9969_v53  ;;  %v16783_v53 = vld [vmem:[#allocation22_spill] sm:$0xff] }
0x135d   : > { %v11115_v31 = vpop.f32.mrb[36].mxu1 }
0x135e   : > { %v7553_v26 = vpop.f32.mrb[37].mxu1 }
0x135f   : > { %v12281_v12 = vpack.c.bf16 %v11115_v31, %v7553_v26  ;;  %v7975_v26 = vpop.permute.xlu1 %7974 }
0x1361   : > { %12282 = vmatprep.subr.bf16.mxu1 %v12281_v12 }
0x1362   : > { %12284 = vmatpush3.bf16.msra.mxu1 %v12281_v12 }
0x1363   : > { %12302 = vmatprep.subr.bf16.mxu1 %v12301_v61 }
0x1365   : > { %11121 = vmatmul.mubr.msk.f32.vlgmr.msra.gmra.mrb[32].mxu1 %vm4917_vm5, %v9970_v52 }
0x1366   : > { %12304 = vmatpush3.bf16.msra.mxu1 %v12301_v61  ;;  %11146 = vmatprep.mubr.msk.f32.mxu1 %vm4917_vm5, %v9975_v50  ;;  %v16779_v61 = vld [vmem:[#allocation59_spill] sm:$0xff]  ;;  %v7980_v50 = vpop.permute.xlu0 %7979 }
0x1367   : > { %12306 = vmatprep.subr.bf16.mxu1 %v15254_v43 }
0x136d   : > { %11147 = vmatmul.mubr.msk.f32.vlgmr.msra.gmra.mrb[32].mxu1 %vm4917_vm5, %v9976_v58 }
0x136e   : > { %12308 = vmatpush3.bf16.msra.mxu1 %v15254_v43  ;;  %11165 = vmatprep.mubr.msk.f32.mxu1 %vm3076_vm3, %v15497_v49  ;;  %v9981_v43 = vld [vmem:[%s16756_s19 + $0x80] sm:$0xff] }
0x136f   : > { %12310 = vmatprep.subr.bf16.mxu1 %v15258_v22 }
0x1372   : > { %12312 = vmatpush3.bf16.msra.mxu1 %v15258_v22  ;;  %v7986_v22 = vld [vmem:[#allocation9] sm:$0xff] }
0x1373   : > { %12314 = vmatprep.subr.bf16.mxu1 %v15264_v24  ;;  %v12327_v9 = vpack.c.bf16 %v7988_v46, %v7986_v22  ;;  %v16785_v22 = vld [vmem:[#allocation25_spill] sm:$0xff] }
0x1374   : > { %v16787_v46 = vld [vmem:[#allocation29_spill] sm:$0xff] }
0x1375   : > { %12328 = vmatpush1.bf16.msra.mxu0 %v12327_v9  ;;  %v16790_v9 = vld [vmem:[#allocation34_spill] sm:$0xff] }
0x1376   : > { %12316 = vmatpush3.bf16.msra.mxu1 %v15264_v24  ;;  %v7993_v24 = vld [vmem:[#allocation9 + $0x38] sm:$0xff] }
0x1377   : > { %12318 = vmatprep.subr.bf16.mxu1 %v15268_v63  ;;  %v12329_v60 = vpack.c.bf16 %v7993_v24, %v7991_v28  ;;  %v16788_v28 = vld [vmem:[#allocation30_spill] sm:$0xff]  ;;  %v16789_v24 = vld [vmem:[#allocation32_spill] sm:$0xff] }
0x1379   : > { %12330 = vmatprep.subr.bf16.mxu0 %v12329_v60  ;;  %v16791_v60 = vld [vmem:[#allocation36_spill] sm:$0xff] }
0x137a   : > { %12320 = vmatpush3.bf16.msra.mxu1 %v15268_v63  ;;  %v7992_v63 = vld [vmem:[#allocation9 + $0x30] sm:$0xff] }
0x137b   : > { %v12331_v49 = vpack.c.bf16 %v7992_v63, %v7990_v56  ;;  %v16792_v56 = vld [vmem:[#allocation38_spill] sm:$0xff]  ;;  %v16793_v63 = vld [vmem:[#allocation40_spill] sm:$0xff] }
0x137d   : > { %11166 = vmatmul.mubr.msk.f32.vlgmr.msra.gmra.mrb[38].mxu1 %vm3076_vm3, %v15495_v38  ;;  %v7997_v38 = vld [vmem:[#allocation9 + $0x58] sm:$0xff]  ;;  %12332 = vmatpush1.bf16.msra.mxu0 %v12331_v49 }
0x137e   : > { %11172 = vmatprep.mubr.msk.f32.mxu1 %vm4917_vm5, %v9981_v43  ;;  %v12333_v45 = vpack.c.bf16 %v7997_v38, %v7995_v32  ;;  %v16794_v32 = vld [vmem:[#allocation42_spill] sm:$0xff]  ;;  %v16795_v38 = vld [vmem:[#allocation44_spill] sm:$0xff] }
0x137f   : > { %v16796_v49 = vld [vmem:[#allocation46_spill] sm:$0xff] }
0x1380   : > { %12334 = vmatprep.subr.bf16.mxu0 %v12333_v45  ;;  %v16797_v45 = vld [vmem:[#allocation48_spill] sm:$0xff] }
0x1381   : > { %12336 = vmatpush1.bf16.msra.mxu0 %v12335_v62  ;;  %v16800_v62 = vld [vmem:[#allocation54_spill] sm:$0xff] }
0x1382   : > { %12338 = vmatprep.subr.bf16.mxu0 %v12337_v55  ;;  %v16829_v55 = vld [vmem:[#allocation89_spill] sm:$0xff] }
0x1385   : > { %12340 = vmatpush1.bf16.msra.mxu0 %v12339_v34  ;;  %v16832_v34 = vld [vmem:[#allocation92_spill] sm:$0xff] }
0x1386   : > { %12342 = vmatprep.subr.bf16.mxu0 %v16783_v53  ;;  %v16833_v53 = vld [vmem:[#allocation93_spill] sm:$0xff] }
0x1450   : > { %v11167_v5 = vpop.f32.mrb[38].mxu1 }
0x1451   : > { %v7875_v48 = vpop.f32.mrb[39].mxu1 }
0x1452   : > { %v12321_v30 = vpack.c.bf16 %v11167_v5, %v7875_v48  ;;  %v16801_v5 = vld [vmem:[#allocation56_spill] sm:$0xff]  ;;  %v16802_v48 = vld [vmem:[#allocation58_spill] sm:$0xff] }
0x1454   : > { %12322 = vmatprep.subr.bf16.mxu1 %v12321_v30 }
0x1455   : > { %12324 = vmatpush3.bf16.msra.mxu1 %v12321_v30  ;;  %v16803_v30 = vld [vmem:[#allocation60_spill] sm:$0xff] }
0x1456   : > { %12406 = vmatprep.subr.bf16.mxu1 %v13637_v3  ;;  %v16760_v3 = vld [vmem:[#allocation20_spill] sm:$0xff] }
0x1458   : > { %11173 = vmatmul.mubr.msk.f32.vlgmr.msra.gmra.mrb[32].mxu1 %vm4917_vm5, %v9982_v40  ;;  %v16804_v40 = vld [vmem:[#allocation62_spill] sm:$0xff] }
0x1459   : > { %12408 = vmatpush1.bf16.msra.mxu1 %v13639_v7  ;;  %v16762_v7 = vld [vmem:[#allocation24_spill] sm:$0xff] }
0x145a   : > { %12410 = vmatprep.subr.bf16.mxu1 %v13641_v8  ;;  %v16763_v8 = vld [vmem:[#allocation27_spill] sm:$0xff] }
0x145d   : > { %12412 = vmatpush1.bf16.msra.mxu1 %v13645_v13  ;;  %v16764_v13 = vld [vmem:[#allocation28_spill] sm:$0xff] }
0x145e   : > { %12414 = vmatprep.subr.bf16.mxu1 %v13648_v14  ;;  %v16765_v14 = vld [vmem:[#allocation31_spill] sm:$0xff] }
0x1461   : > { %12416 = vmatpush1.bf16.msra.mxu1 %v13651_v19  ;;  %v16766_v19 = vld [vmem:[#allocation33_spill] sm:$0xff] }
0x1462   : > { %12418 = vmatprep.subr.bf16.mxu1 %v13654_v20  ;;  %v16767_v20 = vld [vmem:[#allocation35_spill] sm:$0xff] }
0x1465   : > { %12420 = vmatpush1.bf16.msra.mxu1 %v16757_v17  ;;  %v16805_v17 = vld [vmem:[#allocation64_spill] sm:$0xff] }
0x1466   : > { %12422 = vmatprep.subr.bf16.mxu1 %v16758_v18  ;;  %v16806_v18 = vld [vmem:[#allocation66_spill] sm:$0xff] }
0x1469   : > { %12424 = vmatpush1.bf16.msra.mxu1 %v16759_v15  ;;  %v16807_v15 = vld [vmem:[#allocation68_spill] sm:$0xff] }
0x146a   : > { %12426 = vmatprep.subr.bf16.mxu1 %v16760_v3  ;;  %v16808_v3 = vld [vmem:[#allocation70_spill] sm:$0xff] }
0x146d   : > { %12428 = vmatpush1.bf16.msra.mxu1 %v16761_v59  ;;  %v16809_v59 = vld [vmem:[#allocation72_spill] sm:$0xff] }
0x146e   : > { %12430 = vmatprep.subr.bf16.mxu1 %v16762_v7  ;;  %v16810_v7 = vld [vmem:[#allocation74_spill] sm:$0xff] }
0x1471   : > { %12432 = vmatpush1.bf16.msra.mxu1 %v16763_v8  ;;  %v16811_v8 = vld [vmem:[#allocation76_spill] sm:$0xff] }
0x1472   : > { %12434 = vmatprep.subr.bf16.mxu1 %v16764_v13  ;;  %v16812_v13 = vld [vmem:[#allocation78_spill] sm:$0xff] }
0x1475   : > { %12436 = vmatpush1.bf16.msra.mxu1 %v16765_v14  ;;  %v16813_v14 = vld [vmem:[#allocation80_spill] sm:$0xff] }
0x1476   : > { %12438 = vmatprep.subr.bf16.mxu1 %v16766_v19  ;;  %v16814_v19 = vld [vmem:[#allocation82_spill] sm:$0xff] }
0x1479   : > { %12440 = vmatpush1.bf16.msra.mxu1 %v16767_v20 }
0x147a   : > { %12442 = vmatprep.subr.bf16.mxu1 %v16768_v29 }
0x147d   : > { %12444 = vmatpush1.bf16.msra.mxu1 %v16769_v0  ;;  %v16815_v0 = vld [vmem:[#allocation67_spill] sm:$0xff] }
0x147e   : > { %12446 = vmatprep.subr.bf16.mxu1 %v16770_v42 }
0x1481   : > { %12448 = vmatpush1.bf16.msra.mxu1 %v16771_v23 }
0x1482   : > { %12450 = vmatprep.subr.bf16.mxu1 %v16772_v4  ;;  %v16816_v4 = vld [vmem:[#allocation69_spill] sm:$0xff] }
0x1485   : > { %12452 = vmatpush1.bf16.msra.mxu1 %v16773_v36  ;;  %v16817_v36 = vld [vmem:[#allocation71_spill] sm:$0xff] }
0x1486   : > { %12454 = vmatprep.subr.bf16.mxu1 %v16774_v6  ;;  %v16818_v6 = vld [vmem:[#allocation73_spill] sm:$0xff] }
0x1489   : > { %12456 = vmatpush1.bf16.msra.mxu1 %v16775_v47  ;;  %v16819_v47 = vld [vmem:[#allocation75_spill] sm:$0xff] }
0x148a   : > { %12458 = vmatprep.subr.bf16.mxu1 %v16776_v11  ;;  %v16820_v11 = vld [vmem:[#allocation77_spill] sm:$0xff] }
0x148d   : > { %12460 = vmatpush1.bf16.msra.mxu1 %v16777_v33  ;;  %v16821_v33 = vld [vmem:[#allocation79_spill] sm:$0xff] }
0x148e   : > { %12462 = vmatprep.subr.bf16.mxu1 %v16778_v27  ;;  %v16822_v27 = vld [vmem:[#allocation81_spill] sm:$0xff] }
0x1491   : > { %12464 = vmatpush1.bf16.msra.mxu1 %v16779_v61  ;;  %v16823_v61 = vld [vmem:[#allocation83_spill] sm:$0xff] }
0x1492   : > { %12466 = vmatprep.subr.bf16.mxu1 %v16780_v16  ;;  %v16824_v16 = vld [vmem:[#allocation84_spill] sm:$0xff] }
0x1495   : > { %12468 = vmatpush1.bf16.msra.mxu1 %v16781_v39  ;;  %v16825_v39 = vld [vmem:[#allocation85_spill] sm:$0xff] }
0x1496   : > { %12482 = vmatprep.subr.bf16.mxu1 %v16782_v37  ;;  %v16826_v37 = vld [vmem:[#allocation86_spill] sm:$0xff] }
0x152b   : > { %v11174_v31 = vpop.f32.mrb[32].mxu1 }
0x152c   : > { %v7959_v12 = vpop.f32.mrb[33].mxu1  ;;  %v7983_v58 = vadd.f32 %v11174_v31, %v7980_v50  ;;  %v16834_v31 = vld [vmem:[#allocation94_spill] sm:$0xff] }
0x152d   : > { %v7982_v52 = vadd.f32 %v7975_v26, %v7959_v12  ;;  %v16835_v26 = vld [vmem:[#allocation95_spill] sm:$0xff]  ;;  %v16836_v12 = vld [vmem:[#allocation96_spill] sm:$0xff]  ;;  %v16838_v50 = vld [vmem:[#allocation98_spill] sm:$0xff] }
0x152e   : > { %v7985_v2 = vmax.f32 %v7983_v58, 0.0  ;;  %v16839_v58 = vld [vmem:[#allocation99_spill] sm:$0xff] }
0x152f   : > { %v7984_v43 = vmax.f32 %v7982_v52, 0.0  ;;  %v16837_v52 = vld [vmem:[#allocation97_spill] sm:$0xff] }
0x1531   : > { %9985 = vmatmul.mubr.msk.f32.vlgmr.msra.gmra.mrb[60].mxu0 %vm3076_vm3, %v7984_v43  ;;  %v16840_v43 = vld [vmem:[#allocation100_spill] sm:$0xff] }
0x1532   : > { %8078 = vmatprep.mubr.f32.mxu0 %v16591_v54  ;;  %12344 = vmatpush1.bf16.msra.mxu0 %v16784_v25  ;;  %v16841_v25 = vld [vmem:[#allocation101_spill] sm:$0xff] }
0x1533   : > { %12346 = vmatprep.subr.bf16.mxu0 %v16785_v22  ;;  %v16843_v22 = vld [vmem:[#allocation103_spill] sm:$0xff] }
0x1535   : > { %9986 = vmatmul.mubr.msk.f32.gmra.mrb[62].mxu0 %vm3076_vm3, %v7985_v2  ;;  %v16842_v2 = vld [vmem:[#allocation102_spill] sm:$0xff] }
0x1536   : > { %12348 = vmatpush1.bf16.msra.mxu0 %v16786_v41  ;;  %v16844_v41 = vld [vmem:[#allocation104_spill] sm:$0xff] }
0x1537   : > { %12350 = vmatprep.subr.bf16.mxu0 %v16787_v46  ;;  %v16845_v46 = vld [vmem:[#allocation105_spill] sm:$0xff] }
0x153a   : > { %12352 = vmatpush1.bf16.msra.mxu0 %v16788_v28  ;;  %v16846_v28 = vld [vmem:[#allocation106_spill] sm:$0xff] }
0x153b   : > { %12354 = vmatprep.subr.bf16.mxu0 %v16789_v24  ;;  %v16847_v24 = vld [vmem:[#allocation107_spill] sm:$0xff] }
0x153e   : > { %12356 = vmatpush1.bf16.msra.mxu0 %v16790_v9  ;;  %v16848_v9 = vld [vmem:[#allocation108_spill] sm:$0xff] }
0x153f   : > { %12358 = vmatprep.subr.bf16.mxu0 %v16791_v60  ;;  %v16849_v60 = vld [vmem:[#allocation109_spill] sm:$0xff] }
0x1542   : > { %12360 = vmatpush1.bf16.msra.mxu0 %v16792_v56  ;;  %v16850_v56 = vld [vmem:[#allocation110_spill] sm:$0xff] }
0x1543   : > { %12362 = vmatprep.subr.bf16.mxu0 %v16793_v63  ;;  %v16851_v63 = vld [vmem:[#allocation111_spill] sm:$0xff] }
0x1546   : > { %12364 = vmatpush1.bf16.msra.mxu0 %v16794_v32  ;;  %v16852_v32 = vld [vmem:[#allocation112_spill] sm:$0xff] }
0x1547   : > { %12366 = vmatprep.subr.bf16.mxu0 %v16795_v38  ;;  %v16853_v38 = vld [vmem:[#allocation113_spill] sm:$0xff] }
0x154a   : > { %12368 = vmatpush1.bf16.msra.mxu0 %v16796_v49  ;;  %v16854_v49 = vld [vmem:[#allocation114_spill] sm:$0xff] }
0x154b   : > { %12370 = vmatprep.subr.bf16.mxu0 %v16797_v45  ;;  %v16855_v45 = vld [vmem:[#allocation115_spill] sm:$0xff] }
0x154e   : > { %12372 = vmatpush1.bf16.msra.mxu0 %v16798_v44  ;;  %v16856_v44 = vld [vmem:[#allocation116_spill] sm:$0xff] }
0x154f   : > { %12374 = vmatprep.subr.bf16.mxu0 %v16799_v51  ;;  %v16857_v51 = vld [vmem:[#allocation117_spill] sm:$0xff] }
0x1552   : > { %12376 = vmatpush1.bf16.msra.mxu0 %v16800_v62  ;;  %v16858_v62 = vld [vmem:[#allocation118_spill] sm:$0xff] }
0x1553   : > { %12378 = vmatprep.subr.bf16.mxu0 %v16801_v5  ;;  %v16859_v5 = vld [vmem:[#allocation119_spill] sm:$0xff] }
0x1556   : > { %12380 = vmatpush1.bf16.msra.mxu0 %v16802_v48  ;;  %v16860_v48 = vld [vmem:[#allocation120_spill] sm:$0xff] }
0x1557   : > { %12382 = vmatprep.subr.bf16.mxu0 %v16803_v30  ;;  %v16861_v30 = vld [vmem:[#allocation121_spill] sm:$0xff] }
0x155a   : > { %12384 = vmatpush1.bf16.msra.mxu0 %v16804_v40  ;;  %v16862_v40 = vld [vmem:[#allocation122_spill] sm:$0xff] }
0x155b   : > { %12386 = vmatprep.subr.bf16.mxu0 %v16805_v17  ;;  %v16863_v17 = vld [vmem:[#allocation123_spill] sm:$0xff] }
0x155e   : > { %12388 = vmatpush1.bf16.msra.mxu0 %v16806_v18  ;;  %v16864_v18 = vld [vmem:[#allocation124_spill] sm:$0xff] }
0x155f   : > { %12390 = vmatprep.subr.bf16.mxu0 %v16807_v15  ;;  %v16865_v15 = vld [vmem:[#allocation125_spill] sm:$0xff] }
0x1562   : > { %12392 = vmatpush1.bf16.msra.mxu0 %v16808_v3  ;;  %v16866_v3 = vld [vmem:[#allocation126_spill] sm:$0xff] }
0x1563   : > { %12394 = vmatprep.subr.bf16.mxu0 %v16809_v59  ;;  %v16867_v59 = vld [vmem:[#allocation127_spill] sm:$0xff] }
0x1566   : > { %12396 = vmatpush1.bf16.msra.mxu0 %v16810_v7  ;;  %v16868_v7 = vld [vmem:[#allocation128_spill] sm:$0xff] }
0x1567   : > { %12398 = vmatprep.subr.bf16.mxu0 %v16811_v8  ;;  %v16869_v8 = vld [vmem:[#allocation129_spill] sm:$0xff] }
0x156a   : > { %12400 = vmatpush1.bf16.msra.mxu0 %v16812_v13  ;;  %v16870_v13 = vld [vmem:[#allocation130_spill] sm:$0xff] }
0x156b   : > { %12402 = vmatprep.subr.bf16.mxu0 %v16813_v14  ;;  %v16871_v14 = vld [vmem:[#allocation131_spill] sm:$0xff] }
0x156e   : > { %12404 = vmatpush1.bf16.msra.mxu0 %v16814_v19  ;;  %v16872_v19 = vld [vmem:[#allocation132_spill] sm:$0xff] }
0x1604   : > { %v15731_v20 = vpop.f32.mrb[60].mxu0 }
0x1605   : > { %v15733_v29 = vpop.f32.mrb[61].mxu0 }
0x1606   : > { %8149 = vmatprep.mubr.f32.mxu0 %v15733_v29  ;;  %8227 = vmatprep.mubr.f32.mxu1 %v15733_v29 }
0x1607   : > { %8150 = vmatmul.mubr.f32.vlgmr.msra.gmra.mrb[64].mxu0 %v15731_v20  ;;  %8228 = vmatmul.mubr.f32.vlgmr.msra.gmra.mrb[40].mxu1 %v15731_v20 }
0x1608   : > { %12484 = vmatpush1.bf16.msra.mxu1 %v16815_v0  ;;  %v15740_v42 = vpop.f32.mrb[62].mxu0  ;;  %v16873_v0 = vld [vmem:[#allocation133_spill] sm:$0xff] }
0x1609   : > { %v15742_v23 = vpop.f32.mrb[63].mxu0  ;;  %12486 = vmatprep.subr.bf16.mxu1 %v16816_v4  ;;  %v16874_v4 = vld [vmem:[#allocation134_spill] sm:$0xff] }
0x160a   : > { %8155 = vmatprep.mubr.f32.mxu0 %v15742_v23  ;;  %8233 = vmatprep.mubr.f32.mxu1 %v15742_v23 }
0x160b   : > { %8156 = vmatmul.mubr.f32.gmra.mrb[66].mxu0 %v15740_v42  ;;  %8234 = vmatmul.mubr.f32.gmra.mrb[42].mxu1 %v15740_v42 }
0x160c   : > { %12488 = vmatpush1.bf16.msra.mxu1 %v16817_v36  ;;  %8466 = vmatprep.mubr.f32.mxu1 %v15733_v29  ;;  %v16875_v36 = vld [vmem:[#allocation135_spill] sm:$0xff] }
0x160d   : > { %12490 = vmatprep.subr.bf16.mxu1 %v16818_v6  ;;  %8315 = vmatprep.mubr.f32.mxu0 %v16591_v54  ;;  %v16876_v6 = vld [vmem:[#allocation136_spill] sm:$0xff] }
0x1610   : > { %12492 = vmatpush1.bf16.msra.mxu1 %v16819_v47  ;;  %v16877_v47 = vld [vmem:[#allocation137_spill] sm:$0xff] }
0x1611   : > { %12494 = vmatprep.subr.bf16.mxu1 %v16820_v11  ;;  %v16878_v11 = vld [vmem:[#allocation170_spill] sm:$0xff] }
0x1614   : > { %12496 = vmatpush1.bf16.msra.mxu1 %v16821_v33  ;;  %v16879_v33 = vld [vmem:[#allocation171_spill] sm:$0xff] }
0x1615   : > { %12498 = vmatprep.subr.bf16.mxu1 %v16822_v27  ;;  %v16880_v27 = vld [vmem:[#allocation172_spill] sm:$0xff] }
0x1618   : > { %12500 = vmatpush1.bf16.msra.mxu1 %v16823_v61  ;;  %v16881_v61 = vld [vmem:[#allocation173_spill] sm:$0xff] }
0x1619   : > { %12502 = vmatprep.subr.bf16.mxu1 %v16824_v16  ;;  %v16882_v16 = vld [vmem:[#allocation174_spill] sm:$0xff] }
0x161c   : > { %12504 = vmatpush1.bf16.msra.mxu1 %v16825_v39  ;;  %v16883_v39 = vld [vmem:[#allocation175_spill] sm:$0xff] }
0x161d   : > { %12506 = vmatprep.subr.bf16.mxu1 %v16826_v37  ;;  %v16884_v37 = vld [vmem:[#allocation176_spill] sm:$0xff] }
0x1620   : > { %12508 = vmatpush1.bf16.msra.mxu1 %v16827_v10  ;;  %v16885_v10 = vld [vmem:[#allocation177_spill] sm:$0xff] }
0x1621   : > { %12510 = vmatprep.subr.bf16.mxu1 %v16828_v57  ;;  %v16886_v57 = vld [vmem:[#allocation178_spill] sm:$0xff] }
0x1624   : > { %12512 = vmatpush1.bf16.msra.mxu1 %v16829_v55  ;;  %v16887_v55 = vld [vmem:[#allocation179_spill] sm:$0xff] }
0x1625   : > { %12514 = vmatprep.subr.bf16.mxu1 %v16830_v35  ;;  %v16888_v35 = vld [vmem:[#allocation180_spill] sm:$0xff] }
0x1628   : > { %12516 = vmatpush1.bf16.msra.mxu1 %v16831_v1  ;;  %v16889_v1 = vld [vmem:[#allocation181_spill] sm:$0xff] }
0x1629   : > { %12518 = vmatprep.subr.bf16.mxu1 %v16832_v34  ;;  %v16890_v34 = vld [vmem:[#allocation182_spill] sm:$0xff] }
0x162c   : > { %12520 = vmatpush1.bf16.msra.mxu1 %v16833_v53  ;;  %v16891_v53 = vld [vmem:[#allocation183_spill] sm:$0xff] }
0x162d   : > { %12522 = vmatprep.subr.bf16.mxu1 %v16834_v31  ;;  %v16892_v31 = vld [vmem:[#allocation184_spill] sm:$0xff] }
0x1630   : > { %12524 = vmatpush1.bf16.msra.mxu1 %v16835_v26  ;;  %v16893_v26 = vld [vmem:[#allocation185_spill] sm:$0xff] }
0x1631   : > { %12526 = vmatprep.subr.bf16.mxu1 %v16836_v12  ;;  %v16894_v12 = vld [vmem:[#allocation186_spill] sm:$0xff] }
0x1634   : > { %12528 = vmatpush1.bf16.msra.mxu1 %v16837_v52  ;;  %v16895_v52 = vld [vmem:[#allocation187_spill] sm:$0xff] }
0x1635   : > { %12530 = vmatprep.subr.bf16.mxu1 %v16838_v50  ;;  %v16896_v50 = vld [vmem:[#allocation188_spill] sm:$0xff] }
0x1638   : > { %12532 = vmatpush1.bf16.msra.mxu1 %v16839_v58  ;;  %v16897_v58 = vld [vmem:[#allocation189_spill] sm:$0xff] }
0x1639   : > { %12534 = vmatprep.subr.bf16.mxu1 %v16840_v43  ;;  %v16898_v43 = vld [vmem:[#allocation190_spill] sm:$0xff] }
0x163c   : > { %12536 = vmatpush1.bf16.msra.mxu1 %v16841_v25  ;;  %v16899_v25 = vld [vmem:[#allocation191_spill] sm:$0xff] }
0x163d   : > { %12538 = vmatprep.subr.bf16.mxu1 %v16842_v2  ;;  %v16900_v2 = vld [vmem:[#allocation192_spill] sm:$0xff] }
0x1640   : > { %12540 = vmatpush1.bf16.msra.mxu1 %v16843_v22  ;;  %v16901_v22 = vld [vmem:[#allocation193_spill] sm:$0xff] }
0x1641   : > { %12542 = vmatprep.subr.bf16.mxu1 %v16844_v41  ;;  %v16902_v41 = vld [vmem:[#allocation194_spill] sm:$0xff] }
0x1644   : > { %12544 = vmatpush1.bf16.msra.mxu1 %v16845_v46  ;;  %v16903_v46 = vld [vmem:[#allocation195_spill] sm:$0xff] }
0x1645   : > { %12622 = vmatprep.subr.bf16.mxu1 %v16846_v28  ;;  %v16904_v28 = vld [vmem:[#allocation196_spill] sm:$0xff] }
0x1647   : > { %8467 = vmatmul.mubr.f32.vlgmr.msra.gmra.mrb[44].mxu1 %v15731_v20 }
0x1648   : > { %8472 = vmatprep.mubr.f32.mxu1 %v15742_v23  ;;  %12624 = vmatpush1.bf16.msra.mxu1 %v16847_v24  ;;  %v16905_v24 = vld [vmem:[#allocation197_spill] sm:$0xff] }
0x1649   : > { %12626 = vmatprep.subr.bf16.mxu1 %v16848_v9  ;;  %v16906_v9 = vld [vmem:[#allocation198_spill] sm:$0xff] }
0x164b   : > { %8473 = vmatmul.mubr.f32.gmra.mrb[46].mxu1 %v15740_v42 }
0x164c   : > { %12628 = vmatpush1.bf16.msra.mxu1 %v16849_v60  ;;  %8788 = vmatprep.mubr.f32.mxu1 %v15733_v29  ;;  %v16907_v60 = vld [vmem:[#allocation199_spill] sm:$0xff] }
0x164d   : > { %12630 = vmatprep.subr.bf16.mxu1 %v16850_v56  ;;  %v16908_v56 = vld [vmem:[#allocation200_spill] sm:$0xff] }
0x1650   : > { %12632 = vmatpush1.bf16.msra.mxu1 %v16851_v63  ;;  %v16909_v63 = vld [vmem:[#allocation201_spill] sm:$0xff] }
0x1651   : > { %12634 = vmatprep.subr.bf16.mxu1 %v16852_v32  ;;  %v16910_v32 = vld [vmem:[#allocation234_spill] sm:$0xff] }
0x1654   : > { %12636 = vmatpush1.bf16.msra.mxu1 %v16853_v38  ;;  %v16911_v38 = vld [vmem:[#allocation235_spill] sm:$0xff] }
0x1655   : > { %12638 = vmatprep.subr.bf16.mxu1 %v16854_v49  ;;  %v16912_v49 = vld [vmem:[#allocation236_spill] sm:$0xff] }
0x1658   : > { %12640 = vmatpush1.bf16.msra.mxu1 %v16855_v45  ;;  %v16913_v45 = vld [vmem:[#allocation237_spill] sm:$0xff] }
0x1659   : > { %12642 = vmatprep.subr.bf16.mxu1 %v16856_v44  ;;  %v16914_v44 = vld [vmem:[#allocation238_spill] sm:$0xff] }
0x165c   : > { %12644 = vmatpush1.bf16.msra.mxu1 %v16857_v51  ;;  %v16915_v51 = vld [vmem:[#allocation239_spill] sm:$0xff] }
0x165d   : > { %12646 = vmatprep.subr.bf16.mxu1 %v16858_v62  ;;  %v16916_v62 = vld [vmem:[#allocation240_spill] sm:$0xff] }
0x1660   : > { %12648 = vmatpush1.bf16.msra.mxu1 %v16859_v5  ;;  %v16917_v5 = vld [vmem:[#allocation241_spill] sm:$0xff] }
0x1661   : > { %12650 = vmatprep.subr.bf16.mxu1 %v16860_v48  ;;  %v16918_v48 = vld [vmem:[#allocation242_spill] sm:$0xff] }
0x1664   : > { %12652 = vmatpush1.bf16.msra.mxu1 %v16861_v30  ;;  %v16919_v30 = vld [vmem:[#allocation243_spill] sm:$0xff] }
0x1665   : > { %12654 = vmatprep.subr.bf16.mxu1 %v16862_v40  ;;  %v16920_v40 = vld [vmem:[#allocation244_spill] sm:$0xff] }
0x1668   : > { %12656 = vmatpush1.bf16.msra.mxu1 %v16863_v17 }
0x1669   : > { %12658 = vmatprep.subr.bf16.mxu1 %v16864_v18 }
0x166c   : > { %12660 = vmatpush1.bf16.msra.mxu1 %v16865_v15 }
0x166d   : > { %12662 = vmatprep.subr.bf16.mxu1 %v16866_v3 }
0x1670   : > { %12664 = vmatpush1.bf16.msra.mxu1 %v16867_v59  ;;  %v16921_v59 = vld [vmem:[#allocation245_spill] sm:$0xff] }
0x1671   : > { %12666 = vmatprep.subr.bf16.mxu1 %v16868_v7  ;;  %v16922_v7 = vld [vmem:[#allocation246_spill] sm:$0xff] }
0x1674   : > { %12668 = vmatpush1.bf16.msra.mxu1 %v16869_v8 }
0x1675   : > { %12670 = vmatprep.subr.bf16.mxu1 %v16870_v13 }
0x1678   : > { %12672 = vmatpush1.bf16.msra.mxu1 %v16871_v14 }
0x1679   : > { %12674 = vmatprep.subr.bf16.mxu1 %v16872_v19 }
0x167c   : > { %12676 = vmatpush1.bf16.msra.mxu1 %v16873_v0 }
0x167d   : > { %12678 = vmatprep.subr.bf16.mxu1 %v16874_v4 }
0x1680   : > { %12680 = vmatpush1.bf16.msra.mxu1 %v16875_v36 }
0x1681   : > { %12682 = vmatprep.subr.bf16.mxu1 %v16876_v6 }
0x1684   : > { %12684 = vmatpush1.bf16.msra.mxu1 %v16877_v47  ;;  %v16923_v47 = vld [vmem:[#allocation247_spill] sm:$0xff] }
0x1685   : > { %12762 = vmatprep.subr.bf16.mxu1 %v16878_v11  ;;  %v16924_v11 = vld [vmem:[#allocation248_spill] sm:$0xff] }
0x1687   : > { %8789 = vmatmul.mubr.f32.vlgmr.msra.gmra.mrb[48].mxu1 %v15731_v20 }
0x1688   : > { %8794 = vmatprep.mubr.f32.mxu1 %v15742_v23  ;;  %12764 = vmatpush1.bf16.msra.mxu1 %v16879_v33  ;;  %v9987_v33 = vld [vmem:[%s16925_s6 + $0x4] sm:$0x7] }
0x1689   : > { %12766 = vmatprep.subr.bf16.mxu1 %v16880_v27  ;;  %v16926_v27 = vld [vmem:[#allocation249_spill] sm:$0xff] }
0x168b   : > { %8795 = vmatmul.mubr.f32.gmra.mrb[50].mxu1 %v15740_v42 }
0x168c   : > { %12768 = vmatpush1.bf16.msra.mxu1 %v16881_v61  ;;  %9110 = vmatprep.mubr.f32.mxu1 %v15733_v29  ;;  %v16927_v61 = vld [vmem:[#allocation250_spill] sm:$0xff] }
0x168d   : > { %12770 = vmatprep.subr.bf16.mxu1 %v16882_v16  ;;  %v16928_v16 = vld [vmem:[#allocation251_spill] sm:$0xff] }
0x1690   : > { %12772 = vmatpush1.bf16.msra.mxu1 %v16883_v39  ;;  %v16929_v39 = vld [vmem:[#allocation252_spill] sm:$0xff] }
0x1691   : > { %12774 = vmatprep.subr.bf16.mxu1 %v16884_v37  ;;  %v8162_v37 = vld [vmem:[%s16925_s6] sm:$0x7] }
0x1694   : > { %12776 = vmatpush1.bf16.msra.mxu1 %v16885_v10  ;;  %v16930_v10 = vld [vmem:[#allocation253_spill] sm:$0xff] }
0x1695   : > { %12778 = vmatprep.subr.bf16.mxu1 %v16886_v57  ;;  %v16931_v57 = vld [vmem:[#allocation254_spill] sm:$0xff] }
0x1698   : > { %12780 = vmatpush1.bf16.msra.mxu1 %v16887_v55  ;;  %v16932_v55 = vld [vmem:[#allocation255_spill] sm:$0xff] }
0x1699   : > { %12782 = vmatprep.subr.bf16.mxu1 %v16888_v35  ;;  %v16933_v35 = vld [vmem:[#allocation256_spill] sm:$0xff] }
0x169c   : > { %12784 = vmatpush1.bf16.msra.mxu1 %v16889_v1  ;;  %v16934_v1 = vld [vmem:[#allocation257_spill] sm:$0xff] }
0x169d   : > { %12786 = vmatprep.subr.bf16.mxu1 %v16890_v34  ;;  %v16935_v34 = vld [vmem:[#allocation258_spill] sm:$0xff] }
0x16a0   : > { %12788 = vmatpush1.bf16.msra.mxu1 %v16891_v53  ;;  %v16936_v53 = vld [vmem:[#allocation259_spill] sm:$0xff] }
0x16a1   : > { %12790 = vmatprep.subr.bf16.mxu1 %v16892_v31  ;;  %v16937_v31 = vld [vmem:[#allocation260_spill] sm:$0xff] }
0x16a4   : > { %12792 = vmatpush1.bf16.msra.mxu1 %v16893_v26  ;;  %v16938_v26 = vld [vmem:[#allocation261_spill] sm:$0xff] }
0x16a5   : > { %12794 = vmatprep.subr.bf16.mxu1 %v16894_v12  ;;  %v16939_v12 = vld [vmem:[#allocation262_spill] sm:$0xff] }
0x16a8   : > { %12796 = vmatpush1.bf16.msra.mxu1 %v16895_v52  ;;  %v16940_v52 = vld [vmem:[#allocation263_spill] sm:$0xff] }
0x16a9   : > { %12798 = vmatprep.subr.bf16.mxu1 %v16896_v50  ;;  %v16941_v50 = vld [vmem:[#allocation264_spill] sm:$0xff] }
0x16ac   : > { %12800 = vmatpush1.bf16.msra.mxu1 %v16897_v58  ;;  %v16942_v58 = vld [vmem:[#allocation265_spill] sm:$0xff] }
0x16ad   : > { %12802 = vmatprep.subr.bf16.mxu1 %v16898_v43 }
0x16b0   : > { %12804 = vmatpush1.bf16.msra.mxu1 %v16899_v25 }
0x16b1   : > { %12806 = vmatprep.subr.bf16.mxu1 %v16900_v2 }
0x16b4   : > { %12808 = vmatpush1.bf16.msra.mxu1 %v16901_v22 }
0x16b5   : > { %12810 = vmatprep.subr.bf16.mxu1 %v16902_v41 }
0x16b8   : > { %12812 = vmatpush1.bf16.msra.mxu1 %v16903_v46 }
0x16b9   : > { %12814 = vmatprep.subr.bf16.mxu1 %v16904_v28  ;;  %v9994_v28 = vld [vmem:[%s16925_s6 + $0x8] sm:$0x7] }
0x16bc   : > { %12816 = vmatpush1.bf16.msra.mxu1 %v16905_v24  ;;  %v16943_v24 = vld [vmem:[#allocation138_spill] sm:$0xff] }
0x16bd   : > { %12818 = vmatprep.subr.bf16.mxu1 %v16906_v9  ;;  %v16944_v9 = vld [vmem:[#allocation139_spill] sm:$0xff] }
0x16c0   : > { %12820 = vmatpush1.bf16.msra.mxu1 %v16907_v60  ;;  %v16945_v60 = vld [vmem:[#allocation140_spill] sm:$0xff] }
0x16c1   : > { %12822 = vmatprep.subr.bf16.mxu1 %v16908_v56  ;;  %v16946_v56 = vld [vmem:[#allocation141_spill] sm:$0xff] }
0x16c4   : > { %12824 = vmatpush1.bf16.msra.mxu1 %v16909_v63  ;;  %v16947_v63 = vld [vmem:[#allocation142_spill] sm:$0xff] }
0x16c5   : > { %12902 = vmatprep.subr.bf16.mxu1 %v16910_v32  ;;  %v16948_v32 = vld [vmem:[#allocation143_spill] sm:$0xff] }
0x16c7   : > { %9111 = vmatmul.mubr.f32.vlgmr.msra.gmra.mrb[52].mxu1 %v15731_v20 }
0x16c8   : > { %9116 = vmatprep.mubr.f32.mxu1 %v15742_v23  ;;  %12904 = vmatpush1.bf16.msra.mxu1 %v16911_v38  ;;  %v16949_v38 = vld [vmem:[#allocation144_spill] sm:$0xff] }
0x16c9   : > { %12906 = vmatprep.subr.bf16.mxu1 %v16912_v49  ;;  %v16950_v49 = vld [vmem:[#allocation145_spill] sm:$0xff] }
0x16cb   : > { %9117 = vmatmul.mubr.f32.gmra.mrb[54].mxu1 %v15740_v42 }
0x16cc   : > { %12908 = vmatpush1.bf16.msra.mxu1 %v16913_v45  ;;  %9432 = vmatprep.mubr.f32.mxu1 %v15733_v29  ;;  %v16951_v45 = vld [vmem:[#allocation146_spill] sm:$0xff] }
0x16cd   : > { %12910 = vmatprep.subr.bf16.mxu1 %v16914_v44  ;;  %v16952_v44 = vld [vmem:[#allocation147_spill] sm:$0xff] }
0x16d0   : > { %12912 = vmatpush1.bf16.msra.mxu1 %v16915_v51  ;;  %v16953_v51 = vld [vmem:[#allocation148_spill] sm:$0xff] }
0x16d1   : > { %12914 = vmatprep.subr.bf16.mxu1 %v16916_v62  ;;  %v16954_v62 = vld [vmem:[#allocation149_spill] sm:$0xff] }
0x16d4   : > { %12916 = vmatpush1.bf16.msra.mxu1 %v16917_v5  ;;  %v16955_v5 = vld [vmem:[#allocation150_spill] sm:$0xff] }
0x16d5   : > { %12918 = vmatprep.subr.bf16.mxu1 %v16918_v48  ;;  %v16956_v48 = vld [vmem:[#allocation151_spill] sm:$0xff] }
0x16d8   : > { %12920 = vmatpush1.bf16.msra.mxu1 %v16919_v30  ;;  %v16957_v30 = vld [vmem:[#allocation152_spill] sm:$0xff] }
0x16d9   : > { %12922 = vmatprep.subr.bf16.mxu1 %v16920_v40  ;;  %v16958_v40 = vld [vmem:[#allocation153_spill] sm:$0xff] }
0x16da   : > { %v8151_v17 = vpop.f32.mrb[64].mxu0  ;;  %v8229_v18 = vpop.f32.mrb[40].mxu1 }
0x16db   : > { %v8153_v15 = vpop.f32.mrb[65].mxu0  ;;  %v8231_v3 = vpop.f32.mrb[41].mxu1 }
0x16dc   : > { %12924 = vmatpush1.bf16.msra.mxu1 %v16921_v59  ;;  %v16963_v59 = vld [vmem:[#allocation158_spill] sm:$0xff] }
0x16dd   : > { %12926 = vmatprep.subr.bf16.mxu1 %v16922_v7  ;;  %v16964_v7 = vld [vmem:[#allocation159_spill] sm:$0xff] }
0x16de   : > { %v8157_v8 = vpop.f32.mrb[66].mxu0  ;;  %v8235_v13 = vpop.f32.mrb[42].mxu1 }
0x16df   : > { %v12478_v14 = vpack.c.bf16 %v8157_v8, %v8151_v17  ;;  %v12472_v19 = vpack.c.bf16 %v8235_v13, %v8229_v18  ;;  %v8159_v0 = vpop.f32.mrb[67].mxu0  ;;  %v8237_v4 = vpop.f32.mrb[43].mxu1  ;;  %v16959_v17 = vld [vmem:[#allocation154_spill] sm:$0xff]  ;;  %v16960_v18 = vld [vmem:[#allocation155_spill] sm:$0xff]  ;;  %v16965_v8 = vld [vmem:[#allocation160_spill] sm:$0xff] }
0x16e0   : > { %v12475_v36 = vpack.c.bf16 %v8159_v0, %v8153_v15  ;;  %v12469_v6 = vpack.c.bf16 %v8237_v4, %v8231_v3  ;;  %12928 = vmatpush1.bf16.msra.mxu1 %v16923_v47  ;;  %v16961_v15 = vld [vmem:[#allocation156_spill] sm:$0xff]  ;;  %v16962_v3 = vld [vmem:[#allocation157_spill] sm:$0xff]  ;;  %v16971_v47 = vld [vmem:[#allocation166_spill] sm:$0xff] }
0x16e1   : > { %12930 = vmatprep.subr.bf16.mxu1 %v16924_v11  ;;  %v16966_v13 = vld [vmem:[#allocation161_spill] sm:$0xff]  ;;  %v16969_v0 = vld [vmem:[#allocation164_spill] sm:$0xff] }
0x16e2   : > { %12471 = vmatprep.subr.msk.bf16.mxu0 %vm15419_vm9, %v12469_v6 }
0x16e3   : > { %12474 = vmatpush1.bf16.msk.msra.mxu0 %vm15419_vm9, %v12472_v19  ;;  %v16968_v19 = vld [vmem:[#allocation163_spill] sm:$0xff] }
0x16e4   : > { %12932 = vmatpush1.bf16.msra.mxu1 %v16926_v27  ;;  %12477 = vmatprep.subr.msk.bf16.mxu0 %vm15419_vm9, %v12475_v36  ;;  %v16970_v36 = vld [vmem:[#allocation165_spill] sm:$0xff]  ;;  %v16972_v27 = vld [vmem:[#allocation167_spill] sm:$0xff] }
0x16e5   : > { %12934 = vmatprep.subr.bf16.mxu1 %v16927_v61 }
0x16e6   : > { %9990 = vmatmul.mubr.msk.f32.vlgmr.msra.gmra.mrb[68].mxu0 %vm5082_vm6, %v9987_v33 }
0x16e7   : > { %12480 = vmatpush1.bf16.msk.msra.mxu0 %vm15419_vm9, %v12478_v14  ;;  %8395 = vmatprep.mubr.f32.mxu0 %v16591_v54  ;;  %v16967_v14 = vld [vmem:[#allocation162_spill] sm:$0xff] }
0x16e8   : > { %12936 = vmatpush1.bf16.msra.mxu1 %v16928_v16 }
0x16e9   : > { %12938 = vmatprep.subr.bf16.mxu1 %v16929_v39  ;;  %v16973_v39 = vld [vmem:[#allocation168_spill] sm:$0xff] }
0x16ec   : > { %12940 = vmatpush1.bf16.msra.mxu1 %v16930_v10 }
0x16ed   : > { %12942 = vmatprep.subr.bf16.mxu1 %v16931_v57 }
0x16ee   : > { %9993 = vmatmul.mubr.msk.f32.vlgmr.msra.gmra.mrb[68].mxu0 %vm5082_vm6, %v8162_v37  ;;  %v16974_v37 = vld [vmem:[#allocation169_spill] sm:$0xff] }
0x16ef   : > { %8554 = vmatprep.mubr.f32.mxu0 %v16591_v54 }
0x16f0   : > { %12944 = vmatpush1.bf16.msra.mxu1 %v16932_v55 }
0x16f1   : > { %12946 = vmatprep.subr.bf16.mxu1 %v16933_v35 }
0x16f4   : > { %12948 = vmatpush1.bf16.msra.mxu1 %v16934_v1 }
0x16f5   : > { %12950 = vmatprep.subr.bf16.mxu1 %v16935_v34 }
0x16f8   : > { %12952 = vmatpush1.bf16.msra.mxu1 %v16936_v53 }
0x16f9   : > { %12954 = vmatprep.subr.bf16.mxu1 %v16937_v31 }
0x16fc   : > { %12956 = vmatpush1.bf16.msra.mxu1 %v16938_v26 }
0x16fd   : > { %12958 = vmatprep.subr.bf16.mxu1 %v16939_v12 }
0x1700   : > { %12960 = vmatpush1.bf16.msra.mxu1 %v16940_v52 }
0x1701   : > { %12962 = vmatprep.subr.bf16.mxu1 %v16941_v50 }
0x1704   : > { %12964 = vmatpush1.bf16.msra.mxu1 %v16942_v58 }
0x1707   : > { %9433 = vmatmul.mubr.f32.vlgmr.msra.gmra.mrb[56].mxu1 %v15731_v20 }
0x1708   : > { %9438 = vmatprep.mubr.f32.mxu1 %v15742_v23 }
0x170b   : > { %9439 = vmatmul.mubr.f32.gmra.mrb[58].mxu1 %v15740_v42 }
0x171a   : > { %v8468_v43 = vpop.f32.mrb[44].mxu1 }
0x171b   : > { %v8470_v25 = vpop.f32.mrb[45].mxu1 }
0x171e   : > { %v8474_v2 = vpop.f32.mrb[46].mxu1 }
0x171f   : > { %v12548_v22 = vpack.c.bf16 %v8474_v2, %v8468_v43  ;;  %v8476_v41 = vpop.f32.mrb[47].mxu1 }
0x1720   : > { %v12545_v46 = vpack.c.bf16 %v8476_v41, %v8470_v25 }
0x1722   : > { %12547 = vmatprep.subr.msk.bf16.mxu0 %vm15419_vm9, %v12545_v46  ;;  %v9998_v46 = vld [vmem:[%s16925_s6 + $0xc] sm:$0x7] }
0x1723   : > { %12550 = vmatpush1.bf16.msk.msra.mxu0 %vm15419_vm9, %v12548_v22 }
0x1724   : > { %12552 = vmatprep.subr.bf16.mxu0 %v16943_v24  ;;  %v10002_v24 = vld [vmem:[%s16925_s6 + $0x10] sm:$0x7] }
0x1726   : > { %9997 = vmatmul.mubr.msk.f32.vlgmr.msra.gmra.mrb[68].mxu0 %vm5082_vm6, %v9994_v28  ;;  %v16975_v28 = vld [vmem:[#allocation202_spill] sm:$0xff] }
0x1727   : > { %12554 = vmatpush1.bf16.msra.mxu0 %v16944_v9  ;;  %8627 = vmatprep.mubr.f32.mxu0 %v15733_v29  ;;  %v16976_v9 = vld [vmem:[#allocation203_spill] sm:$0xff] }
0x1728   : > { %12556 = vmatprep.subr.bf16.mxu0 %v16945_v60  ;;  %v16977_v60 = vld [vmem:[#allocation204_spill] sm:$0xff] }
0x172b   : > { %12558 = vmatpush1.bf16.msra.mxu0 %v16946_v56  ;;  %v16978_v56 = vld [vmem:[#allocation205_spill] sm:$0xff] }
0x172c   : > { %12560 = vmatprep.subr.bf16.mxu0 %v16947_v63  ;;  %v16979_v63 = vld [vmem:[#allocation206_spill] sm:$0xff] }
0x172f   : > { %12562 = vmatpush1.bf16.msra.mxu0 %v16948_v32  ;;  %v16980_v32 = vld [vmem:[#allocation207_spill] sm:$0xff] }
0x1730   : > { %12564 = vmatprep.subr.bf16.mxu0 %v16949_v38  ;;  %v16981_v38 = vld [vmem:[#allocation208_spill] sm:$0xff] }
0x1733   : > { %12566 = vmatpush1.bf16.msra.mxu0 %v16950_v49  ;;  %v16982_v49 = vld [vmem:[#allocation209_spill] sm:$0xff] }
0x1734   : > { %12568 = vmatprep.subr.bf16.mxu0 %v16951_v45  ;;  %v16983_v45 = vld [vmem:[#allocation210_spill] sm:$0xff] }
0x1737   : > { %12570 = vmatpush1.bf16.msra.mxu0 %v16952_v44  ;;  %v16984_v44 = vld [vmem:[#allocation211_spill] sm:$0xff] }
0x1738   : > { %12572 = vmatprep.subr.bf16.mxu0 %v16953_v51  ;;  %v16985_v51 = vld [vmem:[#allocation212_spill] sm:$0xff] }
0x173b   : > { %12574 = vmatpush1.bf16.msra.mxu0 %v16954_v62  ;;  %v16986_v62 = vld [vmem:[#allocation213_spill] sm:$0xff] }
0x173c   : > { %12576 = vmatprep.subr.bf16.mxu0 %v16955_v5  ;;  %v16987_v5 = vld [vmem:[#allocation214_spill] sm:$0xff] }
0x173f   : > { %12578 = vmatpush1.bf16.msra.mxu0 %v16956_v48  ;;  %v16988_v48 = vld [vmem:[#allocation215_spill] sm:$0xff] }
0x1740   : > { %12580 = vmatprep.subr.bf16.mxu0 %v16957_v30  ;;  %v16989_v30 = vld [vmem:[#allocation216_spill] sm:$0xff] }
0x1743   : > { %12582 = vmatpush1.bf16.msra.mxu0 %v16958_v40  ;;  %v16990_v40 = vld [vmem:[#allocation217_spill] sm:$0xff] }
0x1744   : > { %12584 = vmatprep.subr.bf16.mxu0 %v16959_v17  ;;  %v16991_v17 = vld [vmem:[#allocation218_spill] sm:$0xff] }
0x1747   : > { %12586 = vmatpush1.bf16.msra.mxu0 %v16960_v18  ;;  %v16992_v18 = vld [vmem:[#allocation219_spill] sm:$0xff] }
0x1748   : > { %12588 = vmatprep.subr.bf16.mxu0 %v16961_v15  ;;  %v16993_v15 = vld [vmem:[#allocation220_spill] sm:$0xff] }
0x174b   : > { %12590 = vmatpush1.bf16.msra.mxu0 %v16962_v3  ;;  %v16994_v3 = vld [vmem:[#allocation221_spill] sm:$0xff] }
0x174c   : > { %12592 = vmatprep.subr.bf16.mxu0 %v16963_v59  ;;  %v16995_v59 = vld [vmem:[#allocation222_spill] sm:$0xff] }
0x174f   : > { %12594 = vmatpush1.bf16.msra.mxu0 %v16964_v7  ;;  %v16996_v7 = vld [vmem:[#allocation223_spill] sm:$0xff] }
0x1750   : > { %12596 = vmatprep.subr.bf16.mxu0 %v16965_v8  ;;  %v16997_v8 = vld [vmem:[#allocation224_spill] sm:$0xff] }
0x1753   : > { %12598 = vmatpush1.bf16.msra.mxu0 %v16966_v13  ;;  %v16998_v13 = vld [vmem:[#allocation225_spill] sm:$0xff] }
0x1754   : > { %12600 = vmatprep.subr.bf16.mxu0 %v16967_v14  ;;  %v16999_v14 = vld [vmem:[#allocation226_spill] sm:$0xff] }
0x1757   : > { %12602 = vmatpush1.bf16.msra.mxu0 %v16968_v19  ;;  %v17000_v19 = vld [vmem:[#allocation227_spill] sm:$0xff] }
0x1758   : > { %12604 = vmatprep.subr.bf16.mxu0 %v16969_v0  ;;  %v17001_v0 = vld [vmem:[#allocation228_spill] sm:$0xff] }
0x175a   : > { %v8790_v4 = vpop.f32.mrb[48].mxu1 }
0x175b   : > { %12606 = vmatpush1.bf16.msra.mxu0 %v16970_v36  ;;  %v8792_v6 = vpop.f32.mrb[49].mxu1  ;;  %v17003_v36 = vld [vmem:[#allocation230_spill] sm:$0xff] }
0x175c   : > { %12608 = vmatprep.subr.bf16.mxu0 %v16971_v47  ;;  %v17005_v47 = vld [vmem:[#allocation232_spill] sm:$0xff] }
0x175e   : > { %v8796_v11 = vpop.f32.mrb[50].mxu1 }
0x175f   : > { %v12688_v33 = vpack.c.bf16 %v8796_v11, %v8790_v4  ;;  %12610 = vmatpush1.bf16.msra.mxu0 %v16972_v27  ;;  %v8798_v61 = vpop.f32.mrb[51].mxu1  ;;  %v17002_v4 = vld [vmem:[#allocation229_spill] sm:$0xff] }
0x1760   : > { %v12685_v16 = vpack.c.bf16 %v8798_v61, %v8792_v6  ;;  %12612 = vmatprep.subr.bf16.mxu0 %v16973_v39  ;;  %v17004_v6 = vld [vmem:[#allocation231_spill] sm:$0xff]  ;;  %v17006_v11 = vld [vmem:[#allocation233_spill] sm:$0xff] }
0x1763   : > { %12614 = vmatpush1.bf16.msra.mxu0 %v16974_v37 }
0x1766   : > { %8628 = vmatmul.mubr.f32.vlgmr.msra.gmra.mrb[70].mxu0 %v15731_v20 }
0x1767   : > { %8633 = vmatprep.mubr.f32.mxu0 %v15742_v23 }
0x176a   : > { %8634 = vmatmul.mubr.f32.gmra.mrb[72].mxu0 %v15740_v42 }
0x176b   : > { %8715 = vmatprep.mubr.f32.mxu0 %v16591_v54 }
0x179a   : > { %v15954_v10 = vpop.f32.mrb[52].mxu1 }
0x179b   : > { %v15956_v57 = vpop.f32.mrb[53].mxu1 }
0x179e   : > { %v15958_v55 = vpop.f32.mrb[54].mxu1 }
0x179f   : > { %v12828_v35 = vpack.c.bf16 %v15958_v55, %v15954_v10  ;;  %v15962_v1 = vpop.f32.mrb[55].mxu1  ;;  %v17010_v10 = vld [vmem:[#allocation269_spill] sm:$0xff]  ;;  %v17011_v55 = vld [vmem:[#allocation270_spill] sm:$0xff] }
0x17a0   : > { %v12825_v34 = vpack.c.bf16 %v15962_v1, %v15956_v57  ;;  %v17008_v57 = vld [vmem:[#allocation267_spill] sm:$0xff]  ;;  %v17009_v1 = vld [vmem:[#allocation268_spill] sm:$0xff] }
0x17da   : > { %v15966_v53 = vpop.f32.mrb[56].mxu1 }
0x17db   : > { %v15968_v31 = vpop.f32.mrb[57].mxu1 }
0x17de   : > { %v15970_v26 = vpop.f32.mrb[58].mxu1 }
0x17df   : > { %v12968_v12 = vpack.c.bf16 %v15970_v26, %v15966_v53  ;;  %v15974_v52 = vpop.f32.mrb[59].mxu1 }
0x17e0   : > { %v12965_v50 = vpack.c.bf16 %v15974_v52, %v15968_v31 }
0x1839   : > { %v8629_v58 = vpop.f32.mrb[70].mxu0 }
0x183a   : > { %v8631_v43 = vpop.f32.mrb[71].mxu0 }
0x183d   : > { %v8635_v25 = vpop.f32.mrb[72].mxu0 }
0x183e   : > { %v12618_v2 = vpack.c.bf16 %v8635_v25, %v8629_v58  ;;  %v8637_v22 = vpop.f32.mrb[73].mxu0  ;;  %v10006_v58 = vld [vmem:[%s16925_s6 + $0x14] sm:$0x7]  ;;  %v10010_v25 = vld [vmem:[%s16925_s6 + $0x18] sm:$0x7] }
0x183f   : > { %v12615_v41 = vpack.c.bf16 %v8637_v22, %v8631_v43  ;;  %v17007_v43 = vld [vmem:[#allocation266_spill] sm:$0xff] }
0x1840   : > { %v17015_v22 = vld [vmem:[#allocation274_spill] sm:$0xff] }
0x1841   : > { %12617 = vmatprep.subr.msk.bf16.mxu0 %vm15419_vm9, %v12615_v41  ;;  %v17016_v41 = vld [vmem:[#allocation275_spill] sm:$0xff] }
0x1842   : > { %12620 = vmatpush1.bf16.msk.msra.mxu0 %vm15419_vm9, %v12618_v2  ;;  %v17014_v2 = vld [vmem:[#allocation273_spill] sm:$0xff] }
0x1843   : > { %12687 = vmatprep.subr.msk.bf16.mxu0 %vm15419_vm9, %v12685_v16 }
0x1845   : > { %10001 = vmatmul.mubr.msk.f32.vlgmr.msra.gmra.mrb[68].mxu0 %vm5082_vm6, %v9998_v46  ;;  %v17017_v46 = vld [vmem:[#allocation276_spill] sm:$0xff] }
0x1846   : > { %12690 = vmatpush1.bf16.msk.msra.mxu0 %vm15419_vm9, %v12688_v33  ;;  %8876 = vmatprep.mubr.f32.mxu0 %v16591_v54 }
0x1847   : > { %12692 = vmatprep.subr.bf16.mxu0 %v16975_v28  ;;  %v17018_v28 = vld [vmem:[#allocation277_spill] sm:$0xff] }
0x184d   : > { %10005 = vmatmul.mubr.msk.f32.vlgmr.msra.gmra.mrb[68].mxu0 %vm5082_vm6, %v10002_v24  ;;  %v17020_v24 = vld [vmem:[#allocation279_spill] sm:$0xff] }
0x184e   : > { %12694 = vmatpush1.bf16.msra.mxu0 %v16976_v9  ;;  %8949 = vmatprep.mubr.f32.mxu0 %v15733_v29  ;;  %v17021_v9 = vld [vmem:[#allocation280_spill] sm:$0xff] }
0x184f   : > { %12696 = vmatprep.subr.bf16.mxu0 %v16977_v60  ;;  %v17022_v60 = vld [vmem:[#allocation281_spill] sm:$0xff] }
0x1852   : > { %12698 = vmatpush1.bf16.msra.mxu0 %v16978_v56  ;;  %v17023_v56 = vld [vmem:[#allocation282_spill] sm:$0xff] }
0x1853   : > { %12700 = vmatprep.subr.bf16.mxu0 %v16979_v63  ;;  %v17024_v63 = vld [vmem:[#allocation283_spill] sm:$0xff] }
0x1856   : > { %12702 = vmatpush1.bf16.msra.mxu0 %v16980_v32  ;;  %v17025_v32 = vld [vmem:[#allocation284_spill] sm:$0xff] }
0x1857   : > { %12704 = vmatprep.subr.bf16.mxu0 %v16981_v38  ;;  %v17026_v38 = vld [vmem:[#allocation285_spill] sm:$0xff] }
0x185a   : > { %12706 = vmatpush1.bf16.msra.mxu0 %v16982_v49  ;;  %v17027_v49 = vld [vmem:[#allocation286_spill] sm:$0xff] }
0x185b   : > { %12708 = vmatprep.subr.bf16.mxu0 %v16983_v45  ;;  %v17028_v45 = vld [vmem:[#allocation287_spill] sm:$0xff] }
0x185e   : > { %12710 = vmatpush1.bf16.msra.mxu0 %v16984_v44  ;;  %v17029_v44 = vld [vmem:[#allocation288_spill] sm:$0xff] }
0x185f   : > { %12712 = vmatprep.subr.bf16.mxu0 %v16985_v51  ;;  %v17030_v51 = vld [vmem:[#allocation289_spill] sm:$0xff] }
0x1862   : > { %12714 = vmatpush1.bf16.msra.mxu0 %v16986_v62  ;;  %v17031_v62 = vld [vmem:[#allocation290_spill] sm:$0xff] }
0x1863   : > { %12716 = vmatprep.subr.bf16.mxu0 %v16987_v5  ;;  %v17032_v5 = vld [vmem:[#allocation291_spill] sm:$0xff] }
0x1866   : > { %12718 = vmatpush1.bf16.msra.mxu0 %v16988_v48  ;;  %v17033_v48 = vld [vmem:[#allocation292_spill] sm:$0xff] }
0x1867   : > { %12720 = vmatprep.subr.bf16.mxu0 %v16989_v30  ;;  %v17034_v30 = vld [vmem:[#allocation293_spill] sm:$0xff] }
0x186a   : > { %12722 = vmatpush1.bf16.msra.mxu0 %v16990_v40  ;;  %v17035_v40 = vld [vmem:[#allocation294_spill] sm:$0xff] }
0x186b   : > { %12724 = vmatprep.subr.bf16.mxu0 %v16991_v17  ;;  %v17036_v17 = vld [vmem:[#allocation295_spill] sm:$0xff] }
0x186e   : > { %12726 = vmatpush1.bf16.msra.mxu0 %v16992_v18  ;;  %v17037_v18 = vld [vmem:[#allocation296_spill] sm:$0xff] }
0x186f   : > { %12728 = vmatprep.subr.bf16.mxu0 %v16993_v15  ;;  %v17038_v15 = vld [vmem:[#allocation297_spill] sm:$0xff] }
0x1872   : > { %12730 = vmatpush1.bf16.msra.mxu0 %v16994_v3 }
0x1873   : > { %12732 = vmatprep.subr.bf16.mxu0 %v16995_v59 }
0x1876   : > { %12734 = vmatpush1.bf16.msra.mxu0 %v16996_v7 }
0x1877   : > { %12736 = vmatprep.subr.bf16.mxu0 %v16997_v8 }
0x187a   : > { %12738 = vmatpush1.bf16.msra.mxu0 %v16998_v13 }
0x187b   : > { %12740 = vmatprep.subr.bf16.mxu0 %v16999_v14 }
0x187e   : > { %12742 = vmatpush1.bf16.msra.mxu0 %v17000_v19 }
0x187f   : > { %12744 = vmatprep.subr.bf16.mxu0 %v17001_v0 }
0x1882   : > { %12746 = vmatpush1.bf16.msra.mxu0 %v17002_v4 }
0x1883   : > { %12748 = vmatprep.subr.bf16.mxu0 %v17003_v36 }
0x1886   : > { %12750 = vmatpush1.bf16.msra.mxu0 %v17004_v6 }
0x1887   : > { %12752 = vmatprep.subr.bf16.mxu0 %v17005_v47 }
0x188a   : > { %12754 = vmatpush1.bf16.msra.mxu0 %v17006_v11 }
0x188d   : > { %8950 = vmatmul.mubr.f32.vlgmr.msra.gmra.mrb[74].mxu0 %v15731_v20 }
0x188e   : > { %8955 = vmatprep.mubr.f32.mxu0 %v15742_v23 }
0x1891   : > { %8956 = vmatmul.mubr.f32.gmra.mrb[76].mxu0 %v15740_v42 }
0x1892   : > { %9037 = vmatprep.mubr.f32.mxu0 %v16591_v54 }
0x1960   : > { %v8951_v33 = vpop.f32.mrb[74].mxu0 }
0x1961   : > { %v8953_v27 = vpop.f32.mrb[75].mxu0 }
0x1964   : > { %v8957_v61 = vpop.f32.mrb[76].mxu0 }
0x1965   : > { %v12758_v16 = vpack.c.bf16 %v8957_v61, %v8951_v33  ;;  %v8959_v39 = vpop.f32.mrb[77].mxu0 }
0x1966   : > { %v12755_v37 = vpack.c.bf16 %v8959_v39, %v8953_v27 }
0x1968   : > { %12757 = vmatprep.subr.msk.bf16.mxu0 %vm15419_vm9, %v12755_v37 }
0x1969   : > { %12760 = vmatpush1.bf16.msk.msra.mxu0 %vm15419_vm9, %v12758_v16 }
0x196a   : > { %12827 = vmatprep.subr.msk.bf16.mxu0 %vm15419_vm9, %v12825_v34  ;;  %v17013_v34 = vld [vmem:[#allocation272_spill] sm:$0xff] }
0x196c   : > { %10009 = vmatmul.mubr.msk.f32.vlgmr.msra.gmra.mrb[68].mxu0 %vm5082_vm6, %v10006_v58 }
0x196d   : > { %12830 = vmatpush1.bf16.msk.msra.mxu0 %vm15419_vm9, %v12828_v35  ;;  %9198 = vmatprep.mubr.f32.mxu0 %v16591_v54  ;;  %v17012_v35 = vld [vmem:[#allocation271_spill] sm:$0xff] }
0x196e   : > { %12832 = vmatprep.subr.bf16.mxu0 %v17007_v43 }
0x1974   : > { %10013 = vmatmul.mubr.msk.f32.vlgmr.msra.gmra.mrb[68].mxu0 %vm5082_vm6, %v10010_v25 }
0x1975   : > { %12834 = vmatpush1.bf16.msra.mxu0 %v17008_v57  ;;  %9271 = vmatprep.mubr.f32.mxu0 %v15733_v29  ;;  %v17019_v29 = vld [vmem:[#allocation278_spill] sm:$0xff] }
0x1976   : > { %12836 = vmatprep.subr.bf16.mxu0 %v17009_v1 }
0x1979   : > { %12838 = vmatpush1.bf16.msra.mxu0 %v17010_v10 }
0x197a   : > { %12840 = vmatprep.subr.bf16.mxu0 %v17011_v55 }
0x197d   : > { %12842 = vmatpush1.bf16.msra.mxu0 %v17012_v35 }
0x197e   : > { %12844 = vmatprep.subr.bf16.mxu0 %v17013_v34 }
0x1981   : > { %12846 = vmatpush1.bf16.msra.mxu0 %v17014_v2 }
0x1982   : > { %12848 = vmatprep.subr.bf16.mxu0 %v17015_v22 }
0x1985   : > { %12850 = vmatpush1.bf16.msra.mxu0 %v17016_v41 }
0x1986   : > { %12852 = vmatprep.subr.bf16.mxu0 %v17017_v46 }
0x1989   : > { %12854 = vmatpush1.bf16.msra.mxu0 %v17018_v28 }
0x198a   : > { %12856 = vmatprep.subr.bf16.mxu0 %v17019_v29 }
0x198d   : > { %12858 = vmatpush1.bf16.msra.mxu0 %v17020_v24 }
0x198e   : > { %12860 = vmatprep.subr.bf16.mxu0 %v17021_v9 }
0x1991   : > { %12862 = vmatpush1.bf16.msra.mxu0 %v17022_v60 }
0x1992   : > { %12864 = vmatprep.subr.bf16.mxu0 %v17023_v56 }
0x1995   : > { %12866 = vmatpush1.bf16.msra.mxu0 %v17024_v63 }
0x1996   : > { %12868 = vmatprep.subr.bf16.mxu0 %v17025_v32 }
0x1999   : > { %12870 = vmatpush1.bf16.msra.mxu0 %v17026_v38 }
0x199a   : > { %12872 = vmatprep.subr.bf16.mxu0 %v17027_v49 }
0x199d   : > { %12874 = vmatpush1.bf16.msra.mxu0 %v17028_v45 }
0x199e   : > { %12876 = vmatprep.subr.bf16.mxu0 %v17029_v44 }
0x19a1   : > { %12878 = vmatpush1.bf16.msra.mxu0 %v17030_v51 }
0x19a2   : > { %12880 = vmatprep.subr.bf16.mxu0 %v17031_v62 }
0x19a5   : > { %12882 = vmatpush1.bf16.msra.mxu0 %v17032_v5 }
0x19a6   : > { %12884 = vmatprep.subr.bf16.mxu0 %v17033_v48 }
0x19a9   : > { %12886 = vmatpush1.bf16.msra.mxu0 %v17034_v30 }
0x19aa   : > { %12888 = vmatprep.subr.bf16.mxu0 %v17035_v40 }
0x19ad   : > { %12890 = vmatpush1.bf16.msra.mxu0 %v17036_v17 }
0x19ae   : > { %12892 = vmatprep.subr.bf16.mxu0 %v17037_v18 }
0x19b1   : > { %12894 = vmatpush1.bf16.msra.mxu0 %v17038_v15 }
0x19b4   : > { %9272 = vmatmul.mubr.f32.vlgmr.msra.gmra.mrb[78].mxu0 %v15731_v20  ;;  %v10014_v20 = vld [vmem:[%s16925_s6 + $0x1c] sm:$0x7] }
0x19b5   : > { %9277 = vmatprep.mubr.f32.mxu0 %v15742_v23  ;;  %v9533_v23 = vpop.permute.xlu1 %9532 }
0x19b8   : > { %9278 = vmatmul.mubr.f32.gmra.mrb[80].mxu0 %v15740_v42  ;;  %v10018_v42 = vld [vmem:[%s16925_s6 + $0x20] sm:$0x7] }
0x19b9   : > { %9359 = vmatprep.mubr.f32.mxu0 %v16591_v54 }
0x1a87   : > { %v9273_v3 = vpop.f32.mrb[78].mxu0 }
0x1a88   : > { %v9275_v59 = vpop.f32.mrb[79].mxu0 }
0x1a8b   : > { %v9279_v7 = vpop.f32.mrb[80].mxu0 }
0x1a8c   : > { %v12898_v8 = vpack.c.bf16 %v9279_v7, %v9273_v3  ;;  %v9281_v13 = vpop.f32.mrb[81].mxu0 }
0x1a8d   : > { %v12895_v14 = vpack.c.bf16 %v9281_v13, %v9275_v59 }
0x1a8f   : > { %12897 = vmatprep.subr.msk.bf16.mxu0 %vm15419_vm9, %v12895_v14 }
0x1a90   : > { %12900 = vmatpush1.bf16.msk.msra.mxu0 %vm15419_vm9, %v12898_v8 }
0x1a91   : > { %12967 = vmatprep.subr.msk.bf16.mxu0 %vm15419_vm9, %v12965_v50 }
0x1a93   : > { %10017 = vmatmul.mubr.msk.f32.vlgmr.msra.gmra.mrb[68].mxu0 %vm5082_vm6, %v10014_v20 }
0x1a94   : > { %12970 = vmatpush1.bf16.msk.msra.mxu0 %vm15419_vm9, %v12968_v12  ;;  %9520 = vmatprep.mubr.f32.mxu0 %v16591_v54 }
0x1a9b   : > { %10021 = vmatmul.mubr.msk.f32.vlgmr.msra.gmra.mrb[68].mxu0 %vm5082_vm6, %v10018_v42 }
0x1b6e   : > { %v9522_v31 = vpop.f32.mrb[68].mxu0 }
0x1b6f   : > { %v9535_v52 = vadd.f32 %v9533_v23, %v9522_v31  ;;  %v9524_v50 = vpop.f32.mrb[69].mxu0 }
0x1b70   : > { %v9536_v19 = vadd.f32 %v9533_v23, %v9524_v50 }
0x1b71   : > { %v9537_v0 = vmax.f32 %v9535_v52, 0.0 }
0x1b72   : > { %v9538_v4 = vmax.f32 %v9536_v19, 0.0 }
0x1b74   : > { %v9541_v21 = vcombine.low %v9537_v0, %v9538_v4 }
0x1b76   : > { %9543 = vst [vmem:[%s663_s21] sm:$0x77] %v9541_v21 }
0x1b77 PF: > { %s17040_s29 = sld [smem:[#allocation16_spill]] }
0x1b7d   : > { %s32_s27 = sadd.s32 1, %s17040_s29  }
0x1b7e   : > { %p29_p9 = scmp.ge.s32.totalorder %s32_s27, 4  }
0x1b80   :  { %31 = sbr.rel (!%p29_p9) target bundleno = 14 (0xe), region = 217 }
0x1b87   :  { %9565 = vsyncpa [#allocation3], 1 }
0x1b88   :  { %9567 = vsyncpa [#allocation3 + $0x1], 1 }
0x1b89   :  { %9568 = vsyncpa [#allocation5], 1 }
0x1b8a   :  { %9569 = vsyncpa [#allocation8], 1 }
0x1b8b   :  { %9570 = vsyncpa [#allocation11], 1 }

</bundles_post_ra>
